<compile_context>
chip_gen: v7x
topology: tpu7x:2x2x1
jax: 0.10.0
libtpu: 0.0.40
codegen_flags: <defaults>
</compile_context>

<pallas_src>
import functools

import jax
import jax.numpy as jnp
from jax.experimental import pallas as pl
from jax.experimental.pallas import tpu as pltpu

# ----------------------------- model config (consistent with the module) ------------------------
N_CHANNELS = 4            # n_channels
N_CH_PAD = 8              # layer-0 input padded to 8 sublanes (rows 4..7 always zero)
HIDDEN_DIMS = [16, 32]    # hidden_dims, num_layers = 2
KH, KW = 3, 3             # kernel_size (3, 3) -> padding (1, 1), "same"
BN_EPS = 1e-5             # PyTorch BatchNorm eps


# ----------------------------------------- in-kernel helpers ------------------------------------
def _bn_relu(x, gamma, beta, inv_n):
    """Train-mode BatchNorm (per-channel batch stats over the lane/spatial axis, biased variance)
    + ReLU, one-pass statistics.  x: (C, N) f32; gamma/beta: (C, 1)."""
    s1 = jnp.sum(x, axis=1, keepdims=True)
    s2 = jnp.sum(x * x, axis=1, keepdims=True)
    mean = s1 * inv_n
    var = s2 * inv_n - mean * mean
    xn = (x - mean) * jax.lax.rsqrt(var + BN_EPS)
    return jnp.maximum(xn * gamma + beta, 0.0)


def _build_stack(stack_ref, x, h, mask_ref, img_w, n):
    """im2col into VMEM: for each 3x3 tap, store the lane-rolled + zero-pad-masked [x | h] block
    (cast to bf16) at sublane offset tap*(cx+ch).  All offsets/sizes are multiples of 8 so every
    store is tile-aligned.  One MXU dot against the packed weight then computes the whole conv."""
    cx, ch = x.shape[0], h.shape[0]
    per = cx + ch
    for tap in range(KH * KW):
        dy, dx = tap // KW - 1, tap % KW - 1
        s = dy * img_w + dx                       # flattened (b,h,w) source offset
        base = tap * per
        if s == 0:                                # center tap: no roll, mask is all ones
            xs, hs = x, h
        else:
            m = mask_ref[tap]                     # (1, N): 1 inside the image, 0 on the pad ring
            xs = pltpu.roll(x, (-s) % n, axis=1) * m   # shifted[:, r] = x[:, r + s] (masked)
            hs = pltpu.roll(h, (-s) % n, axis=1) * m
        stack_ref[base:base + cx, :] = xs.astype(jnp.bfloat16)
        stack_ref[base + cx:base + per, :] = hs.astype(jnp.bfloat16)


def _cell_update(stack_ref, w_ref, b_ref, h_ref, c_ref, ch, lane_chunk, n):
    """ConvLSTM gate math from the stacked taps: one (4*Ch, K) @ (K, lane_chunk) bf16 dot per lane
    chunk (f32 accumulate on the MXU), then sigmoid/tanh gates and the c/h update written straight
    back to the persistent state refs.  Lane chunking keeps the live f32 gate tile small."""
    for j in range(n // lane_chunk):
        cols = pl.ds(j * lane_chunk, lane_chunk)
        g = jnp.dot(w_ref[...], stack_ref[:, cols],
                    preferred_element_type=jnp.float32) + b_ref[...]
        ig = jax.nn.sigmoid(g[0 * ch:1 * ch, :])
        fg = jax.nn.sigmoid(g[1 * ch:2 * ch, :])
        og = jax.nn.sigmoid(g[2 * ch:3 * ch, :])
        gg = jnp.tanh(g[3 * ch:4 * ch, :])
        c_new = fg * c_ref[:, cols] + ig * gg
        c_ref[:, cols] = c_new
        h_ref[:, cols] = og * jnp.tanh(c_new)


# ----------------------------------------- fused kernel -----------------------------------------
def _fused_kernel(frames_ref, mask_ref,
                  w0_ref, b0_ref, g0_ref, be0_ref,
                  w1_ref, b1_ref,
                  gh_ref, bh_ref, wfc_ref, bfc_ref,
                  out_ref,
                  h0_ref, c0_ref, h1_ref, c1_ref, fb_ref, stk0_ref, stk1_ref,
                  *, t_warm, t_total, img_w, n, lane_chunk):
    inv_n = 1.0 / n
    ch0, ch1 = HIDDEN_DIMS

    # first_timestep=True -> zero-initialized recurrent state
    h0_ref[...] = jnp.zeros_like(h0_ref)
    c0_ref[...] = jnp.zeros_like(c0_ref)
    h1_ref[...] = jnp.zeros_like(h1_ref)
    c1_ref[...] = jnp.zeros_like(c1_ref)

    def step(t, carry):
        @pl.when(t <= t_warm)                      # warm-up + first decode step use video frames
        def _use_frame():
            fb_ref[...] = frames_ref[t]            # (8, N), rows 4..7 are zero padding

        x = fb_ref[...]                            # otherwise: autoregressive softmax feedback

        # ---- layer 0 ConvLSTM cell ----
        _build_stack(stk0_ref, x, h0_ref[...], mask_ref, img_w, n)
        _cell_update(stk0_ref, w0_ref, b0_ref, h0_ref, c0_ref, ch0, lane_chunk, n)

        # ---- inter-layer BatchNorm3d(T=1) + ReLU ----
        y = _bn_relu(h0_ref[...], g0_ref[...], be0_ref[...], inv_n)

        # ---- layer 1 ConvLSTM cell ----
        _build_stack(stk1_ref, y, h1_ref[...], mask_ref, img_w, n)
        _cell_update(stk1_ref, w1_ref, b1_ref, h1_ref, c1_ref, ch1, lane_chunk, n)

        @pl.when(t >= t_warm)                      # decode: BN2d -> ReLU -> 1x1 conv -> softmax
        def _decode_head():
            z = _bn_relu(h1_ref[...], gh_ref[...], bh_ref[...], inv_n)
            logits = jnp.dot(wfc_ref[...], z,
                             preferred_element_type=jnp.float32) + bfc_ref[...]
            mlog = jnp.max(logits, axis=0, keepdims=True)
            e = jnp.exp(logits - mlog)
            prob = e * pl.reciprocal(jnp.sum(e, axis=0, keepdims=True), approx=True)
            out_ref[t - t_warm] = prob             # (C, N): 512-lane-dense store
            fb_ref[0:N_CHANNELS, :] = prob         # feed back as next decode input

        return carry

    jax.lax.fori_loop(0, t_total, step, 0)


# ----------------------------------------- wrappers ---------------------------------------------
def _make_shift_masks(B, H, W):
    """(9, 1, B*H*W) f32 masks: 1 where the 3x3 tap falls inside the image, 0 on the zero pad."""
    hh = jnp.arange(H)[:, None]
    ww = jnp.arange(W)[None, :]
    ms = []
    for kh in range(KH):
        for kw in range(KW):
            dy, dx = kh - 1, kw - 1
            valid = (hh + dy >= 0) & (hh + dy < H) & (ww + dx >= 0) & (ww + dx < W)
            ms.append(jnp.tile(valid.reshape(-1).astype(jnp.float32), B))
    return jnp.stack(ms, axis=0).reshape(KH * KW, 1, B * H * W)


def _pack_cell_weight(wx, wh, cin_pad):
    """Pack per-tap wx (9,4Ch,Cin) / wh (9,4Ch,Ch) into the stacked-im2col layout:
    (4Ch, 9*(cin_pad+Ch)) bf16, column tap*(cin_pad+Ch)+c = wx[tap,:,c] for c<Cin,
    zeros for the padded input rows, wh[tap,:,c-cin_pad] for the hidden rows."""
    taps, four_ch, cin = wx.shape
    ch = wh.shape[2]
    if cin_pad > cin:
        wx = jnp.concatenate(
            [wx, jnp.zeros((taps, four_ch, cin_pad - cin), wx.dtype)], axis=2)
    w = jnp.concatenate([wx, wh], axis=2)                    # (9, 4Ch, cin_pad+Ch)
    w = jnp.transpose(w, (1, 0, 2)).reshape(four_ch, taps * (cin_pad + ch))
    return w.astype(jnp.bfloat16)


def _forward_impl(video, params, *, target_len):
    """video: (B, T, C, H, W) float32 -> (B, target_len, C, H, W) channel-softmax predictions."""
    B, T, C, H, W = video.shape
    assert C == N_CHANNELS and len(HIDDEN_DIMS) == 2
    n = B * H * W
    assert n % 128 == 0, "flattened spatial size must be lane-tile aligned"
    lane_chunk = 256 if n % 256 == 0 else 128
    t_warm = T - 1                     # frames 0..T-2 warm up the encoder; frame T-1 seeds decoding
    t_total = t_warm + target_len

    # (B, T, C, H, W) -> (T, 8, B*H*W): channels on sublanes (zero-padded to 8), spatial on lanes.
    frames = jnp.transpose(video, (1, 2, 0, 3, 4)).reshape(T, C, n)
    frames = jnp.concatenate(
        [frames, jnp.zeros((T, N_CH_PAD - C, n), frames.dtype)], axis=1)
    masks = _make_shift_masks(B, H, W)

    cell0, cell1 = params["cells"]
    bn0 = params["inter_bn"][0]
    head = params["head"]

    w0 = _pack_cell_weight(cell0["wx"], cell0["wh"], N_CH_PAD)        # (64, 9*24) bf16
    w1 = _pack_cell_weight(cell1["wx"], cell1["wh"], HIDDEN_DIMS[0])  # (128, 9*48) bf16
    k0 = KH * KW * (N_CH_PAD + HIDDEN_DIMS[0])
    k1 = KH * KW * (HIDDEN_DIMS[0] + HIDDEN_DIMS[1])

    vmem = pl.BlockSpec(memory_space=pltpu.MemorySpace.VMEM)

    out = pl.pallas_call(
        functools.partial(_fused_kernel, t_warm=t_warm, t_total=t_total,
                          img_w=W, n=n, lane_chunk=lane_chunk),
        out_shape=jax.ShapeDtypeStruct((target_len, C, n), jnp.float32),
        in_specs=[vmem] * 12,
        out_specs=vmem,
        scratch_shapes=[
            pltpu.VMEM((HIDDEN_DIMS[0], n), jnp.float32),   # h0 (persistent across time steps)
            pltpu.VMEM((HIDDEN_DIMS[0], n), jnp.float32),   # c0
            pltpu.VMEM((HIDDEN_DIMS[1], n), jnp.float32),   # h1
            pltpu.VMEM((HIDDEN_DIMS[1], n), jnp.float32),   # c1
            pltpu.VMEM((N_CH_PAD, n), jnp.float32),         # decoder input / feedback frame
            pltpu.VMEM((k0, n), jnp.bfloat16),              # layer-0 stacked-tap im2col
            pltpu.VMEM((k1, n), jnp.bfloat16),              # layer-1 stacked-tap im2col
        ],
    )(frames, masks,
      w0, cell0["b"], bn0["gamma"], bn0["beta"],
      w1, cell1["b"],
      head["bn_gamma"], head["bn_beta"], head["fc_w"], head["fc_b"])

    out = out.reshape(target_len, C, B, H, W)
    return jnp.transpose(out, (2, 0, 1, 3, 4))            # (B, target_len, C, H, W)


segmented_convlstm_forward = jax.jit(_forward_impl, static_argnames=("target_len",))


# ----------------------------------------- parameters -------------------------------------------
def init_params(key):
    """Deterministic synthetic parameters with the shapes implied by the module's __init__.

    Cell conv weights are stored per 3x3 tap as (9, 4*hidden, cin): entry [o, :, :] with
    o = kh*3 + kw corresponds to the PyTorch Conv2d weight[:, chan_slice, kh, kw] of the
    cat([x, h]) convolution (wx takes the first `cin` input channels, wh the hidden channels),
    with gate order [i|f|o|g] along the 4*hidden output axis — so forward semantics match.
    The head 1x1 conv is (n_channels, hidden_last); BN gamma/beta and biases are (C, 1) columns.
    """
    keys = iter(jax.random.split(key, 16))
    cells = []
    cin = N_CHANNELS
    for ch in HIDDEN_DIMS:
        wx = jax.random.normal(next(keys), (KH * KW, 4 * ch, cin), jnp.float32) / jnp.sqrt(KH * KW * cin)
        wh = jax.random.normal(next(keys), (KH * KW, 4 * ch, ch), jnp.float32) / jnp.sqrt(KH * KW * ch)
        b = 0.01 * jax.random.normal(next(keys), (4 * ch, 1), jnp.float32)
        cells.append({"wx": wx, "wh": wh, "b": b})
        cin = ch
    inter_bn = [{
        "gamma": 1.0 + 0.1 * jax.random.normal(next(keys), (ch, 1), jnp.float32),
        "beta": 0.1 * jax.random.normal(next(keys), (ch, 1), jnp.float32),
    } for ch in HIDDEN_DIMS[:-1]]
    ch_last = HIDDEN_DIMS[-1]
    head = {
        "bn_gamma": 1.0 + 0.1 * jax.random.normal(next(keys), (ch_last, 1), jnp.float32),
        "bn_beta": 0.1 * jax.random.normal(next(keys), (ch_last, 1), jnp.float32),
        "fc_w": jax.random.normal(next(keys), (N_CHANNELS, ch_last), jnp.float32) / jnp.sqrt(ch_last),
        "fc_b": 0.01 * jax.random.normal(next(keys), (N_CHANNELS, 1), jnp.float32),
    }
    return {"cells": cells, "inter_bn": inter_bn, "head": head}


# ----------------------------------------- main --------------------------------------------------
if __name__ == "__main__":
    key = jax.random.PRNGKey(0)
    k_param, k_video = jax.random.split(key)

    B, T, H, W = 2, 6, 16, 16
    TARGET_LEN = 3
    video = jax.random.uniform(k_video, (B, T, N_CHANNELS, H, W), jnp.float32)

    params = init_params(k_param)
    out = segmented_convlstm_forward(video, params, target_len=TARGET_LEN)
    out = jax.block_until_ready(out)

    assert out.shape == (B, TARGET_LEN, N_CHANNELS, H, W), out.shape
    assert bool(jnp.all(jnp.isfinite(out)))
    # softmax over the channel axis -> per-pixel probabilities sum to ~1
    # (looser atol: the denominator uses the EUP approximate reciprocal).
    assert bool(jnp.allclose(jnp.sum(out, axis=2), 1.0, atol=5e-3))
    print("KERNEL_OK")
</pallas_src>

<mosaic_0001>
module attributes {stable_mosaic.version = 11 : i64} {
  func.func @_fused_kernel(%arg0: memref<6x8x512xf32, #tpu.memory_space<vmem>>, %arg1: memref<9x1x512xf32, #tpu.memory_space<vmem>>, %arg2: memref<64x216xbf16, #tpu.memory_space<vmem>>, %arg3: memref<64x1xf32, #tpu.memory_space<vmem>>, %arg4: memref<16x1xf32, #tpu.memory_space<vmem>>, %arg5: memref<16x1xf32, #tpu.memory_space<vmem>>, %arg6: memref<128x432xbf16, #tpu.memory_space<vmem>>, %arg7: memref<128x1xf32, #tpu.memory_space<vmem>>, %arg8: memref<32x1xf32, #tpu.memory_space<vmem>>, %arg9: memref<32x1xf32, #tpu.memory_space<vmem>>, %arg10: memref<4x32xf32, #tpu.memory_space<vmem>>, %arg11: memref<4x1xf32, #tpu.memory_space<vmem>>, %arg12: memref<3x4x512xf32, #tpu.memory_space<vmem>>, %arg13: memref<16x512xf32, #tpu.memory_space<vmem>>, %arg14: memref<16x512xf32, #tpu.memory_space<vmem>>, %arg15: memref<32x512xf32, #tpu.memory_space<vmem>>, %arg16: memref<32x512xf32, #tpu.memory_space<vmem>>, %arg17: memref<8x512xf32, #tpu.memory_space<vmem>>, %arg18: memref<216x512xbf16, #tpu.memory_space<vmem>>, %arg19: memref<432x512xbf16, #tpu.memory_space<vmem>>) attributes {dimension_semantics = [], scalar_prefetch = 0 : i64, scratch_operands = 7 : i64, tpu.core_type = #tpu.core_type<tc>} {
    %cst = arith.constant 0.000000e+00 : f32
    %0 = vector.broadcast %cst : f32 to vector<16x512xf32>
    %c0 = arith.constant 0 : index
    %c0_0 = arith.constant 0 : index
    %1 = vector.load %arg13[%c0, %c0_0] : memref<16x512xf32, #tpu.memory_space<vmem>>, vector<16x512xf32>
    tpu.vector_store %arg13[%c0, %c0_0], %0 {strides = array<i32>} : memref<16x512xf32, #tpu.memory_space<vmem>>, vector<16x512xf32>,
    %cst_1 = arith.constant 0.000000e+00 : f32
    %2 = vector.broadcast %cst_1 : f32 to vector<16x512xf32>
    %c0_2 = arith.constant 0 : index
    %c0_3 = arith.constant 0 : index
    %3 = vector.load %arg14[%c0_2, %c0_3] : memref<16x512xf32, #tpu.memory_space<vmem>>, vector<16x512xf32>
    tpu.vector_store %arg14[%c0_2, %c0_3], %2 {strides = array<i32>} : memref<16x512xf32, #tpu.memory_space<vmem>>, vector<16x512xf32>,
    %cst_4 = arith.constant 0.000000e+00 : f32
    %4 = vector.broadcast %cst_4 : f32 to vector<32x512xf32>
    %c0_5 = arith.constant 0 : index
    %c0_6 = arith.constant 0 : index
    %5 = vector.load %arg15[%c0_5, %c0_6] : memref<32x512xf32, #tpu.memory_space<vmem>>, vector<32x512xf32>
    tpu.vector_store %arg15[%c0_5, %c0_6], %4 {strides = array<i32>} : memref<32x512xf32, #tpu.memory_space<vmem>>, vector<32x512xf32>,
    %cst_7 = arith.constant 0.000000e+00 : f32
    %6 = vector.broadcast %cst_7 : f32 to vector<32x512xf32>
    %c0_8 = arith.constant 0 : index
    %c0_9 = arith.constant 0 : index
    %7 = vector.load %arg16[%c0_8, %c0_9] : memref<32x512xf32, #tpu.memory_space<vmem>>, vector<32x512xf32>
    tpu.vector_store %arg16[%c0_8, %c0_9], %6 {strides = array<i32>} : memref<32x512xf32, #tpu.memory_space<vmem>>, vector<32x512xf32>,
    %c0_i32 = arith.constant 0 : i32
    %c8_i32 = arith.constant 8 : i32
    %8 = arith.addi %c0_i32, %c8_i32 : i32
    %c1_i32 = arith.constant 1 : i32
    scf.for %arg20 = %c0_i32 to %8 step %c1_i32  : i32 {
      %c5_i32 = arith.constant 5 : i32
      %9 = arith.cmpi sle, %arg20, %c5_i32 : i32
      %10 = arith.extui %9 : i1 to i32
      %c0_i32_11 = arith.constant 0 : i32
      %11 = arith.cmpi ne, %10, %c0_i32_11 : i32
      scf.if %11 {
        %381 = arith.index_cast %arg20 : i32 to index
        %c0_205 = arith.constant 0 : index
        %c0_206 = arith.constant 0 : index
        %382 = vector.load %arg0[%381, %c0_205, %c0_206] : memref<6x8x512xf32, #tpu.memory_space<vmem>>, vector<1x8x512xf32>
        %383 = vector.shape_cast %382 : vector<1x8x512xf32> to vector<8x512xf32>
        %c0_207 = arith.constant 0 : index
        %c0_208 = arith.constant 0 : index
        %384 = vector.load %arg17[%c0_207, %c0_208] : memref<8x512xf32, #tpu.memory_space<vmem>>, vector<8x512xf32>
        tpu.vector_store %arg17[%c0_207, %c0_208], %383 {strides = array<i32>} : memref<8x512xf32, #tpu.memory_space<vmem>>, vector<8x512xf32>,
      } else {
      }
      %c0_12 = arith.constant 0 : index
      %c0_13 = arith.constant 0 : index
      %12 = vector.load %arg17[%c0_12, %c0_13] : memref<8x512xf32, #tpu.memory_space<vmem>>, vector<8x512xf32>
      %c0_14 = arith.constant 0 : index
      %c0_15 = arith.constant 0 : index
      %13 = vector.load %arg13[%c0_14, %c0_15] : memref<16x512xf32, #tpu.memory_space<vmem>>, vector<16x512xf32>
      %c0_16 = arith.constant 0 : index
      %c0_17 = arith.constant 0 : index
      %c0_18 = arith.constant 0 : index
      %14 = vector.load %arg1[%c0_16, %c0_17, %c0_18] : memref<9x1x512xf32, #tpu.memory_space<vmem>>, vector<1x1x512xf32>
      %15 = vector.shape_cast %14 : vector<1x1x512xf32> to vector<1x512xf32>
      %c17_i32 = arith.constant 17 : i32
      %16 = tpu.dynamic_rotate %12 by %c17_i32 dim 1 : vector<8x512xf32>, i32 -> vector<8x512xf32>
      %17 = vector.broadcast %15 : vector<1x512xf32> to vector<8x512xf32>
      %18 = arith.mulf %16, %17 : vector<8x512xf32>
      %c17_i32_19 = arith.constant 17 : i32
      %19 = tpu.dynamic_rotate %13 by %c17_i32_19 dim 1 : vector<16x512xf32>, i32 -> vector<16x512xf32>
      %20 = vector.broadcast %15 : vector<1x512xf32> to vector<16x512xf32>
      %21 = arith.mulf %19, %20 : vector<16x512xf32>
      %22 = arith.truncf %18 : vector<8x512xf32> to vector<8x512xbf16>
      %c0_20 = arith.constant 0 : index
      %c0_21 = arith.constant 0 : index
      %23 = vector.load %arg18[%c0_20, %c0_21] : memref<216x512xbf16, #tpu.memory_space<vmem>>, vector<8x512xbf16>
      tpu.vector_store %arg18[%c0_20, %c0_21], %22 {strides = array<i32>} : memref<216x512xbf16, #tpu.memory_space<vmem>>, vector<8x512xbf16>,
      %24 = arith.truncf %21 : vector<16x512xf32> to vector<16x512xbf16>
      %c8 = arith.constant 8 : index
      %c0_22 = arith.constant 0 : index
      %25 = vector.load %arg18[%c8, %c0_22] : memref<216x512xbf16, #tpu.memory_space<vmem>>, vector<16x512xbf16>
      tpu.vector_store %arg18[%c8, %c0_22], %24 {strides = array<i32>} : memref<216x512xbf16, #tpu.memory_space<vmem>>, vector<16x512xbf16>,
      %c1 = arith.constant 1 : index
      %c0_23 = arith.constant 0 : index
      %c0_24 = arith.constant 0 : index
      %26 = vector.load %arg1[%c1, %c0_23, %c0_24] : memref<9x1x512xf32, #tpu.memory_space<vmem>>, vector<1x1x512xf32>
      %27 = vector.shape_cast %26 : vector<1x1x512xf32> to vector<1x512xf32>
      %c16_i32 = arith.constant 16 : i32
      %28 = tpu.dynamic_rotate %12 by %c16_i32 dim 1 : vector<8x512xf32>, i32 -> vector<8x512xf32>
      %29 = vector.broadcast %27 : vector<1x512xf32> to vector<8x512xf32>
      %30 = arith.mulf %28, %29 : vector<8x512xf32>
      %c16_i32_25 = arith.constant 16 : i32
      %31 = tpu.dynamic_rotate %13 by %c16_i32_25 dim 1 : vector<16x512xf32>, i32 -> vector<16x512xf32>
      %32 = vector.broadcast %27 : vector<1x512xf32> to vector<16x512xf32>
      %33 = arith.mulf %31, %32 : vector<16x512xf32>
      %34 = arith.truncf %30 : vector<8x512xf32> to vector<8x512xbf16>
      %c24 = arith.constant 24 : index
      %c0_26 = arith.constant 0 : index
      %35 = vector.load %arg18[%c24, %c0_26] : memref<216x512xbf16, #tpu.memory_space<vmem>>, vector<8x512xbf16>
      tpu.vector_store %arg18[%c24, %c0_26], %34 {strides = array<i32>} : memref<216x512xbf16, #tpu.memory_space<vmem>>, vector<8x512xbf16>,
      %36 = arith.truncf %33 : vector<16x512xf32> to vector<16x512xbf16>
      %c32 = arith.constant 32 : index
      %c0_27 = arith.constant 0 : index
      %37 = vector.load %arg18[%c32, %c0_27] : memref<216x512xbf16, #tpu.memory_space<vmem>>, vector<16x512xbf16>
      tpu.vector_store %arg18[%c32, %c0_27], %36 {strides = array<i32>} : memref<216x512xbf16, #tpu.memory_space<vmem>>, vector<16x512xbf16>,
      %c2 = arith.constant 2 : index
      %c0_28 = arith.constant 0 : index
      %c0_29 = arith.constant 0 : index
      %38 = vector.load %arg1[%c2, %c0_28, %c0_29] : memref<9x1x512xf32, #tpu.memory_space<vmem>>, vector<1x1x512xf32>
      %39 = vector.shape_cast %38 : vector<1x1x512xf32> to vector<1x512xf32>
      %c15_i32 = arith.constant 15 : i32
      %40 = tpu.dynamic_rotate %12 by %c15_i32 dim 1 : vector<8x512xf32>, i32 -> vector<8x512xf32>
      %41 = vector.broadcast %39 : vector<1x512xf32> to vector<8x512xf32>
      %42 = arith.mulf %40, %41 : vector<8x512xf32>
      %c15_i32_30 = arith.constant 15 : i32
      %43 = tpu.dynamic_rotate %13 by %c15_i32_30 dim 1 : vector<16x512xf32>, i32 -> vector<16x512xf32>
      %44 = vector.broadcast %39 : vector<1x512xf32> to vector<16x512xf32>
      %45 = arith.mulf %43, %44 : vector<16x512xf32>
      %46 = arith.truncf %42 : vector<8x512xf32> to vector<8x512xbf16>
      %c48 = arith.constant 48 : index
      %c0_31 = arith.constant 0 : index
      %47 = vector.load %arg18[%c48, %c0_31] : memref<216x512xbf16, #tpu.memory_space<vmem>>, vector<8x512xbf16>
      tpu.vector_store %arg18[%c48, %c0_31], %46 {strides = array<i32>} : memref<216x512xbf16, #tpu.memory_space<vmem>>, vector<8x512xbf16>,
      %48 = arith.truncf %45 : vector<16x512xf32> to vector<16x512xbf16>
      %c56 = arith.constant 56 : index
      %c0_32 = arith.constant 0 : index
      %49 = vector.load %arg18[%c56, %c0_32] : memref<216x512xbf16, #tpu.memory_space<vmem>>, vector<16x512xbf16>
      tpu.vector_store %arg18[%c56, %c0_32], %48 {strides = array<i32>} : memref<216x512xbf16, #tpu.memory_space<vmem>>, vector<16x512xbf16>,
      %c3 = arith.constant 3 : index
      %c0_33 = arith.constant 0 : index
      %c0_34 = arith.constant 0 : index
      %50 = vector.load %arg1[%c3, %c0_33, %c0_34] : memref<9x1x512xf32, #tpu.memory_space<vmem>>, vector<1x1x512xf32>
      %51 = vector.shape_cast %50 : vector<1x1x512xf32> to vector<1x512xf32>
      %c1_i32_35 = arith.constant 1 : i32
      %52 = tpu.dynamic_rotate %12 by %c1_i32_35 dim 1 : vector<8x512xf32>, i32 -> vector<8x512xf32>
      %53 = vector.broadcast %51 : vector<1x512xf32> to vector<8x512xf32>
      %54 = arith.mulf %52, %53 : vector<8x512xf32>
      %c1_i32_36 = arith.constant 1 : i32
      %55 = tpu.dynamic_rotate %13 by %c1_i32_36 dim 1 : vector<16x512xf32>, i32 -> vector<16x512xf32>
      %56 = vector.broadcast %51 : vector<1x512xf32> to vector<16x512xf32>
      %57 = arith.mulf %55, %56 : vector<16x512xf32>
      %58 = arith.truncf %54 : vector<8x512xf32> to vector<8x512xbf16>
      %c72 = arith.constant 72 : index
      %c0_37 = arith.constant 0 : index
      %59 = vector.load %arg18[%c72, %c0_37] : memref<216x512xbf16, #tpu.memory_space<vmem>>, vector<8x512xbf16>
      tpu.vector_store %arg18[%c72, %c0_37], %58 {strides = array<i32>} : memref<216x512xbf16, #tpu.memory_space<vmem>>, vector<8x512xbf16>,
      %60 = arith.truncf %57 : vector<16x512xf32> to vector<16x512xbf16>
      %c80 = arith.constant 80 : index
      %c0_38 = arith.constant 0 : index
      %61 = vector.load %arg18[%c80, %c0_38] : memref<216x512xbf16, #tpu.memory_space<vmem>>, vector<16x512xbf16>
      tpu.vector_store %arg18[%c80, %c0_38], %60 {strides = array<i32>} : memref<216x512xbf16, #tpu.memory_space<vmem>>, vector<16x512xbf16>,
      %62 = arith.truncf %12 : vector<8x512xf32> to vector<8x512xbf16>
      %c96 = arith.constant 96 : index
      %c0_39 = arith.constant 0 : index
      %63 = vector.load %arg18[%c96, %c0_39] : memref<216x512xbf16, #tpu.memory_space<vmem>>, vector<8x512xbf16>
      tpu.vector_store %arg18[%c96, %c0_39], %62 {strides = array<i32>} : memref<216x512xbf16, #tpu.memory_space<vmem>>, vector<8x512xbf16>,
      %64 = arith.truncf %13 : vector<16x512xf32> to vector<16x512xbf16>
      %c104 = arith.constant 104 : index
      %c0_40 = arith.constant 0 : index
      %65 = vector.load %arg18[%c104, %c0_40] : memref<216x512xbf16, #tpu.memory_space<vmem>>, vector<16x512xbf16>
      tpu.vector_store %arg18[%c104, %c0_40], %64 {strides = array<i32>} : memref<216x512xbf16, #tpu.memory_space<vmem>>, vector<16x512xbf16>,
      %c5 = arith.constant 5 : index
      %c0_41 = arith.constant 0 : index
      %c0_42 = arith.constant 0 : index
      %66 = vector.load %arg1[%c5, %c0_41, %c0_42] : memref<9x1x512xf32, #tpu.memory_space<vmem>>, vector<1x1x512xf32>
      %67 = vector.shape_cast %66 : vector<1x1x512xf32> to vector<1x512xf32>
      %c511_i32 = arith.constant 511 : i32
      %68 = tpu.dynamic_rotate %12 by %c511_i32 dim 1 : vector<8x512xf32>, i32 -> vector<8x512xf32>
      %69 = vector.broadcast %67 : vector<1x512xf32> to vector<8x512xf32>
      %70 = arith.mulf %68, %69 : vector<8x512xf32>
      %c511_i32_43 = arith.constant 511 : i32
      %71 = tpu.dynamic_rotate %13 by %c511_i32_43 dim 1 : vector<16x512xf32>, i32 -> vector<16x512xf32>
      %72 = vector.broadcast %67 : vector<1x512xf32> to vector<16x512xf32>
      %73 = arith.mulf %71, %72 : vector<16x512xf32>
      %74 = arith.truncf %70 : vector<8x512xf32> to vector<8x512xbf16>
      %c120 = arith.constant 120 : index
      %c0_44 = arith.constant 0 : index
      %75 = vector.load %arg18[%c120, %c0_44] : memref<216x512xbf16, #tpu.memory_space<vmem>>, vector<8x512xbf16>
      tpu.vector_store %arg18[%c120, %c0_44], %74 {strides = array<i32>} : memref<216x512xbf16, #tpu.memory_space<vmem>>, vector<8x512xbf16>,
      %76 = arith.truncf %73 : vector<16x512xf32> to vector<16x512xbf16>
      %c128 = arith.constant 128 : index
      %c0_45 = arith.constant 0 : index
      %77 = vector.load %arg18[%c128, %c0_45] : memref<216x512xbf16, #tpu.memory_space<vmem>>, vector<16x512xbf16>
      tpu.vector_store %arg18[%c128, %c0_45], %76 {strides = array<i32>} : memref<216x512xbf16, #tpu.memory_space<vmem>>, vector<16x512xbf16>,
      %c6 = arith.constant 6 : index
      %c0_46 = arith.constant 0 : index
      %c0_47 = arith.constant 0 : index
      %78 = vector.load %arg1[%c6, %c0_46, %c0_47] : memref<9x1x512xf32, #tpu.memory_space<vmem>>, vector<1x1x512xf32>
      %79 = vector.shape_cast %78 : vector<1x1x512xf32> to vector<1x512xf32>
      %c497_i32 = arith.constant 497 : i32
      %80 = tpu.dynamic_rotate %12 by %c497_i32 dim 1 : vector<8x512xf32>, i32 -> vector<8x512xf32>
      %81 = vector.broadcast %79 : vector<1x512xf32> to vector<8x512xf32>
      %82 = arith.mulf %80, %81 : vector<8x512xf32>
      %c497_i32_48 = arith.constant 497 : i32
      %83 = tpu.dynamic_rotate %13 by %c497_i32_48 dim 1 : vector<16x512xf32>, i32 -> vector<16x512xf32>
      %84 = vector.broadcast %79 : vector<1x512xf32> to vector<16x512xf32>
      %85 = arith.mulf %83, %84 : vector<16x512xf32>
      %86 = arith.truncf %82 : vector<8x512xf32> to vector<8x512xbf16>
      %c144 = arith.constant 144 : index
      %c0_49 = arith.constant 0 : index
      %87 = vector.load %arg18[%c144, %c0_49] : memref<216x512xbf16, #tpu.memory_space<vmem>>, vector<8x512xbf16>
      tpu.vector_store %arg18[%c144, %c0_49], %86 {strides = array<i32>} : memref<216x512xbf16, #tpu.memory_space<vmem>>, vector<8x512xbf16>,
      %88 = arith.truncf %85 : vector<16x512xf32> to vector<16x512xbf16>
      %c152 = arith.constant 152 : index
      %c0_50 = arith.constant 0 : index
      %89 = vector.load %arg18[%c152, %c0_50] : memref<216x512xbf16, #tpu.memory_space<vmem>>, vector<16x512xbf16>
      tpu.vector_store %arg18[%c152, %c0_50], %88 {strides = array<i32>} : memref<216x512xbf16, #tpu.memory_space<vmem>>, vector<16x512xbf16>,
      %c7 = arith.constant 7 : index
      %c0_51 = arith.constant 0 : index
      %c0_52 = arith.constant 0 : index
      %90 = vector.load %arg1[%c7, %c0_51, %c0_52] : memref<9x1x512xf32, #tpu.memory_space<vmem>>, vector<1x1x512xf32>
      %91 = vector.shape_cast %90 : vector<1x1x512xf32> to vector<1x512xf32>
      %c496_i32 = arith.constant 496 : i32
      %92 = tpu.dynamic_rotate %12 by %c496_i32 dim 1 : vector<8x512xf32>, i32 -> vector<8x512xf32>
      %93 = vector.broadcast %91 : vector<1x512xf32> to vector<8x512xf32>
      %94 = arith.mulf %92, %93 : vector<8x512xf32>
      %c496_i32_53 = arith.constant 496 : i32
      %95 = tpu.dynamic_rotate %13 by %c496_i32_53 dim 1 : vector<16x512xf32>, i32 -> vector<16x512xf32>
      %96 = vector.broadcast %91 : vector<1x512xf32> to vector<16x512xf32>
      %97 = arith.mulf %95, %96 : vector<16x512xf32>
      %98 = arith.truncf %94 : vector<8x512xf32> to vector<8x512xbf16>
      %c168 = arith.constant 168 : index
      %c0_54 = arith.constant 0 : index
      %99 = vector.load %arg18[%c168, %c0_54] : memref<216x512xbf16, #tpu.memory_space<vmem>>, vector<8x512xbf16>
      tpu.vector_store %arg18[%c168, %c0_54], %98 {strides = array<i32>} : memref<216x512xbf16, #tpu.memory_space<vmem>>, vector<8x512xbf16>,
      %100 = arith.truncf %97 : vector<16x512xf32> to vector<16x512xbf16>
      %c176 = arith.constant 176 : index
      %c0_55 = arith.constant 0 : index
      %101 = vector.load %arg18[%c176, %c0_55] : memref<216x512xbf16, #tpu.memory_space<vmem>>, vector<16x512xbf16>
      tpu.vector_store %arg18[%c176, %c0_55], %100 {strides = array<i32>} : memref<216x512xbf16, #tpu.memory_space<vmem>>, vector<16x512xbf16>,
      %c8_56 = arith.constant 8 : index
      %c0_57 = arith.constant 0 : index
      %c0_58 = arith.constant 0 : index
      %102 = vector.load %arg1[%c8_56, %c0_57, %c0_58] : memref<9x1x512xf32, #tpu.memory_space<vmem>>, vector<1x1x512xf32>
      %103 = vector.shape_cast %102 : vector<1x1x512xf32> to vector<1x512xf32>
      %c495_i32 = arith.constant 495 : i32
      %104 = tpu.dynamic_rotate %12 by %c495_i32 dim 1 : vector<8x512xf32>, i32 -> vector<8x512xf32>
      %105 = vector.broadcast %103 : vector<1x512xf32> to vector<8x512xf32>
      %106 = arith.mulf %104, %105 : vector<8x512xf32>
      %c495_i32_59 = arith.constant 495 : i32
      %107 = tpu.dynamic_rotate %13 by %c495_i32_59 dim 1 : vector<16x512xf32>, i32 -> vector<16x512xf32>
      %108 = vector.broadcast %103 : vector<1x512xf32> to vector<16x512xf32>
      %109 = arith.mulf %107, %108 : vector<16x512xf32>
      %110 = arith.truncf %106 : vector<8x512xf32> to vector<8x512xbf16>
      %c192 = arith.constant 192 : index
      %c0_60 = arith.constant 0 : index
      %111 = vector.load %arg18[%c192, %c0_60] : memref<216x512xbf16, #tpu.memory_space<vmem>>, vector<8x512xbf16>
      tpu.vector_store %arg18[%c192, %c0_60], %110 {strides = array<i32>} : memref<216x512xbf16, #tpu.memory_space<vmem>>, vector<8x512xbf16>,
      %112 = arith.truncf %109 : vector<16x512xf32> to vector<16x512xbf16>
      %c200 = arith.constant 200 : index
      %c0_61 = arith.constant 0 : index
      %113 = vector.load %arg18[%c200, %c0_61] : memref<216x512xbf16, #tpu.memory_space<vmem>>, vector<16x512xbf16>
      tpu.vector_store %arg18[%c200, %c0_61], %112 {strides = array<i32>} : memref<216x512xbf16, #tpu.memory_space<vmem>>, vector<16x512xbf16>,
      %c0_62 = arith.constant 0 : index
      %c0_63 = arith.constant 0 : index
      %114 = vector.load %arg2[%c0_62, %c0_63] : memref<64x216xbf16, #tpu.memory_space<vmem>>, vector<64x216xbf16>
      %c0_64 = arith.constant 0 : index
      %c0_65 = arith.constant 0 : index
      %115 = vector.load %arg18[%c0_64, %c0_65] : memref<216x512xbf16, #tpu.memory_space<vmem>>, vector<216x256xbf16>
      %cst_66 = arith.constant dense<0.000000e+00> : vector<64x256xf32>
      %116 = tpu.matmul %114, %115, %cst_66 {dimension_numbers = #tpu.dot_dimension_numbers<[1], [0], [0], [1], [0, 0, 1, 1], [], []>} : vector<64x216xbf16>, vector<216x256xbf16>, vector<64x256xf32> -> vector<64x256xf32>
      %c0_67 = arith.constant 0 : index
      %c0_68 = arith.constant 0 : index
      %117 = vector.load %arg3[%c0_67, %c0_68] : memref<64x1xf32, #tpu.memory_space<vmem>>, vector<64x1xf32>
      %118 = vector.broadcast %117 : vector<64x1xf32> to vector<64x256xf32>
      %119 = arith.addf %116, %118 : vector<64x256xf32>
      %120 = vector.extract_strided_slice %119 {offsets = [0, 0], sizes = [16, 256], strides = [1, 1]} : vector<64x256xf32> to vector<16x256xf32>
      %121 = arith.negf %120 : vector<16x256xf32>
      %122 = math.exp %121 : vector<16x256xf32>
      %cst_69 = arith.constant 1.000000e+00 : f32
      %123 = vector.broadcast %cst_69 : f32 to vector<16x256xf32>
      %124 = arith.addf %123, %122 : vector<16x256xf32>
      %125 = arith.divf %123, %124 : vector<16x256xf32>
      %126 = vector.extract_strided_slice %119 {offsets = [16, 0], sizes = [16, 256], strides = [1, 1]} : vector<64x256xf32> to vector<16x256xf32>
      %127 = arith.negf %126 : vector<16x256xf32>
      %128 = math.exp %127 : vector<16x256xf32>
      %cst_70 = arith.constant 1.000000e+00 : f32
      %129 = vector.broadcast %cst_70 : f32 to vector<16x256xf32>
      %130 = arith.addf %129, %128 : vector<16x256xf32>
      %131 = arith.divf %129, %130 : vector<16x256xf32>
      %132 = vector.extract_strided_slice %119 {offsets = [32, 0], sizes = [16, 256], strides = [1, 1]} : vector<64x256xf32> to vector<16x256xf32>
      %133 = arith.negf %132 : vector<16x256xf32>
      %134 = math.exp %133 : vector<16x256xf32>
      %cst_71 = arith.constant 1.000000e+00 : f32
      %135 = vector.broadcast %cst_71 : f32 to vector<16x256xf32>
      %136 = arith.addf %135, %134 : vector<16x256xf32>
      %137 = arith.divf %135, %136 : vector<16x256xf32>
      %138 = vector.extract_strided_slice %119 {offsets = [48, 0], sizes = [16, 256], strides = [1, 1]} : vector<64x256xf32> to vector<16x256xf32>
      %139 = math.tanh %138 : vector<16x256xf32>
      %c0_72 = arith.constant 0 : index
      %c0_73 = arith.constant 0 : index
      %140 = vector.load %arg14[%c0_72, %c0_73] : memref<16x512xf32, #tpu.memory_space<vmem>>, vector<16x256xf32>
      %141 = arith.mulf %131, %140 : vector<16x256xf32>
      %142 = arith.mulf %125, %139 : vector<16x256xf32>
      %143 = arith.addf %141, %142 : vector<16x256xf32>
      %c0_74 = arith.constant 0 : index
      %c0_75 = arith.constant 0 : index
      %144 = vector.load %arg14[%c0_74, %c0_75] : memref<16x512xf32, #tpu.memory_space<vmem>>, vector<16x256xf32>
      tpu.vector_store %arg14[%c0_74, %c0_75], %143 {strides = array<i32>} : memref<16x512xf32, #tpu.memory_space<vmem>>, vector<16x256xf32>,
      %145 = math.tanh %143 : vector<16x256xf32>
      %146 = arith.mulf %137, %145 : vector<16x256xf32>
      %c0_76 = arith.constant 0 : index
      %c0_77 = arith.constant 0 : index
      %147 = vector.load %arg13[%c0_76, %c0_77] : memref<16x512xf32, #tpu.memory_space<vmem>>, vector<16x256xf32>
      tpu.vector_store %arg13[%c0_76, %c0_77], %146 {strides = array<i32>} : memref<16x512xf32, #tpu.memory_space<vmem>>, vector<16x256xf32>,
      %c0_78 = arith.constant 0 : index
      %c0_79 = arith.constant 0 : index
      %148 = vector.load %arg2[%c0_78, %c0_79] : memref<64x216xbf16, #tpu.memory_space<vmem>>, vector<64x216xbf16>
      %c0_80 = arith.constant 0 : index
      %c256 = arith.constant 256 : index
      %149 = vector.load %arg18[%c0_80, %c256] : memref<216x512xbf16, #tpu.memory_space<vmem>>, vector<216x256xbf16>
      %cst_81 = arith.constant dense<0.000000e+00> : vector<64x256xf32>
      %150 = tpu.matmul %148, %149, %cst_81 {dimension_numbers = #tpu.dot_dimension_numbers<[1], [0], [0], [1], [0, 0, 1, 1], [], []>} : vector<64x216xbf16>, vector<216x256xbf16>, vector<64x256xf32> -> vector<64x256xf32>
      %c0_82 = arith.constant 0 : index
      %c0_83 = arith.constant 0 : index
      %151 = vector.load %arg3[%c0_82, %c0_83] : memref<64x1xf32, #tpu.memory_space<vmem>>, vector<64x1xf32>
      %152 = vector.broadcast %151 : vector<64x1xf32> to vector<64x256xf32>
      %153 = arith.addf %150, %152 : vector<64x256xf32>
      %154 = vector.extract_strided_slice %153 {offsets = [0, 0], sizes = [16, 256], strides = [1, 1]} : vector<64x256xf32> to vector<16x256xf32>
      %155 = arith.negf %154 : vector<16x256xf32>
      %156 = math.exp %155 : vector<16x256xf32>
      %cst_84 = arith.constant 1.000000e+00 : f32
      %157 = vector.broadcast %cst_84 : f32 to vector<16x256xf32>
      %158 = arith.addf %157, %156 : vector<16x256xf32>
      %159 = arith.divf %157, %158 : vector<16x256xf32>
      %160 = vector.extract_strided_slice %153 {offsets = [16, 0], sizes = [16, 256], strides = [1, 1]} : vector<64x256xf32> to vector<16x256xf32>
      %161 = arith.negf %160 : vector<16x256xf32>
      %162 = math.exp %161 : vector<16x256xf32>
      %cst_85 = arith.constant 1.000000e+00 : f32
      %163 = vector.broadcast %cst_85 : f32 to vector<16x256xf32>
      %164 = arith.addf %163, %162 : vector<16x256xf32>
      %165 = arith.divf %163, %164 : vector<16x256xf32>
      %166 = vector.extract_strided_slice %153 {offsets = [32, 0], sizes = [16, 256], strides = [1, 1]} : vector<64x256xf32> to vector<16x256xf32>
      %167 = arith.negf %166 : vector<16x256xf32>
      %168 = math.exp %167 : vector<16x256xf32>
      %cst_86 = arith.constant 1.000000e+00 : f32
      %169 = vector.broadcast %cst_86 : f32 to vector<16x256xf32>
      %170 = arith.addf %169, %168 : vector<16x256xf32>
      %171 = arith.divf %169, %170 : vector<16x256xf32>
      %172 = vector.extract_strided_slice %153 {offsets = [48, 0], sizes = [16, 256], strides = [1, 1]} : vector<64x256xf32> to vector<16x256xf32>
      %173 = math.tanh %172 : vector<16x256xf32>
      %c0_87 = arith.constant 0 : index
      %c256_88 = arith.constant 256 : index
      %174 = vector.load %arg14[%c0_87, %c256_88] : memref<16x512xf32, #tpu.memory_space<vmem>>, vector<16x256xf32>
      %175 = arith.mulf %165, %174 : vector<16x256xf32>
      %176 = arith.mulf %159, %173 : vector<16x256xf32>
      %177 = arith.addf %175, %176 : vector<16x256xf32>
      %c0_89 = arith.constant 0 : index
      %c256_90 = arith.constant 256 : index
      %178 = vector.load %arg14[%c0_89, %c256_90] : memref<16x512xf32, #tpu.memory_space<vmem>>, vector<16x256xf32>
      tpu.vector_store %arg14[%c0_89, %c256_90], %177 {strides = array<i32>} : memref<16x512xf32, #tpu.memory_space<vmem>>, vector<16x256xf32>,
      %179 = math.tanh %177 : vector<16x256xf32>
      %180 = arith.mulf %171, %179 : vector<16x256xf32>
      %c0_91 = arith.constant 0 : index
      %c256_92 = arith.constant 256 : index
      %181 = vector.load %arg13[%c0_91, %c256_92] : memref<16x512xf32, #tpu.memory_space<vmem>>, vector<16x256xf32>
      tpu.vector_store %arg13[%c0_91, %c256_92], %180 {strides = array<i32>} : memref<16x512xf32, #tpu.memory_space<vmem>>, vector<16x256xf32>,
      %c0_93 = arith.constant 0 : index
      %c0_94 = arith.constant 0 : index
      %182 = vector.load %arg13[%c0_93, %c0_94] : memref<16x512xf32, #tpu.memory_space<vmem>>, vector<16x512xf32>
      %c0_95 = arith.constant 0 : index
      %c0_96 = arith.constant 0 : index
      %183 = vector.load %arg4[%c0_95, %c0_96] : memref<16x1xf32, #tpu.memory_space<vmem>>, vector<16x1xf32>
      %c0_97 = arith.constant 0 : index
      %c0_98 = arith.constant 0 : index
      %184 = vector.load %arg5[%c0_97, %c0_98] : memref<16x1xf32, #tpu.memory_space<vmem>>, vector<16x1xf32>
      %cst_99 = arith.constant dense<0.000000e+00> : vector<16xf32>
      %185 = vector.multi_reduction <add>, %182, %cst_99 [1] : vector<16x512xf32> to vector<16xf32>
      %186 = vector.shape_cast %185 : vector<16xf32> to vector<16x1xf32>
      %187 = arith.mulf %182, %182 : vector<16x512xf32>
      %cst_100 = arith.constant dense<0.000000e+00> : vector<16xf32>
      %188 = vector.multi_reduction <add>, %187, %cst_100 [1] : vector<16x512xf32> to vector<16xf32>
      %189 = vector.shape_cast %188 : vector<16xf32> to vector<16x1xf32>
      %cst_101 = arith.constant 0.001953125 : f32
      %190 = vector.broadcast %cst_101 : f32 to vector<16x1xf32>
      %191 = arith.mulf %186, %190 : vector<16x1xf32>
      %cst_102 = arith.constant 0.001953125 : f32
      %192 = vector.broadcast %cst_102 : f32 to vector<16x1xf32>
      %193 = arith.mulf %189, %192 : vector<16x1xf32>
      %194 = arith.mulf %191, %191 : vector<16x1xf32>
      %195 = arith.subf %193, %194 : vector<16x1xf32>
      %196 = vector.broadcast %191 : vector<16x1xf32> to vector<16x512xf32>
      %197 = arith.subf %182, %196 : vector<16x512xf32>
      %cst_103 = arith.constant 9.99999974E-6 : f32
      %198 = vector.broadcast %cst_103 : f32 to vector<16x1xf32>
      %199 = arith.addf %195, %198 : vector<16x1xf32>
      %200 = math.rsqrt %199 : vector<16x1xf32>
      %201 = vector.broadcast %200 : vector<16x1xf32> to vector<16x512xf32>
      %202 = arith.mulf %197, %201 : vector<16x512xf32>
      %203 = vector.broadcast %183 : vector<16x1xf32> to vector<16x512xf32>
      %204 = arith.mulf %202, %203 : vector<16x512xf32>
      %205 = vector.broadcast %184 : vector<16x1xf32> to vector<16x512xf32>
      %206 = arith.addf %204, %205 : vector<16x512xf32>
      %cst_104 = arith.constant 0.000000e+00 : f32
      %207 = vector.broadcast %cst_104 : f32 to vector<16x512xf32>
      %208 = arith.maximumf %206, %207 : vector<16x512xf32>
      %c0_105 = arith.constant 0 : index
      %c0_106 = arith.constant 0 : index
      %209 = vector.load %arg15[%c0_105, %c0_106] : memref<32x512xf32, #tpu.memory_space<vmem>>, vector<32x512xf32>
      %c0_107 = arith.constant 0 : index
      %c0_108 = arith.constant 0 : index
      %c0_109 = arith.constant 0 : index
      %210 = vector.load %arg1[%c0_107, %c0_108, %c0_109] : memref<9x1x512xf32, #tpu.memory_space<vmem>>, vector<1x1x512xf32>
      %211 = vector.shape_cast %210 : vector<1x1x512xf32> to vector<1x512xf32>
      %c17_i32_110 = arith.constant 17 : i32
      %212 = tpu.dynamic_rotate %208 by %c17_i32_110 dim 1 : vector<16x512xf32>, i32 -> vector<16x512xf32>
      %213 = vector.broadcast %211 : vector<1x512xf32> to vector<16x512xf32>
      %214 = arith.mulf %212, %213 : vector<16x512xf32>
      %c17_i32_111 = arith.constant 17 : i32
      %215 = tpu.dynamic_rotate %209 by %c17_i32_111 dim 1 : vector<32x512xf32>, i32 -> vector<32x512xf32>
      %216 = vector.broadcast %211 : vector<1x512xf32> to vector<32x512xf32>
      %217 = arith.mulf %215, %216 : vector<32x512xf32>
      %218 = arith.truncf %214 : vector<16x512xf32> to vector<16x512xbf16>
      %c0_112 = arith.constant 0 : index
      %c0_113 = arith.constant 0 : index
      %219 = vector.load %arg19[%c0_112, %c0_113] : memref<432x512xbf16, #tpu.memory_space<vmem>>, vector<16x512xbf16>
      tpu.vector_store %arg19[%c0_112, %c0_113], %218 {strides = array<i32>} : memref<432x512xbf16, #tpu.memory_space<vmem>>, vector<16x512xbf16>,
      %220 = arith.truncf %217 : vector<32x512xf32> to vector<32x512xbf16>
      %c16 = arith.constant 16 : index
      %c0_114 = arith.constant 0 : index
      %221 = vector.load %arg19[%c16, %c0_114] : memref<432x512xbf16, #tpu.memory_space<vmem>>, vector<32x512xbf16>
      tpu.vector_store %arg19[%c16, %c0_114], %220 {strides = array<i32>} : memref<432x512xbf16, #tpu.memory_space<vmem>>, vector<32x512xbf16>,
      %c1_115 = arith.constant 1 : index
      %c0_116 = arith.constant 0 : index
      %c0_117 = arith.constant 0 : index
      %222 = vector.load %arg1[%c1_115, %c0_116, %c0_117] : memref<9x1x512xf32, #tpu.memory_space<vmem>>, vector<1x1x512xf32>
      %223 = vector.shape_cast %222 : vector<1x1x512xf32> to vector<1x512xf32>
      %c16_i32_118 = arith.constant 16 : i32
      %224 = tpu.dynamic_rotate %208 by %c16_i32_118 dim 1 : vector<16x512xf32>, i32 -> vector<16x512xf32>
      %225 = vector.broadcast %223 : vector<1x512xf32> to vector<16x512xf32>
      %226 = arith.mulf %224, %225 : vector<16x512xf32>
      %c16_i32_119 = arith.constant 16 : i32
      %227 = tpu.dynamic_rotate %209 by %c16_i32_119 dim 1 : vector<32x512xf32>, i32 -> vector<32x512xf32>
      %228 = vector.broadcast %223 : vector<1x512xf32> to vector<32x512xf32>
      %229 = arith.mulf %227, %228 : vector<32x512xf32>
      %230 = arith.truncf %226 : vector<16x512xf32> to vector<16x512xbf16>
      %c48_120 = arith.constant 48 : index
      %c0_121 = arith.constant 0 : index
      %231 = vector.load %arg19[%c48_120, %c0_121] : memref<432x512xbf16, #tpu.memory_space<vmem>>, vector<16x512xbf16>
      tpu.vector_store %arg19[%c48_120, %c0_121], %230 {strides = array<i32>} : memref<432x512xbf16, #tpu.memory_space<vmem>>, vector<16x512xbf16>,
      %232 = arith.truncf %229 : vector<32x512xf32> to vector<32x512xbf16>
      %c64 = arith.constant 64 : index
      %c0_122 = arith.constant 0 : index
      %233 = vector.load %arg19[%c64, %c0_122] : memref<432x512xbf16, #tpu.memory_space<vmem>>, vector<32x512xbf16>
      tpu.vector_store %arg19[%c64, %c0_122], %232 {strides = array<i32>} : memref<432x512xbf16, #tpu.memory_space<vmem>>, vector<32x512xbf16>,
      %c2_123 = arith.constant 2 : index
      %c0_124 = arith.constant 0 : index
      %c0_125 = arith.constant 0 : index
      %234 = vector.load %arg1[%c2_123, %c0_124, %c0_125] : memref<9x1x512xf32, #tpu.memory_space<vmem>>, vector<1x1x512xf32>
      %235 = vector.shape_cast %234 : vector<1x1x512xf32> to vector<1x512xf32>
      %c15_i32_126 = arith.constant 15 : i32
      %236 = tpu.dynamic_rotate %208 by %c15_i32_126 dim 1 : vector<16x512xf32>, i32 -> vector<16x512xf32>
      %237 = vector.broadcast %235 : vector<1x512xf32> to vector<16x512xf32>
      %238 = arith.mulf %236, %237 : vector<16x512xf32>
      %c15_i32_127 = arith.constant 15 : i32
      %239 = tpu.dynamic_rotate %209 by %c15_i32_127 dim 1 : vector<32x512xf32>, i32 -> vector<32x512xf32>
      %240 = vector.broadcast %235 : vector<1x512xf32> to vector<32x512xf32>
      %241 = arith.mulf %239, %240 : vector<32x512xf32>
      %242 = arith.truncf %238 : vector<16x512xf32> to vector<16x512xbf16>
      %c96_128 = arith.constant 96 : index
      %c0_129 = arith.constant 0 : index
      %243 = vector.load %arg19[%c96_128, %c0_129] : memref<432x512xbf16, #tpu.memory_space<vmem>>, vector<16x512xbf16>
      tpu.vector_store %arg19[%c96_128, %c0_129], %242 {strides = array<i32>} : memref<432x512xbf16, #tpu.memory_space<vmem>>, vector<16x512xbf16>,
      %244 = arith.truncf %241 : vector<32x512xf32> to vector<32x512xbf16>
      %c112 = arith.constant 112 : index
      %c0_130 = arith.constant 0 : index
      %245 = vector.load %arg19[%c112, %c0_130] : memref<432x512xbf16, #tpu.memory_space<vmem>>, vector<32x512xbf16>
      tpu.vector_store %arg19[%c112, %c0_130], %244 {strides = array<i32>} : memref<432x512xbf16, #tpu.memory_space<vmem>>, vector<32x512xbf16>,
      %c3_131 = arith.constant 3 : index
      %c0_132 = arith.constant 0 : index
      %c0_133 = arith.constant 0 : index
      %246 = vector.load %arg1[%c3_131, %c0_132, %c0_133] : memref<9x1x512xf32, #tpu.memory_space<vmem>>, vector<1x1x512xf32>
      %247 = vector.shape_cast %246 : vector<1x1x512xf32> to vector<1x512xf32>
      %c1_i32_134 = arith.constant 1 : i32
      %248 = tpu.dynamic_rotate %208 by %c1_i32_134 dim 1 : vector<16x512xf32>, i32 -> vector<16x512xf32>
      %249 = vector.broadcast %247 : vector<1x512xf32> to vector<16x512xf32>
      %250 = arith.mulf %248, %249 : vector<16x512xf32>
      %c1_i32_135 = arith.constant 1 : i32
      %251 = tpu.dynamic_rotate %209 by %c1_i32_135 dim 1 : vector<32x512xf32>, i32 -> vector<32x512xf32>
      %252 = vector.broadcast %247 : vector<1x512xf32> to vector<32x512xf32>
      %253 = arith.mulf %251, %252 : vector<32x512xf32>
      %254 = arith.truncf %250 : vector<16x512xf32> to vector<16x512xbf16>
      %c144_136 = arith.constant 144 : index
      %c0_137 = arith.constant 0 : index
      %255 = vector.load %arg19[%c144_136, %c0_137] : memref<432x512xbf16, #tpu.memory_space<vmem>>, vector<16x512xbf16>
      tpu.vector_store %arg19[%c144_136, %c0_137], %254 {strides = array<i32>} : memref<432x512xbf16, #tpu.memory_space<vmem>>, vector<16x512xbf16>,
      %256 = arith.truncf %253 : vector<32x512xf32> to vector<32x512xbf16>
      %c160 = arith.constant 160 : index
      %c0_138 = arith.constant 0 : index
      %257 = vector.load %arg19[%c160, %c0_138] : memref<432x512xbf16, #tpu.memory_space<vmem>>, vector<32x512xbf16>
      tpu.vector_store %arg19[%c160, %c0_138], %256 {strides = array<i32>} : memref<432x512xbf16, #tpu.memory_space<vmem>>, vector<32x512xbf16>,
      %258 = arith.truncf %208 : vector<16x512xf32> to vector<16x512xbf16>
      %c192_139 = arith.constant 192 : index
      %c0_140 = arith.constant 0 : index
      %259 = vector.load %arg19[%c192_139, %c0_140] : memref<432x512xbf16, #tpu.memory_space<vmem>>, vector<16x512xbf16>
      tpu.vector_store %arg19[%c192_139, %c0_140], %258 {strides = array<i32>} : memref<432x512xbf16, #tpu.memory_space<vmem>>, vector<16x512xbf16>,
      %260 = arith.truncf %209 : vector<32x512xf32> to vector<32x512xbf16>
      %c208 = arith.constant 208 : index
      %c0_141 = arith.constant 0 : index
      %261 = vector.load %arg19[%c208, %c0_141] : memref<432x512xbf16, #tpu.memory_space<vmem>>, vector<32x512xbf16>
      tpu.vector_store %arg19[%c208, %c0_141], %260 {strides = array<i32>} : memref<432x512xbf16, #tpu.memory_space<vmem>>, vector<32x512xbf16>,
      %c5_142 = arith.constant 5 : index
      %c0_143 = arith.constant 0 : index
      %c0_144 = arith.constant 0 : index
      %262 = vector.load %arg1[%c5_142, %c0_143, %c0_144] : memref<9x1x512xf32, #tpu.memory_space<vmem>>, vector<1x1x512xf32>
      %263 = vector.shape_cast %262 : vector<1x1x512xf32> to vector<1x512xf32>
      %c511_i32_145 = arith.constant 511 : i32
      %264 = tpu.dynamic_rotate %208 by %c511_i32_145 dim 1 : vector<16x512xf32>, i32 -> vector<16x512xf32>
      %265 = vector.broadcast %263 : vector<1x512xf32> to vector<16x512xf32>
      %266 = arith.mulf %264, %265 : vector<16x512xf32>
      %c511_i32_146 = arith.constant 511 : i32
      %267 = tpu.dynamic_rotate %209 by %c511_i32_146 dim 1 : vector<32x512xf32>, i32 -> vector<32x512xf32>
      %268 = vector.broadcast %263 : vector<1x512xf32> to vector<32x512xf32>
      %269 = arith.mulf %267, %268 : vector<32x512xf32>
      %270 = arith.truncf %266 : vector<16x512xf32> to vector<16x512xbf16>
      %c240 = arith.constant 240 : index
      %c0_147 = arith.constant 0 : index
      %271 = vector.load %arg19[%c240, %c0_147] : memref<432x512xbf16, #tpu.memory_space<vmem>>, vector<16x512xbf16>
      tpu.vector_store %arg19[%c240, %c0_147], %270 {strides = array<i32>} : memref<432x512xbf16, #tpu.memory_space<vmem>>, vector<16x512xbf16>,
      %272 = arith.truncf %269 : vector<32x512xf32> to vector<32x512xbf16>
      %c256_148 = arith.constant 256 : index
      %c0_149 = arith.constant 0 : index
      %273 = vector.load %arg19[%c256_148, %c0_149] : memref<432x512xbf16, #tpu.memory_space<vmem>>, vector<32x512xbf16>
      tpu.vector_store %arg19[%c256_148, %c0_149], %272 {strides = array<i32>} : memref<432x512xbf16, #tpu.memory_space<vmem>>, vector<32x512xbf16>,
      %c6_150 = arith.constant 6 : index
      %c0_151 = arith.constant 0 : index
      %c0_152 = arith.constant 0 : index
      %274 = vector.load %arg1[%c6_150, %c0_151, %c0_152] : memref<9x1x512xf32, #tpu.memory_space<vmem>>, vector<1x1x512xf32>
      %275 = vector.shape_cast %274 : vector<1x1x512xf32> to vector<1x512xf32>
      %c497_i32_153 = arith.constant 497 : i32
      %276 = tpu.dynamic_rotate %208 by %c497_i32_153 dim 1 : vector<16x512xf32>, i32 -> vector<16x512xf32>
      %277 = vector.broadcast %275 : vector<1x512xf32> to vector<16x512xf32>
      %278 = arith.mulf %276, %277 : vector<16x512xf32>
      %c497_i32_154 = arith.constant 497 : i32
      %279 = tpu.dynamic_rotate %209 by %c497_i32_154 dim 1 : vector<32x512xf32>, i32 -> vector<32x512xf32>
      %280 = vector.broadcast %275 : vector<1x512xf32> to vector<32x512xf32>
      %281 = arith.mulf %279, %280 : vector<32x512xf32>
      %282 = arith.truncf %278 : vector<16x512xf32> to vector<16x512xbf16>
      %c288 = arith.constant 288 : index
      %c0_155 = arith.constant 0 : index
      %283 = vector.load %arg19[%c288, %c0_155] : memref<432x512xbf16, #tpu.memory_space<vmem>>, vector<16x512xbf16>
      tpu.vector_store %arg19[%c288, %c0_155], %282 {strides = array<i32>} : memref<432x512xbf16, #tpu.memory_space<vmem>>, vector<16x512xbf16>,
      %284 = arith.truncf %281 : vector<32x512xf32> to vector<32x512xbf16>
      %c304 = arith.constant 304 : index
      %c0_156 = arith.constant 0 : index
      %285 = vector.load %arg19[%c304, %c0_156] : memref<432x512xbf16, #tpu.memory_space<vmem>>, vector<32x512xbf16>
      tpu.vector_store %arg19[%c304, %c0_156], %284 {strides = array<i32>} : memref<432x512xbf16, #tpu.memory_space<vmem>>, vector<32x512xbf16>,
      %c7_157 = arith.constant 7 : index
      %c0_158 = arith.constant 0 : index
      %c0_159 = arith.constant 0 : index
      %286 = vector.load %arg1[%c7_157, %c0_158, %c0_159] : memref<9x1x512xf32, #tpu.memory_space<vmem>>, vector<1x1x512xf32>
      %287 = vector.shape_cast %286 : vector<1x1x512xf32> to vector<1x512xf32>
      %c496_i32_160 = arith.constant 496 : i32
      %288 = tpu.dynamic_rotate %208 by %c496_i32_160 dim 1 : vector<16x512xf32>, i32 -> vector<16x512xf32>
      %289 = vector.broadcast %287 : vector<1x512xf32> to vector<16x512xf32>
      %290 = arith.mulf %288, %289 : vector<16x512xf32>
      %c496_i32_161 = arith.constant 496 : i32
      %291 = tpu.dynamic_rotate %209 by %c496_i32_161 dim 1 : vector<32x512xf32>, i32 -> vector<32x512xf32>
      %292 = vector.broadcast %287 : vector<1x512xf32> to vector<32x512xf32>
      %293 = arith.mulf %291, %292 : vector<32x512xf32>
      %294 = arith.truncf %290 : vector<16x512xf32> to vector<16x512xbf16>
      %c336 = arith.constant 336 : index
      %c0_162 = arith.constant 0 : index
      %295 = vector.load %arg19[%c336, %c0_162] : memref<432x512xbf16, #tpu.memory_space<vmem>>, vector<16x512xbf16>
      tpu.vector_store %arg19[%c336, %c0_162], %294 {strides = array<i32>} : memref<432x512xbf16, #tpu.memory_space<vmem>>, vector<16x512xbf16>,
      %296 = arith.truncf %293 : vector<32x512xf32> to vector<32x512xbf16>
      %c352 = arith.constant 352 : index
      %c0_163 = arith.constant 0 : index
      %297 = vector.load %arg19[%c352, %c0_163] : memref<432x512xbf16, #tpu.memory_space<vmem>>, vector<32x512xbf16>
      tpu.vector_store %arg19[%c352, %c0_163], %296 {strides = array<i32>} : memref<432x512xbf16, #tpu.memory_space<vmem>>, vector<32x512xbf16>,
      %c8_164 = arith.constant 8 : index
      %c0_165 = arith.constant 0 : index
      %c0_166 = arith.constant 0 : index
      %298 = vector.load %arg1[%c8_164, %c0_165, %c0_166] : memref<9x1x512xf32, #tpu.memory_space<vmem>>, vector<1x1x512xf32>
      %299 = vector.shape_cast %298 : vector<1x1x512xf32> to vector<1x512xf32>
      %c495_i32_167 = arith.constant 495 : i32
      %300 = tpu.dynamic_rotate %208 by %c495_i32_167 dim 1 : vector<16x512xf32>, i32 -> vector<16x512xf32>
      %301 = vector.broadcast %299 : vector<1x512xf32> to vector<16x512xf32>
      %302 = arith.mulf %300, %301 : vector<16x512xf32>
      %c495_i32_168 = arith.constant 495 : i32
      %303 = tpu.dynamic_rotate %209 by %c495_i32_168 dim 1 : vector<32x512xf32>, i32 -> vector<32x512xf32>
      %304 = vector.broadcast %299 : vector<1x512xf32> to vector<32x512xf32>
      %305 = arith.mulf %303, %304 : vector<32x512xf32>
      %306 = arith.truncf %302 : vector<16x512xf32> to vector<16x512xbf16>
      %c384 = arith.constant 384 : index
      %c0_169 = arith.constant 0 : index
      %307 = vector.load %arg19[%c384, %c0_169] : memref<432x512xbf16, #tpu.memory_space<vmem>>, vector<16x512xbf16>
      tpu.vector_store %arg19[%c384, %c0_169], %306 {strides = array<i32>} : memref<432x512xbf16, #tpu.memory_space<vmem>>, vector<16x512xbf16>,
      %308 = arith.truncf %305 : vector<32x512xf32> to vector<32x512xbf16>
      %c400 = arith.constant 400 : index
      %c0_170 = arith.constant 0 : index
      %309 = vector.load %arg19[%c400, %c0_170] : memref<432x512xbf16, #tpu.memory_space<vmem>>, vector<32x512xbf16>
      tpu.vector_store %arg19[%c400, %c0_170], %308 {strides = array<i32>} : memref<432x512xbf16, #tpu.memory_space<vmem>>, vector<32x512xbf16>,
      %c0_171 = arith.constant 0 : index
      %c0_172 = arith.constant 0 : index
      %310 = vector.load %arg6[%c0_171, %c0_172] : memref<128x432xbf16, #tpu.memory_space<vmem>>, vector<128x432xbf16>
      %c0_173 = arith.constant 0 : index
      %c0_174 = arith.constant 0 : index
      %311 = vector.load %arg19[%c0_173, %c0_174] : memref<432x512xbf16, #tpu.memory_space<vmem>>, vector<432x256xbf16>
      %cst_175 = arith.constant dense<0.000000e+00> : vector<128x256xf32>
      %312 = tpu.matmul %310, %311, %cst_175 {dimension_numbers = #tpu.dot_dimension_numbers<[1], [0], [0], [1], [0, 0, 1, 1], [], []>} : vector<128x432xbf16>, vector<432x256xbf16>, vector<128x256xf32> -> vector<128x256xf32>
      %c0_176 = arith.constant 0 : index
      %c0_177 = arith.constant 0 : index
      %313 = vector.load %arg7[%c0_176, %c0_177] : memref<128x1xf32, #tpu.memory_space<vmem>>, vector<128x1xf32>
      %314 = vector.broadcast %313 : vector<128x1xf32> to vector<128x256xf32>
      %315 = arith.addf %312, %314 : vector<128x256xf32>
      %316 = vector.extract_strided_slice %315 {offsets = [0, 0], sizes = [32, 256], strides = [1, 1]} : vector<128x256xf32> to vector<32x256xf32>
      %317 = arith.negf %316 : vector<32x256xf32>
      %318 = math.exp %317 : vector<32x256xf32>
      %cst_178 = arith.constant 1.000000e+00 : f32
      %319 = vector.broadcast %cst_178 : f32 to vector<32x256xf32>
      %320 = arith.addf %319, %318 : vector<32x256xf32>
      %321 = arith.divf %319, %320 : vector<32x256xf32>
      %322 = vector.extract_strided_slice %315 {offsets = [32, 0], sizes = [32, 256], strides = [1, 1]} : vector<128x256xf32> to vector<32x256xf32>
      %323 = arith.negf %322 : vector<32x256xf32>
      %324 = math.exp %323 : vector<32x256xf32>
      %cst_179 = arith.constant 1.000000e+00 : f32
      %325 = vector.broadcast %cst_179 : f32 to vector<32x256xf32>
      %326 = arith.addf %325, %324 : vector<32x256xf32>
      %327 = arith.divf %325, %326 : vector<32x256xf32>
      %328 = vector.extract_strided_slice %315 {offsets = [64, 0], sizes = [32, 256], strides = [1, 1]} : vector<128x256xf32> to vector<32x256xf32>
      %329 = arith.negf %328 : vector<32x256xf32>
      %330 = math.exp %329 : vector<32x256xf32>
      %cst_180 = arith.constant 1.000000e+00 : f32
      %331 = vector.broadcast %cst_180 : f32 to vector<32x256xf32>
      %332 = arith.addf %331, %330 : vector<32x256xf32>
      %333 = arith.divf %331, %332 : vector<32x256xf32>
      %334 = vector.extract_strided_slice %315 {offsets = [96, 0], sizes = [32, 256], strides = [1, 1]} : vector<128x256xf32> to vector<32x256xf32>
      %335 = math.tanh %334 : vector<32x256xf32>
      %c0_181 = arith.constant 0 : index
      %c0_182 = arith.constant 0 : index
      %336 = vector.load %arg16[%c0_181, %c0_182] : memref<32x512xf32, #tpu.memory_space<vmem>>, vector<32x256xf32>
      %337 = arith.mulf %327, %336 : vector<32x256xf32>
      %338 = arith.mulf %321, %335 : vector<32x256xf32>
      %339 = arith.addf %337, %338 : vector<32x256xf32>
      %c0_183 = arith.constant 0 : index
      %c0_184 = arith.constant 0 : index
      %340 = vector.load %arg16[%c0_183, %c0_184] : memref<32x512xf32, #tpu.memory_space<vmem>>, vector<32x256xf32>
      tpu.vector_store %arg16[%c0_183, %c0_184], %339 {strides = array<i32>} : memref<32x512xf32, #tpu.memory_space<vmem>>, vector<32x256xf32>,
      %341 = math.tanh %339 : vector<32x256xf32>
      %342 = arith.mulf %333, %341 : vector<32x256xf32>
      %c0_185 = arith.constant 0 : index
      %c0_186 = arith.constant 0 : index
      %343 = vector.load %arg15[%c0_185, %c0_186] : memref<32x512xf32, #tpu.memory_space<vmem>>, vector<32x256xf32>
      tpu.vector_store %arg15[%c0_185, %c0_186], %342 {strides = array<i32>} : memref<32x512xf32, #tpu.memory_space<vmem>>, vector<32x256xf32>,
      %c0_187 = arith.constant 0 : index
      %c0_188 = arith.constant 0 : index
      %344 = vector.load %arg6[%c0_187, %c0_188] : memref<128x432xbf16, #tpu.memory_space<vmem>>, vector<128x432xbf16>
      %c0_189 = arith.constant 0 : index
      %c256_190 = arith.constant 256 : index
      %345 = vector.load %arg19[%c0_189, %c256_190] : memref<432x512xbf16, #tpu.memory_space<vmem>>, vector<432x256xbf16>
      %cst_191 = arith.constant dense<0.000000e+00> : vector<128x256xf32>
      %346 = tpu.matmul %344, %345, %cst_191 {dimension_numbers = #tpu.dot_dimension_numbers<[1], [0], [0], [1], [0, 0, 1, 1], [], []>} : vector<128x432xbf16>, vector<432x256xbf16>, vector<128x256xf32> -> vector<128x256xf32>
      %c0_192 = arith.constant 0 : index
      %c0_193 = arith.constant 0 : index
      %347 = vector.load %arg7[%c0_192, %c0_193] : memref<128x1xf32, #tpu.memory_space<vmem>>, vector<128x1xf32>
      %348 = vector.broadcast %347 : vector<128x1xf32> to vector<128x256xf32>
      %349 = arith.addf %346, %348 : vector<128x256xf32>
      %350 = vector.extract_strided_slice %349 {offsets = [0, 0], sizes = [32, 256], strides = [1, 1]} : vector<128x256xf32> to vector<32x256xf32>
      %351 = arith.negf %350 : vector<32x256xf32>
      %352 = math.exp %351 : vector<32x256xf32>
      %cst_194 = arith.constant 1.000000e+00 : f32
      %353 = vector.broadcast %cst_194 : f32 to vector<32x256xf32>
      %354 = arith.addf %353, %352 : vector<32x256xf32>
      %355 = arith.divf %353, %354 : vector<32x256xf32>
      %356 = vector.extract_strided_slice %349 {offsets = [32, 0], sizes = [32, 256], strides = [1, 1]} : vector<128x256xf32> to vector<32x256xf32>
      %357 = arith.negf %356 : vector<32x256xf32>
      %358 = math.exp %357 : vector<32x256xf32>
      %cst_195 = arith.constant 1.000000e+00 : f32
      %359 = vector.broadcast %cst_195 : f32 to vector<32x256xf32>
      %360 = arith.addf %359, %358 : vector<32x256xf32>
      %361 = arith.divf %359, %360 : vector<32x256xf32>
      %362 = vector.extract_strided_slice %349 {offsets = [64, 0], sizes = [32, 256], strides = [1, 1]} : vector<128x256xf32> to vector<32x256xf32>
      %363 = arith.negf %362 : vector<32x256xf32>
      %364 = math.exp %363 : vector<32x256xf32>
      %cst_196 = arith.constant 1.000000e+00 : f32
      %365 = vector.broadcast %cst_196 : f32 to vector<32x256xf32>
      %366 = arith.addf %365, %364 : vector<32x256xf32>
      %367 = arith.divf %365, %366 : vector<32x256xf32>
      %368 = vector.extract_strided_slice %349 {offsets = [96, 0], sizes = [32, 256], strides = [1, 1]} : vector<128x256xf32> to vector<32x256xf32>
      %369 = math.tanh %368 : vector<32x256xf32>
      %c0_197 = arith.constant 0 : index
      %c256_198 = arith.constant 256 : index
      %370 = vector.load %arg16[%c0_197, %c256_198] : memref<32x512xf32, #tpu.memory_space<vmem>>, vector<32x256xf32>
      %371 = arith.mulf %361, %370 : vector<32x256xf32>
      %372 = arith.mulf %355, %369 : vector<32x256xf32>
      %373 = arith.addf %371, %372 : vector<32x256xf32>
      %c0_199 = arith.constant 0 : index
      %c256_200 = arith.constant 256 : index
      %374 = vector.load %arg16[%c0_199, %c256_200] : memref<32x512xf32, #tpu.memory_space<vmem>>, vector<32x256xf32>
      tpu.vector_store %arg16[%c0_199, %c256_200], %373 {strides = array<i32>} : memref<32x512xf32, #tpu.memory_space<vmem>>, vector<32x256xf32>,
      %375 = math.tanh %373 : vector<32x256xf32>
      %376 = arith.mulf %367, %375 : vector<32x256xf32>
      %c0_201 = arith.constant 0 : index
      %c256_202 = arith.constant 256 : index
      %377 = vector.load %arg15[%c0_201, %c256_202] : memref<32x512xf32, #tpu.memory_space<vmem>>, vector<32x256xf32>
      tpu.vector_store %arg15[%c0_201, %c256_202], %376 {strides = array<i32>} : memref<32x512xf32, #tpu.memory_space<vmem>>, vector<32x256xf32>,
      %c5_i32_203 = arith.constant 5 : i32
      %378 = arith.cmpi sge, %arg20, %c5_i32_203 : i32
      %379 = arith.extui %378 : i1 to i32
      %c0_i32_204 = arith.constant 0 : i32
      %380 = arith.cmpi ne, %379, %c0_i32_204 : i32
      scf.if %380 {
        %c0_205 = arith.constant 0 : index
        %c0_206 = arith.constant 0 : index
        %381 = vector.load %arg15[%c0_205, %c0_206] : memref<32x512xf32, #tpu.memory_space<vmem>>, vector<32x512xf32>
        %c0_207 = arith.constant 0 : index
        %c0_208 = arith.constant 0 : index
        %382 = vector.load %arg8[%c0_207, %c0_208] : memref<32x1xf32, #tpu.memory_space<vmem>>, vector<32x1xf32>
        %c0_209 = arith.constant 0 : index
        %c0_210 = arith.constant 0 : index
        %383 = vector.load %arg9[%c0_209, %c0_210] : memref<32x1xf32, #tpu.memory_space<vmem>>, vector<32x1xf32>
        %cst_211 = arith.constant dense<0.000000e+00> : vector<32xf32>
        %384 = vector.multi_reduction <add>, %381, %cst_211 [1] : vector<32x512xf32> to vector<32xf32>
        %385 = vector.shape_cast %384 : vector<32xf32> to vector<32x1xf32>
        %386 = arith.mulf %381, %381 : vector<32x512xf32>
        %cst_212 = arith.constant dense<0.000000e+00> : vector<32xf32>
        %387 = vector.multi_reduction <add>, %386, %cst_212 [1] : vector<32x512xf32> to vector<32xf32>
        %388 = vector.shape_cast %387 : vector<32xf32> to vector<32x1xf32>
        %cst_213 = arith.constant 0.001953125 : f32
        %389 = vector.broadcast %cst_213 : f32 to vector<32x1xf32>
        %390 = arith.mulf %385, %389 : vector<32x1xf32>
        %cst_214 = arith.constant 0.001953125 : f32
        %391 = vector.broadcast %cst_214 : f32 to vector<32x1xf32>
        %392 = arith.mulf %388, %391 : vector<32x1xf32>
        %393 = arith.mulf %390, %390 : vector<32x1xf32>
        %394 = arith.subf %392, %393 : vector<32x1xf32>
        %395 = vector.broadcast %390 : vector<32x1xf32> to vector<32x512xf32>
        %396 = arith.subf %381, %395 : vector<32x512xf32>
        %cst_215 = arith.constant 9.99999974E-6 : f32
        %397 = vector.broadcast %cst_215 : f32 to vector<32x1xf32>
        %398 = arith.addf %394, %397 : vector<32x1xf32>
        %399 = math.rsqrt %398 : vector<32x1xf32>
        %400 = vector.broadcast %399 : vector<32x1xf32> to vector<32x512xf32>
        %401 = arith.mulf %396, %400 : vector<32x512xf32>
        %402 = vector.broadcast %382 : vector<32x1xf32> to vector<32x512xf32>
        %403 = arith.mulf %401, %402 : vector<32x512xf32>
        %404 = vector.broadcast %383 : vector<32x1xf32> to vector<32x512xf32>
        %405 = arith.addf %403, %404 : vector<32x512xf32>
        %cst_216 = arith.constant 0.000000e+00 : f32
        %406 = vector.broadcast %cst_216 : f32 to vector<32x512xf32>
        %407 = arith.maximumf %405, %406 : vector<32x512xf32>
        %c0_217 = arith.constant 0 : index
        %c0_218 = arith.constant 0 : index
        %408 = vector.load %arg10[%c0_217, %c0_218] : memref<4x32xf32, #tpu.memory_space<vmem>>, vector<4x32xf32>
        %cst_219 = arith.constant dense<0.000000e+00> : vector<4x512xf32>
        %409 = tpu.matmul %408, %407, %cst_219 {dimension_numbers = #tpu.dot_dimension_numbers<[1], [0], [0], [1], [0, 0, 1, 1], [], []>} : vector<4x32xf32>, vector<32x512xf32>, vector<4x512xf32> -> vector<4x512xf32>
        %c0_220 = arith.constant 0 : index
        %c0_221 = arith.constant 0 : index
        %410 = vector.load %arg11[%c0_220, %c0_221] : memref<4x1xf32, #tpu.memory_space<vmem>>, vector<4x1xf32>
        %411 = vector.broadcast %410 : vector<4x1xf32> to vector<4x512xf32>
        %412 = arith.addf %409, %411 : vector<4x512xf32>
        %cst_222 = arith.constant dense<0xFF800000> : vector<512xf32>
        %413 = vector.multi_reduction <maximumf>, %412, %cst_222 [0] : vector<4x512xf32> to vector<512xf32>
        %414 = vector.shape_cast %413 : vector<512xf32> to vector<1x512xf32>
        %415 = vector.broadcast %414 : vector<1x512xf32> to vector<4x512xf32>
        %416 = arith.subf %412, %415 : vector<4x512xf32>
        %417 = math.exp %416 : vector<4x512xf32>
        %cst_223 = arith.constant dense<0.000000e+00> : vector<512xf32>
        %418 = vector.multi_reduction <add>, %417, %cst_223 [0] : vector<4x512xf32> to vector<512xf32>
        %419 = vector.shape_cast %418 : vector<512xf32> to vector<1x512xf32>
        %420 = tpu.reciprocal %419 {approx = true} : vector<1x512xf32> -> vector<1x512xf32>
        %421 = vector.broadcast %420 : vector<1x512xf32> to vector<4x512xf32>
        %422 = arith.mulf %417, %421 : vector<4x512xf32>
        %c5_i32_224 = arith.constant 5 : i32
        %423 = arith.subi %arg20, %c5_i32_224 : i32
        %424 = arith.index_cast %423 : i32 to index
        %c0_225 = arith.constant 0 : index
        %c0_226 = arith.constant 0 : index
        %425 = vector.load %arg12[%424, %c0_225, %c0_226] : memref<3x4x512xf32, #tpu.memory_space<vmem>>, vector<1x4x512xf32>
        %426 = vector.shape_cast %425 : vector<1x4x512xf32> to vector<4x512xf32>
        %427 = vector.shape_cast %422 : vector<4x512xf32> to vector<1x4x512xf32>
        tpu.vector_store %arg12[%424, %c0_225, %c0_226], %427 {strides = array<i32>} : memref<3x4x512xf32, #tpu.memory_space<vmem>>, vector<1x4x512xf32>,
        %c0_227 = arith.constant 0 : index
        %c0_228 = arith.constant 0 : index
        %428 = vector.load %arg17[%c0_227, %c0_228] : memref<8x512xf32, #tpu.memory_space<vmem>>, vector<4x512xf32>
        tpu.vector_store %arg17[%c0_227, %c0_228], %422 {strides = array<i32>} : memref<8x512xf32, #tpu.memory_space<vmem>>, vector<4x512xf32>,
      } else {
      }
    }
    %c8_i32_10 = arith.constant 8 : i32
    return
  }
}

</mosaic_0001>

<bundles_post_ra>
// kernel: _forward_impl.1
= control target key start
LH: loop header
LB: loop body
LE: loop exit
PB: predicated region body
PF: predicated region fallthrough
CT: control target
= control target key end

     0   :  { %v6502_v0 = vmov 0.0   ;;  %s6579_s21 = smov 0   ;;  %s10313_s0 = inlined_call_operand.vmem [shape: f32[6,8,512], index: 0, kind: input, shape index: {}]   ;;  %s10314_s1 = inlined_call_operand.vmem [shape: f32[9,1,512], index: 1, kind: input, shape index: {}]   ;;  %s10315_s2 = inlined_call_operand.vmem [shape: bf16[64,216], index: 2, kind: input, shape index: {}]   ;;  %s10316_s3 = inlined_call_operand.vmem [shape: f32[64,1], index: 3, kind: input, shape index: {}]   ;;  %s10317_s4 = inlined_call_operand.vmem [shape: f32[16,1], index: 4, kind: input, shape index: {}]   ;;  %s10318_s5 = inlined_call_operand.vmem [shape: f32[16,1], index: 5, kind: input, shape index: {}]   ;;  %s10319_s6 = inlined_call_operand.vmem [shape: bf16[128,432], index: 6, kind: input, shape index: {}]   ;;  %s10320_s7 = inlined_call_operand.vmem [shape: f32[128,1], index: 7, kind: input, shape index: {}]   ;;  %s10321_s8 = inlined_call_operand.vmem [shape: f32[32,1], index: 8, kind: input, shape index: {}]   ;;  %s10322_s9 = inlined_call_operand.vmem [shape: f32[32,1], index: 9, kind: input, shape index: {}]   ;;  %s10323_s10 = inlined_call_operand.vmem [shape: f32[4,32], index: 10, kind: input, shape index: {}]   ;;  %s10324_s11 = inlined_call_operand.vmem [shape: f32[4,1], index: 11, kind: input, shape index: {}]   ;;  %s10325_s12 = inlined_call_operand.vmem [shape: f32[3,4,512], index: 12, kind: output, shape index: {}]  }
   0x1   :  { %42 = vst [vmem:[#allocation2] sm:$0xff] %v6502_v0  ;;  %43 = vst [vmem:[#allocation2 + $0x8] sm:$0xff] %v6502_v0 }
   0x2   :  { %44 = vst [vmem:[#allocation2 + $0x10] sm:$0xff] %v6502_v0  ;;  %45 = vst [vmem:[#allocation2 + $0x18] sm:$0xff] %v6502_v0 }
   0x3   :  { %46 = vst [vmem:[#allocation2 + $0x20] sm:$0xff] %v6502_v0  ;;  %47 = vst [vmem:[#allocation2 + $0x28] sm:$0xff] %v6502_v0 }
   0x4   :  { %48 = vst [vmem:[#allocation2 + $0x30] sm:$0xff] %v6502_v0  ;;  %49 = vst [vmem:[#allocation2 + $0x38] sm:$0xff] %v6502_v0 }
   0x5   :  { %50 = vst [vmem:[#allocation3] sm:$0xff] %v6502_v0  ;;  %51 = vst [vmem:[#allocation3 + $0x8] sm:$0xff] %v6502_v0 }
   0x6   :  { %52 = vst [vmem:[#allocation3 + $0x10] sm:$0xff] %v6502_v0  ;;  %53 = vst [vmem:[#allocation3 + $0x18] sm:$0xff] %v6502_v0 }
   0x7   :  { %54 = vst [vmem:[#allocation3 + $0x20] sm:$0xff] %v6502_v0  ;;  %55 = vst [vmem:[#allocation3 + $0x28] sm:$0xff] %v6502_v0 }
   0x8   :  { %56 = vst [vmem:[#allocation3 + $0x30] sm:$0xff] %v6502_v0  ;;  %57 = vst [vmem:[#allocation3 + $0x38] sm:$0xff] %v6502_v0 }
   0x9   :  { %58 = vst [vmem:[#allocation4] sm:$0xff] %v6502_v0  ;;  %59 = vst [vmem:[#allocation4 + $0x8] sm:$0xff] %v6502_v0 }
   0xa   :  { %60 = vst [vmem:[#allocation4 + $0x10] sm:$0xff] %v6502_v0  ;;  %61 = vst [vmem:[#allocation4 + $0x18] sm:$0xff] %v6502_v0 }
   0xb   :  { %62 = vst [vmem:[#allocation4 + $0x20] sm:$0xff] %v6502_v0  ;;  %63 = vst [vmem:[#allocation4 + $0x28] sm:$0xff] %v6502_v0 }
   0xc   :  { %64 = vst [vmem:[#allocation4 + $0x30] sm:$0xff] %v6502_v0  ;;  %65 = vst [vmem:[#allocation4 + $0x38] sm:$0xff] %v6502_v0 }
   0xd   :  { %66 = vst [vmem:[#allocation4 + $0x40] sm:$0xff] %v6502_v0  ;;  %67 = vst [vmem:[#allocation4 + $0x48] sm:$0xff] %v6502_v0 }
   0xe   :  { %68 = vst [vmem:[#allocation4 + $0x50] sm:$0xff] %v6502_v0  ;;  %69 = vst [vmem:[#allocation4 + $0x58] sm:$0xff] %v6502_v0 }
   0xf   :  { %70 = vst [vmem:[#allocation4 + $0x60] sm:$0xff] %v6502_v0  ;;  %71 = vst [vmem:[#allocation4 + $0x68] sm:$0xff] %v6502_v0 }
  0x10   :  { %72 = vst [vmem:[#allocation4 + $0x70] sm:$0xff] %v6502_v0  ;;  %73 = vst [vmem:[#allocation4 + $0x78] sm:$0xff] %v6502_v0 }
  0x11   :  { %74 = vst [vmem:[#allocation5] sm:$0xff] %v6502_v0  ;;  %75 = vst [vmem:[#allocation5 + $0x8] sm:$0xff] %v6502_v0 }
  0x12   :  { %76 = vst [vmem:[#allocation5 + $0x10] sm:$0xff] %v6502_v0  ;;  %77 = vst [vmem:[#allocation5 + $0x18] sm:$0xff] %v6502_v0 }
  0x13   :  { %78 = vst [vmem:[#allocation5 + $0x20] sm:$0xff] %v6502_v0  ;;  %79 = vst [vmem:[#allocation5 + $0x28] sm:$0xff] %v6502_v0 }
  0x14   :  { %80 = vst [vmem:[#allocation5 + $0x30] sm:$0xff] %v6502_v0  ;;  %81 = vst [vmem:[#allocation5 + $0x38] sm:$0xff] %v6502_v0 }
  0x15   :  { %82 = vst [vmem:[#allocation5 + $0x40] sm:$0xff] %v6502_v0  ;;  %83 = vst [vmem:[#allocation5 + $0x48] sm:$0xff] %v6502_v0 }
  0x16   :  { %84 = vst [vmem:[#allocation5 + $0x50] sm:$0xff] %v6502_v0  ;;  %85 = vst [vmem:[#allocation5 + $0x58] sm:$0xff] %v6502_v0 }
  0x17   :  { %86 = vst [vmem:[#allocation5 + $0x60] sm:$0xff] %v6502_v0  ;;  %87 = vst [vmem:[#allocation5 + $0x68] sm:$0xff] %v6502_v0 }
  0x18   :  { %88 = vst [vmem:[#allocation5 + $0x70] sm:$0xff] %v6502_v0  ;;  %89 = vst [vmem:[#allocation5 + $0x78] sm:$0xff] %v6502_v0 }
  0x19 LB: > { %p5399_p0 = scmp.gt.s32.totalorder %s6500_s21, 5  ;;  %s6500_s21 = sphi %s6579_s21, %s95_s21  }
  0x1a   : > { %s5710_s22 = sshll.u32 (!%p5399_p0), %s6500_s21, 5 }
  0x1b   : > { %99 = sbr.rel (%p5399_p0) target bundleno = 34 (0x22), region = 60  ;;  %s102_s25 = scalar_lea.vmem (!%p5399_p0), %s10313_s0, %s5710_s22 }
  0x1c   : > { %v103_v1 = vld [vmem:[%s102_s25] sm:$0xff] (!%p5399_p0)  ;;  %v104_v2 = vld [vmem:[%s102_s25 + $0x8] sm:$0xff] (!%p5399_p0)  ;;  %v105_v3 = vld [vmem:[%s102_s25 + $0x10] sm:$0xff] (!%p5399_p0) }
  0x1d   : > { %107 = vst [vmem:[#allocation6] sm:$0xff] (!%p5399_p0), %v103_v1  ;;  %108 = vst [vmem:[#allocation6 + $0x8] sm:$0xff] (!%p5399_p0), %v104_v2  ;;  %v106_v4 = vld [vmem:[%s102_s25 + $0x18] sm:$0xff] (!%p5399_p0) }
  0x1e   : > { %109 = vst [vmem:[#allocation6 + $0x10] sm:$0xff] (!%p5399_p0), %v105_v3  ;;  %110 = vst [vmem:[#allocation6 + $0x18] sm:$0xff] (!%p5399_p0), %v106_v4 }
  0x22 PF: > { %v6589_v5 = vld [vmem:[#allocation2] sm:$0xff]  ;;  %s6503_s26 = smov 17   ;;  %v6597_v7 = vld [vmem:[#allocation2 + $0x8] sm:$0xff]  ;;  %v6605_v9 = vld [vmem:[#allocation2 + $0x18] sm:$0xff]  ;;  %s6504_s27 = smov 16   ;;  %v132_v17 = vlaneseq  ;;  %vm1368_vm4 = vcmask 719872  }
  0x23   : > { %164 = vrot.lane.b32.xlu1 %v6589_v5, %s6503_s26  ;;  %v6609_v11 = vld [vmem:[#allocation2 + $0x10] sm:$0xff]  ;;  %v6617_v13 = vld [vmem:[#allocation2 + $0x28] sm:$0xff]  ;;  %v6623_v14 = vld [vmem:[#allocation2 + $0x20] sm:$0xff]  ;;  %s6505_s28 = smov 15   ;;  %s6506_s29 = smov 1   ;;  %vm1381_vm9 = vcmask 1043456  }
  0x24   : > { %v6591_v6 = vld [vmem:[#allocation6] sm:$0xff]  ;;  %v6599_v8 = vld [vmem:[#allocation6 + $0x8] sm:$0xff]  ;;  %v6633_v15 = vld [vmem:[#allocation2 + $0x38] sm:$0xff]  ;;  %s6507_s30 = smov 127   ;;  %v141_v18 = vshrl.u32 %v132_v17, 7  ;;  %v6729_v19 = vand.u32 127, %v132_v17 }
  0x25   : > { %124 = vrot.lane.b32.xlu0 %v6591_v6, %s6503_s26  ;;  %v6607_v10 = vld [vmem:[#allocation6 + $0x18] sm:$0xff]  ;;  %v6615_v12 = vld [vmem:[#allocation6 + $0x10] sm:$0xff]  ;;  %v123_v21 = vld [vmem:[%s10314_s1] sm:$0xf]  ;;  %s6508_s15 = smov 113   ;;  %s6509_s18 = smov 112  }
  0x26   : > { %v6639_v16 = vld [vmem:[#allocation2 + $0x30] sm:$0xff]  ;;  %v6731_v20 = vsub.s32 1, %v141_v18  ;;  %vm134_vm0 = vcmp.lt.s32.totalorder %v6729_v19, 17  ;;  %v6742_v25 = vsub.s32 0, %v141_v18  ;;  %v6748_v30 = vsub.s32 3, %v141_v18  ;;  %s6510_s22 = smov 111  }
  0x27   : > { %168 = vrot.lane.b32.xlu1 %v6597_v7, %s6503_s26  ;;  %v6755_v34 = vsub.s32 2, %v141_v18  ;;  %v5408_v55 = vld [vmem:[%s10314_s1 + $0x4] sm:$0xf]  ;;  %vm252_vm1 = vcmp.lt.s32.totalorder %v6729_v19, 16  ;;  %vm370_vm2 = vcmp.lt.s32.totalorder %v6729_v19, 15  ;;  %vm488_vm3 = vcmp.lt.s32.totalorder %v6729_v19, 1 }
  0x28   : > { %10464 = vst [vmem:[#allocation9_spill] sm:$0xff] %v6731_v20  ;;  %v147_v24 = vrot.slane %v123_v21, %v6731_v20  ;;  %10465 = vst [vmem:[#allocation10_spill] sm:$0xff] %v6742_v25  ;;  %v143_v33 = vrot.slane %v123_v21, %v6742_v25  ;;  %v6762_v40 = vrot.slane %v123_v21, %v6748_v30  ;;  %vm652_vm5 = vcmp.lt.s32.totalorder %v6729_v19, 127  ;;  %p5704_p1 = scmp.lt.s32.totalorder %s6500_s21, 5 }
  0x29   : > { %126 = vrot.lane.b32.xlu0 %v6599_v8, %s6503_s26  ;;  %10466 = vst [vmem:[#allocation11_spill] sm:$0xff] %v6748_v30  ;;  %v151_v43 = vrot.slane %v123_v21, %v6755_v34  ;;  %v265_v60 = vrot.slane %v5408_v55, %v6731_v20  ;;  %v261_v3 = vrot.slane %v5408_v55, %v6742_v25  ;;  %vm770_vm6 = vcmp.lt.s32.totalorder %v6729_v19, 113  ;;  %s5707_s25 = sadd.s32 (!%p5704_p1), 4294967291, %s6500_s21 }
  0x2a   : > { %vm888_vm7 = vcmp.lt.s32.totalorder %v6729_v19, 112  ;;  %vm1006_vm8 = vcmp.lt.s32.totalorder %v6729_v19, 111  ;;  %vm3644_vm10 = vcmask 392192   ;;  %vm5146_vm11 = vcmask (!%p5704_p1), 261120   ;;  %s5765_s13 = sshll.u32 (!%p5704_p1), %s5707_s25, 4 }
  0x2b   : > { %176 = vrot.lane.b32.xlu1 %v6605_v9, %s6503_s26 }
  0x2d   : > { %130 = vrot.lane.b32.xlu0 %v6607_v10, %s6503_s26 }
  0x2f   : > { %172 = vrot.lane.b32.xlu1 %v6609_v11, %s6503_s26 }
  0x31   : > { %128 = vrot.lane.b32.xlu0 %v6615_v12, %s6503_s26 }
  0x33   : > { %170 = vrot.lane.b32.xlu1 %v6617_v13, %s6503_s26 }
  0x35   : > { %166 = vrot.lane.b32.xlu0 %v6623_v14, %s6503_s26 }
  0x37   : > { %246 = vrot.lane.b32.xlu1 %v6599_v8, %s6504_s27 }
  0x39   : > { %244 = vrot.lane.b32.xlu0 %v6591_v6, %s6504_s27 }
  0x3b   : > { %250 = vrot.lane.b32.xlu1 %v6607_v10, %s6504_s27 }
  0x3d   : > { %178 = vrot.lane.b32.xlu0 %v6633_v15, %s6503_s26 }
  0x3f   : > { %248 = vrot.lane.b32.xlu1 %v6615_v12, %s6504_s27 }
  0x41   : > { %174 = vrot.lane.b32.xlu0 %v6639_v16, %s6503_s26 }
  0x43   : > { %284 = vrot.lane.b32.xlu1 %v6623_v14, %s6504_s27 }
  0x45   : > { %282 = vrot.lane.b32.xlu0 %v6589_v5, %s6504_s27 }
  0x47   : > { %288 = vrot.lane.b32.xlu1 %v6617_v13, %s6504_s27 }
  0x49   : > { %286 = vrot.lane.b32.xlu0 %v6597_v7, %s6504_s27 }
  0x4b   : > { %296 = vrot.lane.b32.xlu1 %v6633_v15, %s6504_s27 }
  0x4d   : > { %294 = vrot.lane.b32.xlu0 %v6605_v9, %s6504_s27 }
  0x4f   : > { %292 = vrot.lane.b32.xlu1 %v6639_v16, %s6504_s27 }
  0x51   : > { %290 = vrot.lane.b32.xlu0 %v6609_v11, %s6504_s27 }
  0x53   : > { %364 = vrot.lane.b32.xlu1 %v6599_v8, %s6505_s28 }
  0x55   : > { %362 = vrot.lane.b32.xlu0 %v6591_v6, %s6505_s28 }
  0x57   : > { %404 = vrot.lane.b32.xlu1 %v6597_v7, %s6505_s28 }
  0x59   : > { %400 = vrot.lane.b32.xlu0 %v6589_v5, %s6505_s28 }
  0x5b   : > { %412 = vrot.lane.b32.xlu1 %v6605_v9, %s6505_s28 }
  0x5d   : > { %368 = vrot.lane.b32.xlu0 %v6607_v10, %s6505_s28 }
  0x5f   : > { %408 = vrot.lane.b32.xlu1 %v6609_v11, %s6505_s28 }
  0x61   : > { %366 = vrot.lane.b32.xlu0 %v6615_v12, %s6505_s28 }
  0x63   : > { %406 = vrot.lane.b32.xlu1 %v6617_v13, %s6505_s28 }
  0x65   : > { %402 = vrot.lane.b32.xlu0 %v6623_v14, %s6505_s28 }
  0x67   : > { %482 = vrot.lane.b32.xlu1 %v6599_v8, %s6506_s29 }
  0x69   : > { %480 = vrot.lane.b32.xlu0 %v6591_v6, %s6506_s29 }
  0x6b   : > { %486 = vrot.lane.b32.xlu1 %v6607_v10, %s6506_s29 }
  0x6d   : > { %414 = vrot.lane.b32.xlu0 %v6633_v15, %s6505_s28 }
  0x6f   : > { %484 = vrot.lane.b32.xlu1 %v6615_v12, %s6506_s29 }
  0x71   : > { %410 = vrot.lane.b32.xlu0 %v6639_v16, %s6505_s28 }
  0x73   : > { %520 = vrot.lane.b32.xlu1 %v6623_v14, %s6506_s29 }
  0x75   : > { %518 = vrot.lane.b32.xlu0 %v6589_v5, %s6506_s29 }
  0x77   : > { %524 = vrot.lane.b32.xlu1 %v6617_v13, %s6506_s29 }
  0x79   : > { %522 = vrot.lane.b32.xlu0 %v6597_v7, %s6506_s29 }
  0x7b   : > { %532 = vrot.lane.b32.xlu1 %v6633_v15, %s6506_s29 }
  0x7d   : > { %530 = vrot.lane.b32.xlu0 %v6605_v9, %s6506_s29 }
  0x7f   : > { %528 = vrot.lane.b32.xlu1 %v6639_v16, %s6506_s29 }
  0x81   : > { %526 = vrot.lane.b32.xlu0 %v6609_v11, %s6506_s29 }
  0x83   : > { %648 = vrot.lane.b32.xlu1 %v6615_v12, %s6507_s30 }
  0x85   : > { %646 = vrot.lane.b32.xlu0 %v6599_v8, %s6507_s30 }
  0x87   : > { %650 = vrot.lane.b32.xlu1 %v6607_v10, %s6507_s30 }
  0x89   : > { %644 = vrot.lane.b32.xlu0 %v6591_v6, %s6507_s30 }
  0x8b   : > { %688 = vrot.lane.b32.xlu1 %v6617_v13, %s6507_s30 }
  0x8d   : > { %686 = vrot.lane.b32.xlu0 %v6597_v7, %s6507_s30 }
  0x8f   : > { %692 = vrot.lane.b32.xlu1 %v6639_v16, %s6507_s30 }
  0x91   : > { %690 = vrot.lane.b32.xlu0 %v6609_v11, %s6507_s30 }
  0x93   : > { %684 = vrot.lane.b32.xlu1 %v6623_v14, %s6507_s30 }
  0x95   : > { %682 = vrot.lane.b32.xlu0 %v6589_v5, %s6507_s30  ;;  %v165_v22 = vpop.permute.xlu1 %164 }
  0x97   : > { %v125_v23 = vpop.permute.xlu0 %124  ;;  %696 = vrot.lane.b32.xlu1 %v6633_v15, %s6507_s30 }
  0x99   : > { %694 = vrot.lane.b32.xlu0 %v6605_v9, %s6507_s30  ;;  %v169_v26 = vpop.permute.xlu1 %168 }
  0x9a   : > { %v184_v29 = vsel %vm134_vm0, %v165_v22, %v169_v26 }
  0x9b   : > { %v127_v27 = vpop.permute.xlu0 %126  ;;  %766 = vrot.lane.b32.xlu1 %v6615_v12, %s6508_s15  ;;  %v189_v32 = vmul.f32 %v184_v29, %v147_v24 }
  0x9c   : > { %v137_v28 = vsel %vm134_vm0, %v125_v23, %v127_v27 }
  0x9d   : > { %764 = vrot.lane.b32.xlu0 %v6599_v8, %s6508_s15  ;;  %v161_v31 = vmul.f32 %v147_v24, %v137_v28  ;;  %v177_v35 = vpop.permute.xlu1 %176 }
  0x9e   : > { %v186_v38 = vsel %vm134_vm0, %v177_v35, %v165_v22 }
  0x9f   : > { %v131_v36 = vpop.permute.xlu0 %130  ;;  %v5767_v37 = vpack.c.bf16 %v189_v32, %v161_v31  ;;  %808 = vrot.lane.b32.xlu1 %v6609_v11, %s6508_s15  ;;  %v188_v42 = vmul.f32 %v186_v38, %v143_v33 }
  0xa0   : > { %v138_v39 = vsel %vm134_vm0, %v131_v36, %v125_v23  ;;  %v269_v23 = vrot.slane %v5408_v55, %v6755_v34 }
  0xa1   : > { %804 = vrot.lane.b32.xlu0 %v6597_v7, %s6508_s15  ;;  %v160_v41 = vmul.f32 %v143_v33, %v138_v39  ;;  %1388 = vmatprep.subr.bf16.mxu0 %v5767_v37  ;;  %v173_v44 = vpop.permute.xlu1 %172 }
  0xa2   : > { %v182_v47 = vsel %vm134_vm0, %v169_v26, %v173_v44  ;;  %v180_v50 = vsel %vm134_vm0, %v173_v44, %v177_v35 }
  0xa3   : > { %v129_v45 = vpop.permute.xlu0 %128  ;;  %v5766_v46 = vpack.c.bf16 %v188_v42, %v160_v41  ;;  %800 = vrot.lane.b32.xlu1 %v6589_v5, %s6508_s15  ;;  %v191_v52 = vmul.f32 %v180_v50, %v6762_v40  ;;  %v190_v54 = vmul.f32 %v182_v47, %v151_v43 }
  0xa4   : > { %v136_v48 = vsel %vm134_vm0, %v127_v27, %v129_v45  ;;  %v135_v49 = vsel %vm134_vm0, %v129_v45, %v131_v36  ;;  %v273_v27 = vrot.slane %v5408_v55, %v6748_v30 }
  0xa5   : > { %762 = vrot.lane.b32.xlu0 %v6591_v6, %s6508_s15  ;;  %v163_v51 = vmul.f32 %v6762_v40, %v135_v49  ;;  %v162_v53 = vmul.f32 %v151_v43, %v136_v48  ;;  %1389 = vmatpush1.bf16.msra.mxu0 %v5766_v46  ;;  %v171_v56 = vpop.permute.xlu1 %170 }
  0xa7   : > { %v167_v57 = vpop.permute.xlu0 %166  ;;  %v5795_v58 = vpack.c.bf16 %v191_v52, %v163_v51  ;;  %v5794_v59 = vpack.c.bf16 %v190_v54, %v162_v53  ;;  %812 = vrot.lane.b32.xlu1 %v6605_v9, %s6508_s15 }
  0xa8   : > { %v185_v61 = vsel %vm134_vm0, %v167_v57, %v171_v56 }
  0xa9   : > { %768 = vrot.lane.b32.xlu0 %v6607_v10, %s6508_s15  ;;  %1841 = vmatprep.subr.bf16.mxu1 %v5795_v58  ;;  %v247_v62 = vpop.permute.xlu1 %246  ;;  %v193_v1 = vmul.f32 %v185_v61, %v147_v24 }
  0xaa   : > { %1842 = vmatpush1.bf16.msra.mxu1 %v5794_v59 }
  0xab   : > { %v245_v63 = vpop.permute.xlu0 %244  ;;  %810 = vrot.lane.b32.xlu1 %v6639_v16, %s6508_s15 }
  0xac   : > { %v255_v0 = vsel %vm252_vm1, %v245_v63, %v247_v62 }
  0xad   : > { %v279_v2 = vmul.f32 %v265_v60, %v255_v0  ;;  %806 = vrot.lane.b32.xlu0 %v6617_v13, %s6508_s15  ;;  %v251_v4 = vpop.permute.xlu1 %250 }
  0xae   : > { %v256_v21 = vsel %vm252_vm1, %v251_v4, %v245_v63 }
  0xaf   : > { %v179_v17 = vpop.permute.xlu0 %178  ;;  %v5769_v18 = vpack.c.bf16 %v279_v2, %v193_v1  ;;  %v278_v24 = vmul.f32 %v261_v3, %v256_v21  ;;  %884 = vrot.lane.b32.xlu1 %v6615_v12, %s6509_s18 }
  0xb0   : > { %v187_v22 = vsel %vm134_vm0, %v179_v17, %v167_v57 }
  0xb1   : > { %v192_v26 = vmul.f32 %v187_v22, %v143_v33  ;;  %882 = vrot.lane.b32.xlu0 %v6599_v8, %s6509_s18  ;;  %1390 = vmatprep.subr.bf16.mxu0 %v5769_v18  ;;  %v249_v28 = vpop.permute.xlu1 %248 }
  0xb2   : > { %v253_v32 = vsel %vm252_vm1, %v249_v28, %v251_v4  ;;  %v254_v35 = vsel %vm252_vm1, %v247_v62, %v249_v28 }
  0xb3   : > { %v175_v29 = vpop.permute.xlu0 %174  ;;  %v5768_v31 = vpack.c.bf16 %v278_v24, %v192_v26  ;;  %v280_v37 = vmul.f32 %v269_v23, %v254_v35  ;;  %v281_v38 = vmul.f32 %v273_v27, %v253_v32  ;;  %880 = vrot.lane.b32.xlu1 %v6591_v6, %s6509_s18 }
  0xb4   : > { %v181_v33 = vsel %vm134_vm0, %v175_v29, %v179_v17  ;;  %v183_v36 = vsel %vm134_vm0, %v171_v56, %v175_v29  ;;  %v5415_v17 = vld [vmem:[%s10314_s1 + $0x8] sm:$0xf] }
  0xb5   : > { %v194_v39 = vmul.f32 %v183_v36, %v151_v43  ;;  %v195_v41 = vmul.f32 %v181_v33, %v6762_v40  ;;  %802 = vrot.lane.b32.xlu0 %v6623_v14, %s6508_s15  ;;  %1391 = vmatpush1.bf16.msra.mxu0 %v5768_v31  ;;  %v285_v42 = vpop.permute.xlu1 %284  ;;  %v379_v35 = vrot.slane %v5415_v17, %v6742_v25 }
  0xb7   : > { %v283_v44 = vpop.permute.xlu0 %282  ;;  %v5797_v45 = vpack.c.bf16 %v281_v38, %v195_v41  ;;  %v5796_v46 = vpack.c.bf16 %v280_v37, %v194_v39  ;;  %886 = vrot.lane.b32.xlu1 %v6607_v10, %s6509_s18  ;;  %v6879_v41 = vrot.slane %v5415_v17, %v6755_v34 }
  0xb9   : > { %1843 = vmatprep.subr.bf16.mxu1 %v5797_v45  ;;  %814 = vrot.lane.b32.xlu0 %v6633_v15, %s6508_s15  ;;  %v289_v40 = vpop.permute.xlu1 %288  ;;  %v6884_v45 = vrot.slane %v5415_v17, %v6748_v30 }
  0xba   : > { %1844 = vmatpush1.bf16.msra.mxu1 %v5796_v46  ;;  %v303_v47 = vsel %vm252_vm1, %v285_v42, %v289_v40  ;;  %v6511_v46 = vmov 0  }
  0xbb   : > { %v287_v43 = vpop.permute.xlu0 %286  ;;  %v311_v49 = vmul.f32 %v303_v47, %v265_v60  ;;  %924 = vrot.lane.b32.xlu1 %v6617_v13, %s6509_s18  ;;  %5986 = vset.pattern.permute.xlu0 %v6511_v46 }
  0xbc   : > { %v302_v48 = vsel %vm252_vm1, %v283_v44, %v287_v43  ;;  %5987 = vset.pattern.permute.xlu1 %v6511_v46 }
  0xbd   : > { %v307_v50 = vmul.f32 %v302_v48, %v265_v60  ;;  %922 = vrot.lane.b32.xlu0 %v6597_v7, %s6509_s18  ;;  %v297_v51 = vpop.permute.xlu1 %296 }
  0xbe   : > { %v305_v54 = vsel %vm252_vm1, %v297_v51, %v285_v42 }
  0xbf   : > { %v295_v52 = vpop.permute.xlu0 %294  ;;  %v5771_v53 = vpack.c.bf16 %v311_v49, %v307_v50  ;;  %v310_v56 = vmul.f32 %v305_v54, %v261_v3  ;;  %928 = vrot.lane.b32.xlu1 %v6639_v16, %s6509_s18 }
  0xc0   : > { %v304_v55 = vsel %vm252_vm1, %v295_v52, %v283_v44 }
  0xc1   : > { %v306_v57 = vmul.f32 %v304_v55, %v261_v3  ;;  %1392 = vmatprep.subr.bf16.mxu0 %v5771_v53  ;;  %926 = vrot.lane.b32.xlu0 %v6609_v11, %s6509_s18  ;;  %v293_v58 = vpop.permute.xlu1 %292 }
  0xc2   : > { %v299_v61 = vsel %vm252_vm1, %v293_v58, %v297_v51  ;;  %v301_v62 = vsel %vm252_vm1, %v289_v40, %v293_v58 }
  0xc3   : > { %v291_v59 = vpop.permute.xlu0 %290  ;;  %v5770_v60 = vpack.c.bf16 %v310_v56, %v306_v57  ;;  %v312_v1 = vmul.f32 %v301_v62, %v269_v23  ;;  %v313_v2 = vmul.f32 %v299_v61, %v273_v27  ;;  %920 = vrot.lane.b32.xlu1 %v6623_v14, %s6509_s18  ;;  %v5422_v56 = vld [vmem:[%s10314_s1 + $0xc] sm:$0xf] }
  0xc4   : > { %v298_v63 = vsel %vm252_vm1, %v291_v59, %v295_v52  ;;  %v300_v0 = vsel %vm252_vm1, %v287_v43, %v291_v59  ;;  %v501_v61 = vrot.slane %v5422_v56, %v6731_v20 }
  0xc5   : > { %v308_v3 = vmul.f32 %v300_v0, %v269_v23  ;;  %v309_v4 = vmul.f32 %v298_v63, %v273_v27  ;;  %918 = vrot.lane.b32.xlu0 %v6589_v5, %s6509_s18  ;;  %1393 = vmatpush1.bf16.msra.mxu0 %v5770_v60  ;;  %v365_v18 = vpop.permute.xlu1 %364  ;;  %v383_v23 = vrot.slane %v5415_v17, %v6731_v20 }
  0xc6   : > { %v497_v17 = vrot.slane %v5422_v56, %v6742_v25 }
  0xc7   : > { %v363_v21 = vpop.permute.xlu0 %362  ;;  %v5799_v22 = vpack.c.bf16 %v313_v2, %v309_v4  ;;  %v5798_v24 = vpack.c.bf16 %v312_v1, %v308_v3  ;;  %932 = vrot.lane.b32.xlu1 %v6633_v15, %s6509_s18  ;;  %v5990_v1 = vld [vmem:[%s10315_s2 + $0x4] ss:$8 sps:$4 sm:$0xff]  }
  0xc8   : > { %v373_v26 = vsel %vm370_vm2, %v363_v21, %v365_v18  ;;  %5500 = vmatprep.mubr.msk.bf16.mxu0 %vm1368_vm4, %v5990_v1  ;;  %5553 = vmatprep.mubr.msk.bf16.mxu1 %vm1368_vm4, %v5990_v1 }
  0xc9   : > { %1845 = vmatprep.subr.bf16.mxu1 %v5799_v22  ;;  %930 = vrot.lane.b32.xlu0 %v6605_v9, %s6509_s18  ;;  %v405_v27 = vpop.permute.xlu1 %404  ;;  %v397_v31 = vmul.f32 %v383_v23, %v373_v26  ;;  %v6932_v26 = vrot.slane %v5422_v56, %v6755_v34 }
  0xca   : > { %1846 = vmatpush1.bf16.msra.mxu1 %v5798_v24 }
  0xcb   : > { %v401_v28 = vpop.permute.xlu0 %400  ;;  %1002 = vrot.lane.b32.xlu1 %v6615_v12, %s6510_s22 }
  0xcc   : > { %v420_v29 = vsel %vm370_vm2, %v401_v28, %v405_v27 }
  0xcd   : > { %v425_v32 = vmul.f32 %v420_v29, %v383_v23  ;;  %1000 = vrot.lane.b32.xlu0 %v6599_v8, %s6510_s22  ;;  %v413_v33 = vpop.permute.xlu1 %412  ;;  %v6937_v29 = vrot.slane %v5422_v56, %v6748_v30 }
  0xce   : > { %v422_v38 = vsel %vm370_vm2, %v413_v33, %v401_v28 }
  0xcf   : > { %v369_v36 = vpop.permute.xlu0 %368  ;;  %v5773_v37 = vpack.c.bf16 %v425_v32, %v397_v31  ;;  %v424_v42 = vmul.f32 %v422_v38, %v379_v35  ;;  %1044 = vrot.lane.b32.xlu1 %v6609_v11, %s6510_s22 }
  0xd0   : > { %v374_v39 = vsel %vm370_vm2, %v369_v36, %v363_v21 }
  0xd1   : > { %v396_v44 = vmul.f32 %v379_v35, %v374_v39  ;;  %1394 = vmatprep.subr.bf16.mxu0 %v5773_v37  ;;  %1040 = vrot.lane.b32.xlu0 %v6597_v7, %s6510_s22  ;;  %v409_v40 = vpop.permute.xlu1 %408 }
  0xd2   : > { %v416_v48 = vsel %vm370_vm2, %v409_v40, %v413_v33  ;;  %v418_v49 = vsel %vm370_vm2, %v405_v27, %v409_v40 }
  0xd3   : > { %v367_v43 = vpop.permute.xlu0 %366  ;;  %v5772_v47 = vpack.c.bf16 %v424_v42, %v396_v44  ;;  %v426_v52 = vmul.f32 %v418_v49, %v6879_v41  ;;  %v427_v53 = vmul.f32 %v416_v48, %v6884_v45  ;;  %1036 = vrot.lane.b32.xlu1 %v6589_v5, %s6510_s22 }
  0xd4   : > { %v371_v50 = vsel %vm370_vm2, %v367_v43, %v369_v36  ;;  %v372_v51 = vsel %vm370_vm2, %v365_v18, %v367_v43  ;;  %v1150_v36 = vld [vmem:[%s10316_s3 + $0x8] sm:$0xff] }
  0xd5   : > { %v398_v54 = vmul.f32 %v6879_v41, %v372_v51  ;;  %v399_v55 = vmul.f32 %v6884_v45, %v371_v50  ;;  %998 = vrot.lane.b32.xlu0 %v6591_v6, %s6510_s22  ;;  %1395 = vmatpush1.bf16.msra.mxu0 %v5772_v47  ;;  %v407_v57 = vpop.permute.xlu1 %406  ;;  %v1151_v51 = vld [vmem:[%s10316_s3 + $0x10] sm:$0xff] }
  0xd7   : > { %v403_v58 = vpop.permute.xlu0 %402  ;;  %v5801_v59 = vpack.c.bf16 %v427_v53, %v399_v55  ;;  %v5800_v60 = vpack.c.bf16 %v426_v52, %v398_v54  ;;  %1048 = vrot.lane.b32.xlu1 %v6605_v9, %s6510_s22  ;;  %v1152_v52 = vld [vmem:[%s10316_s3 + $0x18] sm:$0xff] }
  0xd8   : > { %v421_v62 = vsel %vm370_vm2, %v403_v58, %v407_v57 }
  0xd9   : > { %1847 = vmatprep.subr.bf16.mxu1 %v5801_v59  ;;  %1004 = vrot.lane.b32.xlu0 %v6607_v10, %s6510_s22  ;;  %v483_v63 = vpop.permute.xlu1 %482  ;;  %v429_v3 = vmul.f32 %v421_v62, %v383_v23 }
  0xda   : > { %1848 = vmatpush1.bf16.msra.mxu1 %v5800_v60 }
  0xdb   : > { %v481_v0 = vpop.permute.xlu0 %480  ;;  %1042 = vrot.lane.b32.xlu1 %v6617_v13, %s6510_s22 }
  0xdc   : > { %v491_v2 = vsel %vm488_vm3, %v481_v0, %v483_v63 }
  0xdd   : > { %v515_v4 = vmul.f32 %v501_v61, %v491_v2  ;;  %1038 = vrot.lane.b32.xlu0 %v6623_v14, %s6510_s22  ;;  %v487_v18 = vpop.permute.xlu1 %486 }
  0xde   : > { %v492_v24 = vsel %vm488_vm3, %v487_v18, %v481_v0 }
  0xdf   : > { %v415_v21 = vpop.permute.xlu0 %414  ;;  %v5775_v22 = vpack.c.bf16 %v515_v4, %v429_v3  ;;  %v514_v27 = vmul.f32 %v497_v17, %v492_v24  ;;  %1050 = vrot.lane.b32.xlu1 %v6633_v15, %s6510_s22 }
  0xe0   : > { %v423_v23 = vsel %vm370_vm2, %v415_v21, %v403_v58 }
  0xe1   : > { %v428_v28 = vmul.f32 %v423_v23, %v379_v35  ;;  %1396 = vmatprep.subr.bf16.mxu0 %v5775_v22  ;;  %1046 = vrot.lane.b32.xlu0 %v6639_v16, %s6510_s22  ;;  %v485_v31 = vpop.permute.xlu1 %484  ;;  %v1149_v35 = vld [vmem:[%s10316_s3] sm:$0xff] }
  0xe2   : > { %v489_v37 = vsel %vm488_vm3, %v485_v31, %v487_v18  ;;  %v490_v38 = vsel %vm488_vm3, %v483_v63, %v485_v31  ;;  %v5435_v63 = vld [vmem:[%s10314_s1 + $0x14] sm:$0xf] }
  0xe3   : > { %v411_v32 = vpop.permute.xlu0 %410  ;;  %v5774_v33 = vpack.c.bf16 %v514_v27, %v428_v28  ;;  %v516_v44 = vmul.f32 %v6932_v26, %v490_v38  ;;  %v517_v46 = vmul.f32 %v6937_v29, %v489_v37  ;;  %1164 = vperm.xlu1 %5987, %v1150_v36   ;;  %v6980_v18 = vrot.slane %v5435_v63, %v6731_v20  ;;  %v1155_v37 = vld [vmem:[%s10316_s3 + $0x30] sm:$0xff]  ;;  %v1156_v38 = vld [vmem:[%s10316_s3 + $0x38] sm:$0xff] }
  0xe4   : > { %v417_v39 = vsel %vm370_vm2, %v411_v32, %v415_v21  ;;  %v419_v42 = vsel %vm370_vm2, %v407_v57, %v411_v32  ;;  %v5778_v21 = vpack.c.bf16 %v6589_v5, %v6591_v6  ;;  %v1154_v5 = vld [vmem:[%s10316_s3 + $0x28] sm:$0xff] }
  0xe5   : > { %v430_v40 = vmul.f32 %v419_v42, %v6879_v41  ;;  %v431_v43 = vmul.f32 %v417_v39, %v6884_v45  ;;  %1397 = vmatpush1.bf16.msra.mxu0 %v5774_v33  ;;  %1159 = vperm.xlu0 %5986, %v1149_v35   ;;  %v521_v47 = vpop.permute.xlu1 %520  ;;  %v5806_v42 = vpack.c.bf16 %v6609_v11, %v6615_v12 }
  0xe7   : > { %v519_v48 = vpop.permute.xlu0 %518  ;;  %v5803_v49 = vpack.c.bf16 %v517_v46, %v431_v43  ;;  %v5802_v50 = vpack.c.bf16 %v516_v44, %v430_v40  ;;  %1169 = vperm.xlu1 %5987, %v1151_v51  }
  0xe9   : > { %1849 = vmatprep.subr.bf16.mxu1 %v5803_v49  ;;  %v525_v41 = vpop.permute.xlu1 %524  ;;  %1174 = vperm.xlu0 %5986, %v1152_v52  }
  0xea   : > { %1850 = vmatpush1.bf16.msra.mxu1 %v5802_v50  ;;  %v539_v53 = vsel %vm488_vm3, %v521_v47, %v525_v41 }
  0xeb   : > { %v523_v45 = vpop.permute.xlu0 %522  ;;  %v547_v55 = vmul.f32 %v539_v53, %v501_v61  ;;  %1614 = vperm.xlu1 %5987, %v1149_v35   ;;  %v5807_v35 = vpack.c.bf16 %v6605_v9, %v6607_v10  ;;  %v661_v9 = vrot.slane %v5435_v63, %v6742_v25  ;;  %v7018_v10 = vrot.slane %v5435_v63, %v6748_v30 }
  0xec   : > { %v538_v54 = vsel %vm488_vm3, %v519_v48, %v523_v45 }
  0xed   : > { %v543_v56 = vmul.f32 %v538_v54, %v501_v61  ;;  %v533_v57 = vpop.permute.xlu1 %532  ;;  %1619 = vperm.xlu0 %5986, %v1150_v36   ;;  %v5779_v61 = vpack.c.bf16 %v6597_v7, %v6599_v8  ;;  %v2031_v54 = vld [vmem:[%s10317_s4 + $0x8] sm:$0xff] }
  0xee   : > { %v541_v60 = vsel %vm488_vm3, %v533_v57, %v521_v47 }
  0xef   : > { %v531_v58 = vpop.permute.xlu0 %530  ;;  %v5777_v59 = vpack.c.bf16 %v547_v55, %v543_v56  ;;  %v546_v0 = vmul.f32 %v541_v60, %v497_v17  ;;  %1624 = vperm.xlu1 %5987, %v1151_v51   ;;  %v2032_v60 = vld [vmem:[%s10318_s5] sm:$0xff] }
  0xf0   : > { %v540_v62 = vsel %vm488_vm3, %v531_v58, %v519_v48 }
  0xf1   : > { %v542_v1 = vmul.f32 %v540_v62, %v497_v17  ;;  %1398 = vmatprep.subr.bf16.mxu0 %v5777_v59  ;;  %v529_v2 = vpop.permute.xlu1 %528  ;;  %1629 = vperm.xlu0 %5986, %v1152_v52   ;;  %v1153_v17 = vld [vmem:[%s10316_s3 + $0x20] sm:$0xff] }
  0xf2   : > { %v535_v7 = vsel %vm488_vm3, %v529_v2, %v533_v57  ;;  %v537_v8 = vsel %vm488_vm3, %v525_v41, %v529_v2 }
  0xf3   : > { %v527_v3 = vpop.permute.xlu0 %526  ;;  %v5776_v4 = vpack.c.bf16 %v546_v0, %v542_v1  ;;  %v548_v6 = vmul.f32 %v537_v8, %v6932_v26  ;;  %v549_v23 = vmul.f32 %v535_v7, %v6937_v29  ;;  %1179 = vperm.xlu1 %5987, %v1153_v17   ;;  %v2033_v0 = vld [vmem:[%s10318_s5 + $0x8] sm:$0xff] }
  0xf4   : > { %v534_v22 = vsel %vm488_vm3, %v527_v3, %v531_v58  ;;  %v536_v24 = vsel %vm488_vm3, %v523_v45, %v527_v3 }
  0xf5   : > { %v544_v27 = vmul.f32 %v536_v24, %v6932_v26  ;;  %v545_v28 = vmul.f32 %v534_v22, %v6937_v29  ;;  %1399 = vmatpush1.bf16.msra.mxu0 %v5776_v4  ;;  %v649_v31 = vpop.permute.xlu1 %648  ;;  %1184 = vperm.xlu0 %5986, %v1154_v5   ;;  %v7010_v29 = vrot.slane %v5435_v63, %v6755_v34  ;;  %v7066_v22 = vld [vmem:[#allocation4 + $0x20] sm:$0xff] }
  0xf6   : > { %1400 = vmatprep.subr.bf16.mxu0 %v5779_v61 }
  0xf7   : > { %v647_v32 = vpop.permute.xlu0 %646  ;;  %v5805_v33 = vpack.c.bf16 %v549_v23, %v545_v28  ;;  %v5804_v36 = vpack.c.bf16 %v548_v6, %v544_v27  ;;  %1189 = vperm.xlu1 %5987, %v1155_v37   ;;  %v5442_v27 = vld [vmem:[%s10314_s1 + $0x18] sm:$0xf] }
  0xf8   : > { %v654_v26 = vsel %vm652_vm5, %v647_v32, %v649_v31 }
  0xf9   : > { %v679_v39 = vmul.f32 %v6980_v18, %v654_v26  ;;  %1851 = vmatprep.subr.bf16.mxu1 %v5805_v33  ;;  %1401 = vmatpush1.bf16.msra.mxu0 %v5778_v21  ;;  %v651_v44 = vpop.permute.xlu1 %650 }
  0xfa   : > { %1852 = vmatpush1.bf16.msra.mxu1 %v5804_v36  ;;  %1194 = vperm.xlu0 %5986, %v1156_v38   ;;  %v653_v43 = vsel %vm652_vm5, %v649_v31, %v651_v44  ;;  %v7080_v36 = vld [vmem:[#allocation4 + $0x40] sm:$0xff] }
  0xfb   : > { %v645_v46 = vpop.permute.xlu0 %644  ;;  %v5781_v40 = vpack.c.bf16 %v679_v39, %v6617_v13  ;;  %1853 = vmatprep.subr.bf16.mxu1 %v5807_v35  ;;  %v680_v49 = vmul.f32 %v7010_v29, %v653_v43  ;;  %1634 = vperm.xlu1 %5987, %v1153_v17   ;;  %v7082_v35 = vld [vmem:[#allocation4 + $0x60] sm:$0xff]  ;;  %v7093_v39 = vld [vmem:[#allocation4 + $0x8] sm:$0xff] }
  0xfc   : > { %v655_v47 = vsel %vm652_vm5, %v645_v46, %v647_v32  ;;  %v656_v48 = vsel %vm652_vm5, %v651_v44, %v645_v46  ;;  %v7102_v46 = vrot.slane %v5442_v27, %v6742_v25 }
  0xfd   : > { %v678_v50 = vmul.f32 %v661_v9, %v655_v47  ;;  %v681_v11 = vmul.f32 %v7018_v10, %v656_v48  ;;  %1402 = vmatprep.subr.bf16.mxu0 %v5781_v40  ;;  %v689_v12 = vpop.permute.xlu1 %688  ;;  %v5808_v41 = vpack.c.bf16 %v680_v49, %v6639_v16  ;;  %v7108_v48 = vld [vmem:[#allocation4 + $0x10] sm:$0xff] }
  0xfe   : > { %1854 = vmatpush1.bf16.msra.mxu1 %v5806_v42  ;;  %1639 = vperm.xlu0 %5986, %v1154_v5  }
  0xff   : > { %v687_v13 = vpop.permute.xlu0 %686  ;;  %v5780_v51 = vpack.c.bf16 %v678_v50, %v6623_v14  ;;  %v5809_v52 = vpack.c.bf16 %v681_v11, %v6633_v15  ;;  %1644 = vperm.xlu1 %5987, %v1155_v37   ;;  %v2030_v15 = vld [vmem:[%s10317_s4] sm:$0xff]  ;;  %v7085_v37 = vrot.slane %v5442_v27, %v6731_v20  ;;  %v7114_v11 = vld [vmem:[#allocation4 + $0x30] sm:$0xff] }
 0x101   : > { %1403 = vmatpush1.bf16.msra.mxu0 %v5780_v51  ;;  %1855 = vmatprep.subr.bf16.mxu1 %v5809_v52  ;;  %v693_v45 = vpop.permute.xlu1 %692  ;;  %v7119_v51 = vrot.slane %v5442_v27, %v6755_v34  ;;  %v7122_v52 = vrot.slane %v5442_v27, %v6748_v30 }
 0x102   : > { %1856 = vmatpush1.bf16.msra.mxu1 %v5808_v41  ;;  %1649 = vperm.xlu0 %5986, %v1156_v38   ;;  %v701_v55 = vsel %vm652_vm5, %v689_v12, %v693_v45 }
 0x103   : > { %v691_v53 = vpop.permute.xlu0 %690  ;;  %v711_v16 = vmul.f32 %v701_v55, %v6980_v18  ;;  %2097 = vperm.xlu1 %5987, %v2031_v54   ;;  %v7128_v54 = vld [vmem:[#allocation4 + $0x18] sm:$0xff] }
 0x104   : > { %v700_v14 = vsel %vm652_vm5, %v687_v13, %v691_v53 }
 0x105   : > { %v707_v56 = vmul.f32 %v700_v14, %v6980_v18  ;;  %v685_v57 = vpop.permute.xlu1 %684  ;;  %v7056_v18 = vld [vmem:[#allocation4] sm:$0xff] }
 0x106   : > { %2092 = vperm.xlu0 %5986, %v2030_v15   ;;  %v703_v62 = vsel %vm652_vm5, %v685_v57, %v689_v12 }
 0x107   : > { %v683_v58 = vpop.permute.xlu0 %682  ;;  %v5783_v59 = vpack.c.bf16 %v711_v16, %v707_v56  ;;  %v710_v1 = vmul.f32 %v703_v62, %v661_v9  ;;  %2110 = vperm.xlu1 %5987, %v2032_v60   ;;  %v7138_v56 = vld [vmem:[#allocation4 + $0x38] sm:$0xff] }
 0x108   : > { %v702_v63 = vsel %vm652_vm5, %v683_v58, %v687_v13  ;;  %v5449_v62 = vld [vmem:[%s10314_s1 + $0x1c] sm:$0xf] }
 0x109   : > { %v706_v61 = vmul.f32 %v702_v63, %v661_v9  ;;  %1404 = vmatprep.subr.bf16.mxu0 %v5783_v59  ;;  %v697_v2 = vpop.permute.xlu1 %696  ;;  %v897_v27 = vrot.slane %v5449_v62, %v6742_v25 }
 0x10a   : > { %2115 = vperm.xlu0 %5986, %v2033_v0   ;;  %v699_v21 = vsel %vm652_vm5, %v693_v45, %v697_v2  ;;  %v705_v17 = vsel %vm652_vm5, %v697_v2, %v685_v57  ;;  %v7151_v2 = vld [vmem:[#allocation4 + $0x48] sm:$0xff] }
 0x10b   : > { %v695_v3 = vpop.permute.xlu0 %694  ;;  %v5782_v4 = vpack.c.bf16 %v710_v1, %v706_v61  ;;  %v712_v24 = vmul.f32 %v699_v21, %v7010_v29  ;;  %v713_v5 = vmul.f32 %v705_v17, %v7018_v10  ;;  %2204 = vrot.lane.b32.xlu1 %v7056_v18, %s6503_s26 }
 0x10c   : > { %v698_v7 = vsel %vm652_vm5, %v691_v53, %v695_v3  ;;  %v704_v8 = vsel %vm652_vm5, %v695_v3, %v683_v58  ;;  %v7153_v3 = vld [vmem:[#allocation4 + $0x68] sm:$0xff] }
 0x10d   : > { %v708_v6 = vmul.f32 %v698_v7, %v7010_v29  ;;  %v709_v23 = vmul.f32 %v704_v8, %v7018_v10  ;;  %1405 = vmatpush1.bf16.msra.mxu0 %v5782_v4  ;;  %v767_v28 = vpop.permute.xlu1 %766  ;;  %v7097_v10 = vld [vmem:[#allocation4 + $0x28] sm:$0xff]  ;;  %v901_v4 = vrot.slane %v5449_v62, %v6731_v20  ;;  %v7163_v8 = vld [vmem:[#allocation4 + $0x50] sm:$0xff] }
 0x10e   : > { %2206 = vrot.lane.b32.xlu0 %v7066_v22, %s6503_s26 }
 0x10f   : > { %v765_v31 = vpop.permute.xlu0 %764  ;;  %v5811_v32 = vpack.c.bf16 %v713_v5, %v709_v23  ;;  %v5810_v33 = vpack.c.bf16 %v712_v24, %v708_v6  ;;  %2208 = vrot.lane.b32.xlu1 %v7080_v36, %s6503_s26  ;;  %v7167_v5 = vld [vmem:[#allocation4 + $0x70] sm:$0xff] }
 0x110   : > { %v772_v26 = vsel %vm770_vm6, %v765_v31, %v767_v28 }
 0x111   : > { %1857 = vmatprep.subr.bf16.mxu1 %v5811_v32  ;;  %v809_v29 = vpop.permute.xlu1 %808  ;;  %v797_v42 = vmul.f32 %v7085_v37, %v772_v26  ;;  %v7175_v32 = vld [vmem:[#allocation4 + $0x58] sm:$0xff] }
 0x112   : > { %1858 = vmatpush1.bf16.msra.mxu1 %v5810_v33  ;;  %2210 = vrot.lane.b32.xlu0 %v7082_v35, %s6503_s26 }
 0x113   : > { %v805_v38 = vpop.permute.xlu0 %804  ;;  %2212 = vrot.lane.b32.xlu1 %v7093_v39, %s6503_s26 }
 0x114   : > { %v818_v9 = vsel %vm770_vm6, %v805_v38, %v809_v29 }
 0x115   : > { %v825_v44 = vmul.f32 %v818_v9, %v7085_v37  ;;  %v801_v40 = vpop.permute.xlu1 %800  ;;  %v905_v9 = vrot.slane %v5449_v62, %v6755_v34 }
 0x116   : > { %2214 = vrot.lane.b32.xlu0 %v7097_v10, %s6503_s26  ;;  %v820_v49 = vsel %vm770_vm6, %v801_v40, %v805_v38 }
 0x117   : > { %v763_v43 = vpop.permute.xlu0 %762  ;;  %v5785_v47 = vpack.c.bf16 %v825_v44, %v797_v42  ;;  %v824_v12 = vmul.f32 %v820_v49, %v7102_v46  ;;  %2220 = vrot.lane.b32.xlu1 %v7108_v48, %s6503_s26  ;;  %v909_v42 = vrot.slane %v5449_v62, %v6748_v30 }
 0x118   : > { %v773_v50 = vsel %vm770_vm6, %v763_v43, %v765_v31 }
 0x119   : > { %v796_v13 = vmul.f32 %v7102_v46, %v773_v50  ;;  %1406 = vmatprep.subr.bf16.mxu0 %v5785_v47  ;;  %v813_v41 = vpop.permute.xlu1 %812 }
 0x11a   : > { %2222 = vrot.lane.b32.xlu0 %v7114_v11, %s6503_s26  ;;  %v816_v55 = vsel %vm770_vm6, %v809_v29, %v813_v41  ;;  %v822_v14 = vsel %vm770_vm6, %v813_v41, %v801_v40  ;;  %v7179_v29 = vld [vmem:[#allocation4 + $0x78] sm:$0xff] }
 0x11b   : > { %v769_v45 = vpop.permute.xlu0 %768  ;;  %v5784_v53 = vpack.c.bf16 %v824_v12, %v796_v13  ;;  %v826_v57 = vmul.f32 %v816_v55, %v7119_v51  ;;  %v827_v58 = vmul.f32 %v822_v14, %v7122_v52  ;;  %2228 = vrot.lane.b32.xlu1 %v7128_v54, %s6503_s26 }
 0x11c   : > { %v771_v15 = vsel %vm770_vm6, %v767_v28, %v769_v45  ;;  %v774_v16 = vsel %vm770_vm6, %v769_v45, %v763_v43 }
 0x11d   : > { %v798_v59 = vmul.f32 %v7119_v51, %v771_v15  ;;  %v799_v60 = vmul.f32 %v7122_v52, %v774_v16  ;;  %1407 = vmatpush1.bf16.msra.mxu0 %v5784_v53  ;;  %v811_v63 = vpop.permute.xlu1 %810 }
 0x11e   : > { %2230 = vrot.lane.b32.xlu0 %v7138_v56, %s6503_s26 }
 0x11f   : > { %v807_v0 = vpop.permute.xlu0 %806  ;;  %v5813_v1 = vpack.c.bf16 %v827_v58, %v799_v60  ;;  %v5812_v61 = vpack.c.bf16 %v826_v57, %v798_v59  ;;  %2216 = vrot.lane.b32.xlu1 %v7151_v2, %s6503_s26 }
 0x120   : > { %v819_v21 = vsel %vm770_vm6, %v807_v0, %v811_v63 }
 0x121   : > { %1859 = vmatprep.subr.bf16.mxu1 %v5813_v1  ;;  %v885_v17 = vpop.permute.xlu1 %884  ;;  %v829_v6 = vmul.f32 %v819_v21, %v7085_v37 }
 0x122   : > { %1860 = vmatpush1.bf16.msra.mxu1 %v5812_v61  ;;  %2218 = vrot.lane.b32.xlu0 %v7153_v3, %s6503_s26 }
 0x123   : > { %v883_v7 = vpop.permute.xlu0 %882  ;;  %2224 = vrot.lane.b32.xlu1 %v7163_v8, %s6503_s26 }
 0x124   : > { %v890_v24 = vsel %vm888_vm7, %v883_v7, %v885_v17 }
 0x125   : > { %v915_v23 = vmul.f32 %v901_v4, %v890_v24  ;;  %v881_v28 = vpop.permute.xlu1 %880 }
 0x126   : > { %2226 = vrot.lane.b32.xlu0 %v7167_v5, %s6503_s26  ;;  %v891_v33 = vsel %vm888_vm7, %v881_v28, %v883_v7 }
 0x127   : > { %v5787_v31 = vpack.c.bf16 %v915_v23, %v829_v6  ;;  %v803_v26 = vpop.permute.xlu0 %802  ;;  %v914_v37 = vmul.f32 %v897_v27, %v891_v33  ;;  %2232 = vrot.lane.b32.xlu1 %v7175_v32, %s6503_s26 }
 0x128   : > { %v821_v38 = vsel %vm770_vm6, %v803_v26, %v807_v0 }
 0x129   : > { %1408 = vmatprep.subr.bf16.mxu0 %v5787_v31  ;;  %v828_v44 = vmul.f32 %v821_v38, %v7102_v46  ;;  %v887_v40 = vpop.permute.xlu1 %886 }
 0x12a   : > { %2234 = vrot.lane.b32.xlu0 %v7179_v29, %s6503_s26  ;;  %v889_v43 = vsel %vm888_vm7, %v885_v17, %v887_v40  ;;  %v892_v47 = vsel %vm888_vm7, %v887_v40, %v881_v28 }
 0x12b   : > { %v815_v49 = vpop.permute.xlu0 %814  ;;  %v5786_v50 = vpack.c.bf16 %v914_v37, %v828_v44  ;;  %v916_v12 = vmul.f32 %v905_v9, %v889_v43  ;;  %v917_v13 = vmul.f32 %v909_v42, %v892_v47  ;;  %2346 = vrot.lane.b32.xlu1 %v7056_v18, %s6504_s27  ;;  %v5456_v44 = vld [vmem:[%s10314_s1 + $0x20] sm:$0xf] }
 0x12c   : > { %v817_v46 = vsel %vm770_vm6, %v811_v63, %v815_v49  ;;  %v823_v41 = vsel %vm770_vm6, %v815_v49, %v803_v26 }
 0x12d   : > { %v830_v45 = vmul.f32 %v817_v46, %v7119_v51  ;;  %v831_v53 = vmul.f32 %v823_v41, %v7122_v52  ;;  %1409 = vmatpush1.bf16.msra.mxu0 %v5786_v50  ;;  %v925_v55 = vpop.permute.xlu1 %924 }
 0x12e   : > { %2348 = vrot.lane.b32.xlu0 %v7066_v22, %s6504_s27 }
 0x12f   : > { %v923_v14 = vpop.permute.xlu0 %922  ;;  %v5815_v15 = vpack.c.bf16 %v917_v13, %v831_v53  ;;  %v5814_v16 = vpack.c.bf16 %v916_v12, %v830_v45  ;;  %2354 = vrot.lane.b32.xlu1 %v7093_v39, %s6504_s27  ;;  %v1015_v13 = vrot.slane %v5456_v44, %v6742_v25 }
 0x131   : > { %1861 = vmatprep.subr.bf16.mxu1 %v5815_v15  ;;  %v929_v57 = vpop.permute.xlu1 %928 }
 0x132   : > { %1862 = vmatpush1.bf16.msra.mxu1 %v5814_v16  ;;  %2356 = vrot.lane.b32.xlu0 %v7097_v10, %s6504_s27  ;;  %v937_v51 = vsel %vm888_vm7, %v925_v55, %v929_v57 }
 0x133   : > { %v927_v52 = vpop.permute.xlu0 %926  ;;  %v947_v58 = vmul.f32 %v937_v51, %v901_v4  ;;  %2362 = vrot.lane.b32.xlu1 %v7108_v48, %s6504_s27  ;;  %v1027_v51 = vrot.slane %v5456_v44, %v6748_v30 }
 0x134   : > { %v936_v59 = vsel %vm888_vm7, %v923_v14, %v927_v52 }
 0x135   : > { %v943_v60 = vmul.f32 %v936_v59, %v901_v4  ;;  %v921_v62 = vpop.permute.xlu1 %920 }
 0x136   : > { %2364 = vrot.lane.b32.xlu0 %v7114_v11, %s6504_s27  ;;  %v939_v63 = vsel %vm888_vm7, %v921_v62, %v925_v55 }
 0x137   : > { %v919_v0 = vpop.permute.xlu0 %918  ;;  %v5789_v1 = vpack.c.bf16 %v947_v58, %v943_v60  ;;  %v946_v61 = vmul.f32 %v939_v63, %v897_v27  ;;  %2370 = vrot.lane.b32.xlu1 %v7128_v54, %s6504_s27 }
 0x138   : > { %v938_v21 = vsel %vm888_vm7, %v919_v0, %v923_v14 }
 0x139   : > { %v942_v17 = vmul.f32 %v938_v21, %v897_v27  ;;  %1410 = vmatprep.subr.bf16.mxu0 %v5789_v1  ;;  %v933_v4 = vpop.permute.xlu1 %932 }
 0x13a   : > { %2372 = vrot.lane.b32.xlu0 %v7138_v56, %s6504_s27  ;;  %v935_v7 = vsel %vm888_vm7, %v929_v57, %v933_v4  ;;  %v941_v24 = vsel %vm888_vm7, %v933_v4, %v921_v62  ;;  %v1023_v57 = vrot.slane %v5456_v44, %v6755_v34 }
 0x13b   : > { %v931_v6 = vpop.permute.xlu0 %930  ;;  %v5788_v23 = vpack.c.bf16 %v946_v61, %v942_v17  ;;  %v948_v28 = vmul.f32 %v935_v7, %v905_v9  ;;  %v949_v31 = vmul.f32 %v941_v24, %v909_v42  ;;  %2350 = vrot.lane.b32.xlu1 %v7080_v36, %s6504_s27 }
 0x13c   : > { %v934_v27 = vsel %vm888_vm7, %v927_v52, %v931_v6  ;;  %v940_v33 = vsel %vm888_vm7, %v931_v6, %v919_v0 }
 0x13d   : > { %v944_v26 = vmul.f32 %v934_v27, %v905_v9  ;;  %v945_v37 = vmul.f32 %v940_v33, %v909_v42  ;;  %1411 = vmatpush1.bf16.msra.mxu0 %v5788_v23  ;;  %v1003_v38 = vpop.permute.xlu1 %1002  ;;  %v1019_v9 = vrot.slane %v5456_v44, %v6731_v20 }
 0x13e   : > { %2352 = vrot.lane.b32.xlu0 %v7082_v35, %s6504_s27 }
 0x13f   : > { %v1001_v40 = vpop.permute.xlu0 %1000  ;;  %v5817_v43 = vpack.c.bf16 %v949_v31, %v945_v37  ;;  %v5816_v47 = vpack.c.bf16 %v948_v28, %v944_v26  ;;  %2358 = vrot.lane.b32.xlu1 %v7151_v2, %s6504_s27 }
 0x140   : > { %v1008_v42 = vsel %vm1006_vm8, %v1001_v40, %v1003_v38 }
 0x141   : > { %1863 = vmatprep.subr.bf16.mxu1 %v5817_v43  ;;  %v1045_v49 = vpop.permute.xlu1 %1044  ;;  %v1033_v46 = vmul.f32 %v1019_v9, %v1008_v42 }
 0x142   : > { %1864 = vmatpush1.bf16.msra.mxu1 %v5816_v47  ;;  %2360 = vrot.lane.b32.xlu0 %v7153_v3, %s6504_s27 }
 0x143   : > { %v1041_v50 = vpop.permute.xlu0 %1040  ;;  %2366 = vrot.lane.b32.xlu1 %v7163_v8, %s6504_s27 }
 0x144   : > { %v1054_v12 = vsel %vm1006_vm8, %v1041_v50, %v1045_v49 }
 0x145   : > { %v1061_v41 = vmul.f32 %v1054_v12, %v1019_v9  ;;  %v1037_v45 = vpop.permute.xlu1 %1036 }
 0x146   : > { %2368 = vrot.lane.b32.xlu0 %v7167_v5, %s6504_s27  ;;  %v1056_v53 = vsel %vm1006_vm8, %v1037_v45, %v1041_v50 }
 0x147   : > { %v999_v55 = vpop.permute.xlu0 %998  ;;  %v5791_v14 = vpack.c.bf16 %v1061_v41, %v1033_v46  ;;  %v1060_v15 = vmul.f32 %v1056_v53, %v1015_v13  ;;  %2374 = vrot.lane.b32.xlu1 %v7175_v32, %s6504_s27  ;;  %v5991_v46 = vld [vmem:[%s10315_s2 + $0x14] ss:$8 sps:$4 sm:$0xff]   ;;  %v5993_v41 = vld [vmem:[%s10315_s2 + $0x10] ss:$8 sps:$4 sm:$0xff]   ;;  %v5996_v53 = vld [vmem:[%s10315_s2 + $0x20] ss:$8 sps:$4 sm:$0xff]  }
 0x148   : > { %v1009_v16 = vsel %vm1006_vm8, %v999_v55, %v1001_v40 }
 0x149   : > { %v1032_v52 = vmul.f32 %v1015_v13, %v1009_v16  ;;  %1412 = vmatprep.subr.bf16.mxu0 %v5791_v14  ;;  %v1049_v58 = vpop.permute.xlu1 %1048  ;;  %v5999_v14 = vld [vmem:[%s10315_s2 + $0x30] ss:$8 sps:$4 sm:$0xff]  }
 0x14a   : > { %2376 = vrot.lane.b32.xlu0 %v7179_v29, %s6504_s27  ;;  %v1052_v59 = vsel %vm1006_vm8, %v1045_v49, %v1049_v58  ;;  %v1058_v60 = vsel %vm1006_vm8, %v1049_v58, %v1037_v45  ;;  %v5994_v45 = vld [vmem:[%s10315_s2 + $0x24] ss:$8 sps:$4 sm:$0xff]  }
 0x14b   : > { %v1005_v62 = vpop.permute.xlu0 %1004  ;;  %v5790_v63 = vpack.c.bf16 %v1060_v15, %v1032_v52  ;;  %v1062_v0 = vmul.f32 %v1052_v59, %v1023_v57  ;;  %v1063_v1 = vmul.f32 %v1058_v60, %v1027_v51  ;;  %2488 = vrot.lane.b32.xlu1 %v7056_v18, %s6505_s28 }
 0x14c   : > { %v1007_v61 = vsel %vm1006_vm8, %v1003_v38, %v1005_v62  ;;  %v1010_v21 = vsel %vm1006_vm8, %v1005_v62, %v999_v55  ;;  %v5997_v55 = vld [vmem:[%s10315_s2 + $0x34] ss:$8 sps:$4 sm:$0xff]  }
 0x14d   : > { %v1034_v17 = vmul.f32 %v1023_v57, %v1007_v61  ;;  %v1035_v4 = vmul.f32 %v1027_v51, %v1010_v21  ;;  %1413 = vmatpush1.bf16.msra.mxu0 %v5790_v63  ;;  %v1043_v7 = vpop.permute.xlu1 %1042 }
 0x14e   : > { %2490 = vrot.lane.b32.xlu0 %v7066_v22, %s6505_s28 }
 0x14f   : > { %v1039_v24 = vpop.permute.xlu0 %1038  ;;  %v5819_v6 = vpack.c.bf16 %v1063_v1, %v1035_v4  ;;  %v5818_v23 = vpack.c.bf16 %v1062_v0, %v1034_v17  ;;  %2496 = vrot.lane.b32.xlu1 %v7093_v39, %s6505_s28 }
 0x150   : > { %v1057_v28 = vsel %vm1006_vm8, %v1039_v24, %v1043_v7 }
 0x151   : > { %1865 = vmatprep.subr.bf16.mxu1 %v5819_v6  ;;  %v1064_v31 = vmul.f32 %v1057_v28, %v1015_v13  ;;  %v1051_v27 = vpop.permute.xlu1 %1050  ;;  %v5988_v13 = vld [vmem:[%s10315_s2] ss:$8 sps:$4 sm:$0xff]  }
 0x152   : > { %1866 = vmatpush1.bf16.msra.mxu1 %v5818_v23  ;;  %2498 = vrot.lane.b32.xlu0 %v7097_v10, %s6505_s28  ;;  %v1059_v33 = vsel %vm1006_vm8, %v1051_v27, %v1039_v24 }
 0x153   : > { %v1047_v26 = vpop.permute.xlu0 %1046  ;;  %v1067_v37 = vmul.f32 %v1059_v33, %v1027_v51  ;;  %v5792_v43 = vpack.c.bf16 %v1064_v31, %v1064_v31  ;;  %2504 = vrot.lane.b32.xlu1 %v7108_v48, %s6505_s28 }
 0x154   : > { %v1053_v38 = vsel %vm1006_vm8, %v1047_v26, %v1051_v27  ;;  %v1055_v44 = vsel %vm1006_vm8, %v1043_v7, %v1047_v26 }
 0x155   : > { %v1065_v40 = vmul.f32 %v1055_v44, %v1019_v9  ;;  %v1066_v47 = vmul.f32 %v1053_v38, %v1023_v57  ;;  %v5821_v42 = vpack.c.bf16 %v1067_v37, %v1067_v37  ;;  %v1383_v12 = vsel %vm1381_vm9, %v5792_v43, 0 }
 0x156   : > { %2506 = vrot.lane.b32.xlu0 %v7114_v11, %s6505_s28 }
 0x157   : > { %v5793_v49 = vpack.c.bf16 %v1065_v40, %v1065_v40  ;;  %v5820_v50 = vpack.c.bf16 %v1066_v47, %v1066_v47  ;;  %5552 = vmatprep.subr.msk.bf16.mxu1 %vm1381_vm9, %v5821_v42  ;;  %2512 = vrot.lane.b32.xlu1 %v7128_v54, %s6505_s28 }
 0x159   : > { %5499 = vmatprep.subr.msk.bf16.mxu0 %vm1381_vm9, %v5793_v49  ;;  %v1836_v9 = vsel %vm1381_vm9, %v5820_v50, 0 }
 0x15a   : > { %1415 = vmatpush1.bf16.msra.mxu0 %v1383_v12  ;;  %1868 = vmatpush1.bf16.msra.mxu1 %v1836_v9 }
 0x15b   : > { %2514 = vrot.lane.b32.xlu0 %v7138_v56, %s6505_s28  ;;  %2492 = vrot.lane.b32.xlu1 %v7080_v36, %s6505_s28 }
 0x15d   : > { %1421 = vmatmul.mubr.bf16.vlgmr.msra.gmra.mrb[0].mxu0 %v5988_v13  ;;  %1874 = vmatmul.mubr.bf16.vlgmr.msra.gmra.mrb[0].mxu1 %v5988_v13 }
 0x15e   : > { %5501 = vmatprep.mubr.msk.bf16.mxu0 %vm1368_vm4, %v5991_v46  ;;  %5554 = vmatprep.mubr.msk.bf16.mxu1 %vm1368_vm4, %v5991_v46 }
 0x15f   : > { %2494 = vrot.lane.b32.xlu0 %v7082_v35, %s6505_s28  ;;  %2500 = vrot.lane.b32.xlu1 %v7151_v2, %s6505_s28 }
 0x162   : > { %v1165_v15 = vpop.permute.xlu1 %1164 }
 0x163   : > { %2502 = vrot.lane.b32.xlu0 %v7153_v3, %s6505_s28  ;;  %2508 = vrot.lane.b32.xlu1 %v7163_v8, %s6505_s28 }
 0x164   : > { %v1160_v16 = vpop.permute.xlu0 %1159 }
 0x165   : > { %1431 = vmatmul.mubr.bf16.gmra.mrb[4].mxu0 %v5993_v41  ;;  %1884 = vmatmul.mubr.bf16.gmra.mrb[4].mxu1 %v5993_v41 }
 0x166   : > { %5502 = vmatprep.mubr.msk.bf16.mxu0 %vm1368_vm4, %v5994_v45  ;;  %5555 = vmatprep.mubr.msk.bf16.mxu1 %vm1368_vm4, %v5994_v45 }
 0x167   : > { %2510 = vrot.lane.b32.xlu0 %v7167_v5, %s6505_s28  ;;  %2516 = vrot.lane.b32.xlu1 %v7175_v32, %s6505_s28 }
 0x16b   : > { %2518 = vrot.lane.b32.xlu0 %v7179_v29, %s6505_s28  ;;  %2630 = vrot.lane.b32.xlu1 %v7056_v18, %s6506_s29 }
 0x16d   : > { %1441 = vmatmul.mubr.bf16.gmra.mrb[8].mxu0 %v5996_v53  ;;  %1894 = vmatmul.mubr.bf16.gmra.mrb[8].mxu1 %v5996_v53 }
 0x16e   : > { %5503 = vmatprep.mubr.msk.bf16.mxu0 %vm1368_vm4, %v5997_v55  ;;  %5556 = vmatprep.mubr.msk.bf16.mxu1 %vm1368_vm4, %v5997_v55 }
 0x16f   : > { %2632 = vrot.lane.b32.xlu0 %v7066_v22, %s6506_s29  ;;  %2638 = vrot.lane.b32.xlu1 %v7093_v39, %s6506_s29 }
 0x173   : > { %2640 = vrot.lane.b32.xlu0 %v7097_v10, %s6506_s29  ;;  %2646 = vrot.lane.b32.xlu1 %v7108_v48, %s6506_s29 }
 0x175   : > { %1451 = vmatmul.mubr.bf16.gmra.mrb[12].mxu0 %v5999_v14  ;;  %1904 = vmatmul.mubr.bf16.gmra.mrb[12].mxu1 %v5999_v14 }
 0x177   : > { %2648 = vrot.lane.b32.xlu0 %v7114_v11, %s6506_s29  ;;  %2654 = vrot.lane.b32.xlu1 %v7128_v54, %s6506_s29 }
 0x17b   : > { %2656 = vrot.lane.b32.xlu0 %v7138_v56, %s6506_s29  ;;  %2634 = vrot.lane.b32.xlu1 %v7080_v36, %s6506_s29 }
 0x17f   : > { %2636 = vrot.lane.b32.xlu0 %v7082_v35, %s6506_s29  ;;  %2642 = vrot.lane.b32.xlu1 %v7151_v2, %s6506_s29 }
 0x183   : > { %2644 = vrot.lane.b32.xlu0 %v7153_v3, %s6506_s29  ;;  %2650 = vrot.lane.b32.xlu1 %v7163_v8, %s6506_s29 }
 0x187   : > { %2652 = vrot.lane.b32.xlu0 %v7167_v5, %s6506_s29  ;;  %2658 = vrot.lane.b32.xlu1 %v7175_v32, %s6506_s29 }
 0x18b   : > { %2660 = vrot.lane.b32.xlu0 %v7179_v29, %s6506_s29  ;;  %2796 = vrot.lane.b32.xlu1 %v7056_v18, %s6507_s30 }
 0x18f   : > { %2798 = vrot.lane.b32.xlu0 %v7066_v22, %s6507_s30  ;;  %2804 = vrot.lane.b32.xlu1 %v7093_v39, %s6507_s30 }
 0x193   : > { %2806 = vrot.lane.b32.xlu0 %v7097_v10, %s6507_s30  ;;  %2812 = vrot.lane.b32.xlu1 %v7108_v48, %s6507_s30 }
 0x197   : > { %2814 = vrot.lane.b32.xlu0 %v7114_v11, %s6507_s30  ;;  %2820 = vrot.lane.b32.xlu1 %v7128_v54, %s6507_s30 }
 0x19b   : > { %2822 = vrot.lane.b32.xlu0 %v7138_v56, %s6507_s30  ;;  %2800 = vrot.lane.b32.xlu1 %v7080_v36, %s6507_s30  ;;  %v7403_v56 = vpop.permute.xlu1 %1169  ;;  %v7405_v36 = vpop.permute.xlu0 %1174 }
 0x19f   : > { %2802 = vrot.lane.b32.xlu0 %v7082_v35, %s6507_s30  ;;  %2808 = vrot.lane.b32.xlu1 %v7151_v2, %s6507_s30  ;;  %v1615_v35 = vpop.permute.xlu1 %1614  ;;  %v1620_v2 = vpop.permute.xlu0 %1619 }
 0x1a3   : > { %2810 = vrot.lane.b32.xlu0 %v7153_v3, %s6507_s30  ;;  %2816 = vrot.lane.b32.xlu1 %v7163_v8, %s6507_s30  ;;  %v7419_v3 = vpop.permute.xlu1 %1624  ;;  %v7421_v8 = vpop.permute.xlu0 %1629 }
 0x1a7   : > { %2818 = vrot.lane.b32.xlu0 %v7167_v5, %s6507_s30  ;;  %2824 = vrot.lane.b32.xlu1 %v7175_v32, %s6507_s30 }
 0x1ab   : > { %2826 = vrot.lane.b32.xlu0 %v7179_v29, %s6507_s30  ;;  %2938 = vrot.lane.b32.xlu1 %v7056_v18, %s6508_s15  ;;  %v7427_v18 = vpop.permute.xlu1 %1179 }
 0x1af   : > { %2940 = vrot.lane.b32.xlu0 %v7066_v22, %s6508_s15  ;;  %2946 = vrot.lane.b32.xlu1 %v7093_v39, %s6508_s15  ;;  %v7431_v22 = vpop.permute.xlu1 %1189  ;;  %v7433_v39 = vpop.permute.xlu0 %1184 }
 0x1b3   : > { %2948 = vrot.lane.b32.xlu0 %v7097_v10, %s6508_s15  ;;  %2954 = vrot.lane.b32.xlu1 %v7108_v48, %s6508_s15  ;;  %v7435_v10 = vpop.permute.xlu1 %1634  ;;  %v7437_v5 = vpop.permute.xlu0 %1194 }
 0x1b7   : > { %2956 = vrot.lane.b32.xlu0 %v7114_v11, %s6508_s15  ;;  %2962 = vrot.lane.b32.xlu1 %v7128_v54, %s6508_s15  ;;  %v7439_v32 = vpop.permute.xlu1 %1644  ;;  %v7441_v29 = vpop.permute.xlu0 %1639 }
 0x1bb   : > { %v7443_v48 = vpop.permute.xlu1 %2097  ;;  %v7445_v11 = vpop.permute.xlu0 %1649 }
 0x1bf   : > { %v7447_v57 = vpop.permute.xlu1 %2110  ;;  %v7449_v51 = vpop.permute.xlu0 %2092 }
 0x1c3   : > { %v7451_v54 = vpop.permute.xlu1 %2204  ;;  %v7453_v52 = vpop.permute.xlu0 %2115 }
 0x1c7   : > { %v7455_v58 = vpop.permute.xlu1 %2208  ;;  %v7457_v59 = vpop.permute.xlu0 %2206 }
 0x1cb   : > { %v7459_v60 = vpop.permute.xlu1 %2212  ;;  %v7461_v62 = vpop.permute.xlu0 %2210 }
 0x1cc   : > { %10467 = vst [vmem:[#allocation12_spill] sm:$0xff] %v7461_v62 }
 0x1cf   : > { %v7463_v63 = vpop.permute.xlu1 %2220  ;;  %v7465_v0 = vpop.permute.xlu0 %2214 }
 0x1d3   : > { %v7467_v1 = vpop.permute.xlu1 %2228  ;;  %v7469_v61 = vpop.permute.xlu0 %2222 }
 0x1d7   : > { %v7471_v21 = vpop.permute.xlu1 %2216  ;;  %v7473_v17 = vpop.permute.xlu0 %2230 }
 0x1db   : > { %v7475_v4 = vpop.permute.xlu1 %2224  ;;  %v7477_v13 = vpop.permute.xlu0 %2218 }
 0x1dc   : > { %10468 = vst [vmem:[#allocation13_spill] sm:$0xff] %v7477_v13 }
 0x1df   : > { %v7479_v46 = vpop.permute.xlu1 %2232 }
 0x1e0   : > { %10469 = vst [vmem:[#allocation14_spill] sm:$0xff] %v7479_v46 }
 0x230   : > { %v1875_v7 = vpop.f32.mrb[0].mxu1  ;;  %v1422_v24 = vpop.f32.mrb[0].mxu0 }
 0x231   : > { %v1876_v6 = vadd.f32 %v1875_v7, %v1615_v35  ;;  %v1423_v23 = vadd.f32 %v1422_v24, %v1160_v16  ;;  %v1424_v28 = vpop.f32.mrb[1].mxu0  ;;  %v1877_v31 = vpop.f32.mrb[1].mxu1 }
 0x232   : > { %v1425_v27 = vadd.f32 %v1424_v28, %v1160_v16  ;;  %v1878_v33 = vadd.f32 %v1877_v31, %v1615_v35  ;;  %v1879_v26 = vpop.f32.mrb[2].mxu1  ;;  %v1426_v37 = vpop.f32.mrb[2].mxu0 }
 0x233   : > { %v5557_v38 = vmul.f32 -1.442695, %v1876_v6  ;;  %v1880_v44 = vadd.f32 %v1879_v26, %v1620_v2  ;;  %v1428_v40 = vpop.f32.mrb[3].mxu0  ;;  %v1881_v43 = vpop.f32.mrb[3].mxu1  ;;  %v5504_v47 = vmul.f32 -1.442695, %v1423_v23  ;;  %v1427_v42 = vadd.f32 %v1426_v37, %v1165_v15 }
 0x234   : > { %v5505_v49 = vmul.f32 -1.442695, %v1425_v27  ;;  %v1429_v50 = vadd.f32 %v1428_v40, %v1165_v15  ;;  %v5558_v12 = vmul.f32 -1.442695, %v1878_v33  ;;  %v1882_v9 = vadd.f32 %v1881_v43, %v1620_v2  ;;  %v7485_v26 = vpop.permute.xlu0 %2226  ;;  %v7487_v37 = vpop.permute.xlu1 %2346 }
 0x235   : > { %6048 = vpow2.f32 %v5557_v38  ;;  %v5559_v41 = vmul.f32 -1.442695, %v1880_v44  ;;  %v5506_v45 = vmul.f32 -1.442695, %v1427_v42  ;;  %10470 = vst [vmem:[#allocation15_spill] sm:$0xff] %v7487_v37 }
 0x236   : > { %6050 = vpow2.f32 %v5504_v47  ;;  %v5507_v14 = vmul.f32 -1.442695, %v1429_v50  ;;  %v5560_v15 = vmul.f32 -1.442695, %v1882_v9 }
 0x237   : > { %6052 = vpow2.f32 %v5505_v49 }
 0x238   : > { %v1885_v53 = vpop.f32.mrb[4].mxu1  ;;  %v1432_v55 = vpop.f32.mrb[4].mxu0  ;;  %6054 = vpow2.f32 %v5558_v12 }
 0x239   : > { %v1886_v16 = vadd.f32 %v1885_v53, %v7419_v3  ;;  %v1434_v35 = vpop.f32.mrb[5].mxu0  ;;  %v1887_v7 = vpop.f32.mrb[5].mxu1  ;;  %6056 = vpow2.f32 %v5559_v41  ;;  %v1433_v31 = vadd.f32 %v1432_v55, %v7403_v56 }
 0x23a   : > { %v1436_v24 = vpop.f32.mrb[6].mxu0  ;;  %v1889_v2 = vpop.f32.mrb[6].mxu1  ;;  %6058 = vpow2.f32 %v5506_v45  ;;  %v1435_v27 = vadd.f32 %v1434_v35, %v7403_v56  ;;  %v1888_v33 = vadd.f32 %v1887_v7, %v7419_v3 }
 0x23b   : > { %v5561_v6 = vmul.f32 -1.442695, %v1886_v16  ;;  %v1438_v23 = vpop.f32.mrb[7].mxu0  ;;  %v1891_v28 = vpop.f32.mrb[7].mxu1  ;;  %6060 = vpow2.f32 %v5507_v14  ;;  %v1437_v38 = vadd.f32 %v1436_v24, %v7405_v36  ;;  %v5508_v44 = vmul.f32 -1.442695, %v1433_v31 }
 0x23c   : > { %6062 = vpow2.f32 %v5560_v15  ;;  %v5509_v42 = vmul.f32 -1.442695, %v1435_v27  ;;  %v5562_v12 = vmul.f32 -1.442695, %v1888_v33  ;;  %v7502_v31 = vpop.permute.xlu0 %2234 }
 0x23d   : > { %6064 = vpow2.f32 %v5561_v6  ;;  %v5510_v45 = vmul.f32 -1.442695, %v1437_v38  ;;  %10471 = vst [vmem:[#allocation16_spill] sm:$0xff] %v7502_v31  ;;  %v7504_v38 = vpop.permute.xlu1 %2354 }
 0x23e   : > { %6066 = vpow2.f32 %v5508_v44  ;;  %10472 = vst [vmem:[#allocation17_spill] sm:$0xff] %v7504_v38 }
 0x23f   : > { %v6049_v47 = vpop.eup %6048  ;;  %6068 = vpow2.f32 %v5509_v42 }
 0x240   : > { %v1895_v40 = vpop.f32.mrb[8].mxu1  ;;  %v1442_v43 = vpop.f32.mrb[8].mxu0  ;;  %v1926_v14 = vadd.f32 1.0, %v6049_v47  ;;  %6070 = vpow2.f32 %v5562_v12 }
 0x241   : > { %v7490_v49 = vpop.f32.mrb[9].mxu0  ;;  %v7492_v50 = vpop.f32.mrb[9].mxu1  ;;  %6072 = vpow2.f32 %v5510_v45 }
 0x242   : > { %v6051_v56 = vpop.eup %6050  ;;  %v7494_v9 = vpop.f32.mrb[10].mxu1  ;;  %6074 = vrcp.f32 %v1926_v14 }
 0x243   : > { %v7496_v3 = vpop.f32.mrb[10].mxu0  ;;  %v6053_v41 = vpop.eup %6052  ;;  %v1473_v7 = vadd.f32 1.0, %v6051_v56  ;;  %v1890_v56 = vadd.f32 %v1889_v2, %v7421_v8 }
 0x244   : > { %v7498_v53 = vpop.f32.mrb[11].mxu0  ;;  %v6055_v55 = vpop.eup %6054  ;;  %v1474_v24 = vadd.f32 1.0, %v6053_v41  ;;  %v1439_v41 = vadd.f32 %v1438_v23, %v7405_v36  ;;  %v1443_v23 = vadd.f32 %v1442_v43, %v7427_v18 }
 0x245   : > { %v7500_v16 = vpop.f32.mrb[11].mxu1  ;;  %v6057_v35 = vpop.eup %6056  ;;  %v1927_v27 = vadd.f32 1.0, %v6055_v55  ;;  %6076 = vrcp.f32 %v1473_v7  ;;  %v5563_v36 = vmul.f32 -1.442695, %v1890_v56 }
 0x246   : > { %v6059_v15 = vpop.eup %6058  ;;  %v1928_v37 = vadd.f32 1.0, %v6057_v35  ;;  %6078 = vrcp.f32 %v1474_v24  ;;  %v1892_v35 = vadd.f32 %v1891_v28, %v7421_v8  ;;  %v7523_v31 = vpop.permute.xlu0 %2348 }
 0x247   : > { %v6061_v6 = vpop.eup %6060  ;;  %v1475_v62 = vadd.f32 1.0, %v6059_v15  ;;  %6080 = vrcp.f32 %v1927_v27  ;;  %v1896_v15 = vadd.f32 %v1895_v40, %v7435_v10  ;;  %10473 = vst [vmem:[#allocation18_spill] sm:$0xff] %v7523_v31  ;;  %v5511_v27 = vmul.f32 -1.442695, %v1439_v41  ;;  %v7525_v13 = vpop.permute.xlu1 %2362 }
 0x248   : > { %v6063_v33 = vpop.eup %6062  ;;  %v1905_v47 = vpop.f32.mrb[12].mxu1  ;;  %v1476_v12 = vadd.f32 1.0, %v6061_v6  ;;  %6082 = vrcp.f32 %v1928_v37  ;;  %v5564_v28 = vmul.f32 -1.442695, %v1892_v35  ;;  %v1445_v35 = vadd.f32 %v7490_v49, %v7427_v18 }
 0x249   : > { %v6065_v44 = vpop.eup %6064  ;;  %v1452_v42 = vpop.f32.mrb[12].mxu0  ;;  %v1929_v14 = vadd.f32 1.0, %v6063_v33  ;;  %6084 = vrcp.f32 %v1475_v62  ;;  %v5565_v37 = vmul.f32 -1.442695, %v1896_v15  ;;  %v1447_v18 = vadd.f32 %v7496_v3, %v7433_v39 }
 0x24a   : > { %v7507_v46 = vpop.f32.mrb[13].mxu1  ;;  %v7510_v55 = vpop.f32.mrb[13].mxu0  ;;  %v1950_v2 = vadd.f32 1.0, %v6065_v44  ;;  %6086 = vrcp.f32 %v1476_v12  ;;  %v5512_v44 = vmul.f32 -1.442695, %v1443_v23  ;;  %v1453_v49 = vadd.f32 %v1452_v42, %v7431_v22 }
 0x24b   : > { %v7512_v45 = vpop.f32.mrb[14].mxu1  ;;  %v7515_v38 = vpop.f32.mrb[14].mxu0  ;;  %6088 = vrcp.f32 %v1929_v14 }
 0x24c   : > { %v7517_v7 = vpop.f32.mrb[15].mxu1  ;;  %v7520_v24 = vpop.f32.mrb[15].mxu0  ;;  %6090 = vrcp.f32 %v1950_v2 }
 0x24d   : > { %v6067_v6 = vpop.eup %6066  ;;  %6092 = vpow2.f32 %v5563_v36  ;;  %v7533_v41 = vpop.permute.xlu0 %2356  ;;  %v1898_v36 = vadd.f32 %v7492_v50, %v7435_v10  ;;  %v5513_v10 = vmul.f32 -1.442695, %v1445_v35  ;;  %v1449_v50 = vadd.f32 %v7498_v53, %v7433_v39 }
 0x24e   : > { %v6069_v8 = vpop.eup %6068  ;;  %v1497_v56 = vadd.f32 1.0, %v6067_v6  ;;  %6094 = vpow2.f32 %v5511_v27  ;;  %10474 = vst [vmem:[#allocation19_spill] sm:$0xff] %v7533_v41  ;;  %v7543_v6 = vpop.permute.xlu1 %2370  ;;  %v1900_v27 = vadd.f32 %v7494_v9, %v7441_v29  ;;  %v1537_v41 = vld [vmem:[#allocation3] sm:$0xff] }
 0x24f   : > { %v6071_v33 = vpop.eup %6070  ;;  %v1498_v31 = vadd.f32 1.0, %v6069_v8  ;;  %6096 = vpow2.f32 %v5564_v28  ;;  %10475 = vst [vmem:[#allocation20_spill] sm:$0xff] %v7543_v6  ;;  %v1906_v8 = vadd.f32 %v1905_v47, %v7439_v32  ;;  %v5566_v9 = vmul.f32 -1.442695, %v1898_v36 }
 0x250   : > { %v6073_v40 = vpop.eup %6072  ;;  %v1951_v14 = vadd.f32 1.0, %v6071_v33  ;;  %6098 = vpow2.f32 %v5565_v37  ;;  %v1902_v47 = vadd.f32 %v7500_v16, %v7441_v29  ;;  %v5567_v3 = vmul.f32 -1.442695, %v1900_v27  ;;  %v1990_v27 = vld [vmem:[#allocation3 + $0x10] sm:$0xff] }
 0x251   : > { %v7527_v62 = vpop.eup %6074  ;;  %v1499_v15 = vadd.f32 1.0, %v6073_v40  ;;  %6100 = vpow2.f32 %v5512_v44  ;;  %v7561_v40 = vpop.permute.xlu0 %2364  ;;  %v5514_v44 = vmul.f32 -1.442695, %v1447_v18  ;;  %v5515_v39 = vmul.f32 -1.442695, %v1449_v50 }
 0x252   : > { %v7529_v43 = vpop.eup %6076  ;;  %6102 = vrcp.f32 %v1497_v56  ;;  %v5568_v35 = vmul.f32 -1.442695, %v1902_v47 }
 0x253   : > { %v7531_v12 = vpop.eup %6078  ;;  %6104 = vrcp.f32 %v1498_v31 }
 0x254   : > { %v7537_v2 = vpop.eup %6080  ;;  %6106 = vrcp.f32 %v1951_v14  ;;  %v7563_v14 = vpop.permute.xlu1 %2350 }
 0x255   : > { %v7541_v23 = vpop.eup %6082  ;;  %6108 = vrcp.f32 %v1499_v15  ;;  %10476 = vst [vmem:[#allocation21_spill] sm:$0xff] %v7563_v14 }
 0x256   : > { %v7548_v28 = vpop.eup %6084  ;;  %6110 = vtanh.f32 %v1906_v8  ;;  %v7565_v8 = vpop.permute.xlu0 %2372 }
 0x257   : > { %v7553_v33 = vpop.eup %6086  ;;  %6112 = vtanh.f32 %v1453_v49 }
 0x258   : > { %v7557_v37 = vpop.eup %6088  ;;  %6114 = vpow2.f32 %v5513_v10  ;;  %v7567_v50 = vpop.permute.xlu1 %2358 }
 0x259   : > { %v6091_v31 = vpop.eup %6090  ;;  %6116 = vpow2.f32 %v5566_v9  ;;  %10477 = vst [vmem:[#allocation22_spill] sm:$0xff] %v7567_v50 }
 0x25a   : > { %v6093_v42 = vpop.eup %6092  ;;  %6118 = vpow2.f32 %v5567_v3  ;;  %v1994_v3 = vmul.f32 %v6091_v31, %v1990_v27 }
 0x25b   : > { %v6095_v56 = vpop.eup %6094  ;;  %v1952_v36 = vadd.f32 1.0, %v6093_v42  ;;  %6120 = vpow2.f32 %v5514_v44  ;;  %v1455_v42 = vadd.f32 %v7510_v55, %v7431_v22  ;;  %v1910_v22 = vadd.f32 %v7512_v45, %v7445_v11 }
 0x25c   : > { %v6097_v53 = vpop.eup %6096  ;;  %v1500_v16 = vadd.f32 1.0, %v6095_v56  ;;  %6122 = vpow2.f32 %v5515_v39  ;;  %v1908_v39 = vadd.f32 %v7507_v46, %v7439_v32  ;;  %v1457_v46 = vadd.f32 %v7515_v38, %v7437_v5  ;;  %v1538_v38 = vld [vmem:[#allocation3 + $0x8] sm:$0xff] }
 0x25d   : > { %v6099_v15 = vpop.eup %6098  ;;  %v1953_v18 = vadd.f32 1.0, %v6097_v53  ;;  %6124 = vpow2.f32 %v5568_v35  ;;  %v1912_v45 = vadd.f32 %v7517_v7, %v7445_v11  ;;  %v1539_v7 = vld [vmem:[#allocation3 + $0x20] sm:$0xff] }
 0x25e   : > { %v6101_v29 = vpop.eup %6100  ;;  %v1974_v14 = vadd.f32 1.0, %v6099_v15  ;;  %6126 = vrcp.f32 %v1952_v36  ;;  %v7574_v36 = vpop.permute.xlu0 %2352 }
 0x25f   : > { %v6103_v6 = vpop.eup %6102  ;;  %v1521_v9 = vadd.f32 1.0, %v6101_v29  ;;  %6128 = vrcp.f32 %v1500_v16 }
 0x260   : > { %v6105_v49 = vpop.eup %6104  ;;  %v1541_v56 = vmul.f32 %v6103_v6, %v1537_v41  ;;  %6130 = vrcp.f32 %v1953_v18  ;;  %v7579_v41 = vpop.permute.xlu1 %2366 }
 0x261   : > { %v6107_v10 = vpop.eup %6106  ;;  %6132 = vrcp.f32 %v1974_v14  ;;  %v1542_v11 = vmul.f32 %v6105_v49, %v1538_v38  ;;  %v1993_v38 = vld [vmem:[#allocation3 + $0x38] sm:$0xff] }
 0x262   : > { %v6109_v47 = vpop.eup %6108  ;;  %6134 = vrcp.f32 %v1521_v9  ;;  %v7587_v18 = vpop.permute.xlu0 %2360 }
 0x263   : > { %v6111_v44 = vpop.eup %6110  ;;  %6136 = vtanh.f32 %v1455_v42  ;;  %10478 = vst [vmem:[#allocation23_spill] sm:$0xff] %v7587_v18  ;;  %v1540_v18 = vld [vmem:[#allocation3 + $0x28] sm:$0xff] }
 0x264   : > { %v6113_v53 = vpop.eup %6112  ;;  %v1998_v35 = vmul.f32 %v6111_v44, %v7527_v62  ;;  %6138 = vtanh.f32 %v1908_v39  ;;  %v1991_v44 = vld [vmem:[#allocation3 + $0x18] sm:$0xff] }
 0x265   : > { %v6115_v15 = vpop.eup %6114  ;;  %v1545_v31 = vmul.f32 %v6113_v53, %v7529_v43  ;;  %v1459_v43 = vadd.f32 %v7520_v24, %v7437_v5  ;;  %v7589_v5 = vpop.permute.xlu1 %2374 }
 0x266   : > { %v6117_v29 = vpop.eup %6116  ;;  %v2002_v16 = vadd.f32 %v1998_v35, %v1994_v3  ;;  %v1522_v3 = vadd.f32 1.0, %v6115_v15  ;;  %v7591_v15 = vpop.permute.xlu0 %2368 }
 0x267   : > { %v6119_v55 = vpop.eup %6118  ;;  %v1549_v32 = vadd.f32 %v1545_v31, %v1541_v56  ;;  %v1975_v56 = vadd.f32 1.0, %v6117_v29  ;;  %v1995_v31 = vmul.f32 %v6107_v10, %v1991_v44  ;;  %10479 = vst [vmem:[#allocation24_spill] sm:$0xff] %v7591_v15 }
 0x268   : > { %v6121_v62 = vpop.eup %6120  ;;  %2006 = vst [vmem:[#allocation3 + $0x10] sm:$0xff] %v2002_v16  ;;  %6140 = vtanh.f32 %v2002_v16  ;;  %v1976_v39 = vadd.f32 1.0, %v6119_v55  ;;  %v1992_v16 = vld [vmem:[#allocation3 + $0x30] sm:$0xff] }
 0x269   : > { %v6123_v6 = vpop.eup %6122  ;;  %1553 = vst [vmem:[#allocation3] sm:$0xff] %v1549_v32  ;;  %6142 = vtanh.f32 %v1549_v32 }
 0x26a   : > { %v6125_v14 = vpop.eup %6124  ;;  %6144 = vtanh.f32 %v1910_v22  ;;  %v1523_v22 = vadd.f32 1.0, %v6121_v62  ;;  %v1524_v50 = vadd.f32 1.0, %v6123_v6  ;;  %v7597_v62 = vpop.permute.xlu1 %2488 }
 0x26b   : > { %v6127_v27 = vpop.eup %6126  ;;  %6146 = vtanh.f32 %v1457_v46 }
 0x26c   : > { %v6129_v9 = vpop.eup %6128  ;;  %6148 = vtanh.f32 %v1459_v43  ;;  %v1543_v43 = vmul.f32 %v6109_v47, %v1539_v7  ;;  %v1996_v49 = vmul.f32 %v6127_v27, %v1992_v16 }
 0x26d   : > { %v6131_v42 = vpop.eup %6130  ;;  %6150 = vtanh.f32 %v1912_v45  ;;  %v1544_v7 = vmul.f32 %v6129_v9, %v1540_v18 }
 0x26e   : > { %v6133_v24 = vpop.eup %6132  ;;  %6152 = vrcp.f32 %v1522_v3  ;;  %v1997_v27 = vmul.f32 %v6131_v42, %v1993_v38  ;;  %v7609_v42 = vpop.permute.xlu1 %2496 }
 0x26f   : > { %v6135_v53 = vpop.eup %6134  ;;  %6154 = vrcp.f32 %v1975_v56  ;;  %v1977_v56 = vadd.f32 1.0, %v6125_v14 }
 0x270   : > { %v6137_v35 = vpop.eup %6136  ;;  %6156 = vrcp.f32 %v1976_v39  ;;  %v7605_v39 = vpop.permute.xlu0 %2376 }
 0x271   : > { %v6139_v32 = vpop.eup %6138  ;;  %v1546_v46 = vmul.f32 %v6137_v35, %v7531_v12  ;;  %6158 = vrcp.f32 %v1523_v22 }
 0x272   : > { %v6141_v29 = vpop.eup %6140  ;;  %v1999_v55 = vmul.f32 %v6139_v32, %v7537_v2 }
 0x273   : > { %v6143_v45 = vpop.eup %6142  ;;  %v7595_v10 = vmul.f32 %v6141_v29, %v6133_v24  ;;  %v1550_v3 = vadd.f32 %v1546_v46, %v1542_v11 }
 0x274   : > { %v6145_v44 = vpop.eup %6144  ;;  %v7599_v15 = vmul.f32 %v6143_v45, %v6135_v53  ;;  %v2003_v12 = vadd.f32 %v1999_v55, %v1995_v31 }
 0x275   : > { %v6147_v47 = vpop.eup %6146  ;;  %2018 = vst [vmem:[#allocation2 + $0x10] sm:$0xff] %v7595_v10  ;;  %1554 = vst [vmem:[#allocation3 + $0x8] sm:$0xff] %v1550_v3  ;;  %6160 = vtanh.f32 %v1550_v3  ;;  %v2000_v2 = vmul.f32 %v6145_v44, %v7541_v23 }
 0x276   : > { %v6149_v6 = vpop.eup %6148  ;;  %1565 = vst [vmem:[#allocation2] sm:$0xff] %v7599_v15  ;;  %2007 = vst [vmem:[#allocation3 + $0x18] sm:$0xff] %v2003_v12  ;;  %6162 = vtanh.f32 %v2003_v12  ;;  %v1547_v24 = vmul.f32 %v6147_v47, %v7548_v28  ;;  %v2044_v12 = vmul.f32 %v7599_v15, %v7599_v15 }
 0x277   : > { %v6151_v14 = vpop.eup %6150  ;;  %6164 = vrcp.f32 %v1524_v50  ;;  %v2004_v53 = vadd.f32 %v2000_v2, %v1996_v49  ;;  %v1548_v18 = vmul.f32 %v6149_v6, %v7553_v33  ;;  %v7611_v33 = vpop.permute.xlu0 %2490 }
 0x278   : > { %6166 = vrcp.f32 %v1977_v56  ;;  %v1551_v9 = vadd.f32 %v1547_v24, %v1543_v43  ;;  %v2001_v11 = vmul.f32 %v6151_v14, %v7557_v37  ;;  %v6153_v35 = vpop.eup %6152  ;;  %10480 = vst [vmem:[#allocation25_spill] sm:$0xff] %v7611_v33  ;;  %v7613_v37 = vpop.permute.xlu1 %2504 }
 0x279   : > { %2008 = vst [vmem:[#allocation3 + $0x30] sm:$0xff] %v2004_v53  ;;  %6168 = vtanh.f32 %v2004_v53  ;;  %v1552_v23 = vadd.f32 %v1548_v18, %v1544_v7  ;;  %v6155_v31 = vpop.eup %6154  ;;  %10481 = vst [vmem:[#allocation26_spill] sm:$0xff] %v7613_v37 }
 0x27a   : > { %1555 = vst [vmem:[#allocation3 + $0x20] sm:$0xff] %v1551_v9  ;;  %6170 = vtanh.f32 %v1551_v9  ;;  %v2005_v28 = vadd.f32 %v2001_v11, %v1997_v27  ;;  %v6157_v50 = vpop.eup %6156 }
 0x27b   : > { %1556 = vst [vmem:[#allocation3 + $0x28] sm:$0xff] %v1552_v23  ;;  %6172 = vtanh.f32 %v1552_v23  ;;  %v6159_v16 = vpop.eup %6158  ;;  %v7623_v38 = vpop.permute.xlu0 %2498 }
 0x27c   : > { %2009 = vst [vmem:[#allocation3 + $0x38] sm:$0xff] %v2005_v28  ;;  %6174 = vtanh.f32 %v2005_v28  ;;  %10482 = vst [vmem:[#allocation27_spill] sm:$0xff] %v7623_v38  ;;  %v7634_v6 = vpop.permute.xlu1 %2512 }
 0x27d   : > { %10483 = vst [vmem:[#allocation28_spill] sm:$0xff] %v7634_v6 }
 0x27f   : > { %v6161_v22 = vpop.eup %6160  ;;  %v7647_v11 = vpop.permute.xlu0 %2506 }
 0x280   : > { %v6163_v32 = vpop.eup %6162  ;;  %v7615_v46 = vmul.f32 %v6161_v22, %v6153_v35  ;;  %10484 = vst [vmem:[#allocation29_spill] sm:$0xff] %v7647_v11  ;;  %v2046_v35 = vmul.f32 %v7595_v10, %v7595_v10  ;;  %v7652_v28 = vpop.permute.xlu1 %2492 }
 0x281   : > { %v6165_v29 = vpop.eup %6164  ;;  %v7617_v43 = vmul.f32 %v6163_v32, %v6155_v31  ;;  %10485 = vst [vmem:[#allocation30_spill] sm:$0xff] %v7652_v28 }
 0x282   : > { %v6167_v55 = vpop.eup %6166  ;;  %1566 = vst [vmem:[#allocation2 + $0x8] sm:$0xff] %v7615_v46  ;;  %v2034_v45 = vadd.f32 %v7615_v46, %v7599_v15  ;;  %v2045_v47 = vmul.f32 %v7615_v46, %v7615_v46 }
 0x283   : > { %v6169_v49 = vpop.eup %6168  ;;  %2019 = vst [vmem:[#allocation2 + $0x18] sm:$0xff] %v7617_v43  ;;  %v7657_v22 = vpop.permute.xlu0 %2514 }
 0x284   : > { %v6171_v3 = vpop.eup %6170  ;;  %v7625_v44 = vmul.f32 %v6169_v49, %v6157_v50  ;;  %v2035_v56 = vadd.f32 %v2034_v45, %v7595_v10  ;;  %v2052_v9 = vadd.f32 %v2045_v47, %v2044_v12  ;;  %10486 = vst [vmem:[#allocation31_spill] sm:$0xff] %v7657_v22  ;;  %v7665_v49 = vld [vmem:[#allocation4 + $0x40] sm:$0xff] }
 0x285   : > { %v6173_v7 = vpop.eup %6172  ;;  %v7632_v2 = vmul.f32 %v6171_v3, %v6159_v16  ;;  %v2047_v16 = vmul.f32 %v7617_v43, %v7617_v43 }
 0x286   : > { %v6175_v27 = vpop.eup %6174  ;;  %2020 = vst [vmem:[#allocation2 + $0x30] sm:$0xff] %v7625_v44  ;;  %v7637_v24 = vmul.f32 %v6173_v7, %v6165_v29  ;;  %v2036_v14 = vadd.f32 %v2035_v56, %v7617_v43  ;;  %v2053_v50 = vadd.f32 %v2052_v9, %v2046_v35  ;;  %v7659_v29 = vpop.permute.xlu1 %2500 }
 0x287   : > { %1567 = vst [vmem:[#allocation2 + $0x20] sm:$0xff] %v7632_v2  ;;  %v7641_v53 = vmul.f32 %v6175_v27, %v6167_v55  ;;  %10487 = vst [vmem:[#allocation32_spill] sm:$0xff] %v7659_v29  ;;  %v7661_v55 = vpop.permute.xlu0 %2494  ;;  %v7679_v27 = vld [vmem:[#allocation4 + $0x38] sm:$0xff]  ;;  %v2048_v35 = vmul.f32 %v7632_v2, %v7632_v2 }
 0x288   : > { %1568 = vst [vmem:[#allocation2 + $0x28] sm:$0xff] %v7637_v24  ;;  %2037 = vadd.xlane.f32.xlu1 %v2036_v14  ;;  %v2039_v18 = vadd.f32 %v7637_v24, %v7632_v2  ;;  %v2054_v32 = vadd.f32 %v2053_v50, %v2047_v16  ;;  %10488 = vst [vmem:[#allocation33_spill] sm:$0xff] %v7661_v55  ;;  %v7697_v50 = vld [vmem:[#allocation4 + $0x68] sm:$0xff] }
 0x289   : > { %2021 = vst [vmem:[#allocation2 + $0x38] sm:$0xff] %v7641_v53  ;;  %10495 = vst [vmem:[#allocation40_spill] sm:$0xff] %v7679_v27 }
 0x28a   : > { %v2040_v23 = vadd.f32 %v2039_v18, %v7625_v44  ;;  %v7663_v45 = vpop.permute.xlu1 %2508  ;;  %v7685_v18 = vld [vmem:[#allocation4 + $0x60] sm:$0xff]  ;;  %10500 = vst [vmem:[#allocation45_spill] sm:$0xff] %v7697_v50 }
 0x28b   : > { %10489 = vst [vmem:[#allocation34_spill] sm:$0xff] %v7663_v45  ;;  %v7669_v3 = vpop.permute.xlu0 %2502  ;;  %10497 = vst [vmem:[#allocation42_spill] sm:$0xff] %v7685_v18 }
 0x28c   : > { %v2041_v31 = vadd.f32 %v2040_v23, %v7641_v53  ;;  %10490 = vst [vmem:[#allocation35_spill] sm:$0xff] %v7669_v3  ;;  %v7721_v3 = vld [vmem:[#allocation4 + $0x20] sm:$0xff] }
 0x28e   : > { %2042 = vadd.xlane.f32.xlu0 %v2041_v31  ;;  %v7671_v56 = vpop.permute.xlu1 %2516  ;;  %v2049_v31 = vmul.f32 %v7637_v24, %v7637_v24 }
 0x28f   : > { %10491 = vst [vmem:[#allocation36_spill] sm:$0xff] %v7671_v56  ;;  %v7673_v12 = vpop.permute.xlu0 %2510 }
 0x290   : > { %10492 = vst [vmem:[#allocation37_spill] sm:$0xff] %v7673_v12  ;;  %v7711_v12 = vld [vmem:[#allocation4 + $0x78] sm:$0xff] }
 0x291   : > { %10504 = vst [vmem:[#allocation49_spill] sm:$0xff] %v7711_v12 }
 0x292   : > { %2055 = vadd.xlane.f32.xlu0 %v2054_v32  ;;  %v7675_v47 = vpop.permute.xlu1 %2630  ;;  %v2057_v32 = vadd.f32 %v2049_v31, %v2048_v35  ;;  %v2051_v35 = vmul.f32 %v7641_v53, %v7641_v53 }
 0x293   : > { %10493 = vst [vmem:[#allocation38_spill] sm:$0xff] %v7675_v47  ;;  %v7677_v7 = vpop.permute.xlu0 %2518  ;;  %v7703_v47 = vld [vmem:[#allocation4 + $0x70] sm:$0xff] }
 0x294   : > { %10494 = vst [vmem:[#allocation39_spill] sm:$0xff] %v7677_v7  ;;  %10502 = vst [vmem:[#allocation47_spill] sm:$0xff] %v7703_v47 }
 0x296   : > { %v7683_v14 = vpop.permute.xlu1 %2638 }
 0x297   : > { %10496 = vst [vmem:[#allocation41_spill] sm:$0xff] %v7683_v14  ;;  %v7689_v9 = vpop.permute.xlu0 %2632 }
 0x298   : > { %10498 = vst [vmem:[#allocation43_spill] sm:$0xff] %v7689_v9  ;;  %v2050_v9 = vmul.f32 %v7625_v44, %v7625_v44 }
 0x299   : > { %2942 = vrot.lane.b32.xlu1 %v7665_v49, %s6508_s15 }
 0x29a   : > { %v7691_v23 = vpop.permute.xlu1 %2646  ;;  %v2058_v14 = vadd.f32 %v2057_v32, %v2050_v9  ;;  %v7727_v32 = vld [vmem:[#allocation4 + $0x28] sm:$0xff] }
 0x29b   : > { %10499 = vst [vmem:[#allocation44_spill] sm:$0xff] %v7691_v23  ;;  %v7701_v16 = vpop.permute.xlu0 %2640 }
 0x29c   : > { %10501 = vst [vmem:[#allocation46_spill] sm:$0xff] %v7701_v16  ;;  %v2059_v16 = vadd.f32 %v2058_v14, %v2051_v35 }
 0x29e   : > { %v7707_v23 = vpop.permute.xlu1 %2654 }
 0x29f   : > { %10503 = vst [vmem:[#allocation48_spill] sm:$0xff] %v7707_v23  ;;  %v7715_v45 = vpop.permute.xlu0 %2648 }
 0x2a0   : > { %10505 = vst [vmem:[#allocation50_spill] sm:$0xff] %v7715_v45  ;;  %v7733_v45 = vld [vmem:[#allocation4 + $0x30] sm:$0xff] }
 0x2a1   : > { %10509 = vst [vmem:[#allocation54_spill] sm:$0xff] %v7733_v45 }
 0x2a2   : > { %v7719_v31 = vpop.permute.xlu1 %2634 }
 0x2a3   : > { %10506 = vst [vmem:[#allocation51_spill] sm:$0xff] %v7719_v31  ;;  %v7725_v9 = vpop.permute.xlu0 %2656 }
 0x2a4   : > { %10507 = vst [vmem:[#allocation52_spill] sm:$0xff] %v7725_v9 }
 0x2a6   : > { %v7731_v23 = vpop.permute.xlu1 %2642 }
 0x2a7   : > { %10508 = vst [vmem:[#allocation53_spill] sm:$0xff] %v7731_v23  ;;  %v7737_v14 = vpop.permute.xlu0 %2636  ;;  %v7749_v23 = vld [vmem:[#allocation4 + $0x48] sm:$0xff] }
 0x2a8   : > { %2964 = vrot.lane.b32.xlu0 %v7679_v27, %s6508_s15  ;;  %10510 = vst [vmem:[#allocation55_spill] sm:$0xff] %v7737_v14 }
 0x2aa   : > { %v7739_v35 = vpop.permute.xlu1 %2650 }
 0x2ab   : > { %10511 = vst [vmem:[#allocation56_spill] sm:$0xff] %v7739_v35  ;;  %v7757_v35 = vld [vmem:[#allocation4 + $0x50] sm:$0xff] }
 0x2ac   : > { %2944 = vrot.lane.b32.xlu0 %v7685_v18, %s6508_s15 }
 0x2ae   : > { %v7747_v31 = vpop.permute.xlu1 %2658 }
 0x2af   : > { %10513 = vst [vmem:[#allocation58_spill] sm:$0xff] %v7747_v31  ;;  %v7765_v31 = vld [vmem:[#allocation4 + $0x58] sm:$0xff] }
 0x2b0   : > { %2952 = vrot.lane.b32.xlu0 %v7697_v50, %s6508_s15 }
 0x2b4   : > { %2960 = vrot.lane.b32.xlu0 %v7703_v47, %s6508_s15 }
 0x2b8   : > { %2968 = vrot.lane.b32.xlu0 %v7711_v12, %s6508_s15 }
 0x2bc   : > { %3082 = vrot.lane.b32.xlu0 %v7721_v3, %s6509_s18 }
 0x2bd   : > { %2060 = vadd.xlane.f32.xlu1 %v2059_v16  ;;  %v7743_v16 = vpop.permute.xlu0 %2644 }
 0x2be   : > { %10512 = vst [vmem:[#allocation57_spill] sm:$0xff] %v7743_v16  ;;  %v7761_v16 = vpop.permute.xlu1 %2796 }
 0x2bf   : > { %10515 = vst [vmem:[#allocation60_spill] sm:$0xff] %v7761_v16 }
 0x2c0   : > { %3090 = vrot.lane.b32.xlu0 %v7727_v32, %s6509_s18 }
 0x2c1   : > { %v7755_v14 = vpop.permute.xlu0 %2652 }
 0x2c2   : > { %10514 = vst [vmem:[#allocation59_spill] sm:$0xff] %v7755_v14  ;;  %v7773_v14 = vpop.permute.xlu1 %2804 }
 0x2c3   : > { %10517 = vst [vmem:[#allocation62_spill] sm:$0xff] %v7773_v14 }
 0x2c4   : > { %3098 = vrot.lane.b32.xlu0 %v7733_v45, %s6509_s18 }
 0x2c5   : > { %v7769_v9 = vpop.permute.xlu0 %2660 }
 0x2c6   : > { %10516 = vst [vmem:[#allocation61_spill] sm:$0xff] %v7769_v9  ;;  %v7787_v9 = vld [vmem:[#allocation4 + $0x10] sm:$0xff] }
 0x2c8   : > { %3106 = vrot.lane.b32.xlu0 %v7679_v27, %s6509_s18  ;;  %v7795_v27 = vld [vmem:[#allocation4 + $0x18] sm:$0xff] }
 0x2c9   : > { %v7779_v16 = vpop.permute.xlu0 %2798 }
 0x2ca   : > { %10518 = vst [vmem:[#allocation63_spill] sm:$0xff] %v7779_v16 }
 0x2cc   : > { %3086 = vrot.lane.b32.xlu0 %v7685_v18, %s6509_s18  ;;  %v7785_v18 = vpop.permute.xlu1 %2812 }
 0x2cd   : > { %10519 = vst [vmem:[#allocation64_spill] sm:$0xff] %v7785_v18  ;;  %v7791_v14 = vpop.permute.xlu0 %2806 }
 0x2ce   : > { %2950 = vrot.lane.b32.xlu1 %v7749_v23, %s6508_s15  ;;  %10520 = vst [vmem:[#allocation65_spill] sm:$0xff] %v7791_v14 }
 0x2d0   : > { %3094 = vrot.lane.b32.xlu0 %v7697_v50, %s6509_s18  ;;  %v7775_v50 = vld [vmem:[#allocation4] sm:$0xff] }
 0x2d1   : > { %v7799_v16 = vpop.permute.xlu0 %2814 }
 0x2d2   : > { %2958 = vrot.lane.b32.xlu1 %v7757_v35, %s6508_s15  ;;  %10522 = vst [vmem:[#allocation67_spill] sm:$0xff] %v7799_v16 }
 0x2d4   : > { %3102 = vrot.lane.b32.xlu0 %v7703_v47, %s6509_s18  ;;  %v7781_v47 = vld [vmem:[#allocation4 + $0x8] sm:$0xff] }
 0x2d5   : > { %v7807_v29 = vpop.permute.xlu0 %2822 }
 0x2d6   : > { %2966 = vrot.lane.b32.xlu1 %v7765_v31, %s6508_s15  ;;  %10524 = vst [vmem:[#allocation69_spill] sm:$0xff] %v7807_v29 }
 0x2d8   : > { %3110 = vrot.lane.b32.xlu0 %v7711_v12, %s6509_s18  ;;  %v7793_v12 = vpop.permute.xlu1 %2820 }
 0x2d9   : > { %10521 = vst [vmem:[#allocation66_spill] sm:$0xff] %v7793_v12  ;;  %v7813_v12 = vpop.permute.xlu0 %2802 }
 0x2da   : > { %3080 = vrot.lane.b32.xlu1 %v7775_v50, %s6509_s18  ;;  %10526 = vst [vmem:[#allocation71_spill] sm:$0xff] %v7813_v12 }
 0x2dc   : > { %v7803_v18 = vpop.permute.xlu1 %2800 }
 0x2dd   : > { %10523 = vst [vmem:[#allocation68_spill] sm:$0xff] %v7803_v18  ;;  %v7819_v7 = vpop.permute.xlu0 %2810 }
 0x2de   : > { %3088 = vrot.lane.b32.xlu1 %v7781_v47, %s6509_s18  ;;  %10528 = vst [vmem:[#allocation73_spill] sm:$0xff] %v7819_v7 }
 0x2e0   : > { %v7809_v14 = vpop.permute.xlu1 %2808 }
 0x2e1   : > { %10525 = vst [vmem:[#allocation70_spill] sm:$0xff] %v7809_v14  ;;  %v7823_v55 = vpop.permute.xlu0 %2818 }
 0x2e2   : > { %3096 = vrot.lane.b32.xlu1 %v7787_v9, %s6509_s18  ;;  %10530 = vst [vmem:[#allocation75_spill] sm:$0xff] %v7823_v55 }
 0x2e4   : > { %v7817_v16 = vpop.permute.xlu1 %2816 }
 0x2e5   : > { %10527 = vst [vmem:[#allocation72_spill] sm:$0xff] %v7817_v16  ;;  %v7827_v29 = vpop.permute.xlu0 %2826 }
 0x2e6   : > { %3104 = vrot.lane.b32.xlu1 %v7795_v27, %s6509_s18  ;;  %10532 = vst [vmem:[#allocation77_spill] sm:$0xff] %v7827_v29 }
 0x2e8   : > { %v7821_v18 = vpop.permute.xlu1 %2824 }
 0x2e9   : > { %10529 = vst [vmem:[#allocation74_spill] sm:$0xff] %v7821_v18  ;;  %v7831_v28 = vpop.permute.xlu0 %2940 }
 0x2ea   : > { %3084 = vrot.lane.b32.xlu1 %v7665_v49, %s6509_s18  ;;  %10534 = vst [vmem:[#allocation79_spill] sm:$0xff] %v7831_v28 }
 0x2ec   : > { %v7825_v56 = vpop.permute.xlu1 %2938 }
 0x2ed   : > { %10531 = vst [vmem:[#allocation76_spill] sm:$0xff] %v7825_v56  ;;  %v7835_v45 = vpop.permute.xlu0 %2948 }
 0x2ee   : > { %3092 = vrot.lane.b32.xlu1 %v7749_v23, %s6509_s18  ;;  %10536 = vst [vmem:[#allocation81_spill] sm:$0xff] %v7835_v45 }
 0x2f0   : > { %v7829_v14 = vpop.permute.xlu1 %2946 }
 0x2f1   : > { %10533 = vst [vmem:[#allocation78_spill] sm:$0xff] %v7829_v14  ;;  %v7839_v16 = vpop.permute.xlu0 %2956 }
 0x2f2   : > { %3100 = vrot.lane.b32.xlu1 %v7757_v35, %s6509_s18  ;;  %10538 = vst [vmem:[#allocation83_spill] sm:$0xff] %v7839_v16 }
 0x2f4   : > { %v7833_v12 = vpop.permute.xlu1 %2954 }
 0x2f5   : > { %10535 = vst [vmem:[#allocation80_spill] sm:$0xff] %v7833_v12 }
 0x2f6   : > { %3108 = vrot.lane.b32.xlu1 %v7765_v31, %s6509_s18 }
 0x2f8   : > { %v7837_v11 = vpop.permute.xlu1 %2962 }
 0x2f9   : > { %10537 = vst [vmem:[#allocation82_spill] sm:$0xff] %v7837_v11 }
 0x315   : > { %v2038_v7 = vpop.xlane.xlu1 %2037 }
 0x316   : > { %v2062_v37 = vmul.f32 0.001953125, %v2038_v7 }
 0x318   : > { %v2066_v56 = vmul.f32 %v2062_v37, %v2062_v37  ;;  %v2070_v14 = vsub.f32 %v7599_v15, %v2062_v37  ;;  %v2071_v28 = vsub.f32 %v7615_v46, %v2062_v37  ;;  %v2072_v45 = vsub.f32 %v7595_v10, %v2062_v37 }
 0x31b   : > { %v2043_v18 = vpop.xlane.xlu0 %2042 }
 0x31f   : > { %v2056_v55 = vpop.xlane.xlu0 %2055 }
 0x320   : > { %v2064_v22 = vmul.f32 0.001953125, %v2056_v55  ;;  %v2073_v55 = vsub.f32 %v7617_v43, %v2062_v37 }
 0x322   : > { %v2068_v6 = vsub.f32 %v2064_v22, %v2066_v56 }
 0x324   : > { %v2078_v29 = vadd.f32 1e-05, %v2068_v6 }
 0x326   : > { %6176 = vrsqrt.f32 %v2078_v29 }
 0x330   : > { %v6177_v12 = vpop.eup %6176 }
 0x331   : > { %v2082_v33 = vmul.f32 %v6177_v12, %v2070_v14  ;;  %v2083_v11 = vmul.f32 %v6177_v12, %v2071_v28  ;;  %v2084_v7 = vmul.f32 %v6177_v12, %v2072_v45  ;;  %v2085_v29 = vmul.f32 %v6177_v12, %v2073_v55  ;;  %v7869_v28 = vpop.permute.xlu1 %2942 }
 0x332   : > { %10543 = vst [vmem:[#allocation88_spill] sm:$0xff] %v7869_v28  ;;  %v2063_v45 = vmul.f32 0.001953125, %v2043_v18  ;;  %v2249_v28 = vsel %vm134_vm0, %v7473_v17, %v7457_v59 }
 0x333   : > { %v2100_v16 = vmul.f32 %v7449_v51, %v2082_v33  ;;  %v2101_v38 = vmul.f32 %v7449_v51, %v2083_v11  ;;  %v2102_v46 = vmul.f32 %v7449_v51, %v2084_v7  ;;  %v2103_v11 = vmul.f32 %v7449_v51, %v2085_v29 }
 0x334   : > { %v2067_v56 = vmul.f32 %v2063_v45, %v2063_v45  ;;  %v2074_v18 = vsub.f32 %v7632_v2, %v2063_v45  ;;  %v2076_v55 = vsub.f32 %v7625_v44, %v2063_v45 }
 0x335   : > { %v2118_v22 = vadd.f32 %v7447_v57, %v2100_v16  ;;  %v2119_v15 = vadd.f32 %v7447_v57, %v2101_v38  ;;  %v2120_v33 = vadd.f32 %v7447_v57, %v2102_v46  ;;  %v2121_v43 = vadd.f32 %v7447_v57, %v2103_v11 }
 0x336   : > { %v2075_v16 = vsub.f32 %v7637_v24, %v2063_v45  ;;  %v2077_v11 = vsub.f32 %v7641_v53, %v2063_v45 }
 0x337   : > { %v7848_v6 = vmax.f32 %v2118_v22, 0.0  ;;  %v7854_v10 = vmax.f32 %v2119_v15, 0.0  ;;  %v7860_v37 = vmax.f32 %v2120_v33, 0.0  ;;  %v7865_v38 = vmax.f32 %v2121_v43, 0.0 }
 0x339   : > { %10539 = vst [vmem:[#allocation84_spill] sm:$0xff] %v7848_v6  ;;  %2151 = vrot.lane.b32.xlu1 %v7848_v6, %s6503_s26  ;;  %10540 = vst [vmem:[#allocation85_spill] sm:$0xff] %v7854_v10 }
 0x33a   : > { %10541 = vst [vmem:[#allocation86_spill] sm:$0xff] %v7860_v37  ;;  %10542 = vst [vmem:[#allocation87_spill] sm:$0xff] %v7865_v38 }
 0x33d   : > { %2155 = vrot.lane.b32.xlu1 %v7854_v10, %s6503_s26 }
 0x341   : > { %2159 = vrot.lane.b32.xlu1 %v7860_v37, %s6503_s26 }
 0x345   : > { %2163 = vrot.lane.b32.xlu1 %v7865_v38, %s6503_s26 }
 0x349   : > { %2293 = vrot.lane.b32.xlu1 %v7848_v6, %s6504_s27 }
 0x34a   : > { %v2061_v51 = vpop.xlane.xlu1 %2060 }
 0x34b   : > { %v2065_v12 = vmul.f32 0.001953125, %v2061_v51 }
 0x34d   : > { %2297 = vrot.lane.b32.xlu1 %v7854_v10, %s6504_s27  ;;  %v2069_v57 = vsub.f32 %v2065_v12, %v2067_v56 }
 0x34f   : > { %v2079_v14 = vadd.f32 1e-05, %v2069_v57 }
 0x351   : > { %6178 = vrsqrt.f32 %v2079_v14  ;;  %2301 = vrot.lane.b32.xlu1 %v7860_v37, %s6504_s27  ;;  %v7911_v14 = vpop.permute.xlu1 %2950 }
 0x352   : > { %10547 = vst [vmem:[#allocation92_spill] sm:$0xff] %v7911_v14 }
 0x355   : > { %2305 = vrot.lane.b32.xlu1 %v7865_v38, %s6504_s27 }
 0x359   : > { %2435 = vrot.lane.b32.xlu1 %v7848_v6, %s6505_s28 }
 0x35b   : > { %v6179_v7 = vpop.eup %6178 }
 0x35c   : > { %v2086_v22 = vmul.f32 %v6179_v7, %v2074_v18  ;;  %v2087_v15 = vmul.f32 %v6179_v7, %v2075_v16  ;;  %v2088_v33 = vmul.f32 %v6179_v7, %v2076_v55  ;;  %v2089_v51 = vmul.f32 %v6179_v7, %v2077_v11 }
 0x35d   : > { %2439 = vrot.lane.b32.xlu1 %v7854_v10, %s6505_s28 }
 0x35e   : > { %v2104_v46 = vmul.f32 %v7443_v48, %v2086_v22  ;;  %v2105_v29 = vmul.f32 %v7443_v48, %v2087_v15  ;;  %v2106_v24 = vmul.f32 %v7443_v48, %v2088_v33  ;;  %v2107_v45 = vmul.f32 %v7443_v48, %v2089_v51  ;;  %v7921_v48 = vpop.permute.xlu1 %2958  ;;  %v7963_v15 = vpop.permute.xlu0 %2964 }
 0x35f   : > { %10549 = vst [vmem:[#allocation94_spill] sm:$0xff] %v7921_v48  ;;  %10555 = vst [vmem:[#allocation100_spill] sm:$0xff] %v7963_v15 }
 0x360   : > { %v2122_v43 = vadd.f32 %v7453_v52, %v2104_v46  ;;  %v2123_v44 = vadd.f32 %v7453_v52, %v2105_v29  ;;  %v2124_v53 = vadd.f32 %v7453_v52, %v2106_v24  ;;  %v2125_v57 = vadd.f32 %v7453_v52, %v2107_v45 }
 0x361   : > { %2443 = vrot.lane.b32.xlu1 %v7860_v37, %s6505_s28 }
 0x362   : > { %v7892_v2 = vmax.f32 %v2122_v43, 0.0  ;;  %v7900_v56 = vmax.f32 %v2123_v44, 0.0  ;;  %v7908_v12 = vmax.f32 %v2124_v53, 0.0  ;;  %v7917_v18 = vmax.f32 %v2125_v57, 0.0  ;;  %v7929_v52 = vpop.permute.xlu1 %2966  ;;  %v7969_v46 = vpop.permute.xlu0 %2944 }
 0x363   : > { %10550 = vst [vmem:[#allocation95_spill] sm:$0xff] %v7929_v52  ;;  %10556 = vst [vmem:[#allocation101_spill] sm:$0xff] %v7969_v46  ;;  %v2236_v46 = vsel %vm134_vm0, %v7463_v63, %v7467_v1 }
 0x364   : > { %10544 = vst [vmem:[#allocation89_spill] sm:$0xff] %v7892_v2  ;;  %2153 = vrot.lane.b32.xlu0 %v7892_v2, %s6503_s26  ;;  %10545 = vst [vmem:[#allocation90_spill] sm:$0xff] %v7900_v56 }
 0x365   : > { %2447 = vrot.lane.b32.xlu1 %v7865_v38, %s6505_s28  ;;  %10546 = vst [vmem:[#allocation91_spill] sm:$0xff] %v7908_v12  ;;  %10548 = vst [vmem:[#allocation93_spill] sm:$0xff] %v7917_v18 }
 0x366   : > { %v7935_v16 = vpop.permute.xlu1 %3080  ;;  %v7977_v33 = vpop.permute.xlu0 %2952 }
 0x367   : > { %10551 = vst [vmem:[#allocation96_spill] sm:$0xff] %v7935_v16  ;;  %10558 = vst [vmem:[#allocation103_spill] sm:$0xff] %v7977_v33  ;;  %v10584_v33 = vld [vmem:[#allocation16_spill] sm:$0xff] }
 0x368   : > { %2157 = vrot.lane.b32.xlu0 %v7900_v56, %s6503_s26 }
 0x369   : > { %2577 = vrot.lane.b32.xlu1 %v7848_v6, %s6506_s29 }
 0x36a   : > { %v7945_v7 = vpop.permute.xlu1 %3088  ;;  %v7989_v43 = vpop.permute.xlu0 %2960 }
 0x36b   : > { %10552 = vst [vmem:[#allocation97_spill] sm:$0xff] %v7945_v7  ;;  %10560 = vst [vmem:[#allocation105_spill] sm:$0xff] %v7989_v43 }
 0x36c   : > { %2161 = vrot.lane.b32.xlu0 %v7908_v12, %s6503_s26 }
 0x36d   : > { %2581 = vrot.lane.b32.xlu1 %v7854_v10, %s6506_s29 }
 0x36e   : > { %v7951_v55 = vpop.permute.xlu1 %3096  ;;  %v7997_v24 = vpop.permute.xlu0 %2968 }
 0x36f   : > { %10553 = vst [vmem:[#allocation98_spill] sm:$0xff] %v7951_v55  ;;  %10562 = vst [vmem:[#allocation107_spill] sm:$0xff] %v7997_v24 }
 0x370   : > { %2165 = vrot.lane.b32.xlu0 %v7917_v18, %s6503_s26 }
 0x371   : > { %2585 = vrot.lane.b32.xlu1 %v7860_v37, %s6506_s29 }
 0x372   : > { %v7961_v22 = vpop.permute.xlu1 %3104  ;;  %v8007_v53 = vpop.permute.xlu0 %3082 }
 0x373   : > { %10554 = vst [vmem:[#allocation99_spill] sm:$0xff] %v7961_v22  ;;  %10564 = vst [vmem:[#allocation109_spill] sm:$0xff] %v8007_v53 }
 0x374   : > { %2295 = vrot.lane.b32.xlu0 %v7892_v2, %s6504_s27 }
 0x375   : > { %2589 = vrot.lane.b32.xlu1 %v7865_v38, %s6506_s29 }
 0x376   : > { %v7971_v29 = vpop.permute.xlu1 %3084  ;;  %v8017_v57 = vpop.permute.xlu0 %3090 }
 0x377   : > { %10557 = vst [vmem:[#allocation102_spill] sm:$0xff] %v7971_v29  ;;  %10565 = vst [vmem:[#allocation110_spill] sm:$0xff] %v8017_v57 }
 0x378   : > { %2299 = vrot.lane.b32.xlu0 %v7900_v56, %s6504_s27 }
 0x379   : > { %2743 = vrot.lane.b32.xlu1 %v7848_v6, %s6507_s30 }
 0x37a   : > { %v7983_v11 = vpop.permute.xlu1 %3092 }
 0x37b   : > { %10559 = vst [vmem:[#allocation104_spill] sm:$0xff] %v7983_v11  ;;  %v8027_v11 = vpop.permute.xlu0 %3098 }
 0x37c   : > { %2303 = vrot.lane.b32.xlu0 %v7908_v12, %s6504_s27  ;;  %10566 = vst [vmem:[#allocation111_spill] sm:$0xff] %v8027_v11 }
 0x37d   : > { %2747 = vrot.lane.b32.xlu1 %v7854_v10, %s6507_s30 }
 0x37e   : > { %v7991_v44 = vpop.permute.xlu1 %3100 }
 0x37f   : > { %10561 = vst [vmem:[#allocation106_spill] sm:$0xff] %v7991_v44  ;;  %v6002_v44 = vld [vmem:[%s10319_s6 + $0x4] ss:$16 sps:$4 sm:$0xff]   ;;  %v8042_v55 = vpop.permute.xlu0 %3106 }
 0x380   : > { %2307 = vrot.lane.b32.xlu0 %v7917_v18, %s6504_s27  ;;  %3701 = vmatprep.mubr.bf16.mxu0 %v6002_v44  ;;  %10567 = vst [vmem:[#allocation112_spill] sm:$0xff] %v8042_v55  ;;  %s5379_s27 = scalar_lea.vmem (!%p5704_p1), %s10325_s12, %s5765_s13 }
 0x381   : > { %2751 = vrot.lane.b32.xlu1 %v7860_v37, %s6507_s30  ;;  %4501 = vmatprep.mubr.bf16.mxu1 %v6002_v44 }
 0x382   : > { %v8003_v51 = vpop.permute.xlu1 %3108 }
 0x383   : > { %10563 = vst [vmem:[#allocation108_spill] sm:$0xff] %v8003_v51  ;;  %v8052_v52 = vpop.permute.xlu0 %3086 }
 0x384   : > { %2437 = vrot.lane.b32.xlu0 %v7892_v2, %s6505_s28  ;;  %10568 = vst [vmem:[#allocation113_spill] sm:$0xff] %v8052_v52  ;;  %v2150_v52 = vld [vmem:[%s10314_s1] sm:$0xf] }
 0x385   : > { %2755 = vrot.lane.b32.xlu1 %v7865_v38, %s6507_s30  ;;  %v8087_v48 = vrot.slane %v2150_v52, %v6742_v25  ;;  %v8106_v11 = vrot.slane %v2150_v52, %v6731_v20  ;;  %v8115_v24 = vrot.slane %v2150_v52, %v6748_v30 }
 0x387   : > { %v8064_v44 = vpop.permute.xlu0 %3094 }
 0x388   : > { %2441 = vrot.lane.b32.xlu0 %v7900_v56, %s6505_s28  ;;  %10570 = vst [vmem:[#allocation115_spill] sm:$0xff] %v8064_v44  ;;  %v2241_v44 = vsel %vm134_vm0, %v7465_v0, %v7469_v61 }
 0x389   : > { %2885 = vrot.lane.b32.xlu1 %v7848_v6, %s6508_s15 }
 0x38b   : > { %v8099_v14 = vpop.permute.xlu0 %3102 }
 0x38c   : > { %2445 = vrot.lane.b32.xlu0 %v7908_v12, %s6505_s28  ;;  %10573 = vst [vmem:[#allocation118_spill] sm:$0xff] %v8099_v14  ;;  %v5569_v14 = vld [vmem:[%s10314_s1 + $0x4] sm:$0xf] }
 0x38d   : > { %2889 = vrot.lane.b32.xlu1 %v7854_v10, %s6508_s15  ;;  %v8195_v15 = vrot.slane %v5569_v14, %v6755_v34 }
 0x390   : > { %2449 = vrot.lane.b32.xlu0 %v7917_v18, %s6505_s28 }
 0x391   : > { %2893 = vrot.lane.b32.xlu1 %v7860_v37, %s6508_s15 }
 0x394   : > { %2579 = vrot.lane.b32.xlu0 %v7892_v2, %s6506_s29 }
 0x395   : > { %2897 = vrot.lane.b32.xlu1 %v7865_v38, %s6508_s15 }
 0x398   : > { %2583 = vrot.lane.b32.xlu0 %v7900_v56, %s6506_s29 }
 0x399   : > { %3027 = vrot.lane.b32.xlu1 %v7848_v6, %s6509_s18 }
 0x39c   : > { %2587 = vrot.lane.b32.xlu0 %v7908_v12, %s6506_s29 }
 0x39d   : > { %3031 = vrot.lane.b32.xlu1 %v7854_v10, %s6509_s18 }
 0x3a0   : > { %2591 = vrot.lane.b32.xlu0 %v7917_v18, %s6506_s29 }
 0x3a1   : > { %3035 = vrot.lane.b32.xlu1 %v7860_v37, %s6509_s18 }
 0x3a4   : > { %2745 = vrot.lane.b32.xlu0 %v7892_v2, %s6507_s30 }
 0x3a5   : > { %3039 = vrot.lane.b32.xlu1 %v7865_v38, %s6509_s18 }
 0x3a8   : > { %2749 = vrot.lane.b32.xlu0 %v7900_v56, %s6507_s30 }
 0x3a9   : > { %3169 = vrot.lane.b32.xlu1 %v7848_v6, %s6510_s22 }
 0x3ab   : > { %v8011_v45 = vpop.permute.xlu1 %2151 }
 0x3ac   : > { %2753 = vrot.lane.b32.xlu0 %v7908_v12, %s6507_s30 }
 0x3ad   : > { %3173 = vrot.lane.b32.xlu1 %v7854_v10, %s6510_s22  ;;  %v10586_v10 = vld [vmem:[#allocation19_spill] sm:$0xff] }
 0x3af   : > { %v8019_v29 = vpop.permute.xlu1 %2155 }
 0x3b0   : > { %2757 = vrot.lane.b32.xlu0 %v7917_v18, %s6507_s30 }
 0x3b1   : > { %3177 = vrot.lane.b32.xlu1 %v7860_v37, %s6510_s22 }
 0x3b3   : > { %v8025_v51 = vpop.permute.xlu1 %2159 }
 0x3b4   : > { %2887 = vrot.lane.b32.xlu0 %v7892_v2, %s6508_s15 }
 0x3b5   : > { %3181 = vrot.lane.b32.xlu1 %v7865_v38, %s6510_s22  ;;  %v8211_v38 = vrot.slane %v5569_v14, %v6742_v25 }
 0x3b7   : > { %v8036_v22 = vpop.permute.xlu1 %2163 }
 0x3b8   : > { %2891 = vrot.lane.b32.xlu0 %v7900_v56, %s6508_s15 }
 0x3b9   : > { %3222 = vrot.lane.b32.xlu1 %v7775_v50, %s6510_s22 }
 0x3bb   : > { %v8044_v16 = vpop.permute.xlu1 %2293 }
 0x3bc   : > { %2895 = vrot.lane.b32.xlu0 %v7908_v12, %s6508_s15 }
 0x3bd   : > { %3230 = vrot.lane.b32.xlu1 %v7781_v47, %s6510_s22 }
 0x3bf   : > { %v8050_v7 = vpop.permute.xlu1 %2297 }
 0x3c0   : > { %2899 = vrot.lane.b32.xlu0 %v7917_v18, %s6508_s15 }
 0x3c1   : > { %3238 = vrot.lane.b32.xlu1 %v7787_v9, %s6510_s22  ;;  %v8076_v9 = vrot.slane %v2150_v52, %v6755_v34  ;;  %v8132_v52 = vmul.f32 %v2249_v28, %v8087_v48  ;;  %v8170_v28 = vmul.f32 %v2236_v46, %v8115_v24 }
 0x3c3   : > { %v8058_v50 = vpop.permute.xlu1 %2301  ;;  %v8112_v57 = vmul.f32 %v2241_v44, %v8076_v9  ;;  %10577 = vst [vmem:[#allocation122_spill] sm:$0xff] %v8132_v52 }
 0x3c4   : > { %10569 = vst [vmem:[#allocation114_spill] sm:$0xff] %v8058_v50  ;;  %3029 = vrot.lane.b32.xlu0 %v7892_v2, %s6509_s18 }
 0x3c5   : > { %3246 = vrot.lane.b32.xlu1 %v7795_v27, %s6510_s22  ;;  %v2240_v27 = vsel %vm134_vm0, %v7459_v60, %v7463_v63  ;;  %10575 = vst [vmem:[#allocation120_spill] sm:$0xff] %v8112_v57 }
 0x3c6   : > { %v8109_v53 = vmul.f32 %v2240_v27, %v8076_v9  ;;  %v2245_v27 = vsel %vm134_vm0, %v7457_v59, %v7465_v0  ;;  %v2246_v59 = vsel %vm134_vm0, %v7455_v58, %v7471_v21 }
 0x3c7   : > { %v8066_v47 = vpop.permute.xlu1 %2305  ;;  %v8159_v0 = vmul.f32 %v2245_v27, %v8106_v11 }
 0x3c8   : > { %10571 = vst [vmem:[#allocation116_spill] sm:$0xff] %v8066_v47  ;;  %3033 = vrot.lane.b32.xlu0 %v7900_v56, %s6509_s18  ;;  %10574 = vst [vmem:[#allocation119_spill] sm:$0xff] %v8109_v53  ;;  %v2239_v53 = vsel %vm134_vm0, %v7485_v26, %v10584_v33 }
 0x3c9   : > { %3226 = vrot.lane.b32.xlu1 %v7665_v49, %s6510_s22  ;;  %v2248_v49 = vsel %vm134_vm0, %v7467_v1, %v7451_v54 }
 0x3ca   : > { %v8129_v44 = vmul.f32 %v2248_v49, %v8087_v48 }
 0x3cb   : > { %v8089_v55 = vpop.permute.xlu1 %2435 }
 0x3cc   : > { %10572 = vst [vmem:[#allocation117_spill] sm:$0xff] %v8089_v55  ;;  %3037 = vrot.lane.b32.xlu0 %v7908_v12, %s6509_s18  ;;  %10576 = vst [vmem:[#allocation121_spill] sm:$0xff] %v8129_v44  ;;  %v10589_v55 = vld [vmem:[#allocation18_spill] sm:$0xff] }
 0x3cd   : > { %3234 = vrot.lane.b32.xlu1 %v7749_v23, %s6510_s22  ;;  %v2244_v23 = vsel %vm134_vm0, %v7451_v54, %v7459_v60  ;;  %v2237_v54 = vsel %vm134_vm0, %v7469_v61, %v7473_v17  ;;  %v8151_v60 = vrot.slane %v5569_v14, %v6731_v20  ;;  %v2242_v61 = vsel %vm134_vm0, %v7471_v21, %v7475_v4  ;;  %v8167_v17 = vpop.permute.xlu0 %3110 }
 0x3ce   : > { %v8156_v63 = vmul.f32 %v2244_v23, %v8106_v11  ;;  %10579 = vst [vmem:[#allocation124_spill] sm:$0xff] %v8167_v17  ;;  %v10580_v23 = vld [vmem:[#allocation13_spill] sm:$0xff]  ;;  %v8184_v21 = vmul.f32 %v2246_v59, %v8106_v11  ;;  %v10582_v17 = vld [vmem:[#allocation14_spill] sm:$0xff]  ;;  %v8204_v37 = vmul.f32 %v2242_v61, %v8076_v9  ;;  %v2383_v61 = vsel %vm252_vm1, %v10586_v10, %v7561_v40 }
 0x3cf   : > { %v8134_v43 = vpop.permute.xlu1 %2439  ;;  %v2243_v27 = vsel %vm134_vm0, %v10580_v23, %v7485_v26  ;;  %v2250_v46 = vsel %vm134_vm0, %v10582_v17, %v7455_v58  ;;  %v10585_v58 = vld [vmem:[#allocation17_spill] sm:$0xff]  ;;  %v2238_v50 = vsel %vm134_vm0, %v7475_v4, %v10582_v17  ;;  %v2387_v17 = vsel %vm252_vm1, %v10589_v55, %v10586_v10 }
 0x3d0   : > { %10578 = vst [vmem:[#allocation123_spill] sm:$0xff] %v8134_v43  ;;  %3041 = vrot.lane.b32.xlu0 %v7917_v18, %s6509_s18  ;;  %v2382_v6 = vsel %vm252_vm1, %v10585_v58, %v7525_v13  ;;  %v2391_v43 = vsel %vm252_vm1, %v7565_v8, %v10589_v55  ;;  %v8242_v47 = vmul.f32 %v2250_v46, %v8087_v48 }
 0x3d1   : > { %3242 = vrot.lane.b32.xlu1 %v7757_v35, %s6510_s22  ;;  %v8173_v35 = vmul.f32 %v2237_v54, %v8115_v24  ;;  %v10583_v54 = vld [vmem:[#allocation12_spill] sm:$0xff]  ;;  %v8265_v26 = vmul.f32 %v2382_v6, %v8195_v15  ;;  %v8276_v46 = vmul.f32 %v2391_v43, %v8211_v38  ;;  %v2171_v10 = vsel %vm134_vm0, %v8011_v45, %v8019_v29  ;;  %v8297_v43 = vld [vmem:[%s10320_s7 + $0x10] sm:$0xff] }
 0x3d2   : > { %v2251_v49 = vsel %vm134_vm0, %v10584_v33, %v10583_v54  ;;  %v2247_v59 = vsel %vm134_vm0, %v10583_v54, %v10580_v23  ;;  %v10587_v23 = vld [vmem:[#allocation15_spill] sm:$0xff]  ;;  %v10588_v54 = vld [vmem:[#allocation20_spill] sm:$0xff]  ;;  %v8270_v33 = vmul.f32 %v2383_v61, %v8195_v15  ;;  %v8286_v55 = vmul.f32 %v2238_v50, %v8115_v24 }
 0x3d3   : > { %v8181_v1 = vpop.permute.xlu1 %2443  ;;  %v8249_v57 = vmul.f32 %v2251_v49, %v8087_v48  ;;  %v8254_v52 = vmul.f32 %v2247_v59, %v8106_v11  ;;  %v2386_v4 = vsel %vm252_vm1, %v10587_v23, %v10585_v58  ;;  %10591 = vst [vmem:[#allocation12_spill] sm:$0xff] %v8265_v26  ;;  %v8289_v59 = vmul.f32 %v2239_v53, %v8115_v24 }
 0x3d4   : > { %10581 = vst [vmem:[#allocation13_spill] sm:$0xff] %v8181_v1  ;;  %3171 = vrot.lane.b32.xlu0 %v7892_v2, %s6510_s22  ;;  %v8216_v2 = vmul.f32 %v2243_v27, %v8076_v9  ;;  %v2390_v1 = vsel %vm252_vm1, %v10588_v54, %v10587_v23  ;;  %10592 = vst [vmem:[#allocation16_spill] sm:$0xff] %v8270_v33  ;;  %v8302_v23 = vmul.f32 %v2386_v4, %v8151_v60 }
 0x3d5   : > { %3250 = vrot.lane.b32.xlu1 %v7765_v31, %s6510_s22  ;;  %v8233_v31 = vld [vmem:[%s10320_s7] sm:$0xff]  ;;  %v8273_v49 = vmul.f32 %v2390_v1, %v8211_v38  ;;  %v8292_v1 = vrot.slane %v5569_v14, %v6748_v30  ;;  %v2378_v53 = vsel %vm252_vm1, %v7525_v13, %v10588_v54  ;;  %v8314_v6 = vmul.f32 %v2387_v17, %v8151_v60  ;;  %v10596_v17 = vld [vmem:[#allocation22_spill] sm:$0xff] }
 0x3d6   : > { %v8235_v27 = vpop.permute.xlu0 %2153  ;;  %v2379_v4 = vsel %vm252_vm1, %v7561_v40, %v7565_v8  ;;  %v2197_v61 = vmul.f32 %v8106_v11, %v2171_v10  ;;  %v8347_v13 = vld [vmem:[%s10320_s7 + $0x20] sm:$0xff] }
 0x3d7   : > { %v8251_v44 = vpop.permute.xlu1 %2447  ;;  %10593 = vst [vmem:[#allocation17_spill] sm:$0xff] %v8273_v49  ;;  %v8334_v8 = vmul.f32 %v2378_v53, %v8292_v1  ;;  %v8350_v53 = vmul.f32 %v2379_v4, %v8292_v1  ;;  %v2173_v4 = vsel %vm134_vm0, %v8036_v22, %v8011_v45 }
 0x3d8   : > { %10590 = vst [vmem:[#allocation14_spill] sm:$0xff] %v8251_v44  ;;  %3175 = vrot.lane.b32.xlu0 %v7900_v56, %s6510_s22  ;;  %v10598_v44 = vld [vmem:[#allocation23_spill] sm:$0xff] }
 0x3d9   : > { %3414 = vperm.xlu1 %5987, %v8233_v31  }
 0x3da   : > { %v2158_v58 = vpop.permute.xlu0 %2157 }
 0x3db   : > { %v8308_v50 = vpop.permute.xlu1 %2577  ;;  %v2172_v14 = vsel %vm134_vm0, %v8235_v27, %v2158_v58 }
 0x3dc   : > { %10594 = vst [vmem:[#allocation19_spill] sm:$0xff] %v8308_v50  ;;  %v2201_v56 = vmul.f32 %v8106_v11, %v2172_v14  ;;  %3179 = vrot.lane.b32.xlu0 %v7908_v12, %s6510_s22  ;;  %v10595_v11 = vld [vmem:[#allocation21_spill] sm:$0xff]  ;;  %v2393_v14 = vsel %vm252_vm1, %v7605_v39, %v7574_v36  ;;  %v2384_v12 = vsel %vm252_vm1, %v10596_v17, %v7579_v41  ;;  %v10597_v50 = vld [vmem:[#allocation24_spill] sm:$0xff] }
 0x3dd   : > { %3424 = vperm.xlu1 %5987, %v8297_v43   ;;  %v2392_v10 = vsel %vm252_vm1, %v7589_v5, %v10595_v11  ;;  %v2385_v26 = vsel %vm252_vm1, %v10598_v44, %v10597_v50 }
 0x3de   : > { %v2162_v54 = vpop.permute.xlu0 %2161  ;;  %v2269_v40 = vpack.c.bf16 %v2201_v56, %v2197_v61  ;;  %v2388_v56 = vsel %vm252_vm1, %v10595_v11, %v10596_v17  ;;  %v2389_v61 = vsel %vm252_vm1, %v7574_v36, %v10598_v44  ;;  %v8379_v49 = vmul.f32 %v2392_v10, %v8211_v38 }
 0x3df   : > { %v8360_v33 = vpop.permute.xlu1 %2581  ;;  %v2167_v36 = vsel %vm134_vm0, %v8025_v51, %v8036_v22  ;;  %v2170_v45 = vsel %vm134_vm0, %v2158_v58, %v2162_v54  ;;  %v8392_v44 = vmul.f32 %v2384_v12, %v8195_v15  ;;  %v8395_v17 = vmul.f32 %v2385_v26, %v8195_v15  ;;  %v8408_v58 = vld [vmem:[%s10320_s7 + $0x30] sm:$0xff] }
 0x3e0   : > { %10599 = vst [vmem:[#allocation15_spill] sm:$0xff] %v8360_v33  ;;  %3183 = vrot.lane.b32.xlu0 %v7917_v18, %s6510_s22  ;;  %3669 = vmatprep.subr.bf16.mxu0 %v2269_v40  ;;  %v8382_v33 = vmul.f32 %v2393_v14, %v8211_v38  ;;  %v2380_v40 = vsel %vm252_vm1, %v7579_v41, %v7589_v5 }
 0x3e1   : > { %3434 = vperm.xlu1 %5987, %v8347_v13   ;;  %v2381_v22 = vsel %vm252_vm1, %v10597_v50, %v7605_v39  ;;  %v2169_v26 = vsel %vm134_vm0, %v8019_v29, %v8025_v51  ;;  %v2196_v11 = vmul.f32 %v8087_v48, %v2173_v4  ;;  %v2199_v39 = vmul.f32 %v8115_v24, %v2167_v36 }
 0x3e2   : > { %v2166_v12 = vpop.permute.xlu0 %2165  ;;  %v2202_v50 = vmul.f32 %v8076_v9, %v2170_v45  ;;  %v8429_v29 = vmul.f32 %v2388_v56, %v8151_v60  ;;  %v8432_v51 = vmul.f32 %v2389_v61, %v8151_v60  ;;  %v8450_v45 = vmul.f32 %v2380_v40, %v8292_v1 }
 0x3e3   : > { %v8415_v10 = vpop.permute.xlu1 %2585  ;;  %v2168_v41 = vsel %vm134_vm0, %v2162_v54, %v2166_v12  ;;  %v2174_v5 = vsel %vm134_vm0, %v2166_v12, %v8235_v27  ;;  %v5570_v27 = vld [vmem:[%s10314_s1 + $0x8] sm:$0xf]  ;;  %v2198_v54 = vmul.f32 %v8076_v9, %v2169_v26  ;;  %v2528_v40 = vsel %vm370_vm2, %v7597_v62, %v7609_v42 }
 0x3e4   : > { %10600 = vst [vmem:[#allocation20_spill] sm:$0xff] %v8415_v10  ;;  %v2200_v14 = vmul.f32 %v8087_v48, %v2174_v5  ;;  %v2203_v18 = vmul.f32 %v8115_v24, %v2168_v41  ;;  %3224 = vrot.lane.b32.xlu0 %v7721_v3, %s6510_s22  ;;  %v2283_v48 = vpack.c.bf16 %v8289_v59, %v8286_v55  ;;  %v10607_v3 = vld [vmem:[#allocation29_spill] sm:$0xff] }
 0x3e5   : > { %3444 = vperm.xlu1 %5987, %v8408_v58   ;;  %v8453_v55 = vmul.f32 %v2381_v22, %v8292_v1  ;;  %v8460_v9 = vrot.slane %v5570_v27, %v6731_v20  ;;  %v8463_v26 = vrot.slane %v5570_v27, %v6742_v25  ;;  %v10601_v22 = vld [vmem:[#allocation27_spill] sm:$0xff]  ;;  %v2313_v5 = vsel %vm252_vm1, %v8044_v16, %v8050_v7  ;;  %v10612_v24 = vld [vmem:[#allocation121_spill] sm:$0xff] }
 0x3e6   : > { %v2268_v56 = vpack.c.bf16 %v2200_v14, %v2196_v11  ;;  %v8445_v61 = vpop.permute.xlu0 %2295  ;;  %v2271_v4 = vpack.c.bf16 %v2203_v18, %v2199_v39  ;;  %v2270_v18 = vpack.c.bf16 %v2202_v50, %v2198_v54  ;;  %v10602_v11 = vld [vmem:[#allocation25_spill] sm:$0xff]  ;;  %v10603_v39 = vld [vmem:[#allocation28_spill] sm:$0xff]  ;;  %v10604_v14 = vld [vmem:[#allocation31_spill] sm:$0xff]  ;;  %v8503_v12 = vrot.slane %v5570_v27, %v6748_v30 }
 0x3e7   : > { %v8455_v59 = vpop.permute.xlu1 %2589  ;;  %v2529_v41 = vsel %vm370_vm2, %v10602_v11, %v10601_v22  ;;  %v2532_v50 = vsel %vm370_vm2, %v10603_v39, %v7597_v62  ;;  %v2533_v54 = vsel %vm370_vm2, %v10604_v14, %v10602_v11  ;;  %v2525_v62 = vsel %vm370_vm2, %v10601_v22, %v10607_v3  ;;  %v10610_v22 = vld [vmem:[#allocation54_spill] sm:$0xff] }
 0x3e8   : > { %3232 = vrot.lane.b32.xlu0 %v7727_v32, %s6510_s22  ;;  %3670 = vmatpush1.bf16.msra.mxu0 %v2268_v56  ;;  %v8481_v32 = vrot.slane %v5570_v27, %v6755_v34  ;;  %v10605_v56 = vpack.c.bf16 %v8159_v0, %v8156_v63  ;;  %v10609_v0 = vpack.c.bf16 %v8173_v35, %v8170_v28 }
 0x3e9   : > { %4215 = vperm.xlu1 %5987, %v8233_v31   ;;  %4469 = vmatprep.subr.bf16.mxu1 %v2271_v4  ;;  %v10606_v4 = vld [vmem:[#allocation26_spill] sm:$0xff]  ;;  %v8525_v10 = vmul.f32 %v2528_v40, %v8460_v9  ;;  %v8528_v28 = vmul.f32 %v2529_v41, %v8460_v9  ;;  %v2521_v35 = vsel %vm370_vm2, %v10607_v3, %v10604_v14 }
 0x3ea   : > { %3671 = vmatprep.subr.bf16.mxu0 %v10605_v56  ;;  %4470 = vmatpush1.bf16.msra.mxu1 %v2270_v18  ;;  %v2300_v31 = vpop.permute.xlu0 %2299  ;;  %v2524_v36 = vsel %vm370_vm2, %v7609_v42, %v10606_v4  ;;  %v2520_v42 = vsel %vm370_vm2, %v10606_v4, %v10603_v39  ;;  %v2339_v18 = vmul.f32 %v8151_v60, %v2313_v5  ;;  %v10611_v56 = vld [vmem:[#allocation122_spill] sm:$0xff]  ;;  %v10615_v5 = vld [vmem:[#allocation120_spill] sm:$0xff]  ;;  %v10616_v39 = vld [vmem:[#allocation119_spill] sm:$0xff] }
 0x3eb   : > { %v8505_v11 = vpop.permute.xlu1 %2743  ;;  %v2314_v63 = vsel %vm252_vm1, %v8445_v61, %v2300_v31  ;;  %4471 = vmatprep.subr.bf16.mxu1 %v10609_v0  ;;  %v8542_v40 = vmul.f32 %v2532_v50, %v8463_v26  ;;  %v8545_v41 = vmul.f32 %v2533_v54, %v8463_v26  ;;  %v10617_v4 = vpack.c.bf16 %v10615_v5, %v10616_v39  ;;  %v10621_v54 = vld [vmem:[#allocation39_spill] sm:$0xff]  ;;  %v10628_v5 = vld [vmem:[#allocation114_spill] sm:$0xff] }
 0x3ec   : > { %10608 = vst [vmem:[#allocation18_spill] sm:$0xff] %v8505_v11  ;;  %v2343_v27 = vmul.f32 %v8151_v60, %v2314_v63  ;;  %3240 = vrot.lane.b32.xlu0 %v10610_v22, %s6510_s22  ;;  %v10613_v11 = vpack.c.bf16 %v10611_v56, %v10612_v24  ;;  %v10614_v60 = vpack.c.bf16 %v8254_v52, %v8184_v21  ;;  %v10618_v21 = vld [vmem:[#allocation30_spill] sm:$0xff]  ;;  %v10625_v56 = vld [vmem:[#allocation40_spill] sm:$0xff] }
 0x3ed   : > { %4225 = vperm.xlu1 %5987, %v8297_v43   ;;  %v8539_v24 = vmul.f32 %v2524_v36, %v8481_v32  ;;  %v8551_v43 = vmul.f32 %v2525_v62, %v8481_v32  ;;  %v8554_v52 = vmul.f32 %v2520_v42, %v8503_v12  ;;  %v10619_v36 = vld [vmem:[#allocation36_spill] sm:$0xff] }
 0x3ee   : > { %3672 = vmatpush1.bf16.msra.mxu0 %v10613_v11  ;;  %4472 = vmatpush1.bf16.msra.mxu1 %v10617_v4  ;;  %v2304_v3 = vpop.permute.xlu0 %2303  ;;  %v2411_v14 = vpack.c.bf16 %v2343_v27, %v2339_v18  ;;  %v2534_v50 = vsel %vm370_vm2, %v10619_v36, %v10618_v21  ;;  %v10620_v11 = vld [vmem:[#allocation33_spill] sm:$0xff]  ;;  %v8567_v18 = vmul.f32 %v2521_v35, %v8503_v12  ;;  %v10623_v62 = vld [vmem:[#allocation32_spill] sm:$0xff]  ;;  %v10629_v4 = vld [vmem:[#allocation34_spill] sm:$0xff] }
 0x3ef   : > { %3673 = vmatprep.subr.bf16.mxu0 %v10614_v60  ;;  %v2535_v63 = vsel %vm370_vm2, %v10621_v54, %v10620_v11  ;;  %v8564_v0 = vpop.permute.xlu1 %2747  ;;  %4473 = vmatprep.subr.bf16.mxu1 %v2283_v48  ;;  %v2530_v42 = vsel %vm370_vm2, %v10618_v21, %v10623_v62  ;;  %v10624_v27 = vld [vmem:[#allocation116_spill] sm:$0xff]  ;;  %v10626_v60 = vpack.c.bf16 %v8249_v57, %v8242_v47  ;;  %v10627_v48 = vld [vmem:[#allocation35_spill] sm:$0xff]  ;;  %v10630_v47 = vld [vmem:[#allocation37_spill] sm:$0xff] }
 0x3f0   : > { %10622 = vst [vmem:[#allocation21_spill] sm:$0xff] %v8564_v0  ;;  %v2315_v22 = vsel %vm252_vm1, %v10624_v27, %v8044_v16  ;;  %3248 = vrot.lane.b32.xlu0 %v10625_v56, %s6510_s22  ;;  %v2531_v35 = vsel %vm370_vm2, %v10620_v11, %v10627_v48  ;;  %v2309_v39 = vsel %vm252_vm1, %v10628_v5, %v10624_v27 }
 0x3f1   : > { %4235 = vperm.xlu1 %5987, %v8347_v13   ;;  %v2312_v16 = vsel %vm252_vm1, %v2300_v31, %v2304_v3  ;;  %v2526_v57 = vsel %vm370_vm2, %v10623_v62, %v10629_v4  ;;  %v2527_v21 = vsel %vm370_vm2, %v10627_v48, %v10630_v47  ;;  %v8602_v11 = vmul.f32 %v2534_v50, %v8463_v26 }
 0x3f2   : > { %3674 = vmatpush1.bf16.msra.mxu0 %v10626_v60  ;;  %v8605_v27 = vmul.f32 %v2535_v63, %v8463_v26  ;;  %v10631_v13 = vpack.c.bf16 %v8216_v2, %v8204_v37  ;;  %v2308_v31 = vpop.permute.xlu0 %2307  ;;  %v2338_v62 = vmul.f32 %v8211_v38, %v2315_v22  ;;  %v2341_v63 = vmul.f32 %v8292_v1, %v2309_v39  ;;  %v8645_v39 = vld [vmem:[%s10320_s7 + $0x40] sm:$0xff] }
 0x3f3   : > { %3675 = vmatprep.subr.bf16.mxu0 %v2411_v14  ;;  %v2311_v14 = vsel %vm252_vm1, %v8050_v7, %v10628_v5  ;;  %v2310_v56 = vsel %vm252_vm1, %v2304_v3, %v2308_v31  ;;  %v2316_v50 = vsel %vm252_vm1, %v2308_v31, %v8445_v61  ;;  %v2344_v37 = vmul.f32 %v8195_v15, %v2312_v16  ;;  %v8622_v2 = vpop.permute.xlu1 %2751  ;;  %v10633_v7 = vld [vmem:[#allocation42_spill] sm:$0xff] }
 0x3f4   : > { %4474 = vmatpush1.bf16.msra.mxu1 %v10631_v13  ;;  %10632 = vst [vmem:[#allocation22_spill] sm:$0xff] %v8622_v2  ;;  %v2342_v60 = vmul.f32 %v8211_v38, %v2316_v50  ;;  %v2345_v48 = vmul.f32 %v8292_v1, %v2310_v56  ;;  %3228 = vrot.lane.b32.xlu0 %v10633_v7, %s6510_s22  ;;  %v10635_v56 = vld [vmem:[#allocation123_spill] sm:$0xff]  ;;  %v10636_v50 = vld [vmem:[#allocation117_spill] sm:$0xff] }
 0x3f5   : > { %v8629_v22 = vmul.f32 %v2530_v42, %v8460_v9  ;;  %v8632_v3 = vmul.f32 %v2531_v35, %v8460_v9  ;;  %v8635_v61 = vmul.f32 %v2526_v57, %v8481_v32  ;;  %v8638_v5 = vmul.f32 %v2527_v21, %v8481_v32  ;;  %4245 = vperm.xlu1 %5987, %v8408_v58   ;;  %v8693_v7 = vld [vmem:[%s10320_s7 + $0x50] sm:$0xff]  ;;  %v10646_v58 = vld [vmem:[#allocation17_spill] sm:$0xff] }
 0x3f6   : > { %v2340_v38 = vmul.f32 %v8195_v15, %v2311_v14  ;;  %v2410_v1 = vpack.c.bf16 %v2342_v60, %v2338_v62  ;;  %v8647_v42 = vpop.permute.xlu0 %2437  ;;  %v2413_v35 = vpack.c.bf16 %v2345_v48, %v2341_v63  ;;  %v2423_v16 = vpack.c.bf16 %v8432_v51, %v8429_v29  ;;  %v5571_v15 = vld [vmem:[%s10314_s1 + $0xc] sm:$0xf]  ;;  %v10634_v51 = vld [vmem:[#allocation45_spill] sm:$0xff] }
 0x3f7   : > { %v2425_v21 = vpack.c.bf16 %v8453_v55, %v8450_v45  ;;  %v2455_v45 = vsel %vm370_vm2, %v10636_v50, %v10635_v56  ;;  %v2522_v63 = vsel %vm370_vm2, %v10629_v4, %v10619_v36  ;;  %v8686_v60 = vrot.slane %v5571_v15, %v6731_v20  ;;  %v8688_v48 = vpop.permute.xlu1 %2755  ;;  %v10639_v4 = vld [vmem:[#allocation41_spill] sm:$0xff]  ;;  %v10645_v55 = vld [vmem:[#allocation47_spill] sm:$0xff] }
 0x3f8   : > { %v2412_v29 = vpack.c.bf16 %v2344_v37, %v2340_v38  ;;  %3236 = vrot.lane.b32.xlu0 %v10634_v51, %s6510_s22  ;;  %3676 = vmatpush1.bf16.msra.mxu0 %v2410_v1  ;;  %v2523_v37 = vsel %vm370_vm2, %v10630_v47, %v10621_v54  ;;  %10637 = vst [vmem:[#allocation24_spill] sm:$0xff] %v8688_v48  ;;  %v10640_v1 = vld [vmem:[#allocation38_spill] sm:$0xff] }
 0x3f9   : > { %3454 = vperm.xlu1 %5987, %v8645_v39   ;;  %4475 = vmatprep.subr.bf16.mxu1 %v2413_v35  ;;  %v10638_v38 = vpack.c.bf16 %v8314_v6, %v8302_v23  ;;  %v2670_v54 = vsel %vm488_vm3, %v10640_v1, %v10639_v4  ;;  %v10641_v47 = vld [vmem:[#allocation46_spill] sm:$0xff]  ;;  %v10642_v35 = vld [vmem:[#allocation43_spill] sm:$0xff]  ;;  %v8707_v62 = vrot.slane %v5571_v15, %v6755_v34 }
 0x3fa   : > { %4476 = vmatpush1.bf16.msra.mxu1 %v2412_v29  ;;  %v2442_v36 = vpop.permute.xlu0 %2441  ;;  %v2671_v51 = vsel %vm488_vm3, %v10642_v35, %v10641_v47  ;;  %v10643_v23 = vpack.c.bf16 %v8350_v53, %v8334_v8  ;;  %v10644_v29 = vld [vmem:[#allocation44_spill] sm:$0xff]  ;;  %v2481_v31 = vmul.f32 %v8460_v9, %v2455_v45  ;;  %v10647_v14 = vpack.c.bf16 %v8276_v46, %v10646_v58  ;;  %v10648_v53 = vld [vmem:[#allocation50_spill] sm:$0xff] }
 0x3fb   : > { %3677 = vmatprep.subr.bf16.mxu0 %v10638_v38  ;;  %v2456_v6 = vsel %vm370_vm2, %v8647_v42, %v2442_v36  ;;  %v2666_v38 = vsel %vm488_vm3, %v10639_v4, %v10644_v29  ;;  %v8727_v13 = vmul.f32 %v2522_v63, %v8503_v12  ;;  %v8730_v8 = vmul.f32 %v2523_v37, %v8503_v12  ;;  %v10650_v63 = vld [vmem:[#allocation12_spill] sm:$0xff] }
 0x3fc   : > { %4477 = vmatprep.subr.bf16.mxu1 %v10643_v23  ;;  %v2485_v57 = vmul.f32 %v8460_v9, %v2456_v6  ;;  %3244 = vrot.lane.b32.xlu0 %v10645_v55, %s6510_s22  ;;  %v2667_v45 = vsel %vm488_vm3, %v10641_v47, %v10648_v53  ;;  %v8738_v9 = vmul.f32 %v2670_v54, %v8686_v60  ;;  %v10649_v55 = vld [vmem:[#allocation16_spill] sm:$0xff] }
 0x3fd   : > { %3678 = vmatpush1.bf16.msra.mxu0 %v10647_v14  ;;  %3464 = vperm.xlu1 %5987, %v8693_v7   ;;  %v8741_v46 = vrot.slane %v5571_v15, %v6742_v25  ;;  %v8744_v58 = vrot.slane %v5571_v15, %v6748_v30  ;;  %v8749_v14 = vld [vmem:[%s10320_s7 + $0x60] sm:$0xff]  ;;  %v10651_v37 = vpack.c.bf16 %v10649_v55, %v10650_v63  ;;  %v10652_v15 = vld [vmem:[#allocation48_spill] sm:$0xff] }
 0x3fe   : > { %3679 = vmatprep.subr.bf16.mxu0 %v2423_v16  ;;  %v2446_v4 = vpop.permute.xlu0 %2445  ;;  %v2553_v16 = vpack.c.bf16 %v2485_v57, %v2481_v31  ;;  %v8755_v54 = vmul.f32 %v2671_v51, %v8686_v60  ;;  %v8758_v47 = vmul.f32 %v2666_v38, %v8707_v62  ;;  %v2674_v6 = vsel %vm488_vm3, %v10652_v15, %v10640_v1  ;;  %v10653_v23 = vld [vmem:[#allocation52_spill] sm:$0xff]  ;;  %v10654_v31 = vld [vmem:[#allocation14_spill] sm:$0xff]  ;;  %v8779_v1 = vpop.permute.xlu1 %2885  ;;  %v10656_v38 = vld [vmem:[#allocation49_spill] sm:$0xff] }
 0x3ff   : > { %4478 = vmatpush1.bf16.msra.mxu1 %v10651_v37  ;;  %v2675_v48 = vsel %vm488_vm3, %v10653_v23, %v10642_v35  ;;  %v8769_v55 = vmul.f32 %v2667_v45, %v8707_v62  ;;  %v2662_v57 = vsel %vm488_vm3, %v10644_v29, %v10652_v15  ;;  %v2457_v51 = vsel %vm370_vm2, %v10654_v31, %v10636_v50  ;;  %v10658_v29 = vld [vmem:[#allocation13_spill] sm:$0xff]  ;;  %v10660_v37 = vld [vmem:[#allocation51_spill] sm:$0xff] }
 0x400   : > { %4479 = vmatprep.subr.bf16.mxu1 %v2425_v21  ;;  %10655 = vst [vmem:[#allocation23_spill] sm:$0xff] %v8779_v1  ;;  %3252 = vrot.lane.b32.xlu0 %v10656_v38, %s6510_s22  ;;  %v10657_v21 = vpack.c.bf16 %v8382_v33, %v8379_v49  ;;  %v2663_v35 = vsel %vm488_vm3, %v10648_v53, %v10653_v23  ;;  %v8800_v33 = vld [vmem:[%s10320_s7 + $0x8] sm:$0xff]  ;;  %v10659_v63 = vld [vmem:[#allocation53_spill] sm:$0xff] }
 0x401   : > { %v2451_v45 = vsel %vm370_vm2, %v10658_v29, %v10654_v31  ;;  %3474 = vperm.xlu1 %5987, %v8749_v14   ;;  %v2454_v50 = vsel %vm370_vm2, %v2442_v36, %v2446_v4  ;;  %v8803_v49 = vmul.f32 %v2674_v6, %v8741_v46  ;;  %v8806_v53 = vmul.f32 %v2675_v48, %v8741_v46  ;;  %v10661_v23 = vld [vmem:[#allocation57_spill] sm:$0xff]  ;;  %v10662_v31 = vld [vmem:[#allocation55_spill] sm:$0xff] }
 0x402   : > { %3680 = vmatpush1.bf16.msra.mxu0 %v10657_v21  ;;  %v2672_v15 = vsel %vm488_vm3, %v10660_v37, %v10659_v63  ;;  %v2673_v36 = vsel %vm488_vm3, %v10662_v31, %v10661_v23  ;;  %v10663_v6 = vpack.c.bf16 %v8395_v17, %v8392_v44  ;;  %v2450_v48 = vpop.permute.xlu0 %2449  ;;  %v2453_v38 = vsel %vm370_vm2, %v10635_v56, %v10658_v29  ;;  %v5572_v44 = vld [vmem:[%s10314_s1 + $0x14] sm:$0xf]  ;;  %v8854_v29 = vld [vmem:[%s10320_s7 + $0x18] sm:$0xff] }
 0x403   : > { %3681 = vmatprep.subr.bf16.mxu0 %v2553_v16  ;;  %v8819_v16 = vld [vmem:[%s10320_s7 + $0x70] sm:$0xff]  ;;  %v2480_v21 = vmul.f32 %v8463_v26, %v2457_v51  ;;  %v2452_v1 = vsel %vm370_vm2, %v2446_v4, %v2450_v48  ;;  %v2458_v0 = vsel %vm370_vm2, %v2450_v48, %v8647_v42  ;;  %v2483_v17 = vmul.f32 %v8503_v12, %v2451_v45 }
 0x404   : > { %4480 = vmatpush1.bf16.msra.mxu1 %v10663_v6  ;;  %v2486_v6 = vmul.f32 %v8481_v32, %v2454_v50  ;;  %v2484_v2 = vmul.f32 %v8463_v26, %v2458_v0  ;;  %v2487_v56 = vmul.f32 %v8503_v12, %v2452_v1  ;;  %3419 = vperm.xlu0 %5986, %v8800_v33  }
 0x405   : > { %v8845_v51 = vmul.f32 %v2662_v57, %v8744_v58  ;;  %v8848_v42 = vmul.f32 %v2663_v35, %v8744_v58  ;;  %3484 = vperm.xlu1 %5987, %v8819_v16   ;;  %v2567_v12 = vpack.c.bf16 %v8730_v8, %v8727_v13  ;;  %v2482_v0 = vmul.f32 %v8481_v32, %v2453_v38  ;;  %v8861_v57 = vpop.permute.xlu1 %2889  ;;  %v10666_v38 = vld [vmem:[#allocation19_spill] sm:$0xff]  ;;  %v10671_v13 = vld [vmem:[#allocation61_spill] sm:$0xff] }
 0x406   : > { %10664 = vst [vmem:[#allocation27_spill] sm:$0xff] %v8861_v57  ;;  %v2552_v1 = vpack.c.bf16 %v2484_v2, %v2480_v21  ;;  %v8863_v35 = vpop.permute.xlu0 %2579  ;;  %v2555_v45 = vpack.c.bf16 %v2487_v56, %v2483_v17  ;;  %v8866_v50 = vmul.f32 %v2672_v15, %v8686_v60  ;;  %v8869_v48 = vmul.f32 %v2673_v36, %v8686_v60  ;;  %v10665_v36 = vld [vmem:[#allocation15_spill] sm:$0xff]  ;;  %v8894_v17 = vld [vmem:[%s10320_s7 + $0x28] sm:$0xff]  ;;  %v10667_v56 = vld [vmem:[#allocation56_spill] sm:$0xff] }
 0x407   : > { %v8872_v4 = vrot.slane %v5572_v44, %v6742_v25  ;;  %v8877_v32 = vrot.slane %v5572_v44, %v6731_v20  ;;  %v8880_v2 = vrot.slane %v5572_v44, %v6755_v34  ;;  %v2554_v8 = vpack.c.bf16 %v2486_v6, %v2482_v0  ;;  %v10668_v0 = vld [vmem:[#allocation59_spill] sm:$0xff] }
 0x408   : > { %3429 = vperm.xlu0 %5986, %v8854_v29   ;;  %3682 = vmatpush1.bf16.msra.mxu0 %v2552_v1  ;;  %v8884_v15 = vrot.slane %v5572_v44, %v6748_v30  ;;  %v2597_v21 = vsel %vm488_vm3, %v10666_v38, %v10665_v36  ;;  %v2668_v44 = vsel %vm488_vm3, %v10659_v63, %v10667_v56  ;;  %v10678_v30 = vld [vmem:[#allocation64_spill] sm:$0xff] }
 0x409   : > { %4255 = vperm.xlu1 %5987, %v8645_v39   ;;  %4481 = vmatprep.subr.bf16.mxu1 %v2555_v45  ;;  %v2669_v1 = vsel %vm488_vm3, %v10661_v23, %v10668_v0  ;;  %v10669_v39 = vld [vmem:[#allocation58_spill] sm:$0xff]  ;;  %v10670_v26 = vpack.c.bf16 %v8528_v28, %v8525_v10  ;;  %v2665_v23 = vsel %vm488_vm3, %v10668_v0, %v10671_v13 }
 0x40a   : > { %v2664_v45 = vsel %vm488_vm3, %v10667_v56, %v10669_v39  ;;  %4482 = vmatpush1.bf16.msra.mxu1 %v2554_v8  ;;  %v2584_v6 = vpop.permute.xlu0 %2583  ;;  %v2676_v63 = vsel %vm488_vm3, %v10669_v39, %v10660_v37  ;;  %v2677_v56 = vsel %vm488_vm3, %v10671_v13, %v10662_v31  ;;  %v10672_v28 = vpack.c.bf16 %v8567_v18, %v8554_v52  ;;  %v10674_v37 = vld [vmem:[#allocation60_spill] sm:$0xff]  ;;  %v8936_v39 = vpop.permute.xlu1 %2893  ;;  %v10676_v18 = vld [vmem:[#allocation65_spill] sm:$0xff]  ;;  %v10677_v13 = vld [vmem:[#allocation63_spill] sm:$0xff] }
 0x40b   : > { %3683 = vmatprep.subr.bf16.mxu0 %v10670_v26  ;;  %v2598_v10 = vsel %vm488_vm3, %v8863_v35, %v2584_v6  ;;  %v10673_v26 = vld [vmem:[#allocation62_spill] sm:$0xff]  ;;  %v2623_v0 = vmul.f32 %v8686_v60, %v2597_v21  ;;  %v10675_v31 = vpack.c.bf16 %v8545_v41, %v8542_v40  ;;  %v8944_v52 = vmul.f32 %v2668_v44, %v8707_v62  ;;  %v8961_v40 = vld [vmem:[%s10320_s7 + $0x38] sm:$0xff] }
 0x40c   : > { %4483 = vmatprep.subr.bf16.mxu1 %v10672_v28  ;;  %v2836_v8 = vsel %vm652_vm5, %v10674_v37, %v10673_v26  ;;  %v2627_v57 = vmul.f32 %v8686_v60, %v2598_v10  ;;  %3439 = vperm.xlu0 %5986, %v8894_v17   ;;  %v2837_v28 = vsel %vm652_vm5, %v10677_v13, %v10676_v18  ;;  %v10680_v10 = vld [vmem:[#allocation67_spill] sm:$0xff] }
 0x40d   : > { %3684 = vmatpush1.bf16.msra.mxu0 %v10675_v31  ;;  %v2832_v21 = vsel %vm652_vm5, %v10673_v26, %v10678_v30  ;;  %4265 = vperm.xlu1 %5987, %v8693_v7   ;;  %v10679_v60 = vpack.c.bf16 %v8632_v3, %v8629_v22  ;;  %v8964_v41 = vmul.f32 %v2669_v1, %v8707_v62 }
 0x40e   : > { %v8967_v44 = vmul.f32 %v2676_v63, %v8741_v46  ;;  %v2833_v7 = vsel %vm652_vm5, %v10676_v18, %v10680_v10  ;;  %v10681_v22 = vpack.c.bf16 %v8551_v43, %v8539_v24  ;;  %v2588_v3 = vpop.permute.xlu0 %2587  ;;  %v2695_v26 = vpack.c.bf16 %v2627_v57, %v2623_v0 }
 0x40f   : > { %3685 = vmatprep.subr.bf16.mxu0 %v10679_v60  ;;  %v8977_v31 = vmul.f32 %v2664_v45, %v8744_v58  ;;  %v8980_v1 = vmul.f32 %v2677_v56, %v8741_v46  ;;  %v8983_v63 = vmul.f32 %v2665_v23, %v8744_v58  ;;  %v8986_v60 = vmul.f32 %v2836_v8, %v8872_v4  ;;  %v10685_v8 = vld [vmem:[#allocation69_spill] sm:$0xff] }
 0x410   : > { %4484 = vmatpush1.bf16.msra.mxu1 %v10681_v22  ;;  %v8989_v18 = vmul.f32 %v2837_v28, %v8872_v4  ;;  %v8992_v24 = vmul.f32 %v2832_v21, %v8877_v32  ;;  %v2599_v43 = vsel %vm488_vm3, %v8455_v59, %v10666_v38  ;;  %3449 = vperm.xlu0 %5986, %v8961_v40   ;;  %v10684_v38 = vld [vmem:[#allocation66_spill] sm:$0xff] }
 0x411   : > { %4485 = vmatprep.subr.bf16.mxu1 %v2567_v12  ;;  %v10682_v57 = vpack.c.bf16 %v8605_v27, %v8602_v11  ;;  %v9003_v45 = vmul.f32 %v2833_v7, %v8877_v32  ;;  %v10683_v12 = vld [vmem:[#allocation20_spill] sm:$0xff]  ;;  %4275 = vperm.xlu1 %5987, %v8749_v14   ;;  %v2596_v56 = vsel %vm488_vm3, %v2584_v6, %v2588_v3  ;;  %v9028_v6 = vpop.permute.xlu1 %2897 }
 0x412   : > { %v2593_v23 = vsel %vm488_vm3, %v10683_v12, %v8455_v59  ;;  %v2828_v11 = vsel %vm652_vm5, %v10678_v30, %v10684_v38  ;;  %v2840_v27 = vsel %vm652_vm5, %v10684_v38, %v10674_v37  ;;  %v2829_v59 = vsel %vm652_vm5, %v10680_v10, %v10685_v8  ;;  %v2592_v0 = vpop.permute.xlu0 %2591  ;;  %v10688_v38 = vld [vmem:[#allocation68_spill] sm:$0xff] }
 0x413   : > { %3686 = vmatpush1.bf16.msra.mxu0 %v10682_v57  ;;  %v2841_v14 = vsel %vm652_vm5, %v10685_v8, %v10677_v13  ;;  %v10686_v30 = vpack.c.bf16 %v8638_v5, %v8635_v61  ;;  %v2595_v37 = vsel %vm488_vm3, %v10665_v36, %v10683_v12  ;;  %v2622_v28 = vmul.f32 %v8741_v46, %v2599_v43  ;;  %v6458_v12 = vld [vmem:[#allocation4 + $0x48] sm:$0xff] }
 0x414   : > { %3687 = vmatprep.subr.bf16.mxu0 %v2695_v26  ;;  %v2594_v21 = vsel %vm488_vm3, %v2588_v3, %v2592_v0  ;;  %v2600_v13 = vsel %vm488_vm3, %v2592_v0, %v8863_v35  ;;  %v2625_v10 = vmul.f32 %v8744_v58, %v2593_v23  ;;  %v2628_v61 = vmul.f32 %v8707_v62, %v2596_v56  ;;  %v5573_v23 = vld [vmem:[%s10314_s1 + $0x18] sm:$0xf]  ;;  %v10687_v56 = vld [vmem:[#allocation70_spill] sm:$0xff] }
 0x415   : > { %4486 = vmatpush1.bf16.msra.mxu1 %v10686_v30  ;;  %v2626_v5 = vmul.f32 %v8741_v46, %v2600_v13  ;;  %v2629_v7 = vmul.f32 %v8744_v58, %v2594_v21  ;;  %4220 = vperm.xlu0 %5986, %v8800_v33   ;;  %v9049_v36 = vmul.f32 %v2828_v11, %v8880_v2  ;;  %v9085_v8 = vpop.permute.xlu1 %3027  ;;  %v10694_v30 = vld [vmem:[#allocation75_spill] sm:$0xff] }
 0x416   : > { %v9052_v22 = vmul.f32 %v2840_v27, %v8884_v15  ;;  %v9055_v3 = vmul.f32 %v2829_v59, %v8880_v2  ;;  %v9058_v35 = vmul.f32 %v2841_v14, %v8884_v15  ;;  %4285 = vperm.xlu1 %5987, %v8819_v16   ;;  %v2708_v46 = vpack.c.bf16 %v8964_v41, %v8944_v52  ;;  %v9064_v26 = vpop.permute.xlu0 %2745  ;;  %v10689_v27 = vld [vmem:[#allocation73_spill] sm:$0xff]  ;;  %v10693_v14 = vld [vmem:[#allocation72_spill] sm:$0xff] }
 0x417   : > { %v2624_v58 = vmul.f32 %v8707_v62, %v2595_v37  ;;  %v2694_v33 = vpack.c.bf16 %v2626_v5, %v2622_v28  ;;  %v2697_v43 = vpack.c.bf16 %v2629_v7, %v2625_v10  ;;  %v2706_v57 = vpack.c.bf16 %v8980_v1, %v8967_v44  ;;  %v10690_v44 = vld [vmem:[#allocation71_spill] sm:$0xff]  ;;  %10691 = vst [vmem:[#allocation25_spill] sm:$0xff] %v9085_v8  ;;  %v10695_v37 = vld [vmem:[#allocation74_spill] sm:$0xff]  ;;  %v6454_v52 = vld [vmem:[#allocation4 + $0x18] sm:$0xff] }
 0x418   : > { %v2707_v16 = vpack.c.bf16 %v8869_v48, %v8866_v50  ;;  %v2709_v62 = vpack.c.bf16 %v8983_v63, %v8977_v31  ;;  %v2838_v11 = vsel %vm652_vm5, %v10688_v38, %v10687_v56  ;;  %v2839_v1 = vsel %vm652_vm5, %v10690_v44, %v10689_v27  ;;  %v6455_v41 = vld [vmem:[#allocation4 + $0x38] sm:$0xff]  ;;  %v6457_v50 = vld [vmem:[#allocation4 + $0x20] sm:$0xff] }
 0x419   : > { %v2696_v59 = vpack.c.bf16 %v2628_v61, %v2624_v58  ;;  %4230 = vperm.xlu0 %5986, %v8854_v29   ;;  %3688 = vmatpush1.bf16.msra.mxu0 %v2694_v33  ;;  %v10692_v48 = vpack.c.bf16 %v8755_v54, %v8738_v9  ;;  %v2834_v29 = vsel %vm652_vm5, %v10687_v56, %v10693_v14  ;;  %v10696_v61 = vld [vmem:[#allocation77_spill] sm:$0xff]  ;;  %v10698_v33 = vld [vmem:[#allocation78_spill] sm:$0xff]  ;;  %v6462_v8 = vld [vmem:[#allocation4 + $0x58] sm:$0xff] }
 0x41a   : > { %4487 = vmatprep.subr.bf16.mxu1 %v2697_v43  ;;  %v2835_v0 = vsel %vm652_vm5, %v10689_v27, %v10694_v30  ;;  %v2830_v9 = vsel %vm652_vm5, %v10693_v14, %v10695_v37  ;;  %v9110_v54 = vrot.slane %v5573_v23, %v6742_v25  ;;  %v9112_v28 = vpop.permute.xlu0 %2749  ;;  %v9115_v21 = vmul.f32 %v2838_v11, %v8872_v4  ;;  %v10699_v43 = vld [vmem:[#allocation76_spill] sm:$0xff]  ;;  %v10701_v11 = vld [vmem:[#allocation79_spill] sm:$0xff] }
 0x41b   : > { %3689 = vmatprep.subr.bf16.mxu0 %v10692_v48  ;;  %4488 = vmatpush1.bf16.msra.mxu1 %v2696_v59  ;;  %v9118_v13 = vmul.f32 %v2839_v1, %v8872_v4  ;;  %v2842_v10 = vsel %vm652_vm5, %v10695_v37, %v10688_v38  ;;  %v2831_v5 = vsel %vm652_vm5, %v10694_v30, %v10696_v61  ;;  %v10700_v38 = vld [vmem:[#allocation81_spill] sm:$0xff]  ;;  %v10704_v14 = vld [vmem:[#allocation83_spill] sm:$0xff]  ;;  %v9173_v30 = vpop.permute.xlu1 %3031 }
 0x41c   : > { %v10697_v7 = vpack.c.bf16 %v8848_v42, %v8845_v51  ;;  %v2843_v58 = vsel %vm652_vm5, %v10696_v61, %v10690_v44  ;;  %v2978_v56 = vsel %vm770_vm6, %v10699_v43, %v10698_v33  ;;  %v2979_v27 = vsel %vm770_vm6, %v10701_v11, %v10700_v38  ;;  %v10708_v61 = vld [vmem:[#allocation85_spill] sm:$0xff] }
 0x41d   : > { %4240 = vperm.xlu0 %5986, %v8894_v17   ;;  %v10702_v51 = vpack.c.bf16 %v8806_v53, %v8803_v49  ;;  %v9148_v42 = vmul.f32 %v2834_v29, %v8877_v32  ;;  %v9151_v44 = vmul.f32 %v2835_v0, %v8877_v32  ;;  %v9154_v1 = vmul.f32 %v2830_v9, %v8880_v2  ;;  %v10703_v49 = vld [vmem:[#allocation80_spill] sm:$0xff] }
 0x41e   : > { %4489 = vmatprep.subr.bf16.mxu1 %v10697_v7  ;;  %v9157_v59 = vrot.slane %v5573_v23, %v6731_v20  ;;  %v9160_v48 = vmul.f32 %v2842_v10, %v8884_v15  ;;  %v9163_v17 = vmul.f32 %v2831_v5, %v8880_v2  ;;  %v2974_v53 = vsel %vm770_vm6, %v10698_v33, %v10703_v49  ;;  %v9178_v0 = vpop.permute.xlu0 %2753  ;;  %v10709_v5 = vld [vmem:[#allocation90_spill] sm:$0xff] }
 0x41f   : > { %3690 = vmatpush1.bf16.msra.mxu0 %v10702_v51  ;;  %v2975_v29 = vsel %vm770_vm6, %v10700_v38, %v10704_v14  ;;  %v9181_v37 = vmul.f32 %v2843_v58, %v8884_v15  ;;  %v9184_v9 = vmul.f32 %v2978_v56, %v9110_v54  ;;  %v9187_v10 = vmul.f32 %v2979_v27, %v9110_v54  ;;  %v10713_v56 = vld [vmem:[#allocation87_spill] sm:$0xff]  ;;  %v10714_v27 = vld [vmem:[#allocation93_spill] sm:$0xff] }
 0x420   : > { %3691 = vmatprep.subr.bf16.mxu0 %v2707_v16  ;;  %v10705_v16 = vpack.c.bf16 %v8769_v55, %v8758_v47  ;;  %v2719_v7 = vpack.c.bf16 %v10709_v5, %v10708_v61  ;;  %v9194_v47 = vrot.slane %v5573_v23, %v6755_v34  ;;  %v10710_v55 = vld [vmem:[#allocation11_spill] sm:$0xff]  ;;  %v9201_v58 = vmul.f32 %v2974_v53, %v9157_v59  ;;  %v6453_v61 = vld [vmem:[#allocation4 + $0x28] sm:$0xff] }
 0x421   : > { %10706 = vst [vmem:[#allocation28_spill] sm:$0xff] %v9184_v9  ;;  %10707 = vst [vmem:[#allocation31_spill] sm:$0xff] %v9187_v10  ;;  %v9197_v38 = vrot.slane %v5573_v23, %v10710_v55  ;;  %4250 = vperm.xlu0 %5986, %v8961_v40   ;;  %v2721_v51 = vpack.c.bf16 %v10714_v27, %v10713_v56  ;;  %v6452_v23 = vld [vmem:[#allocation4 + $0x8] sm:$0xff]  ;;  %v10717_v56 = vld [vmem:[#allocation89_spill] sm:$0xff]  ;;  %v2764_v9 = vsel %vm652_vm5, %v9064_v26, %v9112_v28 }
 0x422   : > { %4490 = vmatpush1.bf16.msra.mxu1 %v10705_v16  ;;  %10711 = vst [vmem:[#allocation26_spill] sm:$0xff] %v9201_v58  ;;  %v9211_v16 = vld [vmem:[%s10320_s7 + $0x48] sm:$0xff]  ;;  %v2727_v5 = vpack.c.bf16 %v6453_v61, %v6452_v23  ;;  %v10719_v61 = vld [vmem:[#allocation91_spill] sm:$0xff] }
 0x423   : > { %4491 = vmatprep.subr.bf16.mxu1 %v2709_v62  ;;  %3692 = vmatpush1.bf16.msra.mxu0 %v2706_v57  ;;  %v9204_v62 = vmul.f32 %v2975_v29, %v9157_v59  ;;  %v10715_v40 = vld [vmem:[#allocation82_spill] sm:$0xff]  ;;  %v2758_v29 = vpop.permute.xlu0 %2757 }
 0x424   : > { %3693 = vmatprep.subr.bf16.mxu0 %v2719_v7  ;;  %v2970_v57 = vsel %vm770_vm6, %v10703_v49, %v10715_v40  ;;  %v2982_v53 = vsel %vm770_vm6, %v10715_v40, %v10699_v43  ;;  %v10716_v7 = vld [vmem:[#allocation84_spill] sm:$0xff]  ;;  %v10718_v49 = vld [vmem:[#allocation86_spill] sm:$0xff] }
 0x425   : > { %10712 = vst [vmem:[#allocation29_spill] sm:$0xff] %v9204_v62  ;;  %v2718_v27 = vpack.c.bf16 %v10717_v56, %v10716_v7  ;;  %v9235_v43 = vld [vmem:[%s10314_s1 + $0x1c] sm:$0xf]  ;;  %v9239_v7 = vpop.permute.xlu1 %3035  ;;  %v2762_v56 = vsel %vm652_vm5, %v9112_v28, %v9178_v0  ;;  %3459 = vperm.xlu0 %5986, %v9211_v16   ;;  %v2720_v33 = vpack.c.bf16 %v10719_v61, %v10718_v49  ;;  %v10721_v49 = vld [vmem:[#allocation21_spill] sm:$0xff] }
 0x426   : > { %4492 = vmatpush1.bf16.msra.mxu1 %v2708_v46  ;;  %v2729_v46 = vpack.c.bf16 %v6455_v41, %v6454_v52  ;;  %v9249_v52 = vmul.f32 %v2970_v57, %v9194_v47  ;;  %v9252_v41 = vmul.f32 %v2982_v53, %v9197_v38  ;;  %v9257_v40 = vld [vmem:[%s10320_s7 + $0x58] sm:$0xff]  ;;  %v10720_v57 = vld [vmem:[#allocation22_spill] sm:$0xff]  ;;  %v2766_v53 = vsel %vm652_vm5, %v2758_v29, %v9064_v26  ;;  %v6464_v26 = vld [vmem:[#allocation4 + $0x40] sm:$0xff] }
 0x427   : > { %4493 = vmatprep.subr.bf16.mxu1 %v2721_v51  ;;  %3694 = vmatpush1.bf16.msra.mxu0 %v2718_v27  ;;  %v6456_v51 = vld [vmem:[#allocation4] sm:$0xff]  ;;  %v6459_v27 = vld [vmem:[#allocation4 + $0x68] sm:$0xff]  ;;  %v10722_v61 = vld [vmem:[#allocation100_spill] sm:$0xff]  ;;  %v2793_v10 = vmul.f32 %v8877_v32, %v2762_v56 }
 0x428   : > { %v2726_v23 = vpack.c.bf16 %v6457_v50, %v6456_v51  ;;  %3695 = vmatprep.subr.bf16.mxu0 %v2727_v5  ;;  %v2731_v63 = vpack.c.bf16 %v6459_v27, %v6458_v12  ;;  %v9263_v50 = vrot.slane %v9235_v43, %v6742_v25  ;;  %v2761_v5 = vsel %vm652_vm5, %v10721_v49, %v10720_v57  ;;  %v9272_v51 = vpop.permute.xlu0 %2887  ;;  %v6460_v12 = vld [vmem:[#allocation4 + $0x10] sm:$0xff]  ;;  %v10724_v62 = vld [vmem:[#allocation24_spill] sm:$0xff]  ;;  %v6465_v28 = vld [vmem:[#allocation4 + $0x60] sm:$0xff] }
 0x429   : > { %v6461_v27 = vld [vmem:[#allocation4 + $0x30] sm:$0xff]  ;;  %v2971_v25 = vsel %vm770_vm6, %v10704_v14, %v10722_v61  ;;  %3469 = vperm.xlu0 %5986, %v9257_v40   ;;  %v2730_v56 = vpack.c.bf16 %v6465_v28, %v6464_v26 }
 0x42a   : > { %4494 = vmatpush1.bf16.msra.mxu1 %v2720_v33  ;;  %v2728_v31 = vpack.c.bf16 %v6461_v27, %v6460_v12  ;;  %v6463_v33 = vld [vmem:[#allocation4 + $0x78] sm:$0xff]  ;;  %v2983_v12 = vsel %vm770_vm6, %v10722_v61, %v10701_v11  ;;  %v10723_v27 = vld [vmem:[#allocation18_spill] sm:$0xff]  ;;  %v2760_v11 = vsel %vm652_vm5, %v9178_v0, %v2758_v29  ;;  %v2795_v61 = vmul.f32 %v8884_v15, %v2766_v53  ;;  %v6466_v29 = vld [vmem:[#allocation4 + $0x50] sm:$0xff] }
 0x42b   : > { %4495 = vmatprep.subr.bf16.mxu1 %v2729_v46  ;;  %v2733_v58 = vpack.c.bf16 %v6463_v33, %v6462_v8  ;;  %v2765_v14 = vsel %vm652_vm5, %v10724_v62, %v10723_v27  ;;  %3696 = vmatpush1.bf16.msra.mxu0 %v2726_v23  ;;  %v2763_v8 = vsel %vm652_vm5, %v10723_v27, %v10721_v49  ;;  %v9304_v23 = vld [vmem:[%s10320_s7 + $0x68] sm:$0xff] }
 0x42c   : > { %v2789_v46 = vmul.f32 %v8877_v32, %v2761_v5  ;;  %3697 = vmatprep.subr.bf16.mxu0 %v2731_v63  ;;  %v9307_v33 = vmul.f32 %v2971_v25, %v9194_v47  ;;  %v9311_v49 = vrot.slane %v9235_v43, %v6731_v20  ;;  %v9313_v32 = vpop.permute.xlu1 %3039  ;;  %v2792_v5 = vmul.f32 %v8872_v4, %v2764_v9  ;;  %v2892_v0 = vpop.permute.xlu0 %2891  ;;  %v6467_v63 = vld [vmem:[#allocation4 + $0x70] sm:$0xff] }
 0x42d   : > { %10725 = vst [vmem:[#allocation54_spill] sm:$0xff] %v9313_v32  ;;  %v2732_v53 = vpack.c.bf16 %v6467_v63, %v6466_v29  ;;  %v9317_v27 = vmul.f32 %v2983_v12, %v9197_v38  ;;  %v2759_v25 = vsel %vm652_vm5, %v10720_v57, %v10724_v62  ;;  %v2791_v26 = vmul.f32 %v8884_v15, %v2765_v14  ;;  %v10726_v20 = vld [vmem:[#allocation103_spill] sm:$0xff]  ;;  %v10727_v32 = vld [vmem:[#allocation101_spill] sm:$0xff]  ;;  %v9346_v57 = vld [vmem:[%s10320_s7 + $0x78] sm:$0xff] }
 0x42e   : > { %4496 = vmatpush1.bf16.msra.mxu1 %v2728_v31  ;;  %v2861_v28 = vpack.c.bf16 %v2793_v10, %v2789_v46  ;;  %v2981_v31 = vsel %vm770_vm6, %v10727_v32, %v10726_v20  ;;  %v2788_v9 = vmul.f32 %v8872_v4, %v2763_v8  ;;  %v2794_v29 = vmul.f32 %v8880_v2, %v2760_v11  ;;  %v10728_v12 = vld [vmem:[#allocation105_spill] sm:$0xff]  ;;  %v10729_v15 = vld [vmem:[#allocation107_spill] sm:$0xff]  ;;  %v10730_v14 = vld [vmem:[#allocation110_spill] sm:$0xff] }
 0x42f   : > { %4497 = vmatprep.subr.bf16.mxu1 %v2733_v58  ;;  %3479 = vperm.xlu0 %5986, %v9304_v23   ;;  %v2977_v62 = vsel %vm770_vm6, %v10726_v20, %v10728_v12  ;;  %v2973_v10 = vsel %vm770_vm6, %v10728_v12, %v10729_v15  ;;  %v9341_v58 = vrot.slane %v9235_v43, %v6755_v34 }
 0x430   : > { %3698 = vmatpush1.bf16.msra.mxu0 %v2730_v56  ;;  %v2863_v4 = vpack.c.bf16 %v2795_v61, %v2791_v26  ;;  %v2985_v20 = vsel %vm770_vm6, %v10729_v15, %v10727_v32  ;;  %v10731_v56 = vld [vmem:[#allocation109_spill] sm:$0xff]  ;;  %v2790_v46 = vmul.f32 %v8880_v2, %v2759_v25  ;;  %v2860_v11 = vpack.c.bf16 %v2792_v5, %v2788_v9  ;;  %v2896_v61 = vpop.permute.xlu0 %2895 }
 0x431   : > { %3699 = vmatprep.subr.bf16.mxu0 %v2861_v28  ;;  %v3121_v8 = vsel %vm888_vm7, %v10731_v56, %v10730_v14  ;;  %v9360_v26 = vmul.f32 %v2981_v31, %v9110_v54  ;;  %v9364_v28 = vrot.slane %v9235_v43, %v10710_v55  ;;  %v6000_v32 = vld [vmem:[%s10319_s6] ss:$16 sps:$4 sm:$0xff]   ;;  %v9372_v5 = vmul.f32 %v2977_v62, %v9157_v59 }
 0x432   : > { %4498 = vmatpush1.bf16.msra.mxu1 %v2732_v53  ;;  %v9374_v53 = vpop.permute.xlu1 %3169  ;;  %v2862_v25 = vpack.c.bf16 %v2794_v29, %v2790_v46  ;;  %v2904_v31 = vsel %vm770_vm6, %v2892_v0, %v2896_v61  ;;  %v9380_v43 = vmul.f32 %v2973_v10, %v9194_v47  ;;  %v9383_v9 = vmul.f32 %v2985_v20, %v9197_v38  ;;  %v10732_v62 = vld [vmem:[#allocation111_spill] sm:$0xff]  ;;  %v10735_v46 = vld [vmem:[#allocation88_spill] sm:$0xff] }
 0x433   : > { %4499 = vmatprep.subr.bf16.mxu1 %v2863_v4  ;;  %3489 = vperm.xlu0 %5986, %v9346_v57   ;;  %v9386_v12 = vmul.f32 %v3121_v8, %v9263_v50  ;;  %v3117_v29 = vsel %vm888_vm7, %v10730_v14, %v10732_v62  ;;  %v10733_v15 = vpack.c.bf16 %v9003_v45, %v8992_v24  ;;  %v10734_v4 = vld [vmem:[#allocation92_spill] sm:$0xff]  ;;  %v10737_v14 = vld [vmem:[#allocation27_spill] sm:$0xff] }
 0x434   : > { %3700 = vmatpush1.bf16.msra.mxu0 %v2860_v11  ;;  %v2980_v10 = vsel %vm770_vm6, %v10735_v46, %v10734_v4  ;;  %v10736_v11 = vld [vmem:[#allocation112_spill] sm:$0xff]  ;;  %v2903_v24 = vsel %vm770_vm6, %v10737_v14, %v8936_v39  ;;  %v2900_v45 = vpop.permute.xlu0 %2899  ;;  %v2935_v63 = vmul.f32 %v9157_v59, %v2904_v31  ;;  %v10740_v55 = vld [vmem:[#allocation23_spill] sm:$0xff] }
 0x435   : > { %3782 = vmatprep.subr.bf16.mxu0 %v10733_v15  ;;  %v3113_v20 = vsel %vm888_vm7, %v10732_v62, %v10736_v11  ;;  %v3125_v8 = vsel %vm888_vm7, %v10736_v11, %v10731_v56  ;;  %v6003_v15 = vld [vmem:[%s10319_s6 + $0x24] ss:$16 sps:$4 sm:$0xff]   ;;  %v2906_v62 = vsel %vm770_vm6, %v9272_v51, %v2892_v0  ;;  %v2908_v56 = vsel %vm770_vm6, %v2900_v45, %v9272_v51 }
 0x436   : > { %4500 = vmatpush1.bf16.msra.mxu1 %v2862_v25  ;;  %v10738_v11 = vpack.c.bf16 %v9058_v35, %v9052_v22  ;;  %v10739_v25 = vld [vmem:[#allocation94_spill] sm:$0xff]  ;;  %v2905_v0 = vsel %vm770_vm6, %v10740_v55, %v10737_v14  ;;  %v2907_v51 = vsel %vm770_vm6, %v9028_v6, %v10740_v55  ;;  %v10741_v22 = vpack.c.bf16 %v8989_v18, %v8986_v60  ;;  %v9455_v18 = vpop.permute.xlu1 %3173 }
 0x437   : > { %3702 = vmatmul.mubr.bf16.vlgmr.msra.gmra.mrb[16].mxu0 %v6000_v32  ;;  %v2976_v2 = vsel %vm770_vm6, %v10734_v4, %v10739_v25  ;;  %4260 = vperm.xlu0 %5986, %v9211_v16   ;;  %v2931_v35 = vmul.f32 %v9157_v59, %v2903_v24  ;;  %v2902_v31 = vsel %vm770_vm6, %v2896_v61, %v2900_v45 }
 0x438   : > { %4582 = vmatprep.subr.bf16.mxu1 %v10738_v11  ;;  %3783 = vmatpush1.bf16.msra.mxu0 %v10741_v22  ;;  %v2937_v4 = vmul.f32 %v9197_v38, %v2908_v56  ;;  %v10742_v14 = vpack.c.bf16 %v9151_v44, %v9148_v42  ;;  %v10743_v11 = vld [vmem:[#allocation95_spill] sm:$0xff]  ;;  %v2934_v16 = vmul.f32 %v9110_v54, %v2906_v62  ;;  %v9461_v42 = vpop.permute.xlu0 %3029  ;;  %v10752_v22 = vld [vmem:[#allocation29_spill] sm:$0xff] }
 0x439   : > { %4502 = vmatmul.mubr.bf16.vlgmr.msra.gmra.mrb[16].mxu1 %v6000_v32  ;;  %v2972_v55 = vsel %vm770_vm6, %v10739_v25, %v10743_v11  ;;  %v2984_v60 = vsel %vm770_vm6, %v10743_v11, %v10735_v46  ;;  %v10744_v61 = vpack.c.bf16 %v9055_v3, %v9049_v36  ;;  %3711 = vmatprep.mubr.bf16.mxu0 %v6003_v15  ;;  %v6005_v36 = vld [vmem:[%s10319_s6 + $0x20] ss:$16 sps:$4 sm:$0xff]   ;;  %v10756_v11 = vld [vmem:[#allocation96_spill] sm:$0xff] }
 0x43a   : > { %3784 = vmatprep.subr.bf16.mxu0 %v10742_v14  ;;  %v2901_v44 = vsel %vm770_vm6, %v8936_v39, %v9028_v6  ;;  %v2933_v32 = vmul.f32 %v9197_v38, %v2907_v51  ;;  %v10745_v46 = vpack.c.bf16 %v9181_v37, %v9160_v48  ;;  %v3003_v24 = vpack.c.bf16 %v2935_v63, %v2931_v35  ;;  %v9524_v25 = vpop.permute.xlu1 %3177  ;;  %v10753_v35 = vld [vmem:[#allocation26_spill] sm:$0xff]  ;;  %v10755_v14 = vld [vmem:[#allocation97_spill] sm:$0xff] }
 0x43b   : > { %4583 = vmatpush1.bf16.msra.mxu1 %v10744_v61  ;;  %4511 = vmatprep.mubr.bf16.mxu1 %v6003_v15  ;;  %v9475_v3 = vmul.f32 %v2980_v10, %v9110_v54  ;;  %v2930_v45 = vmul.f32 %v9110_v54, %v2905_v0  ;;  %v2936_v62 = vmul.f32 %v9194_v47, %v2902_v31  ;;  %v10758_v61 = vld [vmem:[#allocation25_spill] sm:$0xff] }
 0x43c   : > { %4584 = vmatprep.subr.bf16.mxu1 %v10745_v46  ;;  %4270 = vperm.xlu0 %5986, %v9257_v40   ;;  %v10746_v39 = vpack.c.bf16 %v9118_v13, %v9115_v21  ;;  %v2995_v6 = vmul.f32 %v2976_v2, %v9157_v59  ;;  %v9485_v48 = vmul.f32 %v2972_v55, %v9194_v47  ;;  %v3034_v13 = vpop.permute.xlu0 %3033  ;;  %v6006_v59 = vld [vmem:[%s10319_s6 + $0x44] ss:$16 sps:$4 sm:$0xff]   ;;  %v10757_v55 = vld [vmem:[#allocation98_spill] sm:$0xff] }
 0x43d   : > { %v9488_v37 = vmul.f32 %v3117_v29, %v9311_v49  ;;  %v3005_v63 = vpack.c.bf16 %v2937_v4, %v2933_v32  ;;  %v2997_v54 = vmul.f32 %v2984_v60, %v9197_v38  ;;  %v9492_v10 = vmul.f32 %v3113_v20, %v9341_v58  ;;  %v10748_v29 = vld [vmem:[#allocation115_spill] sm:$0xff]  ;;  %v10749_v38 = vld [vmem:[#allocation113_spill] sm:$0xff] }
 0x43e   : > { %3785 = vmatpush1.bf16.msra.mxu0 %v10746_v39  ;;  %v2932_v40 = vmul.f32 %v9194_v47, %v2901_v44  ;;  %v3002_v15 = vpack.c.bf16 %v2934_v16, %v2930_v45  ;;  %v10747_v21 = vpack.c.bf16 %v9163_v17, %v9154_v1  ;;  %v9502_v2 = vmul.f32 %v3125_v8, %v9364_v28  ;;  %v10750_v47 = vld [vmem:[#allocation118_spill] sm:$0xff]  ;;  %v10751_v8 = vld [vmem:[#allocation124_spill] sm:$0xff]  ;;  %v10761_v45 = vld [vmem:[#allocation31_spill] sm:$0xff] }
 0x43f   : > { %3786 = vmatprep.subr.bf16.mxu0 %v3003_v24  ;;  %v9508_v20 = vsel %vm888_vm7, %v10749_v38, %v10748_v29  ;;  %v9514_v1 = vsel %vm888_vm7, %v10748_v29, %v10750_v47  ;;  %3712 = vmatmul.mubr.bf16.gmra.mrb[20].mxu0 %v6005_v36  ;;  %v3014_v17 = vpack.c.bf16 %v9360_v26, %v9475_v3 }
 0x440   : > { %4585 = vmatpush1.bf16.msra.mxu1 %v10747_v21  ;;  %v9522_v56 = vsel %vm888_vm7, %v10751_v8, %v10749_v38  ;;  %v3004_v0 = vpack.c.bf16 %v2936_v62, %v2932_v40  ;;  %4280 = vperm.xlu0 %5986, %v9304_v23   ;;  %v3016_v51 = vpack.c.bf16 %v9380_v43, %v9485_v48  ;;  %v3038_v60 = vpop.permute.xlu0 %3037  ;;  %v10762_v62 = vld [vmem:[#allocation28_spill] sm:$0xff]  ;;  %v10764_v48 = vld [vmem:[#allocation99_spill] sm:$0xff]  ;;  %v9591_v21 = vpop.permute.xlu1 %3181 }
 0x441   : > { %4586 = vmatprep.subr.bf16.mxu1 %v3005_v63  ;;  %v3045_v26 = vsel %vm888_vm7, %v9173_v30, %v9239_v7  ;;  %v10754_v31 = vpack.c.bf16 %v10752_v22, %v10753_v35  ;;  %v3015_v4 = vpack.c.bf16 %v9372_v5, %v2995_v6  ;;  %4512 = vmatmul.mubr.bf16.gmra.mrb[20].mxu1 %v6005_v36  ;;  %v10760_v36 = vld [vmem:[#allocation54_spill] sm:$0xff] }
 0x442   : > { %3787 = vmatpush1.bf16.msra.mxu0 %v3002_v15  ;;  %v3120_v23 = vsel %vm888_vm7, %v10756_v11, %v10755_v14  ;;  %v3116_v43 = vsel %vm888_vm7, %v10755_v14, %v10757_v55  ;;  %v3017_v16 = vpack.c.bf16 %v9383_v9, %v2997_v54  ;;  %3721 = vmatprep.mubr.bf16.mxu0 %v6006_v59  ;;  %v6008_v9 = vld [vmem:[%s10319_s6 + $0x40] ss:$16 sps:$4 sm:$0xff]   ;;  %v10765_v63 = vld [vmem:[#allocation106_spill] sm:$0xff]  ;;  %v10766_v54 = vld [vmem:[#allocation104_spill] sm:$0xff] }
 0x443   : > { %3788 = vmatprep.subr.bf16.mxu0 %v10754_v31  ;;  %v3047_v5 = vsel %vm888_vm7, %v10758_v61, %v9173_v30  ;;  %v3048_v44 = vsel %vm888_vm7, %v9461_v42, %v3034_v13  ;;  %v3046_v32 = vsel %vm888_vm7, %v3034_v13, %v3038_v60  ;;  %v10759_v46 = vpack.c.bf16 %v9317_v27, %v9252_v41  ;;  %v6009_v27 = vld [vmem:[%s10319_s6 + $0x64] ss:$16 sps:$4 sm:$0xff]   ;;  %v10768_v14 = vld [vmem:[#allocation102_spill] sm:$0xff] }
 0x444   : > { %4587 = vmatpush1.bf16.msra.mxu1 %v3004_v0  ;;  %4521 = vmatprep.mubr.bf16.mxu1 %v6006_v59  ;;  %v3073_v24 = vmul.f32 %v9311_v49, %v3045_v26  ;;  %v3043_v30 = vsel %vm888_vm7, %v9239_v7, %v10760_v36  ;;  %v3077_v3 = vmul.f32 %v9311_v49, %v3046_v32  ;;  %v3042_v29 = vpop.permute.xlu0 %3041 }
 0x445   : > { %4588 = vmatprep.subr.bf16.mxu1 %v10759_v46  ;;  %4290 = vperm.xlu0 %5986, %v9346_v57   ;;  %v10763_v41 = vpack.c.bf16 %v10761_v45, %v10762_v62  ;;  %v9575_v39 = vmul.f32 %v3120_v23, %v9263_v50  ;;  %v3129_v6 = vmul.f32 %v3116_v43, %v9311_v49  ;;  %v9615_v23 = vpop.permute.xlu1 %3222  ;;  %v10770_v62 = vld [vmem:[#allocation9_spill] sm:$0xff] }
 0x446   : > { %v3124_v7 = vsel %vm888_vm7, %v10764_v48, %v10756_v11  ;;  %v3049_v57 = vsel %vm888_vm7, %v10760_v36, %v10758_v61  ;;  %v3118_v40 = vsel %vm888_vm7, %v10766_v54, %v10765_v63  ;;  %v3072_v15 = vmul.f32 %v9263_v50, %v3047_v5  ;;  %v10769_v11 = vld [vmem:[#allocation108_spill] sm:$0xff] }
 0x447   : > { %3789 = vmatpush1.bf16.msra.mxu0 %v10763_v41  ;;  %v3076_v13 = vmul.f32 %v9263_v50, %v3048_v44  ;;  %v10767_v59 = vpack.c.bf16 %v9307_v33, %v9249_v52  ;;  %v3145_v38 = vpack.c.bf16 %v3077_v3, %v3073_v24  ;;  %v3074_v0 = vmul.f32 %v9341_v58, %v3043_v30 }
 0x448   : > { %3790 = vmatprep.subr.bf16.mxu0 %v3015_v4  ;;  %v3044_v26 = vsel %vm888_vm7, %v3038_v60, %v3042_v29  ;;  %v3050_v22 = vsel %vm888_vm7, %v3042_v29, %v9461_v42  ;;  %3722 = vmatmul.mubr.bf16.gmra.mrb[24].mxu0 %v6008_v9  ;;  %v3075_v35 = vmul.f32 %v9364_v28, %v3049_v57  ;;  %v6015_v29 = vld [vmem:[%s10319_s6 + $0xa4] ss:$16 sps:$4 sm:$0xff]  }
 0x449   : > { %4589 = vmatpush1.bf16.msra.mxu1 %v10767_v59  ;;  %v3078_v31 = vmul.f32 %v9341_v58, %v3044_v26  ;;  %v3079_v52 = vmul.f32 %v9364_v28, %v3050_v22  ;;  %3731 = vmatprep.mubr.bf16.mxu0 %v6009_v27  ;;  %v3112_v33 = vsel %vm888_vm7, %v10757_v55, %v10764_v48  ;;  %v3231_v41 = vpop.permute.xlu1 %3230 }
 0x44a   : > { %4590 = vmatprep.subr.bf16.mxu1 %v3017_v16  ;;  %v3131_v4 = vmul.f32 %v3124_v7, %v9364_v28  ;;  %v3126_v42 = vsel %vm888_vm7, %v10769_v11, %v10768_v14  ;;  %4522 = vmatmul.mubr.bf16.gmra.mrb[24].mxu1 %v6008_v9  ;;  %v3144_v43 = vpack.c.bf16 %v3076_v13, %v3072_v15 }
 0x44b   : > { %3791 = vmatpush1.bf16.msra.mxu0 %v3014_v17  ;;  %v3146_v60 = vpack.c.bf16 %v3078_v31, %v3074_v0  ;;  %v9617_v17 = vpop.permute.xlu0 %3171  ;;  %v3147_v16 = vpack.c.bf16 %v3079_v52, %v3075_v35  ;;  %4531 = vmatprep.mubr.bf16.mxu1 %v6009_v27  ;;  %v3122_v55 = vsel %vm888_vm7, %v10768_v14, %v10766_v54 }
 0x44c   : > { %3792 = vmatprep.subr.bf16.mxu0 %v3145_v38  ;;  %v3137_v61 = vmul.f32 %v3118_v40, %v9311_v49  ;;  %v3141_v5 = vmul.f32 %v9514_v1, %v9311_v49  ;;  %v3153_v44 = vpack.c.bf16 %v9488_v37, %v3129_v6  ;;  %v3130_v32 = vmul.f32 %v3112_v33, %v9341_v58  ;;  %v6012_v49 = vld [vmem:[%s10319_s6 + $0x84] ss:$16 sps:$4 sm:$0xff]   ;;  %v6014_v40 = vld [vmem:[%s10319_s6 + $0x80] ss:$16 sps:$4 sm:$0xff]  }
 0x44d   : > { %4591 = vmatpush1.bf16.msra.mxu1 %v3016_v51  ;;  %v6011_v51 = vld [vmem:[%s10319_s6 + $0x60] ss:$16 sps:$4 sm:$0xff]   ;;  %v3114_v46 = vsel %vm888_vm7, %v10765_v63, %v10769_v11  ;;  %v3115_v9 = vsel %vm888_vm7, %v10750_v47, %v10751_v8  ;;  %v3139_v37 = vmul.f32 %v3126_v42, %v9364_v28  ;;  %v3143_v1 = vmul.f32 %v9522_v56, %v9364_v28  ;;  %v3239_v26 = vpop.permute.xlu1 %3238 }
 0x44e   : > { %4592 = vmatprep.subr.bf16.mxu1 %v3147_v16  ;;  %v3155_v24 = vpack.c.bf16 %v9502_v2, %v3131_v4  ;;  %v3136_v36 = vmul.f32 %v3122_v55, %v9263_v50  ;;  %v3152_v30 = vpack.c.bf16 %v9386_v12, %v9575_v39  ;;  %v3140_v47 = vmul.f32 %v9508_v20, %v9263_v50  ;;  %v5575_v8 = vld [vmem:[%s10314_s1 + $0x20] sm:$0xf]  ;;  %v10771_v20 = vld [vmem:[#allocation10_spill] sm:$0xff] }
 0x44f   : > { %3793 = vmatpush1.bf16.msra.mxu0 %v3144_v43  ;;  %v3176_v3 = vpop.permute.xlu0 %3175  ;;  %v3138_v45 = vmul.f32 %v3114_v46, %v9341_v58  ;;  %v3142_v28 = vmul.f32 %v3115_v9, %v9341_v58  ;;  %v3157_v2 = vpack.c.bf16 %v3141_v5, %v3137_v61  ;;  %v3154_v56 = vpack.c.bf16 %v9492_v10, %v3130_v32  ;;  %v6017_v43 = vld [vmem:[%s10319_s6 + $0xa0] ss:$16 sps:$4 sm:$0xff]  }
 0x450   : > { %3794 = vmatprep.subr.bf16.mxu0 %v3153_v44  ;;  %3732 = vmatmul.mubr.bf16.gmra.mrb[28].mxu0 %v6011_v51  ;;  %v9658_v12 = vrot.slane %v5575_v8, %v10770_v62  ;;  %v3190_v50 = vsel %vm1006_vm8, %v9617_v17, %v3176_v3  ;;  %v9664_v27 = vrot.slane %v5575_v8, %v10771_v20  ;;  %v6020_v9 = vld [vmem:[%s10319_s6 + $0xc0] ss:$16 sps:$4 sm:$0xff]  }
 0x451   : > { %4593 = vmatpush1.bf16.msra.mxu1 %v3146_v60  ;;  %3741 = vmatprep.mubr.bf16.mxu0 %v6012_v49  ;;  %v3187_v58 = vsel %vm1006_vm8, %v9455_v18, %v9524_v25  ;;  %v3159_v10 = vpack.c.bf16 %v3143_v1, %v3139_v37  ;;  %v3156_v39 = vpack.c.bf16 %v3140_v47, %v3136_v36  ;;  %v3247_v60 = vpop.permute.xlu1 %3246 }
 0x452   : > { %4594 = vmatprep.subr.bf16.mxu1 %v3155_v24  ;;  %4532 = vmatmul.mubr.bf16.gmra.mrb[28].mxu1 %v6011_v51  ;;  %v3189_v6 = vsel %vm1006_vm8, %v9374_v53, %v9455_v18  ;;  %v3158_v7 = vpack.c.bf16 %v3142_v28, %v3138_v45  ;;  %v9675_v57 = vrot.slane %v5575_v8, %v6755_v34  ;;  %v10772_v18 = vld [vmem:[#allocation11_spill] sm:$0xff] }
 0x453   : > { %3795 = vmatpush1.bf16.msra.mxu0 %v3152_v30  ;;  %v3180_v48 = vpop.permute.xlu0 %3179  ;;  %4541 = vmatprep.mubr.bf16.mxu1 %v6012_v49  ;;  %v3218_v63 = vmul.f32 %v9664_v27, %v3190_v50  ;;  %v3215_v15 = vmul.f32 %v9658_v12, %v3187_v58  ;;  %v9685_v13 = vrot.slane %v5575_v8, %v10772_v18  ;;  %v6021_v24 = vld [vmem:[%s10319_s6 + $0xe4] ss:$16 sps:$4 sm:$0xff]  }
 0x454   : > { %3796 = vmatprep.subr.bf16.mxu0 %v3157_v2  ;;  %v3188_v54 = vsel %vm1006_vm8, %v3176_v3, %v3180_v48  ;;  %v3185_v34 = vsel %vm1006_vm8, %v9524_v25, %v9591_v21  ;;  %v3214_v38 = vmul.f32 %v9664_v27, %v3189_v6  ;;  %v3191_v0 = vsel %vm1006_vm8, %v9591_v21, %v9374_v53 }
 0x455   : > { %4595 = vmatpush1.bf16.msra.mxu1 %v3154_v56  ;;  %v3219_v59 = vmul.f32 %v9658_v12, %v3188_v54  ;;  %v3216_v25 = vmul.f32 %v9675_v57, %v3185_v34  ;;  %v3217_v4 = vmul.f32 %v9685_v13, %v3191_v0  ;;  %v3258_v61 = vsel %vm1006_vm8, %v3231_v41, %v3239_v26  ;;  %v3227_v44 = vpop.permute.xlu1 %3226 }
 0x456   : > { %4596 = vmatprep.subr.bf16.mxu1 %v3159_v10  ;;  %v3286_v31 = vpack.c.bf16 %v3218_v63, %v3214_v38  ;;  %v3262_v5 = vsel %vm1006_vm8, %v9615_v23, %v3231_v41  ;;  %v3271_v49 = vmul.f32 %v3258_v61, %v9658_v12  ;;  %v3254_v37 = vsel %vm1006_vm8, %v3239_v26, %v3247_v60  ;;  %v6023_v10 = vld [vmem:[%s10319_s6 + $0xe0] ss:$16 sps:$4 sm:$0xff]   ;;  %v6042_v61 = vld [vmem:[%s10319_s6 + $0xcc] ss:$16 sps:$4 sm:$0xff]  }
 0x457   : > { %3797 = vmatpush1.bf16.msra.mxu0 %v3156_v39  ;;  %v3184_v22 = vpop.permute.xlu0 %3183  ;;  %v3287_v35 = vpack.c.bf16 %v3219_v59, %v3215_v15  ;;  %v3270_v36 = vmul.f32 %v3262_v5, %v9664_v27  ;;  %v3266_v30 = vsel %vm1006_vm8, %v3247_v60, %v9615_v23  ;;  %v3272_v3 = vmul.f32 %v3254_v37, %v9675_v57  ;;  %v6026_v39 = vld [vmem:[%s10319_s6 + $0xc] ss:$16 sps:$4 sm:$0xff]   ;;  %v6044_v5 = vld [vmem:[%s10319_s6 + $0xc8] ss:$16 sps:$4 sm:$0xff]  }
 0x458   : > { %v3186_v52 = vsel %vm1006_vm8, %v3180_v48, %v3184_v22  ;;  %v3192_v33 = vsel %vm1006_vm8, %v3184_v22, %v9617_v17  ;;  %3742 = vmatmul.mubr.bf16.gmra.mrb[32].mxu0 %v6014_v40  ;;  %v6018_v17 = vld [vmem:[%s10319_s6 + $0xc4] ss:$16 sps:$4 sm:$0xff]   ;;  %v3273_v56 = vmul.f32 %v3266_v30, %v9685_v13  ;;  %v6036_v60 = vld [vmem:[%s10319_s6 + $0x8c] ss:$16 sps:$4 sm:$0xff]  }
 0x459   : > { %4597 = vmatpush1.bf16.msra.mxu1 %v3158_v7  ;;  %v3220_v14 = vmul.f32 %v9675_v57, %v3186_v52  ;;  %v3221_v53 = vmul.f32 %v9685_v13, %v3192_v33  ;;  %3798 = vmatprep.subr.bf16.mxu0 %v3287_v35  ;;  %v3235_v62 = vpop.permute.xlu1 %3234 }
 0x45a   : > { %3751 = vmatprep.mubr.bf16.mxu0 %v6015_v29  ;;  %4542 = vmatmul.mubr.bf16.gmra.mrb[32].mxu1 %v6014_v40  ;;  %v3264_v54 = vsel %vm1006_vm8, %v3227_v44, %v3235_v62 }
 0x45b   : > { %3799 = vmatpush1.bf16.msra.mxu0 %v3286_v31  ;;  %v3288_v21 = vpack.c.bf16 %v3220_v14, %v3216_v25  ;;  %v3225_v11 = vpop.permute.xlu0 %3224  ;;  %v3289_v42 = vpack.c.bf16 %v3221_v53, %v3217_v4  ;;  %4551 = vmatprep.mubr.bf16.mxu1 %v6015_v29  ;;  %v3278_v38 = vmul.f32 %v3264_v54, %v9664_v27  ;;  %v6024_v14 = vld [vmem:[%s10319_s6 + $0x8] ss:$16 sps:$4 sm:$0xff]   ;;  %v6027_v53 = vld [vmem:[%s10319_s6 + $0x2c] ss:$16 sps:$4 sm:$0xff]  }
 0x45d   : > { %4598 = vmatprep.subr.bf16.mxu1 %v3289_v42  ;;  %v3243_v6 = vpop.permute.xlu1 %3242  ;;  %v6033_v42 = vld [vmem:[%s10319_s6 + $0x6c] ss:$16 sps:$4 sm:$0xff]  }
 0x45e   : > { %4599 = vmatpush1.bf16.msra.mxu1 %v3288_v21  ;;  %v3260_v63 = vsel %vm1006_vm8, %v3235_v62, %v3243_v6 }
 0x45f   : > { %v3233_v16 = vpop.permute.xlu0 %3232  ;;  %v3279_v34 = vmul.f32 %v3260_v63, %v9658_v12 }
 0x460   : > { %3752 = vmatmul.mubr.bf16.gmra.mrb[36].mxu0 %v6017_v43  ;;  %v3263_v55 = vsel %vm1006_vm8, %v3225_v11, %v3233_v16 }
 0x461   : > { %3761 = vmatprep.mubr.bf16.mxu0 %v6018_v17  ;;  %v3274_v32 = vmul.f32 %v3263_v55, %v9664_v27  ;;  %v3251_v59 = vpop.permute.xlu1 %3250  ;;  %v6041_v55 = vld [vmem:[%s10319_s6 + $0xa8] ss:$16 sps:$4 sm:$0xff]  }
 0x462   : > { %4552 = vmatmul.mubr.bf16.gmra.mrb[36].mxu1 %v6017_v43  ;;  %v3256_v0 = vsel %vm1006_vm8, %v3243_v6, %v3251_v59  ;;  %v3268_v26 = vsel %vm1006_vm8, %v3251_v59, %v3227_v44  ;;  %v6035_v43 = vld [vmem:[%s10319_s6 + $0x68] ss:$16 sps:$4 sm:$0xff]   ;;  %v6045_v44 = vld [vmem:[%s10319_s6 + $0xec] ss:$16 sps:$4 sm:$0xff]  }
 0x463   : > { %v3241_v51 = vpop.permute.xlu0 %3240  ;;  %4561 = vmatprep.mubr.bf16.mxu1 %v6018_v17  ;;  %v3294_v45 = vpack.c.bf16 %v3274_v32, %v3270_v36  ;;  %v3280_v33 = vmul.f32 %v3256_v0, %v9675_v57  ;;  %v6038_v17 = vld [vmem:[%s10319_s6 + $0x88] ss:$16 sps:$4 sm:$0xff]  }
 0x464   : > { %v3259_v46 = vsel %vm1006_vm8, %v3233_v16, %v3241_v51  ;;  %v6039_v16 = vld [vmem:[%s10319_s6 + $0xac] ss:$16 sps:$4 sm:$0xff]  }
 0x465   : > { %v3275_v1 = vmul.f32 %v3259_v46, %v9658_v12  ;;  %v3415_v32 = vpop.permute.xlu1 %3414 }
 0x467   : > { %v3249_v47 = vpop.permute.xlu0 %3248  ;;  %v3295_v8 = vpack.c.bf16 %v3275_v1, %v3271_v49 }
 0x468   : > { %v3255_v28 = vsel %vm1006_vm8, %v3241_v51, %v3249_v47  ;;  %v3267_v2 = vsel %vm1006_vm8, %v3249_v47, %v3225_v11  ;;  %3762 = vmatmul.mubr.bf16.gmra.mrb[40].mxu0 %v6020_v9  ;;  %v6032_v11 = vld [vmem:[%s10319_s6 + $0x48] ss:$16 sps:$4 sm:$0xff]  }
 0x469   : > { %v3276_v41 = vmul.f32 %v3255_v28, %v9675_v57  ;;  %v3277_v50 = vmul.f32 %v3267_v2, %v9685_v13  ;;  %3800 = vmatprep.subr.bf16.mxu0 %v3295_v8  ;;  %3771 = vmatprep.mubr.bf16.mxu0 %v6021_v24  ;;  %v6047_v51 = vld [vmem:[%s10319_s6 + $0xe8] ss:$16 sps:$4 sm:$0xff]  }
 0x46a   : > { %3801 = vmatpush1.bf16.msra.mxu0 %v3294_v45  ;;  %4562 = vmatmul.mubr.bf16.gmra.mrb[40].mxu1 %v6020_v9  ;;  %v3425_v9 = vpop.permute.xlu1 %3424 }
 0x46b   : > { %v3296_v23 = vpack.c.bf16 %v3276_v41, %v3272_v3  ;;  %v3229_v20 = vpop.permute.xlu0 %3228  ;;  %v3297_v58 = vpack.c.bf16 %v3277_v50, %v3273_v56  ;;  %4571 = vmatprep.mubr.bf16.mxu1 %v6021_v24 }
 0x46d   : > { %4600 = vmatprep.subr.bf16.mxu1 %v3297_v58 }
 0x46e   : > { %4601 = vmatpush1.bf16.msra.mxu1 %v3296_v23  ;;  %v9838_v37 = vpop.permute.xlu1 %3434 }
 0x46f   : > { %v3237_v48 = vpop.permute.xlu0 %3236 }
 0x470   : > { %3772 = vmatmul.mubr.bf16.gmra.mrb[44].mxu0 %v6023_v10  ;;  %v3265_v7 = vsel %vm1006_vm8, %v3229_v20, %v3237_v48 }
 0x471   : > { %5608 = vmatprep.mubr.msk.bf16.mxu0 %vm3644_vm10, %v6026_v39  ;;  %v3282_v15 = vmul.f32 %v3265_v7, %v9664_v27 }
 0x472   : > { %4572 = vmatmul.mubr.bf16.gmra.mrb[44].mxu1 %v6023_v10  ;;  %v9842_v24 = vpop.permute.xlu1 %3444 }
 0x473   : > { %v3245_v40 = vpop.permute.xlu0 %3244  ;;  %5672 = vmatprep.mubr.msk.bf16.mxu1 %vm3644_vm10, %v6026_v39  ;;  %v3298_v25 = vpack.c.bf16 %v3282_v15, %v3278_v38 }
 0x474   : > { %v3261_v18 = vsel %vm1006_vm8, %v3237_v48, %v3245_v40 }
 0x475   : > { %v3283_v29 = vmul.f32 %v3261_v18, %v9658_v12  ;;  %v3281_v12 = vmul.f32 %v3268_v26, %v9685_v13 }
 0x476   : > { %v4216_v62 = vpop.permute.xlu1 %4215 }
 0x477   : > { %v3253_v22 = vpop.permute.xlu0 %3252  ;;  %v3299_v35 = vpack.c.bf16 %v3283_v29, %v3279_v34 }
 0x478   : > { %v3257_v31 = vsel %vm1006_vm8, %v3245_v40, %v3253_v22  ;;  %v3269_v52 = vsel %vm1006_vm8, %v3253_v22, %v3229_v20 }
 0x479   : > { %v3284_v27 = vmul.f32 %v3257_v31, %v9675_v57  ;;  %v3285_v4 = vmul.f32 %v3269_v52, %v9685_v13  ;;  %3802 = vmatprep.subr.bf16.mxu0 %v3299_v35  ;;  %v6029_v57 = vld [vmem:[%s10319_s6 + $0x28] ss:$16 sps:$4 sm:$0xff]   ;;  %v6030_v13 = vld [vmem:[%s10319_s6 + $0x4c] ss:$16 sps:$4 sm:$0xff]  }
 0x47a   : > { %3803 = vmatpush1.bf16.msra.mxu0 %v3298_v25  ;;  %v4226_v52 = vpop.permute.xlu1 %4225 }
 0x47b   : > { %v3300_v19 = vpack.c.bf16 %v3284_v27, %v3280_v33  ;;  %v3301_v21 = vpack.c.bf16 %v3285_v4, %v3281_v12 }
 0x47d   : > { %3815 = vmatmul.mubr.bf16.vlgmr.msra.gmra.mrb[16].mxu0 %v6024_v14  ;;  %4602 = vmatprep.subr.bf16.mxu1 %v3301_v21 }
 0x47e   : > { %4603 = vmatpush1.bf16.msra.mxu1 %v3300_v19  ;;  %5609 = vmatprep.mubr.msk.bf16.mxu0 %vm3644_vm10, %v6027_v53 }
 0x481   : > { %4615 = vmatmul.mubr.bf16.vlgmr.msra.gmra.mrb[16].mxu1 %v6024_v14 }
 0x482   : > { %5673 = vmatprep.mubr.msk.bf16.mxu1 %vm3644_vm10, %v6027_v53 }
 0x483   : > { %v3420_v46 = vpop.permute.xlu0 %3419 }
 0x485   : > { %3825 = vmatmul.mubr.bf16.gmra.mrb[20].mxu0 %v6029_v57 }
 0x486   : > { %5610 = vmatprep.mubr.msk.bf16.mxu0 %vm3644_vm10, %v6030_v13 }
 0x487   : > { %v3430_v49 = vpop.permute.xlu0 %3429 }
 0x489   : > { %4625 = vmatmul.mubr.bf16.gmra.mrb[20].mxu1 %v6029_v57 }
 0x48a   : > { %5674 = vmatprep.mubr.msk.bf16.mxu1 %vm3644_vm10, %v6030_v13 }
 0x48b   : > { %v9840_v1 = vpop.permute.xlu0 %3439 }
 0x48d   : > { %3835 = vmatmul.mubr.bf16.gmra.mrb[24].mxu0 %v6032_v11 }
 0x48e   : > { %5611 = vmatprep.mubr.msk.bf16.mxu0 %vm3644_vm10, %v6033_v42 }
 0x48f   : > { %v9844_v36 = vpop.permute.xlu0 %3449 }
 0x491   : > { %4635 = vmatmul.mubr.bf16.gmra.mrb[24].mxu1 %v6032_v11 }
 0x492   : > { %5675 = vmatprep.mubr.msk.bf16.mxu1 %vm3644_vm10, %v6033_v42 }
 0x494   : > { %v4221_v39 = vpop.permute.xlu0 %4220 }
 0x495   : > { %3845 = vmatmul.mubr.bf16.gmra.mrb[28].mxu0 %v6035_v43 }
 0x496   : > { %5612 = vmatprep.mubr.msk.bf16.mxu0 %vm3644_vm10, %v6036_v60 }
 0x499   : > { %4645 = vmatmul.mubr.bf16.gmra.mrb[28].mxu1 %v6035_v43 }
 0x49a   : > { %5676 = vmatprep.mubr.msk.bf16.mxu1 %vm3644_vm10, %v6036_v60 }
 0x49d   : > { %3855 = vmatmul.mubr.bf16.gmra.mrb[32].mxu0 %v6038_v17 }
 0x49e   : > { %5613 = vmatprep.mubr.msk.bf16.mxu0 %vm3644_vm10, %v6039_v16 }
 0x4a1   : > { %4655 = vmatmul.mubr.bf16.gmra.mrb[32].mxu1 %v6038_v17 }
 0x4a2   : > { %5677 = vmatprep.mubr.msk.bf16.mxu1 %vm3644_vm10, %v6039_v16 }
 0x4a5   : > { %3865 = vmatmul.mubr.bf16.gmra.mrb[36].mxu0 %v6041_v55 }
 0x4a6   : > { %5614 = vmatprep.mubr.msk.bf16.mxu0 %vm3644_vm10, %v6042_v61 }
 0x4a9   : > { %4665 = vmatmul.mubr.bf16.gmra.mrb[36].mxu1 %v6041_v55 }
 0x4aa   : > { %5678 = vmatprep.mubr.msk.bf16.mxu1 %vm3644_vm10, %v6042_v61 }
 0x4ad   : > { %3875 = vmatmul.mubr.bf16.gmra.mrb[40].mxu0 %v6044_v5 }
 0x4ae   : > { %5615 = vmatprep.mubr.msk.bf16.mxu0 %vm3644_vm10, %v6045_v44 }
 0x4b1   : > { %4675 = vmatmul.mubr.bf16.gmra.mrb[40].mxu1 %v6044_v5 }
 0x4b2   : > { %5679 = vmatprep.mubr.msk.bf16.mxu1 %vm3644_vm10, %v6045_v44 }
 0x4b5   : > { %3885 = vmatmul.mubr.bf16.gmra.mrb[44].mxu0 %v6047_v51 }
 0x4b9   : > { %4685 = vmatmul.mubr.bf16.gmra.mrb[44].mxu1 %v6047_v51 }
 0x550   : > { %v3816_v30 = vpop.f32.mrb[16].mxu0 }
 0x551   : > { %v5838_v47 = vadd.f32 %v3816_v30, %v3415_v32  ;;  %v3818_v8 = vpop.f32.mrb[17].mxu0 }
 0x552   : > { %v5839_v3 = vadd.f32 %v3818_v8, %v3415_v32  ;;  %v3820_v45 = vpop.f32.mrb[18].mxu0 }
 0x553   : > { %v5616_v28 = vmul.f32 -1.442695, %v5838_v47  ;;  %v5840_v2 = vadd.f32 %v3820_v45, %v3420_v46  ;;  %v3822_v56 = vpop.f32.mrb[19].mxu0 }
 0x554   : > { %v5617_v41 = vmul.f32 -1.442695, %v5839_v3  ;;  %v5841_v50 = vadd.f32 %v3822_v56, %v3420_v46  ;;  %v4616_v23 = vpop.f32.mrb[16].mxu1  ;;  %v4231_v3 = vpop.permute.xlu0 %4230 }
 0x555   : > { %6180 = vpow2.f32 %v5616_v28  ;;  %v5618_v20 = vmul.f32 -1.442695, %v5840_v2  ;;  %v5870_v58 = vadd.f32 %v4616_v23, %v4216_v62  ;;  %v4618_v10 = vpop.f32.mrb[17].mxu1 }
 0x556   : > { %6182 = vpow2.f32 %v5617_v41  ;;  %v5619_v6 = vmul.f32 -1.442695, %v5841_v50  ;;  %v5871_v48 = vadd.f32 %v4618_v10, %v4216_v62  ;;  %v4620_v7 = vpop.f32.mrb[18].mxu1 }
 0x557   : > { %6184 = vpow2.f32 %v5618_v20  ;;  %v5680_v63 = vmul.f32 -1.442695, %v5870_v58  ;;  %v5872_v54 = vadd.f32 %v4620_v7, %v4221_v39  ;;  %v4622_v40 = vpop.f32.mrb[19].mxu1 }
 0x558   : > { %6186 = vpow2.f32 %v5619_v6  ;;  %v5681_v15 = vmul.f32 -1.442695, %v5871_v48  ;;  %v5873_v18 = vadd.f32 %v4622_v40, %v4221_v39  ;;  %v3826_v34 = vpop.f32.mrb[20].mxu0  ;;  %v4236_v6 = vpop.permute.xlu1 %4235 }
 0x559   : > { %6188 = vpow2.f32 %v5680_v63  ;;  %v5682_v59 = vmul.f32 -1.442695, %v5872_v54  ;;  %v5842_v29 = vadd.f32 %v3826_v34, %v3425_v9  ;;  %v3828_v38 = vpop.f32.mrb[21].mxu0  ;;  %v4241_v34 = vpop.permute.xlu0 %4240 }
 0x55a   : > { %6190 = vpow2.f32 %v5681_v15  ;;  %v5683_v0 = vmul.f32 -1.442695, %v5873_v18  ;;  %v5843_v26 = vadd.f32 %v3828_v38, %v3425_v9  ;;  %v3830_v22 = vpop.f32.mrb[22].mxu0 }
 0x55b   : > { %6192 = vpow2.f32 %v5682_v59  ;;  %v5620_v35 = vmul.f32 -1.442695, %v5842_v29  ;;  %v5844_v25 = vadd.f32 %v3830_v22, %v3430_v49  ;;  %v3832_v31 = vpop.f32.mrb[23].mxu0 }
 0x55c   : > { %6194 = vpow2.f32 %v5683_v0  ;;  %v5845_v33 = vadd.f32 %v3832_v31, %v3430_v49  ;;  %v4626_v12 = vpop.f32.mrb[20].mxu1  ;;  %v5621_v14 = vmul.f32 -1.442695, %v5843_v26 }
 0x55d   : > { %6196 = vpow2.f32 %v5620_v35  ;;  %v5874_v27 = vadd.f32 %v4626_v12, %v4226_v52  ;;  %v4628_v4 = vpop.f32.mrb[21].mxu1  ;;  %v5622_v21 = vmul.f32 -1.442695, %v5844_v25 }
 0x55e   : > { %v4630_v53 = vpop.f32.mrb[22].mxu1  ;;  %v5623_v11 = vmul.f32 -1.442695, %v5845_v33  ;;  %6198 = vpow2.f32 %v5621_v14  ;;  %v5875_v62 = vadd.f32 %v4628_v4, %v4226_v52 }
 0x55f   : > { %v6181_v19 = vpop.eup %6180  ;;  %v4632_v57 = vpop.f32.mrb[23].mxu1  ;;  %v5684_v60 = vmul.f32 -1.442695, %v5874_v27  ;;  %6200 = vpow2.f32 %v5622_v21  ;;  %v5876_v23 = vadd.f32 %v4630_v53, %v4231_v3 }
 0x560   : > { %v6183_v13 = vpop.eup %6182  ;;  %v3836_v42 = vpop.f32.mrb[24].mxu0  ;;  %v3919_v55 = vadd.f32 1.0, %v6181_v19  ;;  %6202 = vpow2.f32 %v5623_v11  ;;  %v5877_v10 = vadd.f32 %v4632_v57, %v4231_v3  ;;  %v5685_v54 = vmul.f32 -1.442695, %v5875_v62 }
 0x561   : > { %v6185_v43 = vpop.eup %6184  ;;  %v3838_v17 = vpop.f32.mrb[25].mxu0  ;;  %v3920_v44 = vadd.f32 1.0, %v6183_v13  ;;  %6204 = vpow2.f32 %v5684_v60  ;;  %v5846_v7 = vadd.f32 %v3836_v42, %v9838_v37  ;;  %v5686_v59 = vmul.f32 -1.442695, %v5876_v23 }
 0x562   : > { %v6187_v16 = vpop.eup %6186  ;;  %v3840_v61 = vpop.f32.mrb[26].mxu0  ;;  %v3921_v46 = vadd.f32 1.0, %v6185_v43  ;;  %6206 = vrcp.f32 %v3919_v55  ;;  %v5847_v40 = vadd.f32 %v3838_v17, %v9838_v37  ;;  %v5687_v26 = vmul.f32 -1.442695, %v5877_v10 }
 0x563   : > { %v6189_v5 = vpop.eup %6188  ;;  %v3842_v51 = vpop.f32.mrb[27].mxu0  ;;  %v3922_v30 = vadd.f32 1.0, %v6187_v16  ;;  %6208 = vrcp.f32 %v3920_v44  ;;  %v5848_v29 = vadd.f32 %v3840_v61, %v9840_v1  ;;  %v5624_v37 = vmul.f32 -1.442695, %v5846_v7 }
 0x564   : > { %v6191_v32 = vpop.eup %6190  ;;  %v4636_v9 = vpop.f32.mrb[24].mxu1  ;;  %v4719_v45 = vadd.f32 1.0, %v6189_v5  ;;  %6210 = vrcp.f32 %v3921_v46  ;;  %v5849_v22 = vadd.f32 %v3842_v51, %v9840_v1  ;;  %v5625_v12 = vmul.f32 -1.442695, %v5847_v40 }
 0x565   : > { %v6193_v49 = vpop.eup %6192  ;;  %v4638_v47 = vpop.f32.mrb[25].mxu1  ;;  %v4720_v56 = vadd.f32 1.0, %v6191_v32  ;;  %6212 = vrcp.f32 %v3922_v30  ;;  %v5878_v31 = vadd.f32 %v4636_v9, %v4236_v6  ;;  %v5626_v1 = vmul.f32 -1.442695, %v5848_v29 }
 0x566   : > { %v6195_v8 = vpop.eup %6194  ;;  %v9846_v28 = vpop.f32.mrb[26].mxu1  ;;  %v4721_v50 = vadd.f32 1.0, %v6193_v49  ;;  %6214 = vrcp.f32 %v4719_v45  ;;  %v5879_v27 = vadd.f32 %v4638_v47, %v4236_v6  ;;  %v5627_v57 = vmul.f32 -1.442695, %v5849_v22 }
 0x567   : > { %v6197_v2 = vpop.eup %6196  ;;  %v9848_v41 = vpop.f32.mrb[27].mxu1  ;;  %v4722_v58 = vadd.f32 1.0, %v6195_v8  ;;  %6216 = vrcp.f32 %v4720_v56  ;;  %v5688_v43 = vmul.f32 -1.442695, %v5878_v31  ;;  %v5880_v44 = vadd.f32 %v9846_v28, %v4241_v34 }
 0x568   : > { %v9850_v20 = vpop.f32.mrb[28].mxu0  ;;  %v3923_v48 = vadd.f32 1.0, %v6197_v2  ;;  %v6199_v18 = vpop.eup %6198  ;;  %6218 = vrcp.f32 %v4721_v50  ;;  %v5689_v16 = vmul.f32 -1.442695, %v5879_v27  ;;  %v5881_v9 = vadd.f32 %v9848_v41, %v4241_v34 }
 0x569   : > { %v9852_v39 = vpop.f32.mrb[29].mxu0  ;;  %v6201_v0 = vpop.eup %6200  ;;  %6220 = vrcp.f32 %v4722_v58  ;;  %v3924_v5 = vadd.f32 1.0, %v6199_v18  ;;  %v5850_v3 = vadd.f32 %v9850_v20, %v9842_v24  ;;  %v5690_v23 = vmul.f32 -1.442695, %v5880_v44 }
 0x56a   : > { %v9855_v63 = vpop.f32.mrb[30].mxu0  ;;  %v6203_v25 = vpop.eup %6202  ;;  %6222 = vrcp.f32 %v3923_v48  ;;  %v3925_v46 = vadd.f32 1.0, %v6201_v0  ;;  %v5851_v56 = vadd.f32 %v9852_v39, %v9842_v24  ;;  %v5691_v10 = vmul.f32 -1.442695, %v5881_v9 }
 0x56b   : > { %v9858_v15 = vpop.f32.mrb[31].mxu0  ;;  %v6205_v33 = vpop.eup %6204  ;;  %6224 = vpow2.f32 %v5685_v54  ;;  %v3926_v8 = vadd.f32 1.0, %v6203_v25  ;;  %v5628_v7 = vmul.f32 -1.442695, %v5850_v3 }
 0x56c   : > { %v9861_v38 = vpop.f32.mrb[28].mxu1  ;;  %v9870_v14 = vpop.eup %6206  ;;  %6226 = vpow2.f32 %v5686_v59  ;;  %v4723_v2 = vadd.f32 1.0, %v6205_v33  ;;  %v5629_v39 = vmul.f32 -1.442695, %v5851_v56  ;;  %v5853_v56 = vadd.f32 %v9858_v15, %v9844_v36 }
 0x56d   : > { %v9864_v35 = vpop.f32.mrb[29].mxu1  ;;  %v9872_v53 = vpop.permute.xlu1 %4245  ;;  %6228 = vpow2.f32 %v5687_v26 }
 0x56e   : > { %v9866_v52 = vpop.f32.mrb[30].mxu1  ;;  %v9876_v21 = vpop.eup %6208  ;;  %6230 = vpow2.f32 %v5624_v37 }
 0x56f   : > { %v9868_v4 = vpop.f32.mrb[31].mxu1  ;;  %v9880_v11 = vpop.eup %6210  ;;  %6232 = vpow2.f32 %v5625_v12 }
 0x570   : > { %v9874_v19 = vpop.f32.mrb[32].mxu0  ;;  %v9882_v42 = vpop.permute.xlu0 %4250  ;;  %6234 = vpow2.f32 %v5626_v1 }
 0x571   : > { %v9878_v13 = vpop.f32.mrb[33].mxu0  ;;  %v9886_v17 = vpop.eup %6212  ;;  %6236 = vpow2.f32 %v5627_v57 }
 0x572   : > { %v9884_v60 = vpop.f32.mrb[34].mxu0  ;;  %v9890_v61 = vpop.eup %6214  ;;  %6238 = vpow2.f32 %v5688_v43 }
 0x573   : > { %v9888_v55 = vpop.f32.mrb[35].mxu0  ;;  %v9895_v32 = vpop.eup %6216  ;;  %6240 = vpow2.f32 %v5689_v16 }
 0x574   : > { %v9893_v51 = vpop.f32.mrb[32].mxu1  ;;  %v9900_v30 = vpop.eup %6218  ;;  %6242 = vrcp.f32 %v3924_v5 }
 0x575   : > { %v9898_v49 = vpop.f32.mrb[33].mxu1  ;;  %10773 = vst [vmem:[#allocation122_spill] sm:$0xff] %v9900_v30  ;;  %v9902_v47 = vpop.permute.xlu1 %3454  ;;  %6244 = vrcp.f32 %v3925_v46  ;;  %v5852_v46 = vadd.f32 %v9855_v63, %v9844_v36  ;;  %v5882_v63 = vadd.f32 %v9861_v38, %v9872_v53  ;;  %v5883_v36 = vadd.f32 %v9864_v35, %v9872_v53 }
 0x576   : > { %v9906_v45 = vpop.f32.mrb[34].mxu1  ;;  %v9908_v28 = vpop.eup %6220  ;;  %6246 = vrcp.f32 %v3926_v8  ;;  %v5884_v38 = vadd.f32 %v9866_v52, %v9882_v42 }
 0x577   : > { %10774 = vst [vmem:[#allocation121_spill] sm:$0xff] %v9908_v28  ;;  %v9912_v62 = vpop.f32.mrb[35].mxu1  ;;  %v9914_v41 = vpop.eup %6222  ;;  %6248 = vrcp.f32 %v4723_v2  ;;  %v5692_v53 = vmul.f32 -1.442695, %v5882_v63 }
 0x578   : > { %10775 = vst [vmem:[#allocation120_spill] sm:$0xff] %v9914_v41  ;;  %v9916_v50 = vpop.permute.xlu0 %3459  ;;  %v9918_v58 = vpop.f32.mrb[36].mxu0  ;;  %6250 = vpow2.f32 %v5690_v23 }
 0x579   : > { %v6225_v20 = vpop.eup %6224  ;;  %v9920_v6 = vpop.f32.mrb[37].mxu0  ;;  %6252 = vpow2.f32 %v5691_v10 }
 0x57a   : > { %v6227_v48 = vpop.eup %6226  ;;  %v9922_v54 = vpop.f32.mrb[38].mxu0  ;;  %v4724_v59 = vadd.f32 1.0, %v6225_v20  ;;  %6254 = vpow2.f32 %v5628_v7 }
 0x57b   : > { %v6229_v24 = vpop.eup %6228  ;;  %v9924_v40 = vpop.f32.mrb[39].mxu0  ;;  %v4725_v26 = vadd.f32 1.0, %v6227_v48  ;;  %6256 = vpow2.f32 %v5629_v39 }
 0x57c   : > { %v6231_v18 = vpop.eup %6230  ;;  %v9926_v34 = vpop.permute.xlu1 %3464  ;;  %v4726_v31 = vadd.f32 1.0, %v6229_v24  ;;  %6258 = vrcp.f32 %v4724_v59  ;;  %v5630_v59 = vmul.f32 -1.442695, %v5852_v46 }
 0x57d   : > { %v9928_v29 = vpop.f32.mrb[36].mxu1  ;;  %v6233_v0 = vpop.eup %6232  ;;  %v3967_v27 = vadd.f32 1.0, %v6231_v18  ;;  %6260 = vrcp.f32 %v4725_v26 }
 0x57e   : > { %v9930_v22 = vpop.f32.mrb[37].mxu1  ;;  %v6235_v25 = vpop.eup %6234  ;;  %v3968_v43 = vadd.f32 1.0, %v6233_v0  ;;  %6262 = vrcp.f32 %v4726_v31  ;;  %v5885_v31 = vadd.f32 %v9868_v4, %v9882_v42  ;;  %v5694_v42 = vmul.f32 -1.442695, %v5884_v38 }
 0x57f   : > { %v9932_v37 = vpop.permute.xlu0 %3469  ;;  %v9934_v33 = vpop.f32.mrb[38].mxu1  ;;  %v3969_v44 = vadd.f32 1.0, %v6235_v25  ;;  %6264 = vrcp.f32 %v3967_v27  ;;  %v5631_v25 = vmul.f32 -1.442695, %v5853_v56  ;;  %v5854_v27 = vadd.f32 %v9874_v19, %v9902_v47 }
 0x580   : > { %v6237_v12 = vpop.eup %6236  ;;  %v9936_v1 = vpop.f32.mrb[39].mxu1  ;;  %6266 = vrcp.f32 %v3968_v43  ;;  %v5695_v63 = vmul.f32 -1.442695, %v5885_v31 }
 0x581   : > { %v6239_v57 = vpop.eup %6238  ;;  %v9938_v16 = vpop.f32.mrb[40].mxu0  ;;  %v3970_v2 = vadd.f32 1.0, %v6237_v12  ;;  %6268 = vrcp.f32 %v3969_v44  ;;  %v5855_v44 = vadd.f32 %v9878_v13, %v9902_v47  ;;  %v5632_v13 = vmul.f32 -1.442695, %v5854_v27 }
 0x582   : > { %v6241_v5 = vpop.eup %6240  ;;  %v9942_v9 = vpop.f32.mrb[41].mxu0  ;;  %v4767_v10 = vadd.f32 1.0, %v6239_v57 }
 0x583   : > { %v9944_v8 = vpop.eup %6242  ;;  %v9946_v3 = vpop.permute.xlu1 %3474  ;;  %v4768_v39 = vadd.f32 1.0, %v6241_v5  ;;  %6270 = vrcp.f32 %v3970_v2  ;;  %v5693_v5 = vmul.f32 -1.442695, %v5883_v36  ;;  %v5856_v2 = vadd.f32 %v9884_v60, %v9916_v50 }
 0x584   : > { %10776 = vst [vmem:[#allocation119_spill] sm:$0xff] %v9944_v8  ;;  %v9950_v23 = vpop.f32.mrb[42].mxu0  ;;  %v9952_v20 = vpop.eup %6244  ;;  %6272 = vrcp.f32 %v4767_v10  ;;  %v5633_v60 = vmul.f32 -1.442695, %v5855_v44 }
 0x585   : > { %10777 = vst [vmem:[#allocation30_spill] sm:$0xff] %v9952_v20  ;;  %v9956_v48 = vpop.f32.mrb[43].mxu0  ;;  %v9958_v7 = vpop.eup %6246  ;;  %6274 = vrcp.f32 %v4768_v39 }
 0x586   : > { %10778 = vst [vmem:[#allocation36_spill] sm:$0xff] %v9958_v7  ;;  %v9960_v24 = vpop.permute.xlu0 %3479  ;;  %v9964_v15 = vpop.f32.mrb[40].mxu1  ;;  %6276 = vpow2.f32 %v5630_v59 }
 0x587   : > { %v9966_v18 = vpop.eup %6248  ;;  %v9970_v0 = vpop.f32.mrb[41].mxu1  ;;  %6278 = vpow2.f32 %v5631_v25 }
 0x588   : > { %10779 = vst [vmem:[#allocation33_spill] sm:$0xff] %v9966_v18  ;;  %v6251_v26 = vpop.eup %6250  ;;  %v9974_v12 = vpop.f32.mrb[42].mxu1  ;;  %6280 = vpow2.f32 %v5692_v53  ;;  %v5857_v53 = vadd.f32 %v9888_v55, %v9916_v50 }
 0x589   : > { %v6253_v35 = vpop.eup %6252  ;;  %v9978_v57 = vpop.f32.mrb[43].mxu1  ;;  %6282 = vpow2.f32 %v5693_v5 }
 0x58a   : > { %v6255_v43 = vpop.eup %6254  ;;  %v9980_v52 = vpop.permute.xlu1 %3484  ;;  %6284 = vpow2.f32 %v5694_v42  ;;  %v4770_v44 = vadd.f32 1.0, %v6253_v35  ;;  %v5635_v35 = vmul.f32 -1.442695, %v5857_v53 }
 0x58b   : > { %v9984_v46 = vpop.f32.mrb[44].mxu0  ;;  %v6257_v4 = vpop.eup %6256  ;;  %6286 = vpow2.f32 %v5695_v63  ;;  %v3971_v8 = vadd.f32 1.0, %v6255_v43 }
 0x58c   : > { %v9988_v56 = vpop.f32.mrb[45].mxu0  ;;  %v9990_v19 = vpop.eup %6258  ;;  %6288 = vpow2.f32 %v5632_v13  ;;  %v3972_v55 = vadd.f32 1.0, %v6257_v4 }
 0x58d   : > { %10780 = vst [vmem:[#allocation39_spill] sm:$0xff] %v9990_v19  ;;  %v9992_v10 = vpop.permute.xlu0 %3489  ;;  %v9994_v39 = vpop.f32.mrb[46].mxu0  ;;  %v5634_v19 = vmul.f32 -1.442695, %v5856_v2  ;;  %6290 = vpow2.f32 %v5633_v60 }
 0x58e   : > { %v9996_v36 = vpop.eup %6260  ;;  %v9998_v47 = vpop.f32.mrb[47].mxu0 }
 0x58f   : > { %10781 = vst [vmem:[#allocation32_spill] sm:$0xff] %v9996_v36  ;;  %v10000_v59 = vpop.eup %6262  ;;  %v10002_v38 = vpop.f32.mrb[44].mxu1  ;;  %v4769_v36 = vadd.f32 1.0, %v6251_v26  ;;  %6292 = vpow2.f32 %v5634_v19 }
 0x590   : > { %10782 = vst [vmem:[#allocation116_spill] sm:$0xff] %v10000_v59  ;;  %v10004_v18 = vpop.eup %6264  ;;  %v10006_v25 = vpop.f32.mrb[45].mxu1 }
 0x591   : > { %v10008_v31 = vpop.eup %6266  ;;  %v4256_v7 = vpop.permute.xlu1 %4255  ;;  %6294 = vrcp.f32 %v4769_v36 }
 0x592   : > { %v10012_v27 = vpop.f32.mrb[46].mxu1  ;;  %v10014_v5 = vpop.eup %6268  ;;  %v5886_v59 = vadd.f32 %v9893_v51, %v4256_v7  ;;  %v5887_v26 = vadd.f32 %v9898_v49, %v4256_v7  ;;  %6296 = vrcp.f32 %v4770_v44 }
 0x593   : > { %v10017_v42 = vpop.f32.mrb[47].mxu1  ;;  %v10019_v2 = vpop.eup %6270  ;;  %6298 = vrcp.f32 %v3971_v8 }
 0x594   : > { %10783 = vst [vmem:[#allocation40_spill] sm:$0xff] %v10017_v42  ;;  %v4261_v20 = vpop.permute.xlu0 %4260  ;;  %v10022_v63 = vpop.eup %6272  ;;  %v5696_v13 = vmul.f32 -1.442695, %v5886_v59  ;;  %v5697_v30 = vmul.f32 -1.442695, %v5887_v26  ;;  %6300 = vrcp.f32 %v3972_v55 }
 0x595   : > { %v5888_v50 = vadd.f32 %v9906_v45, %v4261_v20  ;;  %v10025_v41 = vpop.eup %6274  ;;  %6302 = vpow2.f32 %v5635_v35  ;;  %v5889_v55 = vadd.f32 %v9912_v62, %v4261_v20  ;;  %v5860_v62 = vadd.f32 %v9922_v54, %v9932_v37 }
 0x596   : > { %v6277_v51 = vpop.eup %6276  ;;  %6304 = vpow2.f32 %v5696_v13  ;;  %v5859_v13 = vadd.f32 %v9920_v6, %v9926_v34 }
 0x597   : > { %v6279_v28 = vpop.eup %6278  ;;  %v5698_v60 = vmul.f32 -1.442695, %v5888_v50  ;;  %v3973_v7 = vadd.f32 1.0, %v6277_v51  ;;  %6306 = vpow2.f32 %v5697_v30 }
 0x598   : > { %v6281_v43 = vpop.eup %6280  ;;  %v3974_v19 = vadd.f32 1.0, %v6279_v28  ;;  %v5858_v28 = vadd.f32 %v9918_v58, %v9926_v34  ;;  %v5861_v58 = vadd.f32 %v9924_v40, %v9932_v37  ;;  %v5637_v6 = vmul.f32 -1.442695, %v5859_v13 }
 0x599   : > { %v6283_v49 = vpop.eup %6282  ;;  %v4771_v42 = vadd.f32 1.0, %v6281_v43  ;;  %6308 = vpow2.f32 %v5698_v60 }
 0x59a   : > { %v6285_v4 = vpop.eup %6284  ;;  %v4772_v53 = vadd.f32 1.0, %v6283_v49  ;;  %6310 = vrcp.f32 %v3973_v7  ;;  %v5636_v7 = vmul.f32 -1.442695, %v5858_v28 }
 0x59b   : > { %v6287_v45 = vpop.eup %6286  ;;  %v4773_v59 = vadd.f32 1.0, %v6285_v4  ;;  %6312 = vrcp.f32 %v3974_v19  ;;  %v5638_v19 = vmul.f32 -1.442695, %v5860_v62 }
 0x59c   : > { %v6289_v36 = vpop.eup %6288  ;;  %v4774_v26 = vadd.f32 1.0, %v6287_v45  ;;  %6314 = vrcp.f32 %v4771_v42  ;;  %v5699_v42 = vmul.f32 -1.442695, %v5889_v55 }
 0x59d   : > { %v6291_v44 = vpop.eup %6290  ;;  %v4015_v35 = vadd.f32 1.0, %v6289_v36  ;;  %6316 = vrcp.f32 %v4772_v53  ;;  %v5639_v36 = vmul.f32 -1.442695, %v5861_v58 }
 0x59e   : > { %v6293_v8 = vpop.eup %6292  ;;  %v4016_v30 = vadd.f32 1.0, %v6291_v44  ;;  %6318 = vrcp.f32 %v4773_v59 }
 0x59f   : > { %v10028_v50 = vpop.eup %6294  ;;  %v4017_v60 = vadd.f32 1.0, %v6293_v8  ;;  %6320 = vrcp.f32 %v4774_v26  ;;  %v4266_v26 = vpop.permute.xlu1 %4265 }
 0x5a0   : > { %v10032_v51 = vpop.eup %6296  ;;  %6322 = vrcp.f32 %v4015_v35  ;;  %v5890_v28 = vadd.f32 %v9928_v29, %v4266_v26  ;;  %v5891_v62 = vadd.f32 %v9930_v22, %v4266_v26  ;;  %v5864_v29 = vadd.f32 %v9950_v23, %v9960_v24 }
 0x5a1   : > { %v10036_v43 = vpop.eup %6298  ;;  %6324 = vrcp.f32 %v4016_v30  ;;  %v5862_v30 = vadd.f32 %v9938_v16, %v9946_v3 }
 0x5a2   : > { %v10040_v20 = vpop.eup %6300  ;;  %6326 = vrcp.f32 %v4017_v60  ;;  %v4271_v60 = vpop.permute.xlu0 %4270 }
 0x5a3   : > { %v6303_v49 = vpop.eup %6302  ;;  %6328 = vpow2.f32 %v5699_v42  ;;  %v5863_v42 = vadd.f32 %v9942_v9, %v9946_v3  ;;  %v5893_v16 = vadd.f32 %v9936_v1, %v4271_v60  ;;  %v5701_v3 = vmul.f32 -1.442695, %v5891_v62  ;;  %v4048_v62 = vld [vmem:[#allocation5 + $0x8] sm:$0xff] }
 0x5a4   : > { %v6305_v4 = vpop.eup %6304  ;;  %v4018_v53 = vadd.f32 1.0, %v6303_v49  ;;  %6330 = vpow2.f32 %v5636_v7  ;;  %v5892_v49 = vadd.f32 %v9934_v33, %v4271_v60 }
 0x5a5   : > { %v6307_v34 = vpop.eup %6306  ;;  %v4815_v59 = vadd.f32 1.0, %v6305_v4  ;;  %6332 = vpow2.f32 %v5637_v6  ;;  %v5865_v4 = vadd.f32 %v9956_v48, %v9960_v24  ;;  %v5700_v6 = vmul.f32 -1.442695, %v5890_v28  ;;  %v4047_v28 = vld [vmem:[#allocation5] sm:$0xff] }
 0x5a6   : > { %v6309_v45 = vpop.eup %6308  ;;  %v4816_v37 = vadd.f32 1.0, %v6307_v34  ;;  %6334 = vpow2.f32 %v5638_v19  ;;  %v5702_v33 = vmul.f32 -1.442695, %v5892_v49  ;;  %v5703_v23 = vmul.f32 -1.442695, %v5893_v16 }
 0x5a7   : > { %v10044_v54 = vpop.eup %6310  ;;  %v4817_v55 = vadd.f32 1.0, %v6309_v45  ;;  %6336 = vpow2.f32 %v5639_v36 }
 0x5a8   : > { %v10046_v44 = vpop.eup %6312  ;;  %6338 = vrcp.f32 %v4018_v53 }
 0x5a9   : > { %v10048_v40 = vpop.eup %6314  ;;  %6340 = vrcp.f32 %v4815_v59 }
 0x5aa   : > { %v10050_v8 = vpop.eup %6316  ;;  %6342 = vrcp.f32 %v4816_v37 }
 0x5ab   : > { %v10052_v35 = vpop.eup %6318  ;;  %6344 = vrcp.f32 %v4817_v55  ;;  %v4276_v55 = vpop.permute.xlu1 %4275 }
 0x5ac   : > { %v10057_v13 = vpop.eup %6320  ;;  %6346 = vtanh.f32 %v5862_v30  ;;  %v5895_v16 = vadd.f32 %v9970_v0, %v4276_v55 }
 0x5ad   : > { %v10062_v58 = vpop.eup %6322  ;;  %6348 = vtanh.f32 %v5863_v42  ;;  %v5894_v42 = vadd.f32 %v9964_v15, %v4276_v55 }
 0x5ae   : > { %v10067_v7 = vpop.eup %6324  ;;  %6350 = vtanh.f32 %v5864_v29  ;;  %v4049_v29 = vld [vmem:[#allocation5 + $0x20] sm:$0xff] }
 0x5af   : > { %v10072_v22 = vpop.eup %6326  ;;  %6352 = vtanh.f32 %v5865_v4  ;;  %v4057_v15 = vmul.f32 %v10014_v5, %v4049_v29 }
 0x5b0   : > { %v6329_v9 = vpop.eup %6328  ;;  %6354 = vpow2.f32 %v5700_v6  ;;  %v4055_v6 = vmul.f32 %v10004_v18, %v4047_v28 }
 0x5b1   : > { %v6331_v34 = vpop.eup %6330  ;;  %v4818_v36 = vadd.f32 1.0, %v6329_v9  ;;  %6356 = vpow2.f32 %v5701_v3  ;;  %v4050_v9 = vld [vmem:[#allocation5 + $0x28] sm:$0xff] }
 0x5b2   : > { %v6333_v19 = vpop.eup %6332  ;;  %v4019_v53 = vadd.f32 1.0, %v6331_v34  ;;  %6358 = vpow2.f32 %v5702_v33  ;;  %v4056_v33 = vmul.f32 %v10008_v31, %v4048_v62  ;;  %v4058_v18 = vmul.f32 %v10019_v2, %v4050_v9  ;;  %v4286_v62 = vpop.permute.xlu1 %4285 }
 0x5b3   : > { %v6335_v45 = vpop.eup %6334  ;;  %v4020_v24 = vadd.f32 1.0, %v6333_v19  ;;  %6360 = vpow2.f32 %v5703_v23  ;;  %v5898_v29 = vadd.f32 %v10002_v38, %v4286_v62 }
 0x5b4   : > { %v6337_v1 = vpop.eup %6336  ;;  %v4021_v37 = vadd.f32 1.0, %v6335_v45  ;;  %6362 = vrcp.f32 %v4818_v36 }
 0x5b5   : > { %v10074_v48 = vpop.eup %6338  ;;  %v4022_v30 = vadd.f32 1.0, %v6337_v1  ;;  %6364 = vrcp.f32 %v4019_v53  ;;  %v4281_v1 = vpop.permute.xlu0 %4280 }
 0x5b6   : > { %v10076_v59 = vpop.eup %6340  ;;  %6366 = vrcp.f32 %v4020_v24 }
 0x5b7   : > { %v10078_v26 = vpop.eup %6342  ;;  %6368 = vrcp.f32 %v4021_v37 }
 0x5b8   : > { %v10080_v60 = vpop.eup %6344  ;;  %6370 = vrcp.f32 %v4022_v30 }
 0x5b9   : > { %v6347_v49 = vpop.eup %6346  ;;  %6372 = vtanh.f32 %v5894_v42 }
 0x5ba   : > { %v6349_v4 = vpop.eup %6348  ;;  %v4063_v3 = vmul.f32 %v6347_v49, %v9870_v14  ;;  %6374 = vtanh.f32 %v5895_v16  ;;  %v4847_v49 = vld [vmem:[#allocation5 + $0x10] sm:$0xff]  ;;  %v4848_v16 = vld [vmem:[#allocation5 + $0x18] sm:$0xff] }
 0x5bb   : > { %v6351_v34 = vpop.eup %6350  ;;  %v4064_v19 = vmul.f32 %v6349_v4, %v9876_v21  ;;  %v5896_v21 = vadd.f32 %v9974_v12, %v4281_v1  ;;  %v5867_v12 = vadd.f32 %v9988_v56, %v9980_v52  ;;  %v4291_v56 = vpop.permute.xlu0 %4290  ;;  %v4856_v38 = vmul.f32 %v10025_v41, %v4848_v16  ;;  %v4851_v16 = vld [vmem:[#allocation5 + $0x50] sm:$0xff] }
 0x5bc   : > { %v6353_v23 = vpop.eup %6352  ;;  %v4071_v45 = vadd.f32 %v4063_v3, %v4055_v6  ;;  %v4065_v36 = vmul.f32 %v6351_v34, %v9880_v11  ;;  %v5897_v11 = vadd.f32 %v9978_v57, %v4281_v1  ;;  %v5868_v57 = vadd.f32 %v9994_v39, %v9992_v10 }
 0x5bd   : > { %v6355_v0 = vpop.eup %6354  ;;  %v4072_v53 = vadd.f32 %v4064_v19, %v4056_v33  ;;  %v4066_v14 = vmul.f32 %v6353_v23, %v9886_v17  ;;  %v5866_v17 = vadd.f32 %v9984_v46, %v9980_v52  ;;  %v5869_v46 = vadd.f32 %v9998_v47, %v9992_v10  ;;  %v10784_v23 = vld [vmem:[#allocation40_spill] sm:$0xff] }
 0x5be   : > { %v6357_v24 = vpop.eup %6356  ;;  %4079 = vst [vmem:[#allocation5] sm:$0xff] %v4071_v45  ;;  %6376 = vtanh.f32 %v4071_v45  ;;  %v4073_v31 = vadd.f32 %v4065_v36, %v4057_v15  ;;  %v5899_v39 = vadd.f32 %v10006_v25, %v4286_v62  ;;  %v5900_v6 = vadd.f32 %v10012_v27, %v4291_v56  ;;  %v4849_v45 = vld [vmem:[#allocation5 + $0x30] sm:$0xff]  ;;  %v4054_v62 = vld [vmem:[#allocation5 + $0x68] sm:$0xff] }
 0x5bf   : > { %v6359_v37 = vpop.eup %6358  ;;  %4080 = vst [vmem:[#allocation5 + $0x8] sm:$0xff] %v4072_v53  ;;  %6378 = vtanh.f32 %v4072_v53  ;;  %v4074_v5 = vadd.f32 %v4066_v14, %v4058_v18  ;;  %v4855_v10 = vmul.f32 %v10022_v63, %v4847_v49  ;;  %v5901_v15 = vadd.f32 %v10784_v23, %v4291_v56  ;;  %v4850_v18 = vld [vmem:[#allocation5 + $0x38] sm:$0xff]  ;;  %v4051_v53 = vld [vmem:[#allocation5 + $0x40] sm:$0xff] }
 0x5c0   : > { %v10094_v55 = vpop.eup %6360  ;;  %4081 = vst [vmem:[#allocation5 + $0x20] sm:$0xff] %v4073_v31  ;;  %6380 = vtanh.f32 %v4073_v31  ;;  %v4819_v36 = vadd.f32 1.0, %v6355_v0  ;;  %v4820_v41 = vadd.f32 1.0, %v6357_v24  ;;  %v4821_v14 = vadd.f32 1.0, %v6359_v37  ;;  %v10786_v37 = vld [vmem:[#allocation121_spill] sm:$0xff] }
 0x5c1   : > { %v10098_v2 = vpop.eup %6362  ;;  %4082 = vst [vmem:[#allocation5 + $0x28] sm:$0xff] %v4074_v5  ;;  %6382 = vtanh.f32 %v4074_v5  ;;  %v10785_v5 = vld [vmem:[#allocation122_spill] sm:$0xff] }
 0x5c2   : > { %v10102_v28 = vpop.eup %6364  ;;  %6384 = vtanh.f32 %v5896_v21  ;;  %v4052_v21 = vld [vmem:[#allocation5 + $0x48] sm:$0xff] }
 0x5c3   : > { %v10106_v30 = vpop.eup %6366  ;;  %6386 = vtanh.f32 %v5897_v11  ;;  %v4060_v56 = vmul.f32 %v10040_v20, %v4052_v21 }
 0x5c4   : > { %v10110_v42 = vpop.eup %6368  ;;  %6388 = vtanh.f32 %v5866_v17  ;;  %v4053_v17 = vld [vmem:[#allocation5 + $0x60] sm:$0xff] }
 0x5c5   : > { %v10113_v52 = vpop.eup %6370  ;;  %6390 = vtanh.f32 %v5867_v12 }
 0x5c6   : > { %v6373_v4 = vpop.eup %6372  ;;  %6392 = vtanh.f32 %v5868_v57 }
 0x5c7   : > { %v6375_v9 = vpop.eup %6374  ;;  %v4863_v47 = vmul.f32 %v6373_v4, %v9890_v61  ;;  %6394 = vtanh.f32 %v5869_v46 }
 0x5c8   : > { %v6377_v3 = vpop.eup %6376  ;;  %v4864_v34 = vmul.f32 %v6375_v9, %v9895_v32  ;;  %6396 = vtanh.f32 %v5898_v29  ;;  %v4061_v9 = vmul.f32 %v10044_v54, %v4053_v17 }
 0x5c9   : > { %v6379_v33 = vpop.eup %6378  ;;  %v4095_v19 = vmul.f32 %v6377_v3, %v10062_v58  ;;  %v4871_v25 = vadd.f32 %v4863_v47, %v4855_v10  ;;  %6398 = vtanh.f32 %v5899_v39  ;;  %v4852_v10 = vld [vmem:[#allocation5 + $0x58] sm:$0xff]  ;;  %v10789_v47 = vld [vmem:[#allocation30_spill] sm:$0xff] }
 0x5ca   : > { %v6381_v27 = vpop.eup %6380  ;;  %v4096_v63 = vmul.f32 %v6379_v33, %v10067_v7  ;;  %v4872_v61 = vadd.f32 %v4864_v34, %v4856_v38  ;;  %6400 = vtanh.f32 %v5900_v6  ;;  %v4857_v7 = vmul.f32 %v10028_v50, %v4849_v45  ;;  %v10787_v50 = vld [vmem:[#allocation120_spill] sm:$0xff]  ;;  %v4853_v33 = vld [vmem:[#allocation5 + $0x70] sm:$0xff] }
 0x5cb   : > { %v6383_v1 = vpop.eup %6382  ;;  %4103 = vst [vmem:[#allocation4] sm:$0xff] %v4095_v19  ;;  %v4097_v32 = vmul.f32 %v6381_v27, %v10072_v22  ;;  %4879 = vst [vmem:[#allocation5 + $0x10] sm:$0xff] %v4871_v25  ;;  %6402 = vtanh.f32 %v4871_v25  ;;  %v4858_v22 = vmul.f32 %v10032_v51, %v4850_v18  ;;  %v10788_v51 = vld [vmem:[#allocation119_spill] sm:$0xff]  ;;  %v4062_v34 = vmul.f32 %v10046_v44, %v4054_v62  ;;  %v10790_v19 = vld [vmem:[#allocation36_spill] sm:$0xff] }
 0x5cc   : > { %v6385_v58 = vpop.eup %6384  ;;  %4104 = vst [vmem:[#allocation4 + $0x8] sm:$0xff] %v4096_v63  ;;  %v4098_v31 = vmul.f32 %v6383_v1, %v10074_v48  ;;  %4880 = vst [vmem:[#allocation5 + $0x18] sm:$0xff] %v4872_v61  ;;  %6404 = vtanh.f32 %v4872_v61  ;;  %v4059_v48 = vmul.f32 %v10036_v43, %v4051_v53  ;;  %v10791_v27 = vld [vmem:[#allocation33_spill] sm:$0xff]  ;;  %v4860_v63 = vmul.f32 %v10050_v8, %v4852_v10  ;;  %v10792_v61 = vld [vmem:[#allocation39_spill] sm:$0xff] }
 0x5cd   : > { %v6387_v0 = vpop.eup %6386  ;;  %4105 = vst [vmem:[#allocation4 + $0x20] sm:$0xff] %v4097_v32  ;;  %v4865_v24 = vmul.f32 %v6385_v58, %v10785_v5  ;;  %6406 = vtanh.f32 %v5901_v15  ;;  %v4859_v15 = vmul.f32 %v10048_v40, %v4851_v16  ;;  %v4854_v32 = vld [vmem:[#allocation5 + $0x78] sm:$0xff] }
 0x5ce   : > { %v6389_v11 = vpop.eup %6388  ;;  %6408 = vrcp.f32 %v4819_v36  ;;  %4106 = vst [vmem:[#allocation4 + $0x28] sm:$0xff] %v4098_v31  ;;  %v4866_v12 = vmul.f32 %v6387_v0, %v10786_v37  ;;  %v10793_v58 = vld [vmem:[#allocation32_spill] sm:$0xff] }
 0x5cf   : > { %v6391_v57 = vpop.eup %6390  ;;  %6410 = vrcp.f32 %v4820_v41  ;;  %v4873_v46 = vadd.f32 %v4865_v24, %v4857_v7  ;;  %v4067_v49 = vmul.f32 %v6389_v11, %v10787_v50  ;;  %v4861_v41 = vmul.f32 %v10052_v35, %v4853_v33  ;;  %v10794_v11 = vld [vmem:[#allocation116_spill] sm:$0xff] }
 0x5d0   : > { %v6393_v29 = vpop.eup %6392  ;;  %6412 = vrcp.f32 %v4821_v14  ;;  %v4874_v39 = vadd.f32 %v4866_v12, %v4858_v22  ;;  %v4068_v4 = vmul.f32 %v6391_v57, %v10788_v51  ;;  %v4822_v7 = vadd.f32 1.0, %v10094_v55 }
 0x5d1   : > { %v6395_v6 = vpop.eup %6394  ;;  %4881 = vst [vmem:[#allocation5 + $0x30] sm:$0xff] %v4873_v46  ;;  %6414 = vtanh.f32 %v4873_v46  ;;  %v4075_v43 = vadd.f32 %v4067_v49, %v4059_v48  ;;  %v4069_v3 = vmul.f32 %v6393_v29, %v10789_v47  ;;  %v4862_v24 = vmul.f32 %v10057_v13, %v4854_v32 }
 0x5d2   : > { %v6397_v38 = vpop.eup %6396  ;;  %4882 = vst [vmem:[#allocation5 + $0x38] sm:$0xff] %v4874_v39  ;;  %6416 = vtanh.f32 %v4874_v39  ;;  %v4076_v20 = vadd.f32 %v4068_v4, %v4060_v56  ;;  %v4070_v25 = vmul.f32 %v6395_v6, %v10790_v19  ;;  %v10166_v47 = vld [vmem:[#allocation4] sm:$0xff] (!%p5704_p1)  ;;  %v6512_v33 = vmov (!%p5704_p1), 0  }
 0x5d3   : > { %v6399_v23 = vpop.eup %6398  ;;  %4083 = vst [vmem:[#allocation5 + $0x40] sm:$0xff] %v4075_v43  ;;  %6418 = vtanh.f32 %v4075_v43  ;;  %v4077_v54 = vadd.f32 %v4069_v3, %v4061_v9  ;;  %v4867_v45 = vmul.f32 %v6397_v38, %v10791_v27  ;;  %v10168_v3 = vld [vmem:[#allocation4 + $0x8] sm:$0xff] (!%p5704_p1)  ;;  %6469 = vset.pattern.permute.xlu1 (!%p5704_p1), %v6512_v33  ;;  %6468 = vset.pattern.permute.xlu0 (!%p5704_p1), %v6512_v33 }
 0x5d4   : > { %v6401_v36 = vpop.eup %6400  ;;  %4084 = vst [vmem:[#allocation5 + $0x48] sm:$0xff] %v4076_v20  ;;  %6420 = vtanh.f32 %v4076_v20  ;;  %v4078_v44 = vadd.f32 %v4070_v25, %v4062_v34  ;;  %v4868_v1 = vmul.f32 %v6399_v23, %v10792_v61  ;;  %v4939_v25 = vadd.f32 (!%p5704_p1), %v10168_v3, %v10166_v47 }
 0x5d5   : > { %v6403_v18 = vpop.eup %6402  ;;  %4085 = vst [vmem:[#allocation5 + $0x60] sm:$0xff] %v4077_v54  ;;  %6422 = vtanh.f32 %v4077_v54  ;;  %v4875_v40 = vadd.f32 %v4867_v45, %v4859_v15  ;;  %v4869_v53 = vmul.f32 %v6401_v36, %v10793_v58  ;;  %v4959_v23 = vmul.f32 (!%p5704_p1), %v10166_v47, %v10166_v47  ;;  %v10184_v54 = vld [vmem:[#allocation4 + $0x20] sm:$0xff] (!%p5704_p1) }
 0x5d6   : > { %v6405_v14 = vpop.eup %6404  ;;  %v4895_v31 = vmul.f32 %v6403_v18, %v10076_v59  ;;  %4086 = vst [vmem:[#allocation5 + $0x68] sm:$0xff] %v4078_v44  ;;  %6424 = vtanh.f32 %v4078_v44  ;;  %v4876_v8 = vadd.f32 %v4868_v1, %v4860_v63  ;;  %v4960_v15 = vmul.f32 (!%p5704_p1), %v10168_v3, %v10168_v3  ;;  %v10193_v44 = vld [vmem:[#allocation4 + $0x28] sm:$0xff] (!%p5704_p1) }
 0x5d7   : > { %v6407_v0 = vpop.eup %6406  ;;  %v4896_v21 = vmul.f32 %v6405_v14, %v10078_v26  ;;  %4883 = vst [vmem:[#allocation5 + $0x50] sm:$0xff] %v4875_v40  ;;  %6426 = vtanh.f32 %v4875_v40  ;;  %v4877_v35 = vadd.f32 %v4869_v53, %v4861_v41  ;;  %v4963_v18 = vmul.f32 (!%p5704_p1), %v10184_v54, %v10184_v54 }
 0x5d8   : > { %v6409_v5 = vpop.eup %6408  ;;  %4903 = vst [vmem:[#allocation4 + $0x10] sm:$0xff] %v4895_v31  ;;  %4884 = vst [vmem:[#allocation5 + $0x58] sm:$0xff] %v4876_v8  ;;  %6428 = vtanh.f32 %v4876_v8  ;;  %v4870_v22 = vmul.f32 %v6407_v0, %v10794_v11  ;;  %v4975_v32 = vadd.f32 (!%p5704_p1), %v4960_v15, %v4959_v23  ;;  %v4944_v40 = vadd.f32 (!%p5704_p1), %v10193_v44, %v10184_v54 }
 0x5d9   : > { %v6411_v59 = vpop.eup %6410  ;;  %4904 = vst [vmem:[#allocation4 + $0x18] sm:$0xff] %v4896_v21  ;;  %4885 = vst [vmem:[#allocation5 + $0x70] sm:$0xff] %v4877_v35  ;;  %6430 = vtanh.f32 %v4877_v35  ;;  %v4964_v58 = vmul.f32 (!%p5704_p1), %v10193_v44, %v10193_v44 }
 0x5da   : > { %v6413_v17 = vpop.eup %6412  ;;  %v4878_v37 = vadd.f32 %v4870_v22, %v4862_v24  ;;  %6432 = vrcp.f32 %v4822_v7 }
 0x5db   : > { %v6415_v55 = vpop.eup %6414  ;;  %v4980_v11 = vadd.f32 (!%p5704_p1), %v4964_v58, %v4963_v18 }
 0x5dc   : > { %v6417_v26 = vpop.eup %6416  ;;  %v4897_v12 = vmul.f32 %v6415_v55, %v10080_v60  ;;  %4886 = vst [vmem:[#allocation5 + $0x78] sm:$0xff] %v4878_v37  ;;  %6434 = vtanh.f32 %v4878_v37 }
 0x5dd   : > { %v6419_v57 = vpop.eup %6418  ;;  %v4898_v13 = vmul.f32 %v6417_v26, %v10098_v2 }
 0x5de   : > { %v6421_v48 = vpop.eup %6420  ;;  %4905 = vst [vmem:[#allocation4 + $0x30] sm:$0xff] %v4897_v12  ;;  %v4099_v62 = vmul.f32 %v6419_v57, %v10102_v28 }
 0x5df   : > { %v6423_v46 = vpop.eup %6422  ;;  %4906 = vst [vmem:[#allocation4 + $0x38] sm:$0xff] %v4898_v13  ;;  %v4100_v50 = vmul.f32 %v6421_v48, %v10106_v30  ;;  %v10174_v20 = vld [vmem:[#allocation4 + $0x10] sm:$0xff] (!%p5704_p1) }
 0x5e0   : > { %v6425_v49 = vpop.eup %6424  ;;  %4107 = vst [vmem:[#allocation4 + $0x40] sm:$0xff] %v4099_v62  ;;  %v4101_v29 = vmul.f32 %v6423_v46, %v10110_v42  ;;  %v10176_v19 = vld [vmem:[#allocation4 + $0x18] sm:$0xff] (!%p5704_p1)  ;;  %v4961_v36 = vmul.f32 (!%p5704_p1), %v10174_v20, %v10174_v20  ;;  %v4940_v41 = vadd.f32 (!%p5704_p1), %v4939_v25, %v10174_v20 }
 0x5e1   : > { %v6427_v56 = vpop.eup %6426  ;;  %4108 = vst [vmem:[#allocation4 + $0x48] sm:$0xff] %v4100_v50  ;;  %v4102_v60 = vmul.f32 %v6425_v49, %v10113_v52  ;;  %v4962_v63 = vmul.f32 (!%p5704_p1), %v10176_v19, %v10176_v19 }
 0x5e2   : > { %v6429_v16 = vpop.eup %6428  ;;  %4109 = vst [vmem:[#allocation4 + $0x60] sm:$0xff] %v4101_v29  ;;  %v4899_v39 = vmul.f32 %v6427_v56, %v6409_v5  ;;  %v4941_v35 = vadd.f32 (!%p5704_p1), %v4940_v41, %v10176_v19  ;;  %v4976_v5 = vadd.f32 (!%p5704_p1), %v4975_v32, %v4961_v36 }
 0x5e3   : > { %v6431_v2 = vpop.eup %6430  ;;  %4110 = vst [vmem:[#allocation4 + $0x68] sm:$0xff] %v4102_v60  ;;  %v4900_v51 = vmul.f32 %v6429_v16, %v6411_v59  ;;  %4914 = sbr.rel (%p5704_p1) target bundleno = 1989 (0x7c5), region = 64 }
 0x5e4   : > { %4907 = vst [vmem:[#allocation4 + $0x50] sm:$0xff] %v4899_v39  ;;  %v4901_v28 = vmul.f32 %v6431_v2, %v6413_v17  ;;  %v6433_v4 = vpop.eup %6432  ;;  %4942 = vadd.xlane.f32.xlu0 (!%p5704_p1), %v4941_v35  ;;  %v4977_v55 = vadd.f32 (!%p5704_p1), %v4976_v5, %v4962_v63  ;;  %v4932_v39 = vld [vmem:[%s10321_s8 + $0x8] sm:$0xff] (!%p5704_p1)  ;;  %v4935_v2 = vld [vmem:[%s10322_s9] sm:$0xff] (!%p5704_p1) }
 0x5e5   : > { %4908 = vst [vmem:[#allocation4 + $0x58] sm:$0xff] %v4900_v51  ;;  %v10195_v61 = vld [vmem:[#allocation4 + $0x30] sm:$0xff] (!%p5704_p1)  ;;  %v4931_v51 = vld [vmem:[%s10321_s8] sm:$0xff] (!%p5704_p1) }
 0x5e6   : > { %v6435_v6 = vpop.eup %6434  ;;  %4909 = vst [vmem:[#allocation4 + $0x70] sm:$0xff] %v4901_v28  ;;  %v10197_v1 = vld [vmem:[#allocation4 + $0x38] sm:$0xff] (!%p5704_p1)  ;;  %v4965_v0 = vmul.f32 (!%p5704_p1), %v10195_v61, %v10195_v61  ;;  %v4945_v24 = vadd.f32 (!%p5704_p1), %v4944_v40, %v10195_v61  ;;  %v4936_v28 = vld [vmem:[%s10322_s9 + $0x8] sm:$0xff] (!%p5704_p1) }
 0x5e7   : > { %v4902_v30 = vmul.f32 %v6435_v6, %v6433_v4  ;;  %v10206_v53 = vld [vmem:[#allocation4 + $0x40] sm:$0xff] (!%p5704_p1)  ;;  %v4966_v7 = vmul.f32 (!%p5704_p1), %v10197_v1, %v10197_v1  ;;  %v4933_v4 = vld [vmem:[%s10321_s8 + $0x10] sm:$0xff] (!%p5704_p1)  ;;  %v4934_v6 = vld [vmem:[%s10321_s8 + $0x18] sm:$0xff] (!%p5704_p1) }
 0x5e8   : > { %v10208_v14 = vld [vmem:[#allocation4 + $0x48] sm:$0xff] (!%p5704_p1)  ;;  %v4967_v17 = vmul.f32 (!%p5704_p1), %v10206_v53, %v10206_v53  ;;  %v4946_v26 = vadd.f32 (!%p5704_p1), %v4945_v24, %v10197_v1  ;;  %v4981_v12 = vadd.f32 (!%p5704_p1), %v4980_v11, %v4965_v0 }
 0x5e9   : > { %4910 = vst [vmem:[#allocation4 + $0x78] sm:$0xff] %v4902_v30  ;;  %v10156_v42 = vld [vmem:[#allocation4 + $0x60] sm:$0xff] (!%p5704_p1)  ;;  %v4949_v21 = vadd.f32 (!%p5704_p1), %v10208_v14, %v10206_v53  ;;  %v4968_v37 = vmul.f32 (!%p5704_p1), %v10208_v14, %v10208_v14  ;;  %v4937_v30 = vld [vmem:[%s10322_s9 + $0x10] sm:$0xff] (!%p5704_p1) }
 0x5ea   : > { %v10158_v52 = vld [vmem:[#allocation4 + $0x68] sm:$0xff]  ;;  %v4971_v38 = vmul.f32 %v10156_v42, %v10156_v42  ;;  %v4982_v62 = vadd.f32 %v4981_v12, %v4966_v7  ;;  %4947 = vadd.xlane.f32.xlu0 %v4946_v26 }
 0x5eb   : > { %v4954_v43 = vadd.f32 %v10158_v52, %v10156_v42  ;;  %v4972_v34 = vmul.f32 %v10158_v52, %v10158_v52  ;;  %v10210_v31 = vld [vmem:[#allocation4 + $0x50] sm:$0xff]  ;;  %v4985_v48 = vadd.f32 %v4968_v37, %v4967_v17 }
 0x5ec   : > { %v4950_v22 = vadd.f32 %v4949_v21, %v10210_v31  ;;  %v4969_v57 = vmul.f32 %v10210_v31, %v10210_v31  ;;  %v10229_v13 = vld [vmem:[#allocation4 + $0x58] sm:$0xff] }
 0x5ed   : > { %v10160_v9 = vld [vmem:[#allocation4 + $0x70] sm:$0xff]  ;;  %v4990_v59 = vadd.f32 %v4972_v34, %v4971_v38  ;;  %v4970_v29 = vmul.f32 %v10229_v13, %v10229_v13  ;;  %v5140_v38 = vld [vmem:[%s10324_s11] sm:$0xf]  ;;  %v6513_v34 = vmov 0.0  }
 0x5ee   : > { %v4973_v27 = vmul.f32 %v10160_v9, %v10160_v9  ;;  %v4955_v45 = vadd.f32 %v4954_v43, %v10160_v9  ;;  %v4951_v49 = vadd.f32 %v4950_v22, %v10229_v13  ;;  %v4986_v56 = vadd.f32 %v4985_v48, %v4969_v57  ;;  %v4938_v43 = vld [vmem:[%s10322_s9 + $0x18] sm:$0xff]  ;;  %5214 = vmatprep.mubr.f32.mxu0 %v6513_v34 }
 0x5ef   : > { %5285 = vmatprep.mubr.f32.mxu1 %v6513_v34 }
 0x5f0   : > { %v10162_v10 = vld [vmem:[#allocation4 + $0x78] sm:$0xff]  ;;  %v4991_v50 = vadd.f32 %v4990_v59, %v4973_v27  ;;  %4952 = vadd.xlane.f32.xlu0 %v4951_v49  ;;  %v4987_v16 = vadd.f32 %v4986_v56, %v4970_v29 }
 0x5f1   : > { %v4956_v8 = vadd.f32 %v4955_v45, %v10162_v10  ;;  %v4974_v46 = vmul.f32 %v10162_v10, %v10162_v10 }
 0x5f3   : > { %4957 = vadd.xlane.f32.xlu1 %v4956_v8  ;;  %v4992_v60 = vadd.f32 %v4991_v50, %v4974_v46 }
 0x5f4   : > { %4988 = vadd.xlane.f32.xlu0 %v4987_v16 }
 0x5f7   : > { %4978 = vadd.xlane.f32.xlu1 %v4977_v55 }
 0x5fb   : > { %4983 = vadd.xlane.f32.xlu1 %v4982_v62 }
 0x5ff   : > { %4993 = vadd.xlane.f32.xlu1 %v4992_v60 }
 0x60a   : > { %5053 = vperm.xlu0 %6468, %v4931_v51  }
 0x610   : > { %5058 = vperm.xlu1 %6469, %v4932_v39  }
 0x614   : > { %5089 = vperm.xlu1 %6469, %v4935_v2  }
 0x618   : > { %5094 = vperm.xlu1 %6469, %v4936_v28  }
 0x61c   : > { %5063 = vperm.xlu1 %6469, %v4933_v4  }
 0x620   : > { %5068 = vperm.xlu1 %6469, %v4934_v6  }
 0x624   : > { %5099 = vperm.xlu1 %6469, %v4937_v30  }
 0x628   : > { %5104 = vperm.xlu1 %6469, %v4938_v43  }
 0x62c   : > { %5143 = vperm.xlu1 %6469, %v5140_v38  }
 0x671   : > { %v4943_v25 = vpop.xlane.xlu0 %4942 }
 0x672   : > { %v4995_v23 = vmul.f32 0.001953125, %v4943_v25 }
 0x674   : > { %v5003_v27 = vmul.f32 %v4995_v23, %v4995_v23  ;;  %v5012_v62 = vsub.f32 %v10168_v3, %v4995_v23  ;;  %v5014_v46 = vsub.f32 %v10176_v19, %v4995_v23  ;;  %v5011_v49 = vsub.f32 %v10166_v47, %v4995_v23 }
 0x675   : > { %v5013_v29 = vsub.f32 %v10174_v20, %v4995_v23 }
 0x677   : > { %v4948_v36 = vpop.xlane.xlu0 %4947 }
 0x678   : > { %v4996_v63 = vmul.f32 0.001953125, %v4948_v36 }
 0x67a   : > { %v5004_v32 = vmul.f32 %v4996_v63, %v4996_v63  ;;  %v5015_v51 = vsub.f32 %v10184_v54, %v4996_v63  ;;  %v5017_v28 = vsub.f32 %v10195_v61, %v4996_v63  ;;  %v5016_v6 = vsub.f32 %v10193_v44, %v4996_v63 }
 0x67b   : > { %v5018_v47 = vsub.f32 %v10197_v1, %v4996_v63 }
 0x67d   : > { %v4953_v0 = vpop.xlane.xlu0 %4952 }
 0x67e   : > { %v10265_v7 = vmul.f32 0.001953125, %v4953_v0 }
 0x680   : > { %v4958_v33 = vpop.xlane.xlu1 %4957  ;;  %v5005_v5 = vmul.f32 %v10265_v7, %v10265_v7  ;;  %v5019_v1 = vsub.f32 %v10206_v53, %v10265_v7  ;;  %v5020_v36 = vsub.f32 %v10208_v14, %v10265_v7 }
 0x681   : > { %v10263_v40 = vmul.f32 0.001953125, %v4958_v33  ;;  %v4989_v59 = vpop.xlane.xlu0 %4988 }
 0x682   : > { %v5001_v17 = vmul.f32 0.001953125, %v4989_v59 }
 0x683   : > { %v5006_v11 = vmul.f32 %v10263_v40, %v10263_v40  ;;  %v5023_v19 = vsub.f32 %v10156_v42, %v10263_v40  ;;  %v5024_v54 = vsub.f32 %v10158_v52, %v10263_v40  ;;  %v5021_v52 = vsub.f32 %v10210_v31, %v10265_v7 }
 0x684   : > { %v4979_v15 = vpop.xlane.xlu1 %4978  ;;  %v5009_v55 = vsub.f32 %v5001_v17, %v5005_v5 }
 0x685   : > { %v4999_v45 = vmul.f32 0.001953125, %v4979_v15 }
 0x686   : > { %v5029_v57 = vadd.f32 1e-05, %v5009_v55 }
 0x687   : > { %v5007_v18 = vsub.f32 %v4999_v45, %v5003_v27  ;;  %v5025_v27 = vsub.f32 %v10160_v9, %v10263_v40  ;;  %v5026_v9 = vsub.f32 %v10162_v10, %v10263_v40 }
 0x688   : > { %v4984_v41 = vpop.xlane.xlu1 %4983 }
 0x689   : > { %v5027_v58 = vadd.f32 1e-05, %v5007_v18  ;;  %v5000_v8 = vmul.f32 0.001953125, %v4984_v41  ;;  %v5054_v16 = vpop.permute.xlu0 %5053 }
 0x68b   : > { %6470 = vrsqrt.f32 %v5027_v58  ;;  %v5008_v21 = vsub.f32 %v5000_v8, %v5004_v32  ;;  %v5022_v32 = vsub.f32 %v10229_v13, %v10265_v7 }
 0x68c   : > { %v4994_v35 = vpop.xlane.xlu1 %4993 }
 0x68d   : > { %v5028_v24 = vadd.f32 1e-05, %v5008_v21  ;;  %v5002_v22 = vmul.f32 0.001953125, %v4994_v35 }
 0x68f   : > { %6472 = vrsqrt.f32 %v5028_v24  ;;  %v5010_v37 = vsub.f32 %v5002_v22, %v5006_v11 }
 0x690   : > { %v5059_v26 = vpop.permute.xlu1 %5058 }
 0x691   : > { %v5030_v12 = vadd.f32 1e-05, %v5010_v37 }
 0x693   : > { %6474 = vrsqrt.f32 %v5030_v12 }
 0x694   : > { %6476 = vrsqrt.f32 %v5029_v57  ;;  %v5090_v48 = vpop.permute.xlu1 %5089 }
 0x695   : > { %v6471_v50 = vpop.eup %6470 }
 0x696   : > { %v5036_v56 = vmul.f32 %v6471_v50, %v5012_v62  ;;  %v5038_v60 = vmul.f32 %v6471_v50, %v5014_v46  ;;  %v5035_v39 = vmul.f32 %v6471_v50, %v5011_v49  ;;  %v5037_v2 = vmul.f32 %v6471_v50, %v5013_v29 }
 0x698   : > { %v5095_v4 = vpop.permute.xlu1 %5094  ;;  %v5072_v30 = vmul.f32 %v5054_v16, %v5036_v56  ;;  %v5074_v38 = vmul.f32 %v5054_v16, %v5038_v60  ;;  %v5071_v33 = vmul.f32 %v5054_v16, %v5035_v39  ;;  %v5073_v25 = vmul.f32 %v5054_v16, %v5037_v2 }
 0x699   : > { %v6473_v3 = vpop.eup %6472 }
 0x69a   : > { %v5039_v20 = vmul.f32 %v6473_v3, %v5015_v51  ;;  %v5041_v43 = vmul.f32 %v6473_v3, %v5017_v28  ;;  %v5040_v34 = vmul.f32 %v6473_v3, %v5016_v6  ;;  %v5042_v61 = vmul.f32 %v6473_v3, %v5018_v47 }
 0x69b   : > { %v5108_v63 = vadd.f32 %v5090_v48, %v5072_v30  ;;  %v5110_v58 = vadd.f32 %v5090_v48, %v5074_v38  ;;  %v5107_v21 = vadd.f32 %v5090_v48, %v5071_v33  ;;  %v5109_v53 = vadd.f32 %v5090_v48, %v5073_v25 }
 0x69c   : > { %v5075_v23 = vmul.f32 %v5059_v26, %v5039_v20  ;;  %v5077_v15 = vmul.f32 %v5059_v26, %v5041_v43  ;;  %v5064_v44 = vpop.permute.xlu1 %5063  ;;  %v5076_v45 = vmul.f32 %v5059_v26, %v5040_v34  ;;  %v5078_v18 = vmul.f32 %v5059_v26, %v5042_v61 }
 0x69d   : > { %v6475_v42 = vpop.eup %6474  ;;  %v5124_v31 = vmax.f32 %v5108_v63, 0.0  ;;  %v5126_v48 = vmax.f32 %v5110_v58, 0.0  ;;  %v5123_v46 = vmax.f32 %v5107_v21, 0.0  ;;  %v5125_v50 = vmax.f32 %v5109_v53, 0.0  ;;  %v5139_v63 = vld [vmem:[%s10323_s10] sm:$0xf] }
 0x69e   : > { %v6477_v41 = vpop.eup %6476  ;;  %v5112_v5 = vadd.f32 %v5095_v4, %v5076_v45  ;;  %v5114_v14 = vadd.f32 %v5095_v4, %v5078_v18  ;;  %v5111_v24 = vadd.f32 %v5095_v4, %v5075_v23  ;;  %v5113_v11 = vadd.f32 %v5095_v4, %v5077_v15 }
 0x69f   : > { %v5043_v8 = vmul.f32 %v6477_v41, %v5019_v1  ;;  %v5044_v0 = vmul.f32 %v6477_v41, %v5020_v36  ;;  %v5045_v22 = vmul.f32 %v6477_v41, %v5021_v52  ;;  %v5046_v59 = vmul.f32 %v6477_v41, %v5022_v32 }
 0x6a0   : > { %v5069_v35 = vpop.permute.xlu1 %5068  ;;  %v5047_v17 = vmul.f32 %v6475_v42, %v5023_v19  ;;  %v5048_v13 = vmul.f32 %v6475_v42, %v5024_v54  ;;  %v5049_v7 = vmul.f32 %v6475_v42, %v5025_v27  ;;  %v5128_v26 = vmax.f32 %v5112_v5, 0.0 }
 0x6a1   : > { %v5079_v37 = vmul.f32 %v5064_v44, %v5043_v8  ;;  %v5080_v55 = vmul.f32 %v5064_v44, %v5044_v0  ;;  %v5130_v10 = vmax.f32 %v5114_v14, 0.0  ;;  %v5127_v40 = vmax.f32 %v5111_v24, 0.0 }
 0x6a2   : > { %v5129_v12 = vmax.f32 %v5113_v11, 0.0  ;;  %v5050_v57 = vmul.f32 %v6475_v42, %v5026_v9  ;;  %v5081_v49 = vmul.f32 %v5064_v44, %v5045_v22  ;;  %v5082_v29 = vmul.f32 %v5064_v44, %v5046_v59 }
 0x6a3   : > { %v5822_v16 = vpack.c.bf16 %v5128_v26, %v5124_v31  ;;  %v5830_v39 = vpack.c.bf16 %v5130_v10, %v5126_v48  ;;  %v5824_v2 = vpack.c.bf16 %v5127_v40, %v5123_v46  ;;  %v5083_v28 = vmul.f32 %v5069_v35, %v5047_v17 }
 0x6a4   : > { %v5100_v62 = vpop.permute.xlu1 %5099  ;;  %v5832_v51 = vpack.c.bf16 %v5129_v12, %v5125_v50  ;;  %v5084_v4 = vmul.f32 %v5069_v35, %v5048_v13  ;;  %v5085_v6 = vmul.f32 %v5069_v35, %v5049_v7  ;;  %v5086_v30 = vmul.f32 %v5069_v35, %v5050_v57 }
 0x6a5   : > { %v5115_v56 = vadd.f32 %v5100_v62, %v5079_v37  ;;  %v5116_v60 = vadd.f32 %v5100_v62, %v5080_v55  ;;  %v5117_v3 = vadd.f32 %v5100_v62, %v5081_v49  ;;  %v5118_v19 = vadd.f32 %v5100_v62, %v5082_v29  ;;  %5823 = vmatprep.subr.bf16.mxu0 %v5822_v16 }
 0x6a6   : > { %5831 = vmatprep.subr.bf16.mxu1 %v5830_v39  ;;  %5825 = vmatpush1.bf16.msra.mxu0 %v5824_v2 }
 0x6a7   : > { %5833 = vmatpush1.bf16.msra.mxu1 %v5832_v51  ;;  %v5132_v33 = vmax.f32 %v5116_v60, 0.0  ;;  %v5131_v25 = vmax.f32 %v5115_v56, 0.0  ;;  %v5133_v23 = vmax.f32 %v5117_v3, 0.0  ;;  %v5134_v44 = vmax.f32 %v5118_v19, 0.0 }
 0x6a8   : > { %v5105_v47 = vpop.permute.xlu1 %5104 }
 0x6a9   : > { %v5119_v20 = vadd.f32 %v5105_v47, %v5083_v28  ;;  %v5120_v43 = vadd.f32 %v5105_v47, %v5084_v4  ;;  %v5121_v38 = vadd.f32 %v5105_v47, %v5085_v6  ;;  %v5122_v34 = vadd.f32 %v5105_v47, %v5086_v30 }
 0x6ab   : > { %v5136_v54 = vmax.f32 %v5120_v43, 0.0  ;;  %v5135_v61 = vmax.f32 %v5119_v20, 0.0  ;;  %v5137_v15 = vmax.f32 %v5121_v38, 0.0  ;;  %v5138_v27 = vmax.f32 %v5122_v34, 0.0 }
 0x6ac   : > { %v5144_v18 = vpop.permute.xlu1 %5143 }
 0x6ad   : > { %v5826_v45 = vpack.c.bf16 %v5136_v54, %v5132_v33  ;;  %v5828_v42 = vpack.c.bf16 %v5135_v61, %v5131_v25  ;;  %v5836_v1 = vpack.c.bf16 %v5137_v15, %v5133_v23  ;;  %v5834_v36 = vpack.c.bf16 %v5138_v27, %v5134_v44 }
 0x6af   : > { %5827 = vmatprep.subr.bf16.mxu0 %v5826_v45  ;;  %5835 = vmatprep.subr.bf16.mxu1 %v5834_v36 }
 0x6b0   : > { %5829 = vmatpush1.bf16.msra.mxu0 %v5828_v42  ;;  %5837 = vmatpush1.bf16.msra.mxu1 %v5836_v1 }
 0x6b3   : > { %5705 = vmatmul.mubr.msk.f32.vlgmr.msra.gmra.mrb[0].mxu0 %vm5146_vm11, %v5139_v63  ;;  %5706 = vmatmul.mubr.msk.f32.vlgmr.msra.gmra.mrb[0].mxu1 %vm5146_vm11, %v5139_v63 }
 0x786   : > { %v5216_v41 = vpop.f32.mrb[0].mxu0  ;;  %v5287_v32 = vpop.f32.mrb[0].mxu1 }
 0x787   : > { %v5217_v52 = vadd.f32 %v5216_v41, %v5144_v18  ;;  %v5218_v9 = vpop.f32.mrb[1].mxu0  ;;  %v5288_v58 = vadd.f32 %v5287_v32, %v5144_v18  ;;  %v5289_v0 = vpop.f32.mrb[1].mxu1 }
 0x788   : > { %v5219_v8 = vadd.f32 %v5218_v9, %v5144_v18  ;;  %v5290_v53 = vadd.f32 %v5289_v0, %v5144_v18 }
 0x789   : > { %v5292_v21 = vsel %vm1381_vm9, %v5217_v52, -inf  ;;  %v5306_v5 = vsel %vm1381_vm9, %v5288_v58, -inf }
 0x78a   : > { %v5293_v35 = vrot.slane %v5292_v21, 4  ;;  %v5299_v14 = vsel %vm1381_vm9, %v5219_v8, -inf  ;;  %v5307_v24 = vrot.slane %v5306_v5, 4  ;;  %v5313_v22 = vsel %vm1381_vm9, %v5290_v53, -inf }
 0x78b   : > { %v5300_v11 = vrot.slane %v5299_v14, 4  ;;  %v5314_v17 = vrot.slane %v5313_v22, 4 }
 0x78c   : > { %v5294_v59 = vmax.f32 %v5292_v21, %v5293_v35  ;;  %v5308_v31 = vmax.f32 %v5306_v5, %v5307_v24 }
 0x78d   : > { %v5301_v37 = vmax.f32 %v5299_v14, %v5300_v11  ;;  %v5315_v13 = vmax.f32 %v5313_v22, %v5314_v17 }
 0x78e   : > { %v5295_v55 = vrot.slane %v5294_v59, 2  ;;  %v5309_v7 = vrot.slane %v5308_v31, 2 }
 0x78f   : > { %v5302_v26 = vrot.slane %v5301_v37, 2  ;;  %v5316_v40 = vrot.slane %v5315_v13, 2 }
 0x790   : > { %v5296_v10 = vmax.f32 %v5294_v59, %v5295_v55  ;;  %v5310_v12 = vmax.f32 %v5308_v31, %v5309_v7 }
 0x791   : > { %v5303_v57 = vmax.f32 %v5301_v37, %v5302_v26  ;;  %v5317_v48 = vmax.f32 %v5315_v13, %v5316_v40 }
 0x792   : > { %v5297_v62 = vrot.slane %v5296_v10, 1  ;;  %v5311_v46 = vrot.slane %v5310_v12, 1 }
 0x793   : > { %v5304_v50 = vrot.slane %v5303_v57, 1  ;;  %v5318_v29 = vrot.slane %v5317_v48, 1 }
 0x794   : > { %v5298_v49 = vmax.f32 %v5296_v10, %v5297_v62  ;;  %v5312_v56 = vmax.f32 %v5310_v12, %v5311_v46 }
 0x795   : > { %v5305_v60 = vmax.f32 %v5303_v57, %v5304_v50  ;;  %v5319_v39 = vmax.f32 %v5317_v48, %v5318_v29 }
 0x796   : > { %v5320_v16 = vsub.f32 %v5217_v52, %v5298_v49  ;;  %v5322_v2 = vsub.f32 %v5288_v58, %v5312_v56 }
 0x797   : > { %v5321_v51 = vsub.f32 %v5219_v8, %v5305_v60  ;;  %v5323_v4 = vsub.f32 %v5290_v53, %v5319_v39 }
 0x798   : > { %v5324_v28 = vmul.f32 1.442695, %v5320_v16  ;;  %v5328_v6 = vmul.f32 1.442695, %v5322_v2 }
 0x799   : > { %v5326_v3 = vmul.f32 1.442695, %v5321_v51  ;;  %v5330_v30 = vmul.f32 1.442695, %v5323_v4 }
 0x79a   : > { %6478 = vpow2.f32 %v5324_v28 }
 0x79b   : > { %6480 = vpow2.f32 %v5328_v6 }
 0x79c   : > { %6482 = vpow2.f32 %v5326_v3 }
 0x79d   : > { %6484 = vpow2.f32 %v5330_v30 }
 0x7a4   : > { %v6479_v19 = vpop.eup %6478 }
 0x7a5   : > { %v6481_v47 = vpop.eup %6480  ;;  %v5332_v20 = vsel %vm1381_vm9, %v6479_v19, 0.0 }
 0x7a6   : > { %v6483_v43 = vpop.eup %6482  ;;  %v5333_v38 = vrot.slane %v5332_v20, 4  ;;  %v5346_v34 = vsel %vm1381_vm9, %v6481_v47, 0.0 }
 0x7a7   : > { %v6485_v33 = vpop.eup %6484  ;;  %v5347_v25 = vrot.slane %v5346_v34, 4  ;;  %v5339_v54 = vsel %vm1381_vm9, %v6483_v43, 0.0 }
 0x7a8   : > { %v5334_v61 = vadd.f32 %v5333_v38, %v5332_v20  ;;  %v5340_v23 = vrot.slane %v5339_v54, 4  ;;  %v5353_v15 = vsel %vm1381_vm9, %v6485_v33, 0.0 }
 0x7a9   : > { %v5348_v44 = vadd.f32 %v5347_v25, %v5346_v34  ;;  %v5354_v27 = vrot.slane %v5353_v15, 4 }
 0x7aa   : > { %v5335_v45 = vrot.slane %v5334_v61, 2  ;;  %v5341_v42 = vadd.f32 %v5340_v23, %v5339_v54 }
 0x7ab   : > { %v5349_v1 = vrot.slane %v5348_v44, 2  ;;  %v5355_v36 = vadd.f32 %v5354_v27, %v5353_v15 }
 0x7ac   : > { %v5336_v63 = vadd.f32 %v5335_v45, %v5334_v61  ;;  %v5342_v18 = vrot.slane %v5341_v42, 2 }
 0x7ad   : > { %v5350_v41 = vadd.f32 %v5349_v1, %v5348_v44  ;;  %v5356_v52 = vrot.slane %v5355_v36, 2 }
 0x7ae   : > { %v5337_v32 = vrot.slane %v5336_v63, 1  ;;  %v5343_v9 = vadd.f32 %v5342_v18, %v5341_v42 }
 0x7af   : > { %v5351_v58 = vrot.slane %v5350_v41, 1  ;;  %v5357_v8 = vadd.f32 %v5356_v52, %v5355_v36 }
 0x7b0   : > { %v5338_v0 = vadd.f32 %v5337_v32, %v5336_v63  ;;  %v5344_v21 = vrot.slane %v5343_v9, 1 }
 0x7b1   : > { %v5352_v53 = vadd.f32 %v5351_v58, %v5350_v41  ;;  %v5358_v35 = vrot.slane %v5357_v8, 1 }
 0x7b2   : > { %6486 = vrcp.f32 %v5338_v0  ;;  %v5345_v5 = vadd.f32 %v5344_v21, %v5343_v9 }
 0x7b3   : > { %6488 = vrcp.f32 %v5352_v53  ;;  %v5359_v14 = vadd.f32 %v5358_v35, %v5357_v8 }
 0x7b4   : > { %6490 = vrcp.f32 %v5345_v5 }
 0x7b5   : > { %6492 = vrcp.f32 %v5359_v14 }
 0x7bc   : > { %v6487_v24 = vpop.eup %6486 }
 0x7bd   : > { %v6489_v11 = vpop.eup %6488  ;;  %v5364_v22 = vmul.f32 %v6487_v24, %v6479_v19 }
 0x7be   : > { %v6491_v59 = vpop.eup %6490  ;;  %v5366_v17 = vmul.f32 %v6489_v11, %v6481_v47 }
 0x7bf   : > { %v6493_v31 = vpop.eup %6492  ;;  %5382 = vst [vmem:[#allocation6] sm:$0xf] %v5364_v22  ;;  %v5365_v37 = vmul.f32 %v6491_v59, %v6483_v43 }
 0x7c0   : > { %5384 = vst [vmem:[#allocation6 + $0x10] sm:$0xf] %v5366_v17  ;;  %v5367_v55 = vmul.f32 %v6493_v31, %v6485_v33 }
 0x7c1   : > { %v5373_v13 = vcombine.low %v5364_v22, %v5365_v37  ;;  %5383 = vst [vmem:[#allocation6 + $0x8] sm:$0xf] %v5365_v37 }
 0x7c2   : > { %v5374_v7 = vcombine.low %v5366_v17, %v5367_v55  ;;  %5385 = vst [vmem:[#allocation6 + $0x18] sm:$0xf] %v5367_v55 }
 0x7c3   : > { %5380 = vst [vmem:[%s5379_s27] sm:$0xff] %v5373_v13 }
 0x7c4   : > { %5381 = vst [vmem:[%s5379_s27 + $0x8] sm:$0xff] %v5374_v7 }
 0x7c5 PF: > { %s95_s21 = sadd.s32 1, %s6500_s21  }
 0x7c6   : > { %p92_p2 = scmp.ge.s32.totalorder %s95_s21, 8  }
 0x7c8   :  { %94 = sbr.rel (!%p92_p2) target bundleno = 25 (0x19), region = 92 }

</bundles_post_ra>
